<compile_context>
chip_gen: v7x
topology: tpu7x:2x2x1
jax: 0.10.0
libtpu: 0.0.40
codegen_flags: <defaults>
</compile_context>

<pallas_src>
import jax
import jax.numpy as jnp
from jax.experimental import pallas as pl
from jax.experimental.pallas import tpu as pltpu

# ---------------- configuration (small, consistent with the module) ----------
B = 2               # batch
S = 32              # seq length == CrossAttention.max_seq_length
D = 32              # d_model  (== S, see note above)
H = 4               # n_heads
DH = D // H         # d_head
DFF = 64            # d_ff
HH = 64             # hidden width of each prediction head (512 in torch module)
VOCAB = 50
N_LAYERS = 2
LN_EPS = 1e-5
N_OUT_HEADS = 11    # mw, pdi, phi, pressure, cloud_point, phase + 5 uncertainties
HPAD = 768          # 11*HH = 704, padded to a multiple of 128 lanes
OUT_PAD = 128       # lane-dense output slab width
# tanh-form GELU (EUP slot) per the perf review; flip to False for exact-erf
# parity with torch nn.GELU (numeric deviation is ~1e-3 relative).
GELU_APPROX = True

assert S == D, "module is only shape-consistent when seq_len == d_model"
assert D % H == 0
assert N_OUT_HEADS * HH <= HPAD

# per-layer packed vector parameters: [N_LAYERS, 17, D] (all rows are width D)
(R_SA_QB, R_SA_KB, R_SA_VB, R_SA_OB, R_SA_LS,
 R_CA_QB, R_CA_KB, R_CA_VB, R_CA_OB, R_CA_LS,
 R_FF_B2, R_LN1_W, R_LN2_W, R_LN3_W, R_LN1_B, R_LN2_B, R_LN3_B) = range(17)
N_VEC_ROWS = 17


# ---------------- in-kernel helpers ------------------------------------------
def _layernorm(x, w, b):
    mu = jnp.mean(x, axis=-1, keepdims=True)
    var = jnp.mean(jnp.square(x - mu), axis=-1, keepdims=True)
    return (x - mu) * jax.lax.rsqrt(var + LN_EPS) * w + b


# ---------------- the fused forward kernel (one sequence per grid step) -------
def fused_forward_kernel(ids_ref, enc_ref, tok_emb_ref, pos_emb_ref,
                         attn_w_ref, vecs_ref, ff_w1_ref, ff_b1_ref, ff_w2_ref,
                         head_w1_ref, head_b1_ref, head_w2_ref, head_b2_ref,
                         out_ref):
    f32, bf16 = jnp.float32, jnp.bfloat16

    # Per-head lane masks over the d_model lanes, built once and reused by every
    # attention block: heads stay implicit in the lane axis, so there are no
    # [.., DH=8] tensors and no split/merge transposes anywhere.
    lane = jax.lax.broadcasted_iota(jnp.int32, (1, D), 1)
    head_masks = [(lane >= h * DH) & (lane < (h + 1) * DH) for h in range(H)]

    def mha(xq, xkv, wq, bq, wk, bk, wv, bv, wo, bo, ls_row):
        # 1/sqrt(d_head) already folded into (wq, bq) on the host.
        xq16, xkv16 = xq.astype(bf16), xkv.astype(bf16)
        q = jnp.dot(xq16, wq, preferred_element_type=f32) + bq       # [S, D]
        k = jnp.dot(xkv16, wk, preferred_element_type=f32) + bk
        v = jnp.dot(xkv16, wv, preferred_element_type=f32) + bv
        k16, v16 = k.astype(bf16), v.astype(bf16)
        o = jnp.zeros((S, D), f32)
        for hm in head_masks:
            qh = jnp.where(hm, q, 0.0).astype(bf16)                  # keep only head-h lanes
            # scores: NT matmul, contraction over the full (masked) D axis
            s = jnp.einsum('qd,kd->qk', qh, k16, preferred_element_type=f32)
            s = s * ls_row                                           # layer_scale over key axis (S == D)
            m = jnp.max(s, axis=-1, keepdims=True)
            e = jnp.exp(s - m)
            p = e * pl.reciprocal(jnp.sum(e, axis=-1, keepdims=True), approx=True)
            oh = jnp.dot(p.astype(bf16), v16, preferred_element_type=f32)
            o = o + jnp.where(hm, oh, 0.0)                           # head-h output lanes only
        return jnp.dot(o.astype(bf16), wo, preferred_element_type=f32) + bo

    # ---- token embedding (one-hot matmul == gather) + positional embedding ----
    ids = ids_ref[0]                                                 # [S, 1] int32
    onehot = (ids == jax.lax.broadcasted_iota(jnp.int32, (S, VOCAB), 1)).astype(bf16)
    x = jnp.dot(onehot, tok_emb_ref[...], preferred_element_type=f32) + pos_emb_ref[...]

    enc = enc_ref[0]                                                 # [S, D] f32

    # ---- decoder layers (static unroll; weights stacked on a leading axis) ----
    for l in range(N_LAYERS):
        vec = vecs_ref[l]                                            # [17, D] f32
        row = lambda r: vec[r:r + 1]                                 # sublane slice, cheap
        aw = lambda a, j: attn_w_ref[l * 8 + a * 4 + j]              # [D, D] bf16 (q,k,v,o)

        # self-attention + residual + norm1
        sa = mha(x, x,
                 aw(0, 0), row(R_SA_QB), aw(0, 1), row(R_SA_KB),
                 aw(0, 2), row(R_SA_VB), aw(0, 3), row(R_SA_OB), row(R_SA_LS))
        x = _layernorm(x + sa, row(R_LN1_W), row(R_LN1_B))

        # cross-attention (keys/values = encoder output) + residual + norm2
        ca = mha(x, enc,
                 aw(1, 0), row(R_CA_QB), aw(1, 1), row(R_CA_KB),
                 aw(1, 2), row(R_CA_VB), aw(1, 3), row(R_CA_OB), row(R_CA_LS))
        x = _layernorm(x + ca, row(R_LN2_W), row(R_LN2_B))

        # feed-forward (Linear -> GELU -> Linear) + residual + norm3
        hh = jnp.dot(x.astype(bf16), ff_w1_ref[l], preferred_element_type=f32) + ff_b1_ref[l]
        hh = jax.nn.gelu(hh, approximate=GELU_APPROX)
        ff = jnp.dot(hh.astype(bf16), ff_w2_ref[l], preferred_element_type=f32) + row(R_FF_B2)
        x = _layernorm(x + ff, row(R_LN3_W), row(R_LN3_B))

    # ---- mean pool + all 11 prediction heads (single block-diagonal matmul) ----
    pooled = jnp.mean(x, axis=0, keepdims=True)                      # [1, D]
    h1 = (jnp.dot(pooled.astype(bf16), head_w1_ref[...], preferred_element_type=f32)
          + head_b1_ref[...])                                        # [1, HPAD]
    h1 = jax.nn.gelu(h1, approximate=GELU_APPROX)
    raw = (jnp.dot(h1.astype(bf16), head_w2_ref[...], preferred_element_type=f32)
           + head_b2_ref[...])                                       # [1, OUT_PAD]

    # ---- fused epilogue: per-head output nonlinearity, selected per lane ----
    ol = jax.lax.broadcasted_iota(jnp.int32, (1, OUT_PAD), 1)
    ex = jnp.exp(raw)
    rl = jnp.maximum(raw, 0.0)
    sg = jax.nn.sigmoid(raw)
    sg2 = jax.nn.sigmoid(sg)                        # phase_head Sigmoid + extra torch.sigmoid
    final = jnp.where((ol == 0) | (ol == 3), ex,    # mw, pressure       -> exp
            jnp.where(ol == 1, rl + 1.0,            # pdi                -> relu + 1
            jnp.where(ol == 2, sg,                  # phi                -> sigmoid
            jnp.where(ol == 4, raw,                 # cloud_point        -> identity
            jnp.where(ol == 5, sg2, rl)))))         # phase -> sigmoid^2; 6..10 uncertainties -> relu
    # lane-dense, unmasked full-tile store ([8,128] slab, wrapper reads row 0)
    out_ref[0] = jnp.broadcast_to(final, (8, OUT_PAD))


# ---------------- pallas_call wrapper -----------------------------------------
def run_fused_forward(ids, enc, p):
    # All operands are blocked into VMEM (default placement for blocked specs);
    # weights use constant index_maps so they are staged once across grid steps.
    full = lambda a: pl.BlockSpec(a.shape, lambda b, _nd=a.ndim: (0,) * _nd)
    in_specs = [
        pl.BlockSpec((1, S, 1), lambda b: (b, 0, 0)),        # ids (per sequence)
        pl.BlockSpec((1, S, D), lambda b: (b, 0, 0)),        # encoder output (per sequence)
        full(p["tok_emb"]), full(p["pos_emb"]),
        full(p["attn_w"]), full(p["vecs"]),
        full(p["ff_w1"]), full(p["ff_b1"]), full(p["ff_w2"]),
        full(p["head_w1"]), full(p["head_b1"]), full(p["head_w2"]), full(p["head_b2"]),
    ]
    return pl.pallas_call(
        fused_forward_kernel,
        grid=(B,),
        in_specs=in_specs,
        out_specs=pl.BlockSpec((1, 8, OUT_PAD), lambda b: (b, 0, 0)),
        out_shape=jax.ShapeDtypeStruct((B, 8, OUT_PAD), jnp.float32),
        compiler_params=pltpu.CompilerParams(
            dimension_semantics=("parallel",),        # v7x: one sequence per TensorCore
            vmem_limit_bytes=32 * 1024 * 1024),       # documents huge headroom at these shapes
        cost_estimate=pl.CostEstimate(
            flops=8_300_000, transcendentals=45_000, bytes_accessed=340_000),
    )(ids, enc, p["tok_emb"], p["pos_emb"], p["attn_w"], p["vecs"],
      p["ff_w1"], p["ff_b1"], p["ff_w2"],
      p["head_w1"], p["head_b1"], p["head_w2"], p["head_b2"])


# ---------------- parameter init (deterministic, synthetic) ------------------
def init_params(key):
    ks = iter(jax.random.split(key, 64))
    nrm = lambda shape, sc: jax.random.normal(next(ks), shape, jnp.float32) * sc
    bf = lambda a: a.astype(jnp.bfloat16)

    tok_emb = nrm((VOCAB, D), 0.1)
    pos_emb = nrm((S, D), 0.02)

    inv_scale = 1.0 / (DH ** 0.5)
    attn_w, vecs, ff_w1, ff_b1, ff_w2 = [], [], [], [], []
    for _ in range(N_LAYERS):
        layer_attn, layer_vec = [], []
        for _a in range(2):                     # 0 = self-attn, 1 = cross-attn
            wq = nrm((D, D), 0.05) * inv_scale  # score scale folded into Q projection
            bq = nrm((D,), 0.02) * inv_scale
            wk = nrm((D, D), 0.05); bk = nrm((D,), 0.02)
            wv = nrm((D, D), 0.05); bv = nrm((D,), 0.02)
            wo = nrm((D, D), 0.05); bo = nrm((D,), 0.02)
            ls = jnp.full((D,), 0.1, jnp.float32)         # layer_scale init (0.1)
            layer_attn.append(jnp.stack([wq, wk, wv, wo]))            # [4, D, D]
            layer_vec += [bq, bk, bv, bo, ls]
        w1 = nrm((D, DFF), 0.05); b1 = nrm((DFF,), 0.02)
        w2 = nrm((DFF, D), 0.05); b2 = nrm((D,), 0.02)
        ln_w = jnp.ones((3, D), jnp.float32)
        ln_b = jnp.zeros((3, D), jnp.float32)
        layer_vec += [b2, ln_w[0], ln_w[1], ln_w[2], ln_b[0], ln_b[1], ln_b[2]]

        attn_w.append(jnp.stack(layer_attn))                          # [2, 4, D, D]
        vecs.append(jnp.stack(layer_vec))                             # [17, D]
        ff_w1.append(w1); ff_b1.append(b1.reshape(1, DFF)); ff_w2.append(w2)

    # prediction heads: 11 first-layer Linears concatenated on the lane axis
    # (padded to HPAD); second layers packed block-diagonally -> one MXU matmul.
    hw1 = jnp.pad(nrm((D, N_OUT_HEADS * HH), 0.05),
                  ((0, 0), (0, HPAD - N_OUT_HEADS * HH)))
    hb1 = jnp.pad(nrm((1, N_OUT_HEADS * HH), 0.02),
                  ((0, 0), (0, HPAD - N_OUT_HEADS * HH)))
    hw2 = nrm((N_OUT_HEADS, HH), 0.05)          # each head's Linear(HH, 1) weight
    hb2 = nrm((N_OUT_HEADS,), 0.02)
    w2_bd = jnp.zeros((HPAD, OUT_PAD), jnp.float32)
    for i in range(N_OUT_HEADS):
        w2_bd = w2_bd.at[i * HH:(i + 1) * HH, i].set(hw2[i])
    b2_pad = jnp.zeros((1, OUT_PAD), jnp.float32).at[0, :N_OUT_HEADS].set(hb2)

    return {
        "tok_emb": bf(tok_emb),                                   # [VOCAB, D] bf16
        "pos_emb": pos_emb,                                       # [S, D] f32
        "attn_w": bf(jnp.stack(attn_w).reshape(N_LAYERS * 8, D, D)),  # [L*2*4, D, D] bf16
        "vecs": jnp.stack(vecs),                                  # [L, 17, D] f32
        "ff_w1": bf(jnp.stack(ff_w1)),                            # [L, D, DFF] bf16
        "ff_b1": jnp.stack(ff_b1),                                # [L, 1, DFF] f32
        "ff_w2": bf(jnp.stack(ff_w2)),                            # [L, DFF, D] bf16
        "head_w1": bf(hw1),                                       # [D, HPAD] bf16
        "head_b1": hb1,                                           # [1, HPAD] f32
        "head_w2": bf(w2_bd),                                     # [HPAD, OUT_PAD] bf16 block-diag
        "head_b2": b2_pad,                                        # [1, OUT_PAD] f32
    }


# ---------------- full forward -------------------------------------------------
@jax.jit
def polymer_decoder_forward(input_ids, encoder_output, params):
    ids = input_ids.reshape(B, S, 1).astype(jnp.int32)
    enc = encoder_output.reshape(B, S, D).astype(jnp.float32)

    # the kernel already applied each head's output nonlinearity (fused epilogue);
    # the wrapper only slices lanes out of the lane-dense slab.
    slab = run_fused_forward(ids, enc, params)           # [B, 8, OUT_PAD]
    vals = slab[:, 0, :]                                 # [B, OUT_PAD]
    col = lambda i: vals[:, i:i + 1]
    return {
        "mw": col(0),
        "pdi": col(1),
        "phi": col(2),
        "pressure": col(3),
        "cloud_point": col(4),
        "phase": col(5),
        "mw_uncertainty": col(6),
        "pdi_uncertainty": col(7),
        "phi_uncertainty": col(8),
        "pressure_uncertainty": col(9),
        "cp_uncertainty": col(10),
    }


if __name__ == "__main__":
    key = jax.random.PRNGKey(0)
    k_param, k_ids, k_enc = jax.random.split(key, 3)

    params = init_params(k_param)
    input_ids = jax.random.randint(k_ids, (B, S), 0, VOCAB, dtype=jnp.int32)
    encoder_output = jax.random.normal(k_enc, (B, S, D), jnp.float32)

    out = polymer_decoder_forward(input_ids, encoder_output, params)
    out = jax.tree_util.tree_map(jax.block_until_ready, out)

    # sanity: every output head is [B, 1] and finite
    assert all(v.shape == (B, 1) for v in out.values())
    assert all(bool(jnp.all(jnp.isfinite(v))) for v in out.values())
    print("KERNEL_OK")
</pallas_src>

<mosaic_0001>
module attributes {stable_mosaic.version = 11 : i64} {
  func.func @fused_forward_kernel(%arg0: i32, %arg1: memref<1x32x1xi32, #tpu.memory_space<vmem>>, %arg2: memref<1x32x32xf32, #tpu.memory_space<vmem>>, %arg3: memref<50x32xbf16, #tpu.memory_space<vmem>>, %arg4: memref<32x32xf32, #tpu.memory_space<vmem>>, %arg5: memref<16x32x32xbf16, #tpu.memory_space<vmem>>, %arg6: memref<2x17x32xf32, #tpu.memory_space<vmem>>, %arg7: memref<2x32x64xbf16, #tpu.memory_space<vmem>>, %arg8: memref<2x1x64xf32, #tpu.memory_space<vmem>>, %arg9: memref<2x64x32xbf16, #tpu.memory_space<vmem>>, %arg10: memref<32x768xbf16, #tpu.memory_space<vmem>>, %arg11: memref<1x768xf32, #tpu.memory_space<vmem>>, %arg12: memref<768x128xbf16, #tpu.memory_space<vmem>>, %arg13: memref<1x128xf32, #tpu.memory_space<vmem>>, %arg14: memref<1x8x128xf32, #tpu.memory_space<vmem>>) attributes {dimension_semantics = [#tpu.dimension_semantics<parallel>], iteration_bounds = array<i64: 2>, scalar_prefetch = 0 : i64, scratch_operands = 0 : i64, tpu.core_type = #tpu.core_type<tc>, window_params = [{transform_indices = @transform_0, window_bounds = array<i64: 1, 32, 1>}, {transform_indices = @transform_1, window_bounds = array<i64: 1, 32, 32>}, {pipeline_mode = #tpu.pipeline_mode<synchronous>, transform_indices = @transform_2, window_bounds = array<i64: 50, 32>}, {pipeline_mode = #tpu.pipeline_mode<synchronous>, transform_indices = @transform_3, window_bounds = array<i64: 32, 32>}, {pipeline_mode = #tpu.pipeline_mode<synchronous>, transform_indices = @transform_4, window_bounds = array<i64: 16, 32, 32>}, {pipeline_mode = #tpu.pipeline_mode<synchronous>, transform_indices = @transform_5, window_bounds = array<i64: 2, 17, 32>}, {pipeline_mode = #tpu.pipeline_mode<synchronous>, transform_indices = @transform_6, window_bounds = array<i64: 2, 32, 64>}, {pipeline_mode = #tpu.pipeline_mode<synchronous>, transform_indices = @transform_7, window_bounds = array<i64: 2, 1, 64>}, {pipeline_mode = #tpu.pipeline_mode<synchronous>, transform_indices = @transform_8, window_bounds = array<i64: 2, 64, 32>}, {pipeline_mode = #tpu.pipeline_mode<synchronous>, transform_indices = @transform_9, window_bounds = array<i64: 32, 768>}, {pipeline_mode = #tpu.pipeline_mode<synchronous>, transform_indices = @transform_10, window_bounds = array<i64: 1, 768>}, {pipeline_mode = #tpu.pipeline_mode<synchronous>, transform_indices = @transform_11, window_bounds = array<i64: 768, 128>}, {pipeline_mode = #tpu.pipeline_mode<synchronous>, transform_indices = @transform_12, window_bounds = array<i64: 1, 128>}, {transform_indices = @transform_13, window_bounds = array<i64: 1, 8, 128>}]} {
    %0 = tpu.iota {dimensions = array<i32: 1>} : vector<1x32xi32>
    %c0_i32 = arith.constant 0 : i32
    %1 = vector.broadcast %c0_i32 : i32 to vector<1x32xi32>
    %2 = arith.cmpi sge, %0, %1 : vector<1x32xi32>
    %c8_i32 = arith.constant 8 : i32
    %3 = vector.broadcast %c8_i32 : i32 to vector<1x32xi32>
    %4 = arith.cmpi slt, %0, %3 : vector<1x32xi32>
    %5 = arith.andi %2, %4 : vector<1x32xi1>
    %c8_i32_0 = arith.constant 8 : i32
    %6 = vector.broadcast %c8_i32_0 : i32 to vector<1x32xi32>
    %7 = arith.cmpi sge, %0, %6 : vector<1x32xi32>
    %c16_i32 = arith.constant 16 : i32
    %8 = vector.broadcast %c16_i32 : i32 to vector<1x32xi32>
    %9 = arith.cmpi slt, %0, %8 : vector<1x32xi32>
    %10 = arith.andi %7, %9 : vector<1x32xi1>
    %c16_i32_1 = arith.constant 16 : i32
    %11 = vector.broadcast %c16_i32_1 : i32 to vector<1x32xi32>
    %12 = arith.cmpi sge, %0, %11 : vector<1x32xi32>
    %c24_i32 = arith.constant 24 : i32
    %13 = vector.broadcast %c24_i32 : i32 to vector<1x32xi32>
    %14 = arith.cmpi slt, %0, %13 : vector<1x32xi32>
    %15 = arith.andi %12, %14 : vector<1x32xi1>
    %c24_i32_2 = arith.constant 24 : i32
    %16 = vector.broadcast %c24_i32_2 : i32 to vector<1x32xi32>
    %17 = arith.cmpi sge, %0, %16 : vector<1x32xi32>
    %c32_i32 = arith.constant 32 : i32
    %18 = vector.broadcast %c32_i32 : i32 to vector<1x32xi32>
    %19 = arith.cmpi slt, %0, %18 : vector<1x32xi32>
    %20 = arith.andi %17, %19 : vector<1x32xi1>
    %c0 = arith.constant 0 : index
    %c0_3 = arith.constant 0 : index
    %c0_4 = arith.constant 0 : index
    %21 = vector.load %arg1[%c0, %c0_3, %c0_4] : memref<1x32x1xi32, #tpu.memory_space<vmem>>, vector<1x32x1xi32>
    %22 = vector.shape_cast %21 : vector<1x32x1xi32> to vector<32x1xi32>
    %23 = tpu.iota {dimensions = array<i32: 1>} : vector<32x50xi32>
    %24 = vector.broadcast %22 : vector<32x1xi32> to vector<32x50xi32>
    %25 = arith.cmpi eq, %24, %23 : vector<32x50xi32>
    %26 = arith.extui %25 : vector<32x50xi1> to vector<32x50xi32>
    %27 = arith.sitofp %26 : vector<32x50xi32> to vector<32x50xf32>
    %28 = arith.truncf %27 : vector<32x50xf32> to vector<32x50xbf16>
    %c0_5 = arith.constant 0 : index
    %c0_6 = arith.constant 0 : index
    %29 = vector.load %arg3[%c0_5, %c0_6] : memref<50x32xbf16, #tpu.memory_space<vmem>>, vector<50x32xbf16>
    %cst = arith.constant dense<0.000000e+00> : vector<32x32xf32>
    %30 = tpu.matmul %28, %29, %cst {dimension_numbers = #tpu.dot_dimension_numbers<[1], [0], [0], [1], [0, 0, 1, 1], [], []>} : vector<32x50xbf16>, vector<50x32xbf16>, vector<32x32xf32> -> vector<32x32xf32>
    %c0_7 = arith.constant 0 : index
    %c0_8 = arith.constant 0 : index
    %31 = vector.load %arg4[%c0_7, %c0_8] : memref<32x32xf32, #tpu.memory_space<vmem>>, vector<32x32xf32>
    %32 = arith.addf %30, %31 : vector<32x32xf32>
    %c0_9 = arith.constant 0 : index
    %c0_10 = arith.constant 0 : index
    %c0_11 = arith.constant 0 : index
    %33 = vector.load %arg2[%c0_9, %c0_10, %c0_11] : memref<1x32x32xf32, #tpu.memory_space<vmem>>, vector<1x32x32xf32>
    %34 = vector.shape_cast %33 : vector<1x32x32xf32> to vector<32x32xf32>
    %c0_12 = arith.constant 0 : index
    %c0_13 = arith.constant 0 : index
    %c0_14 = arith.constant 0 : index
    %35 = vector.load %arg6[%c0_12, %c0_13, %c0_14] : memref<2x17x32xf32, #tpu.memory_space<vmem>>, vector<1x17x32xf32>
    %36 = vector.shape_cast %35 : vector<1x17x32xf32> to vector<17x32xf32>
    %c0_15 = arith.constant 0 : index
    %c0_16 = arith.constant 0 : index
    %c0_17 = arith.constant 0 : index
    %37 = vector.load %arg5[%c0_15, %c0_16, %c0_17] : memref<16x32x32xbf16, #tpu.memory_space<vmem>>, vector<1x32x32xbf16>
    %38 = vector.shape_cast %37 : vector<1x32x32xbf16> to vector<32x32xbf16>
    %39 = vector.extract_strided_slice %36 {offsets = [0, 0], sizes = [1, 32], strides = [1, 1]} : vector<17x32xf32> to vector<1x32xf32>
    %c1 = arith.constant 1 : index
    %c0_18 = arith.constant 0 : index
    %c0_19 = arith.constant 0 : index
    %40 = vector.load %arg5[%c1, %c0_18, %c0_19] : memref<16x32x32xbf16, #tpu.memory_space<vmem>>, vector<1x32x32xbf16>
    %41 = vector.shape_cast %40 : vector<1x32x32xbf16> to vector<32x32xbf16>
    %42 = vector.extract_strided_slice %36 {offsets = [1, 0], sizes = [1, 32], strides = [1, 1]} : vector<17x32xf32> to vector<1x32xf32>
    %c2 = arith.constant 2 : index
    %c0_20 = arith.constant 0 : index
    %c0_21 = arith.constant 0 : index
    %43 = vector.load %arg5[%c2, %c0_20, %c0_21] : memref<16x32x32xbf16, #tpu.memory_space<vmem>>, vector<1x32x32xbf16>
    %44 = vector.shape_cast %43 : vector<1x32x32xbf16> to vector<32x32xbf16>
    %45 = vector.extract_strided_slice %36 {offsets = [2, 0], sizes = [1, 32], strides = [1, 1]} : vector<17x32xf32> to vector<1x32xf32>
    %c3 = arith.constant 3 : index
    %c0_22 = arith.constant 0 : index
    %c0_23 = arith.constant 0 : index
    %46 = vector.load %arg5[%c3, %c0_22, %c0_23] : memref<16x32x32xbf16, #tpu.memory_space<vmem>>, vector<1x32x32xbf16>
    %47 = vector.shape_cast %46 : vector<1x32x32xbf16> to vector<32x32xbf16>
    %48 = vector.extract_strided_slice %36 {offsets = [3, 0], sizes = [1, 32], strides = [1, 1]} : vector<17x32xf32> to vector<1x32xf32>
    %49 = vector.extract_strided_slice %36 {offsets = [4, 0], sizes = [1, 32], strides = [1, 1]} : vector<17x32xf32> to vector<1x32xf32>
    %50 = arith.truncf %32 : vector<32x32xf32> to vector<32x32xbf16>
    %51 = arith.truncf %32 : vector<32x32xf32> to vector<32x32xbf16>
    %cst_24 = arith.constant dense<0.000000e+00> : vector<32x32xf32>
    %52 = tpu.matmul %50, %38, %cst_24 {dimension_numbers = #tpu.dot_dimension_numbers<[1], [0], [0], [1], [0, 0, 1, 1], [], []>} : vector<32x32xbf16>, vector<32x32xbf16>, vector<32x32xf32> -> vector<32x32xf32>
    %53 = vector.broadcast %39 : vector<1x32xf32> to vector<32x32xf32>
    %54 = arith.addf %52, %53 : vector<32x32xf32>
    %cst_25 = arith.constant dense<0.000000e+00> : vector<32x32xf32>
    %55 = tpu.matmul %51, %41, %cst_25 {dimension_numbers = #tpu.dot_dimension_numbers<[1], [0], [0], [1], [0, 0, 1, 1], [], []>} : vector<32x32xbf16>, vector<32x32xbf16>, vector<32x32xf32> -> vector<32x32xf32>
    %56 = vector.broadcast %42 : vector<1x32xf32> to vector<32x32xf32>
    %57 = arith.addf %55, %56 : vector<32x32xf32>
    %cst_26 = arith.constant dense<0.000000e+00> : vector<32x32xf32>
    %58 = tpu.matmul %51, %44, %cst_26 {dimension_numbers = #tpu.dot_dimension_numbers<[1], [0], [0], [1], [0, 0, 1, 1], [], []>} : vector<32x32xbf16>, vector<32x32xbf16>, vector<32x32xf32> -> vector<32x32xf32>
    %59 = vector.broadcast %45 : vector<1x32xf32> to vector<32x32xf32>
    %60 = arith.addf %58, %59 : vector<32x32xf32>
    %61 = arith.truncf %57 : vector<32x32xf32> to vector<32x32xbf16>
    %62 = arith.truncf %60 : vector<32x32xf32> to vector<32x32xbf16>
    %cst_27 = arith.constant 0.000000e+00 : f32
    %63 = vector.broadcast %cst_27 : f32 to vector<32x32xf32>
    %cst_28 = arith.constant 0.000000e+00 : f32
    %64 = vector.shape_cast %5 : vector<1x32xi1> to vector<1x32xi1>
    %65 = vector.broadcast %64 : vector<1x32xi1> to vector<32x32xi1>
    %66 = vector.broadcast %cst_28 : f32 to vector<32x32xf32>
    %67 = arith.select %65, %54, %66 : vector<32x32xi1>, vector<32x32xf32>
    %68 = arith.truncf %67 : vector<32x32xf32> to vector<32x32xbf16>
    "tpu.trace_start"() <{level = 10 : i32, message = "qd,kd->qk"}> : () -> ()
    %cst_29 = arith.constant dense<0.000000e+00> : vector<32x32xf32>
    %69 = tpu.matmul %68, %61, %cst_29 {dimension_numbers = #tpu.dot_dimension_numbers<[1], [1], [0], [0], [0, 0, 1, 0], [], []>} : vector<32x32xbf16>, vector<32x32xbf16>, vector<32x32xf32> -> vector<32x32xf32>
    "tpu.trace_stop"() : () -> ()
    %70 = vector.broadcast %49 : vector<1x32xf32> to vector<32x32xf32>
    %71 = arith.mulf %69, %70 : vector<32x32xf32>
    %cst_30 = arith.constant dense<0xFF800000> : vector<32xf32>
    %72 = vector.multi_reduction <maximumf>, %71, %cst_30 [1] : vector<32x32xf32> to vector<32xf32>
    %73 = vector.shape_cast %72 : vector<32xf32> to vector<32x1xf32>
    %74 = vector.broadcast %73 : vector<32x1xf32> to vector<32x32xf32>
    %75 = arith.subf %71, %74 : vector<32x32xf32>
    %76 = math.exp %75 : vector<32x32xf32>
    %cst_31 = arith.constant dense<0.000000e+00> : vector<32xf32>
    %77 = vector.multi_reduction <add>, %76, %cst_31 [1] : vector<32x32xf32> to vector<32xf32>
    %78 = vector.shape_cast %77 : vector<32xf32> to vector<32x1xf32>
    %79 = tpu.reciprocal %78 {approx = true} : vector<32x1xf32> -> vector<32x1xf32>
    %80 = vector.broadcast %79 : vector<32x1xf32> to vector<32x32xf32>
    %81 = arith.mulf %76, %80 : vector<32x32xf32>
    %82 = arith.truncf %81 : vector<32x32xf32> to vector<32x32xbf16>
    %cst_32 = arith.constant dense<0.000000e+00> : vector<32x32xf32>
    %83 = tpu.matmul %82, %62, %cst_32 {dimension_numbers = #tpu.dot_dimension_numbers<[1], [0], [0], [1], [0, 0, 1, 1], [], []>} : vector<32x32xbf16>, vector<32x32xbf16>, vector<32x32xf32> -> vector<32x32xf32>
    %cst_33 = arith.constant 0.000000e+00 : f32
    %84 = vector.shape_cast %5 : vector<1x32xi1> to vector<1x32xi1>
    %85 = vector.broadcast %84 : vector<1x32xi1> to vector<32x32xi1>
    %86 = vector.broadcast %cst_33 : f32 to vector<32x32xf32>
    %87 = arith.select %85, %83, %86 : vector<32x32xi1>, vector<32x32xf32>
    %88 = arith.addf %63, %87 : vector<32x32xf32>
    %cst_34 = arith.constant 0.000000e+00 : f32
    %89 = vector.shape_cast %10 : vector<1x32xi1> to vector<1x32xi1>
    %90 = vector.broadcast %89 : vector<1x32xi1> to vector<32x32xi1>
    %91 = vector.broadcast %cst_34 : f32 to vector<32x32xf32>
    %92 = arith.select %90, %54, %91 : vector<32x32xi1>, vector<32x32xf32>
    %93 = arith.truncf %92 : vector<32x32xf32> to vector<32x32xbf16>
    "tpu.trace_start"() <{level = 10 : i32, message = "qd,kd->qk"}> : () -> ()
    %cst_35 = arith.constant dense<0.000000e+00> : vector<32x32xf32>
    %94 = tpu.matmul %93, %61, %cst_35 {dimension_numbers = #tpu.dot_dimension_numbers<[1], [1], [0], [0], [0, 0, 1, 0], [], []>} : vector<32x32xbf16>, vector<32x32xbf16>, vector<32x32xf32> -> vector<32x32xf32>
    "tpu.trace_stop"() : () -> ()
    %95 = vector.broadcast %49 : vector<1x32xf32> to vector<32x32xf32>
    %96 = arith.mulf %94, %95 : vector<32x32xf32>
    %cst_36 = arith.constant dense<0xFF800000> : vector<32xf32>
    %97 = vector.multi_reduction <maximumf>, %96, %cst_36 [1] : vector<32x32xf32> to vector<32xf32>
    %98 = vector.shape_cast %97 : vector<32xf32> to vector<32x1xf32>
    %99 = vector.broadcast %98 : vector<32x1xf32> to vector<32x32xf32>
    %100 = arith.subf %96, %99 : vector<32x32xf32>
    %101 = math.exp %100 : vector<32x32xf32>
    %cst_37 = arith.constant dense<0.000000e+00> : vector<32xf32>
    %102 = vector.multi_reduction <add>, %101, %cst_37 [1] : vector<32x32xf32> to vector<32xf32>
    %103 = vector.shape_cast %102 : vector<32xf32> to vector<32x1xf32>
    %104 = tpu.reciprocal %103 {approx = true} : vector<32x1xf32> -> vector<32x1xf32>
    %105 = vector.broadcast %104 : vector<32x1xf32> to vector<32x32xf32>
    %106 = arith.mulf %101, %105 : vector<32x32xf32>
    %107 = arith.truncf %106 : vector<32x32xf32> to vector<32x32xbf16>
    %cst_38 = arith.constant dense<0.000000e+00> : vector<32x32xf32>
    %108 = tpu.matmul %107, %62, %cst_38 {dimension_numbers = #tpu.dot_dimension_numbers<[1], [0], [0], [1], [0, 0, 1, 1], [], []>} : vector<32x32xbf16>, vector<32x32xbf16>, vector<32x32xf32> -> vector<32x32xf32>
    %cst_39 = arith.constant 0.000000e+00 : f32
    %109 = vector.shape_cast %10 : vector<1x32xi1> to vector<1x32xi1>
    %110 = vector.broadcast %109 : vector<1x32xi1> to vector<32x32xi1>
    %111 = vector.broadcast %cst_39 : f32 to vector<32x32xf32>
    %112 = arith.select %110, %108, %111 : vector<32x32xi1>, vector<32x32xf32>
    %113 = arith.addf %88, %112 : vector<32x32xf32>
    %cst_40 = arith.constant 0.000000e+00 : f32
    %114 = vector.shape_cast %15 : vector<1x32xi1> to vector<1x32xi1>
    %115 = vector.broadcast %114 : vector<1x32xi1> to vector<32x32xi1>
    %116 = vector.broadcast %cst_40 : f32 to vector<32x32xf32>
    %117 = arith.select %115, %54, %116 : vector<32x32xi1>, vector<32x32xf32>
    %118 = arith.truncf %117 : vector<32x32xf32> to vector<32x32xbf16>
    "tpu.trace_start"() <{level = 10 : i32, message = "qd,kd->qk"}> : () -> ()
    %cst_41 = arith.constant dense<0.000000e+00> : vector<32x32xf32>
    %119 = tpu.matmul %118, %61, %cst_41 {dimension_numbers = #tpu.dot_dimension_numbers<[1], [1], [0], [0], [0, 0, 1, 0], [], []>} : vector<32x32xbf16>, vector<32x32xbf16>, vector<32x32xf32> -> vector<32x32xf32>
    "tpu.trace_stop"() : () -> ()
    %120 = vector.broadcast %49 : vector<1x32xf32> to vector<32x32xf32>
    %121 = arith.mulf %119, %120 : vector<32x32xf32>
    %cst_42 = arith.constant dense<0xFF800000> : vector<32xf32>
    %122 = vector.multi_reduction <maximumf>, %121, %cst_42 [1] : vector<32x32xf32> to vector<32xf32>
    %123 = vector.shape_cast %122 : vector<32xf32> to vector<32x1xf32>
    %124 = vector.broadcast %123 : vector<32x1xf32> to vector<32x32xf32>
    %125 = arith.subf %121, %124 : vector<32x32xf32>
    %126 = math.exp %125 : vector<32x32xf32>
    %cst_43 = arith.constant dense<0.000000e+00> : vector<32xf32>
    %127 = vector.multi_reduction <add>, %126, %cst_43 [1] : vector<32x32xf32> to vector<32xf32>
    %128 = vector.shape_cast %127 : vector<32xf32> to vector<32x1xf32>
    %129 = tpu.reciprocal %128 {approx = true} : vector<32x1xf32> -> vector<32x1xf32>
    %130 = vector.broadcast %129 : vector<32x1xf32> to vector<32x32xf32>
    %131 = arith.mulf %126, %130 : vector<32x32xf32>
    %132 = arith.truncf %131 : vector<32x32xf32> to vector<32x32xbf16>
    %cst_44 = arith.constant dense<0.000000e+00> : vector<32x32xf32>
    %133 = tpu.matmul %132, %62, %cst_44 {dimension_numbers = #tpu.dot_dimension_numbers<[1], [0], [0], [1], [0, 0, 1, 1], [], []>} : vector<32x32xbf16>, vector<32x32xbf16>, vector<32x32xf32> -> vector<32x32xf32>
    %cst_45 = arith.constant 0.000000e+00 : f32
    %134 = vector.shape_cast %15 : vector<1x32xi1> to vector<1x32xi1>
    %135 = vector.broadcast %134 : vector<1x32xi1> to vector<32x32xi1>
    %136 = vector.broadcast %cst_45 : f32 to vector<32x32xf32>
    %137 = arith.select %135, %133, %136 : vector<32x32xi1>, vector<32x32xf32>
    %138 = arith.addf %113, %137 : vector<32x32xf32>
    %cst_46 = arith.constant 0.000000e+00 : f32
    %139 = vector.shape_cast %20 : vector<1x32xi1> to vector<1x32xi1>
    %140 = vector.broadcast %139 : vector<1x32xi1> to vector<32x32xi1>
    %141 = vector.broadcast %cst_46 : f32 to vector<32x32xf32>
    %142 = arith.select %140, %54, %141 : vector<32x32xi1>, vector<32x32xf32>
    %143 = arith.truncf %142 : vector<32x32xf32> to vector<32x32xbf16>
    "tpu.trace_start"() <{level = 10 : i32, message = "qd,kd->qk"}> : () -> ()
    %cst_47 = arith.constant dense<0.000000e+00> : vector<32x32xf32>
    %144 = tpu.matmul %143, %61, %cst_47 {dimension_numbers = #tpu.dot_dimension_numbers<[1], [1], [0], [0], [0, 0, 1, 0], [], []>} : vector<32x32xbf16>, vector<32x32xbf16>, vector<32x32xf32> -> vector<32x32xf32>
    "tpu.trace_stop"() : () -> ()
    %145 = vector.broadcast %49 : vector<1x32xf32> to vector<32x32xf32>
    %146 = arith.mulf %144, %145 : vector<32x32xf32>
    %cst_48 = arith.constant dense<0xFF800000> : vector<32xf32>
    %147 = vector.multi_reduction <maximumf>, %146, %cst_48 [1] : vector<32x32xf32> to vector<32xf32>
    %148 = vector.shape_cast %147 : vector<32xf32> to vector<32x1xf32>
    %149 = vector.broadcast %148 : vector<32x1xf32> to vector<32x32xf32>
    %150 = arith.subf %146, %149 : vector<32x32xf32>
    %151 = math.exp %150 : vector<32x32xf32>
    %cst_49 = arith.constant dense<0.000000e+00> : vector<32xf32>
    %152 = vector.multi_reduction <add>, %151, %cst_49 [1] : vector<32x32xf32> to vector<32xf32>
    %153 = vector.shape_cast %152 : vector<32xf32> to vector<32x1xf32>
    %154 = tpu.reciprocal %153 {approx = true} : vector<32x1xf32> -> vector<32x1xf32>
    %155 = vector.broadcast %154 : vector<32x1xf32> to vector<32x32xf32>
    %156 = arith.mulf %151, %155 : vector<32x32xf32>
    %157 = arith.truncf %156 : vector<32x32xf32> to vector<32x32xbf16>
    %cst_50 = arith.constant dense<0.000000e+00> : vector<32x32xf32>
    %158 = tpu.matmul %157, %62, %cst_50 {dimension_numbers = #tpu.dot_dimension_numbers<[1], [0], [0], [1], [0, 0, 1, 1], [], []>} : vector<32x32xbf16>, vector<32x32xbf16>, vector<32x32xf32> -> vector<32x32xf32>
    %cst_51 = arith.constant 0.000000e+00 : f32
    %159 = vector.shape_cast %20 : vector<1x32xi1> to vector<1x32xi1>
    %160 = vector.broadcast %159 : vector<1x32xi1> to vector<32x32xi1>
    %161 = vector.broadcast %cst_51 : f32 to vector<32x32xf32>
    %162 = arith.select %160, %158, %161 : vector<32x32xi1>, vector<32x32xf32>
    %163 = arith.addf %138, %162 : vector<32x32xf32>
    %164 = arith.truncf %163 : vector<32x32xf32> to vector<32x32xbf16>
    %cst_52 = arith.constant dense<0.000000e+00> : vector<32x32xf32>
    %165 = tpu.matmul %164, %47, %cst_52 {dimension_numbers = #tpu.dot_dimension_numbers<[1], [0], [0], [1], [0, 0, 1, 1], [], []>} : vector<32x32xbf16>, vector<32x32xbf16>, vector<32x32xf32> -> vector<32x32xf32>
    %166 = vector.broadcast %48 : vector<1x32xf32> to vector<32x32xf32>
    %167 = arith.addf %165, %166 : vector<32x32xf32>
    %168 = arith.addf %32, %167 : vector<32x32xf32>
    %169 = vector.extract_strided_slice %36 {offsets = [11, 0], sizes = [1, 32], strides = [1, 1]} : vector<17x32xf32> to vector<1x32xf32>
    %170 = vector.extract_strided_slice %36 {offsets = [14, 0], sizes = [1, 32], strides = [1, 1]} : vector<17x32xf32> to vector<1x32xf32>
    %cst_53 = arith.constant dense<0.000000e+00> : vector<32xf32>
    %171 = vector.multi_reduction <add>, %168, %cst_53 [1] : vector<32x32xf32> to vector<32xf32>
    %172 = vector.shape_cast %171 : vector<32xf32> to vector<32x1xf32>
    %cst_54 = arith.constant 3.200000e+01 : f32
    %173 = vector.broadcast %cst_54 : f32 to vector<32x1xf32>
    %174 = arith.divf %172, %173 : vector<32x1xf32>
    %175 = vector.broadcast %174 : vector<32x1xf32> to vector<32x32xf32>
    %176 = arith.subf %168, %175 : vector<32x32xf32>
    %177 = arith.mulf %176, %176 : vector<32x32xf32>
    %cst_55 = arith.constant dense<0.000000e+00> : vector<32xf32>
    %178 = vector.multi_reduction <add>, %177, %cst_55 [1] : vector<32x32xf32> to vector<32xf32>
    %179 = vector.shape_cast %178 : vector<32xf32> to vector<32x1xf32>
    %cst_56 = arith.constant 3.200000e+01 : f32
    %180 = vector.broadcast %cst_56 : f32 to vector<32x1xf32>
    %181 = arith.divf %179, %180 : vector<32x1xf32>
    %182 = vector.broadcast %174 : vector<32x1xf32> to vector<32x32xf32>
    %183 = arith.subf %168, %182 : vector<32x32xf32>
    %cst_57 = arith.constant 9.99999974E-6 : f32
    %184 = vector.broadcast %cst_57 : f32 to vector<32x1xf32>
    %185 = arith.addf %181, %184 : vector<32x1xf32>
    %186 = math.rsqrt %185 : vector<32x1xf32>
    %187 = vector.broadcast %186 : vector<32x1xf32> to vector<32x32xf32>
    %188 = arith.mulf %183, %187 : vector<32x32xf32>
    %189 = vector.broadcast %169 : vector<1x32xf32> to vector<32x32xf32>
    %190 = arith.mulf %188, %189 : vector<32x32xf32>
    %191 = vector.broadcast %170 : vector<1x32xf32> to vector<32x32xf32>
    %192 = arith.addf %190, %191 : vector<32x32xf32>
    %c4 = arith.constant 4 : index
    %c0_58 = arith.constant 0 : index
    %c0_59 = arith.constant 0 : index
    %193 = vector.load %arg5[%c4, %c0_58, %c0_59] : memref<16x32x32xbf16, #tpu.memory_space<vmem>>, vector<1x32x32xbf16>
    %194 = vector.shape_cast %193 : vector<1x32x32xbf16> to vector<32x32xbf16>
    %195 = vector.extract_strided_slice %36 {offsets = [5, 0], sizes = [1, 32], strides = [1, 1]} : vector<17x32xf32> to vector<1x32xf32>
    %c5 = arith.constant 5 : index
    %c0_60 = arith.constant 0 : index
    %c0_61 = arith.constant 0 : index
    %196 = vector.load %arg5[%c5, %c0_60, %c0_61] : memref<16x32x32xbf16, #tpu.memory_space<vmem>>, vector<1x32x32xbf16>
    %197 = vector.shape_cast %196 : vector<1x32x32xbf16> to vector<32x32xbf16>
    %198 = vector.extract_strided_slice %36 {offsets = [6, 0], sizes = [1, 32], strides = [1, 1]} : vector<17x32xf32> to vector<1x32xf32>
    %c6 = arith.constant 6 : index
    %c0_62 = arith.constant 0 : index
    %c0_63 = arith.constant 0 : index
    %199 = vector.load %arg5[%c6, %c0_62, %c0_63] : memref<16x32x32xbf16, #tpu.memory_space<vmem>>, vector<1x32x32xbf16>
    %200 = vector.shape_cast %199 : vector<1x32x32xbf16> to vector<32x32xbf16>
    %201 = vector.extract_strided_slice %36 {offsets = [7, 0], sizes = [1, 32], strides = [1, 1]} : vector<17x32xf32> to vector<1x32xf32>
    %c7 = arith.constant 7 : index
    %c0_64 = arith.constant 0 : index
    %c0_65 = arith.constant 0 : index
    %202 = vector.load %arg5[%c7, %c0_64, %c0_65] : memref<16x32x32xbf16, #tpu.memory_space<vmem>>, vector<1x32x32xbf16>
    %203 = vector.shape_cast %202 : vector<1x32x32xbf16> to vector<32x32xbf16>
    %204 = vector.extract_strided_slice %36 {offsets = [8, 0], sizes = [1, 32], strides = [1, 1]} : vector<17x32xf32> to vector<1x32xf32>
    %205 = vector.extract_strided_slice %36 {offsets = [9, 0], sizes = [1, 32], strides = [1, 1]} : vector<17x32xf32> to vector<1x32xf32>
    %206 = arith.truncf %192 : vector<32x32xf32> to vector<32x32xbf16>
    %207 = arith.truncf %34 : vector<32x32xf32> to vector<32x32xbf16>
    %cst_66 = arith.constant dense<0.000000e+00> : vector<32x32xf32>
    %208 = tpu.matmul %206, %194, %cst_66 {dimension_numbers = #tpu.dot_dimension_numbers<[1], [0], [0], [1], [0, 0, 1, 1], [], []>} : vector<32x32xbf16>, vector<32x32xbf16>, vector<32x32xf32> -> vector<32x32xf32>
    %209 = vector.broadcast %195 : vector<1x32xf32> to vector<32x32xf32>
    %210 = arith.addf %208, %209 : vector<32x32xf32>
    %cst_67 = arith.constant dense<0.000000e+00> : vector<32x32xf32>
    %211 = tpu.matmul %207, %197, %cst_67 {dimension_numbers = #tpu.dot_dimension_numbers<[1], [0], [0], [1], [0, 0, 1, 1], [], []>} : vector<32x32xbf16>, vector<32x32xbf16>, vector<32x32xf32> -> vector<32x32xf32>
    %212 = vector.broadcast %198 : vector<1x32xf32> to vector<32x32xf32>
    %213 = arith.addf %211, %212 : vector<32x32xf32>
    %cst_68 = arith.constant dense<0.000000e+00> : vector<32x32xf32>
    %214 = tpu.matmul %207, %200, %cst_68 {dimension_numbers = #tpu.dot_dimension_numbers<[1], [0], [0], [1], [0, 0, 1, 1], [], []>} : vector<32x32xbf16>, vector<32x32xbf16>, vector<32x32xf32> -> vector<32x32xf32>
    %215 = vector.broadcast %201 : vector<1x32xf32> to vector<32x32xf32>
    %216 = arith.addf %214, %215 : vector<32x32xf32>
    %217 = arith.truncf %213 : vector<32x32xf32> to vector<32x32xbf16>
    %218 = arith.truncf %216 : vector<32x32xf32> to vector<32x32xbf16>
    %cst_69 = arith.constant 0.000000e+00 : f32
    %219 = vector.broadcast %cst_69 : f32 to vector<32x32xf32>
    %cst_70 = arith.constant 0.000000e+00 : f32
    %220 = vector.shape_cast %5 : vector<1x32xi1> to vector<1x32xi1>
    %221 = vector.broadcast %220 : vector<1x32xi1> to vector<32x32xi1>
    %222 = vector.broadcast %cst_70 : f32 to vector<32x32xf32>
    %223 = arith.select %221, %210, %222 : vector<32x32xi1>, vector<32x32xf32>
    %224 = arith.truncf %223 : vector<32x32xf32> to vector<32x32xbf16>
    "tpu.trace_start"() <{level = 10 : i32, message = "qd,kd->qk"}> : () -> ()
    %cst_71 = arith.constant dense<0.000000e+00> : vector<32x32xf32>
    %225 = tpu.matmul %224, %217, %cst_71 {dimension_numbers = #tpu.dot_dimension_numbers<[1], [1], [0], [0], [0, 0, 1, 0], [], []>} : vector<32x32xbf16>, vector<32x32xbf16>, vector<32x32xf32> -> vector<32x32xf32>
    "tpu.trace_stop"() : () -> ()
    %226 = vector.broadcast %205 : vector<1x32xf32> to vector<32x32xf32>
    %227 = arith.mulf %225, %226 : vector<32x32xf32>
    %cst_72 = arith.constant dense<0xFF800000> : vector<32xf32>
    %228 = vector.multi_reduction <maximumf>, %227, %cst_72 [1] : vector<32x32xf32> to vector<32xf32>
    %229 = vector.shape_cast %228 : vector<32xf32> to vector<32x1xf32>
    %230 = vector.broadcast %229 : vector<32x1xf32> to vector<32x32xf32>
    %231 = arith.subf %227, %230 : vector<32x32xf32>
    %232 = math.exp %231 : vector<32x32xf32>
    %cst_73 = arith.constant dense<0.000000e+00> : vector<32xf32>
    %233 = vector.multi_reduction <add>, %232, %cst_73 [1] : vector<32x32xf32> to vector<32xf32>
    %234 = vector.shape_cast %233 : vector<32xf32> to vector<32x1xf32>
    %235 = tpu.reciprocal %234 {approx = true} : vector<32x1xf32> -> vector<32x1xf32>
    %236 = vector.broadcast %235 : vector<32x1xf32> to vector<32x32xf32>
    %237 = arith.mulf %232, %236 : vector<32x32xf32>
    %238 = arith.truncf %237 : vector<32x32xf32> to vector<32x32xbf16>
    %cst_74 = arith.constant dense<0.000000e+00> : vector<32x32xf32>
    %239 = tpu.matmul %238, %218, %cst_74 {dimension_numbers = #tpu.dot_dimension_numbers<[1], [0], [0], [1], [0, 0, 1, 1], [], []>} : vector<32x32xbf16>, vector<32x32xbf16>, vector<32x32xf32> -> vector<32x32xf32>
    %cst_75 = arith.constant 0.000000e+00 : f32
    %240 = vector.shape_cast %5 : vector<1x32xi1> to vector<1x32xi1>
    %241 = vector.broadcast %240 : vector<1x32xi1> to vector<32x32xi1>
    %242 = vector.broadcast %cst_75 : f32 to vector<32x32xf32>
    %243 = arith.select %241, %239, %242 : vector<32x32xi1>, vector<32x32xf32>
    %244 = arith.addf %219, %243 : vector<32x32xf32>
    %cst_76 = arith.constant 0.000000e+00 : f32
    %245 = vector.shape_cast %10 : vector<1x32xi1> to vector<1x32xi1>
    %246 = vector.broadcast %245 : vector<1x32xi1> to vector<32x32xi1>
    %247 = vector.broadcast %cst_76 : f32 to vector<32x32xf32>
    %248 = arith.select %246, %210, %247 : vector<32x32xi1>, vector<32x32xf32>
    %249 = arith.truncf %248 : vector<32x32xf32> to vector<32x32xbf16>
    "tpu.trace_start"() <{level = 10 : i32, message = "qd,kd->qk"}> : () -> ()
    %cst_77 = arith.constant dense<0.000000e+00> : vector<32x32xf32>
    %250 = tpu.matmul %249, %217, %cst_77 {dimension_numbers = #tpu.dot_dimension_numbers<[1], [1], [0], [0], [0, 0, 1, 0], [], []>} : vector<32x32xbf16>, vector<32x32xbf16>, vector<32x32xf32> -> vector<32x32xf32>
    "tpu.trace_stop"() : () -> ()
    %251 = vector.broadcast %205 : vector<1x32xf32> to vector<32x32xf32>
    %252 = arith.mulf %250, %251 : vector<32x32xf32>
    %cst_78 = arith.constant dense<0xFF800000> : vector<32xf32>
    %253 = vector.multi_reduction <maximumf>, %252, %cst_78 [1] : vector<32x32xf32> to vector<32xf32>
    %254 = vector.shape_cast %253 : vector<32xf32> to vector<32x1xf32>
    %255 = vector.broadcast %254 : vector<32x1xf32> to vector<32x32xf32>
    %256 = arith.subf %252, %255 : vector<32x32xf32>
    %257 = math.exp %256 : vector<32x32xf32>
    %cst_79 = arith.constant dense<0.000000e+00> : vector<32xf32>
    %258 = vector.multi_reduction <add>, %257, %cst_79 [1] : vector<32x32xf32> to vector<32xf32>
    %259 = vector.shape_cast %258 : vector<32xf32> to vector<32x1xf32>
    %260 = tpu.reciprocal %259 {approx = true} : vector<32x1xf32> -> vector<32x1xf32>
    %261 = vector.broadcast %260 : vector<32x1xf32> to vector<32x32xf32>
    %262 = arith.mulf %257, %261 : vector<32x32xf32>
    %263 = arith.truncf %262 : vector<32x32xf32> to vector<32x32xbf16>
    %cst_80 = arith.constant dense<0.000000e+00> : vector<32x32xf32>
    %264 = tpu.matmul %263, %218, %cst_80 {dimension_numbers = #tpu.dot_dimension_numbers<[1], [0], [0], [1], [0, 0, 1, 1], [], []>} : vector<32x32xbf16>, vector<32x32xbf16>, vector<32x32xf32> -> vector<32x32xf32>
    %cst_81 = arith.constant 0.000000e+00 : f32
    %265 = vector.shape_cast %10 : vector<1x32xi1> to vector<1x32xi1>
    %266 = vector.broadcast %265 : vector<1x32xi1> to vector<32x32xi1>
    %267 = vector.broadcast %cst_81 : f32 to vector<32x32xf32>
    %268 = arith.select %266, %264, %267 : vector<32x32xi1>, vector<32x32xf32>
    %269 = arith.addf %244, %268 : vector<32x32xf32>
    %cst_82 = arith.constant 0.000000e+00 : f32
    %270 = vector.shape_cast %15 : vector<1x32xi1> to vector<1x32xi1>
    %271 = vector.broadcast %270 : vector<1x32xi1> to vector<32x32xi1>
    %272 = vector.broadcast %cst_82 : f32 to vector<32x32xf32>
    %273 = arith.select %271, %210, %272 : vector<32x32xi1>, vector<32x32xf32>
    %274 = arith.truncf %273 : vector<32x32xf32> to vector<32x32xbf16>
    "tpu.trace_start"() <{level = 10 : i32, message = "qd,kd->qk"}> : () -> ()
    %cst_83 = arith.constant dense<0.000000e+00> : vector<32x32xf32>
    %275 = tpu.matmul %274, %217, %cst_83 {dimension_numbers = #tpu.dot_dimension_numbers<[1], [1], [0], [0], [0, 0, 1, 0], [], []>} : vector<32x32xbf16>, vector<32x32xbf16>, vector<32x32xf32> -> vector<32x32xf32>
    "tpu.trace_stop"() : () -> ()
    %276 = vector.broadcast %205 : vector<1x32xf32> to vector<32x32xf32>
    %277 = arith.mulf %275, %276 : vector<32x32xf32>
    %cst_84 = arith.constant dense<0xFF800000> : vector<32xf32>
    %278 = vector.multi_reduction <maximumf>, %277, %cst_84 [1] : vector<32x32xf32> to vector<32xf32>
    %279 = vector.shape_cast %278 : vector<32xf32> to vector<32x1xf32>
    %280 = vector.broadcast %279 : vector<32x1xf32> to vector<32x32xf32>
    %281 = arith.subf %277, %280 : vector<32x32xf32>
    %282 = math.exp %281 : vector<32x32xf32>
    %cst_85 = arith.constant dense<0.000000e+00> : vector<32xf32>
    %283 = vector.multi_reduction <add>, %282, %cst_85 [1] : vector<32x32xf32> to vector<32xf32>
    %284 = vector.shape_cast %283 : vector<32xf32> to vector<32x1xf32>
    %285 = tpu.reciprocal %284 {approx = true} : vector<32x1xf32> -> vector<32x1xf32>
    %286 = vector.broadcast %285 : vector<32x1xf32> to vector<32x32xf32>
    %287 = arith.mulf %282, %286 : vector<32x32xf32>
    %288 = arith.truncf %287 : vector<32x32xf32> to vector<32x32xbf16>
    %cst_86 = arith.constant dense<0.000000e+00> : vector<32x32xf32>
    %289 = tpu.matmul %288, %218, %cst_86 {dimension_numbers = #tpu.dot_dimension_numbers<[1], [0], [0], [1], [0, 0, 1, 1], [], []>} : vector<32x32xbf16>, vector<32x32xbf16>, vector<32x32xf32> -> vector<32x32xf32>
    %cst_87 = arith.constant 0.000000e+00 : f32
    %290 = vector.shape_cast %15 : vector<1x32xi1> to vector<1x32xi1>
    %291 = vector.broadcast %290 : vector<1x32xi1> to vector<32x32xi1>
    %292 = vector.broadcast %cst_87 : f32 to vector<32x32xf32>
    %293 = arith.select %291, %289, %292 : vector<32x32xi1>, vector<32x32xf32>
    %294 = arith.addf %269, %293 : vector<32x32xf32>
    %cst_88 = arith.constant 0.000000e+00 : f32
    %295 = vector.shape_cast %20 : vector<1x32xi1> to vector<1x32xi1>
    %296 = vector.broadcast %295 : vector<1x32xi1> to vector<32x32xi1>
    %297 = vector.broadcast %cst_88 : f32 to vector<32x32xf32>
    %298 = arith.select %296, %210, %297 : vector<32x32xi1>, vector<32x32xf32>
    %299 = arith.truncf %298 : vector<32x32xf32> to vector<32x32xbf16>
    "tpu.trace_start"() <{level = 10 : i32, message = "qd,kd->qk"}> : () -> ()
    %cst_89 = arith.constant dense<0.000000e+00> : vector<32x32xf32>
    %300 = tpu.matmul %299, %217, %cst_89 {dimension_numbers = #tpu.dot_dimension_numbers<[1], [1], [0], [0], [0, 0, 1, 0], [], []>} : vector<32x32xbf16>, vector<32x32xbf16>, vector<32x32xf32> -> vector<32x32xf32>
    "tpu.trace_stop"() : () -> ()
    %301 = vector.broadcast %205 : vector<1x32xf32> to vector<32x32xf32>
    %302 = arith.mulf %300, %301 : vector<32x32xf32>
    %cst_90 = arith.constant dense<0xFF800000> : vector<32xf32>
    %303 = vector.multi_reduction <maximumf>, %302, %cst_90 [1] : vector<32x32xf32> to vector<32xf32>
    %304 = vector.shape_cast %303 : vector<32xf32> to vector<32x1xf32>
    %305 = vector.broadcast %304 : vector<32x1xf32> to vector<32x32xf32>
    %306 = arith.subf %302, %305 : vector<32x32xf32>
    %307 = math.exp %306 : vector<32x32xf32>
    %cst_91 = arith.constant dense<0.000000e+00> : vector<32xf32>
    %308 = vector.multi_reduction <add>, %307, %cst_91 [1] : vector<32x32xf32> to vector<32xf32>
    %309 = vector.shape_cast %308 : vector<32xf32> to vector<32x1xf32>
    %310 = tpu.reciprocal %309 {approx = true} : vector<32x1xf32> -> vector<32x1xf32>
    %311 = vector.broadcast %310 : vector<32x1xf32> to vector<32x32xf32>
    %312 = arith.mulf %307, %311 : vector<32x32xf32>
    %313 = arith.truncf %312 : vector<32x32xf32> to vector<32x32xbf16>
    %cst_92 = arith.constant dense<0.000000e+00> : vector<32x32xf32>
    %314 = tpu.matmul %313, %218, %cst_92 {dimension_numbers = #tpu.dot_dimension_numbers<[1], [0], [0], [1], [0, 0, 1, 1], [], []>} : vector<32x32xbf16>, vector<32x32xbf16>, vector<32x32xf32> -> vector<32x32xf32>
    %cst_93 = arith.constant 0.000000e+00 : f32
    %315 = vector.shape_cast %20 : vector<1x32xi1> to vector<1x32xi1>
    %316 = vector.broadcast %315 : vector<1x32xi1> to vector<32x32xi1>
    %317 = vector.broadcast %cst_93 : f32 to vector<32x32xf32>
    %318 = arith.select %316, %314, %317 : vector<32x32xi1>, vector<32x32xf32>
    %319 = arith.addf %294, %318 : vector<32x32xf32>
    %320 = arith.truncf %319 : vector<32x32xf32> to vector<32x32xbf16>
    %cst_94 = arith.constant dense<0.000000e+00> : vector<32x32xf32>
    %321 = tpu.matmul %320, %203, %cst_94 {dimension_numbers = #tpu.dot_dimension_numbers<[1], [0], [0], [1], [0, 0, 1, 1], [], []>} : vector<32x32xbf16>, vector<32x32xbf16>, vector<32x32xf32> -> vector<32x32xf32>
    %322 = vector.broadcast %204 : vector<1x32xf32> to vector<32x32xf32>
    %323 = arith.addf %321, %322 : vector<32x32xf32>
    %324 = arith.addf %192, %323 : vector<32x32xf32>
    %325 = vector.extract_strided_slice %36 {offsets = [12, 0], sizes = [1, 32], strides = [1, 1]} : vector<17x32xf32> to vector<1x32xf32>
    %326 = vector.extract_strided_slice %36 {offsets = [15, 0], sizes = [1, 32], strides = [1, 1]} : vector<17x32xf32> to vector<1x32xf32>
    %cst_95 = arith.constant dense<0.000000e+00> : vector<32xf32>
    %327 = vector.multi_reduction <add>, %324, %cst_95 [1] : vector<32x32xf32> to vector<32xf32>
    %328 = vector.shape_cast %327 : vector<32xf32> to vector<32x1xf32>
    %cst_96 = arith.constant 3.200000e+01 : f32
    %329 = vector.broadcast %cst_96 : f32 to vector<32x1xf32>
    %330 = arith.divf %328, %329 : vector<32x1xf32>
    %331 = vector.broadcast %330 : vector<32x1xf32> to vector<32x32xf32>
    %332 = arith.subf %324, %331 : vector<32x32xf32>
    %333 = arith.mulf %332, %332 : vector<32x32xf32>
    %cst_97 = arith.constant dense<0.000000e+00> : vector<32xf32>
    %334 = vector.multi_reduction <add>, %333, %cst_97 [1] : vector<32x32xf32> to vector<32xf32>
    %335 = vector.shape_cast %334 : vector<32xf32> to vector<32x1xf32>
    %cst_98 = arith.constant 3.200000e+01 : f32
    %336 = vector.broadcast %cst_98 : f32 to vector<32x1xf32>
    %337 = arith.divf %335, %336 : vector<32x1xf32>
    %338 = vector.broadcast %330 : vector<32x1xf32> to vector<32x32xf32>
    %339 = arith.subf %324, %338 : vector<32x32xf32>
    %cst_99 = arith.constant 9.99999974E-6 : f32
    %340 = vector.broadcast %cst_99 : f32 to vector<32x1xf32>
    %341 = arith.addf %337, %340 : vector<32x1xf32>
    %342 = math.rsqrt %341 : vector<32x1xf32>
    %343 = vector.broadcast %342 : vector<32x1xf32> to vector<32x32xf32>
    %344 = arith.mulf %339, %343 : vector<32x32xf32>
    %345 = vector.broadcast %325 : vector<1x32xf32> to vector<32x32xf32>
    %346 = arith.mulf %344, %345 : vector<32x32xf32>
    %347 = vector.broadcast %326 : vector<1x32xf32> to vector<32x32xf32>
    %348 = arith.addf %346, %347 : vector<32x32xf32>
    %349 = arith.truncf %348 : vector<32x32xf32> to vector<32x32xbf16>
    %c0_100 = arith.constant 0 : index
    %c0_101 = arith.constant 0 : index
    %c0_102 = arith.constant 0 : index
    %350 = vector.load %arg7[%c0_100, %c0_101, %c0_102] : memref<2x32x64xbf16, #tpu.memory_space<vmem>>, vector<1x32x64xbf16>
    %351 = vector.shape_cast %350 : vector<1x32x64xbf16> to vector<32x64xbf16>
    %cst_103 = arith.constant dense<0.000000e+00> : vector<32x64xf32>
    %352 = tpu.matmul %349, %351, %cst_103 {dimension_numbers = #tpu.dot_dimension_numbers<[1], [0], [0], [1], [0, 0, 1, 1], [], []>} : vector<32x32xbf16>, vector<32x64xbf16>, vector<32x64xf32> -> vector<32x64xf32>
    %c0_104 = arith.constant 0 : index
    %c0_105 = arith.constant 0 : index
    %c0_106 = arith.constant 0 : index
    %353 = vector.load %arg8[%c0_104, %c0_105, %c0_106] : memref<2x1x64xf32, #tpu.memory_space<vmem>>, vector<1x1x64xf32>
    %354 = vector.shape_cast %353 : vector<1x1x64xf32> to vector<1x64xf32>
    %355 = vector.broadcast %354 : vector<1x64xf32> to vector<32x64xf32>
    %356 = arith.addf %352, %355 : vector<32x64xf32>
    %357 = arith.mulf %356, %356 : vector<32x64xf32>
    %358 = arith.mulf %356, %357 : vector<32x64xf32>
    %cst_107 = arith.constant 4.471500e-02 : f32
    %359 = vector.broadcast %cst_107 : f32 to vector<32x64xf32>
    %360 = arith.mulf %359, %358 : vector<32x64xf32>
    %361 = arith.addf %356, %360 : vector<32x64xf32>
    %cst_108 = arith.constant 0.797884583 : f32
    %362 = vector.broadcast %cst_108 : f32 to vector<32x64xf32>
    %363 = arith.mulf %362, %361 : vector<32x64xf32>
    %364 = math.tanh %363 : vector<32x64xf32>
    %cst_109 = arith.constant 1.000000e+00 : f32
    %365 = vector.broadcast %cst_109 : f32 to vector<32x64xf32>
    %366 = arith.addf %365, %364 : vector<32x64xf32>
    %cst_110 = arith.constant 5.000000e-01 : f32
    %367 = vector.broadcast %cst_110 : f32 to vector<32x64xf32>
    %368 = arith.mulf %367, %366 : vector<32x64xf32>
    %369 = arith.mulf %356, %368 : vector<32x64xf32>
    %370 = arith.truncf %369 : vector<32x64xf32> to vector<32x64xbf16>
    %c0_111 = arith.constant 0 : index
    %c0_112 = arith.constant 0 : index
    %c0_113 = arith.constant 0 : index
    %371 = vector.load %arg9[%c0_111, %c0_112, %c0_113] : memref<2x64x32xbf16, #tpu.memory_space<vmem>>, vector<1x64x32xbf16>
    %372 = vector.shape_cast %371 : vector<1x64x32xbf16> to vector<64x32xbf16>
    %cst_114 = arith.constant dense<0.000000e+00> : vector<32x32xf32>
    %373 = tpu.matmul %370, %372, %cst_114 {dimension_numbers = #tpu.dot_dimension_numbers<[1], [0], [0], [1], [0, 0, 1, 1], [], []>} : vector<32x64xbf16>, vector<64x32xbf16>, vector<32x32xf32> -> vector<32x32xf32>
    %374 = vector.extract_strided_slice %36 {offsets = [10, 0], sizes = [1, 32], strides = [1, 1]} : vector<17x32xf32> to vector<1x32xf32>
    %375 = vector.broadcast %374 : vector<1x32xf32> to vector<32x32xf32>
    %376 = arith.addf %373, %375 : vector<32x32xf32>
    %377 = arith.addf %348, %376 : vector<32x32xf32>
    %378 = vector.extract_strided_slice %36 {offsets = [13, 0], sizes = [1, 32], strides = [1, 1]} : vector<17x32xf32> to vector<1x32xf32>
    %379 = vector.extract_strided_slice %36 {offsets = [16, 0], sizes = [1, 32], strides = [1, 1]} : vector<17x32xf32> to vector<1x32xf32>
    %cst_115 = arith.constant dense<0.000000e+00> : vector<32xf32>
    %380 = vector.multi_reduction <add>, %377, %cst_115 [1] : vector<32x32xf32> to vector<32xf32>
    %381 = vector.shape_cast %380 : vector<32xf32> to vector<32x1xf32>
    %cst_116 = arith.constant 3.200000e+01 : f32
    %382 = vector.broadcast %cst_116 : f32 to vector<32x1xf32>
    %383 = arith.divf %381, %382 : vector<32x1xf32>
    %384 = vector.broadcast %383 : vector<32x1xf32> to vector<32x32xf32>
    %385 = arith.subf %377, %384 : vector<32x32xf32>
    %386 = arith.mulf %385, %385 : vector<32x32xf32>
    %cst_117 = arith.constant dense<0.000000e+00> : vector<32xf32>
    %387 = vector.multi_reduction <add>, %386, %cst_117 [1] : vector<32x32xf32> to vector<32xf32>
    %388 = vector.shape_cast %387 : vector<32xf32> to vector<32x1xf32>
    %cst_118 = arith.constant 3.200000e+01 : f32
    %389 = vector.broadcast %cst_118 : f32 to vector<32x1xf32>
    %390 = arith.divf %388, %389 : vector<32x1xf32>
    %391 = vector.broadcast %383 : vector<32x1xf32> to vector<32x32xf32>
    %392 = arith.subf %377, %391 : vector<32x32xf32>
    %cst_119 = arith.constant 9.99999974E-6 : f32
    %393 = vector.broadcast %cst_119 : f32 to vector<32x1xf32>
    %394 = arith.addf %390, %393 : vector<32x1xf32>
    %395 = math.rsqrt %394 : vector<32x1xf32>
    %396 = vector.broadcast %395 : vector<32x1xf32> to vector<32x32xf32>
    %397 = arith.mulf %392, %396 : vector<32x32xf32>
    %398 = vector.broadcast %378 : vector<1x32xf32> to vector<32x32xf32>
    %399 = arith.mulf %397, %398 : vector<32x32xf32>
    %400 = vector.broadcast %379 : vector<1x32xf32> to vector<32x32xf32>
    %401 = arith.addf %399, %400 : vector<32x32xf32>
    %c1_120 = arith.constant 1 : index
    %c0_121 = arith.constant 0 : index
    %c0_122 = arith.constant 0 : index
    %402 = vector.load %arg6[%c1_120, %c0_121, %c0_122] : memref<2x17x32xf32, #tpu.memory_space<vmem>>, vector<1x17x32xf32>
    %403 = vector.shape_cast %402 : vector<1x17x32xf32> to vector<17x32xf32>
    %c8 = arith.constant 8 : index
    %c0_123 = arith.constant 0 : index
    %c0_124 = arith.constant 0 : index
    %404 = vector.load %arg5[%c8, %c0_123, %c0_124] : memref<16x32x32xbf16, #tpu.memory_space<vmem>>, vector<1x32x32xbf16>
    %405 = vector.shape_cast %404 : vector<1x32x32xbf16> to vector<32x32xbf16>
    %406 = vector.extract_strided_slice %403 {offsets = [0, 0], sizes = [1, 32], strides = [1, 1]} : vector<17x32xf32> to vector<1x32xf32>
    %c9 = arith.constant 9 : index
    %c0_125 = arith.constant 0 : index
    %c0_126 = arith.constant 0 : index
    %407 = vector.load %arg5[%c9, %c0_125, %c0_126] : memref<16x32x32xbf16, #tpu.memory_space<vmem>>, vector<1x32x32xbf16>
    %408 = vector.shape_cast %407 : vector<1x32x32xbf16> to vector<32x32xbf16>
    %409 = vector.extract_strided_slice %403 {offsets = [1, 0], sizes = [1, 32], strides = [1, 1]} : vector<17x32xf32> to vector<1x32xf32>
    %c10 = arith.constant 10 : index
    %c0_127 = arith.constant 0 : index
    %c0_128 = arith.constant 0 : index
    %410 = vector.load %arg5[%c10, %c0_127, %c0_128] : memref<16x32x32xbf16, #tpu.memory_space<vmem>>, vector<1x32x32xbf16>
    %411 = vector.shape_cast %410 : vector<1x32x32xbf16> to vector<32x32xbf16>
    %412 = vector.extract_strided_slice %403 {offsets = [2, 0], sizes = [1, 32], strides = [1, 1]} : vector<17x32xf32> to vector<1x32xf32>
    %c11 = arith.constant 11 : index
    %c0_129 = arith.constant 0 : index
    %c0_130 = arith.constant 0 : index
    %413 = vector.load %arg5[%c11, %c0_129, %c0_130] : memref<16x32x32xbf16, #tpu.memory_space<vmem>>, vector<1x32x32xbf16>
    %414 = vector.shape_cast %413 : vector<1x32x32xbf16> to vector<32x32xbf16>
    %415 = vector.extract_strided_slice %403 {offsets = [3, 0], sizes = [1, 32], strides = [1, 1]} : vector<17x32xf32> to vector<1x32xf32>
    %416 = vector.extract_strided_slice %403 {offsets = [4, 0], sizes = [1, 32], strides = [1, 1]} : vector<17x32xf32> to vector<1x32xf32>
    %417 = arith.truncf %401 : vector<32x32xf32> to vector<32x32xbf16>
    %418 = arith.truncf %401 : vector<32x32xf32> to vector<32x32xbf16>
    %cst_131 = arith.constant dense<0.000000e+00> : vector<32x32xf32>
    %419 = tpu.matmul %417, %405, %cst_131 {dimension_numbers = #tpu.dot_dimension_numbers<[1], [0], [0], [1], [0, 0, 1, 1], [], []>} : vector<32x32xbf16>, vector<32x32xbf16>, vector<32x32xf32> -> vector<32x32xf32>
    %420 = vector.broadcast %406 : vector<1x32xf32> to vector<32x32xf32>
    %421 = arith.addf %419, %420 : vector<32x32xf32>
    %cst_132 = arith.constant dense<0.000000e+00> : vector<32x32xf32>
    %422 = tpu.matmul %418, %408, %cst_132 {dimension_numbers = #tpu.dot_dimension_numbers<[1], [0], [0], [1], [0, 0, 1, 1], [], []>} : vector<32x32xbf16>, vector<32x32xbf16>, vector<32x32xf32> -> vector<32x32xf32>
    %423 = vector.broadcast %409 : vector<1x32xf32> to vector<32x32xf32>
    %424 = arith.addf %422, %423 : vector<32x32xf32>
    %cst_133 = arith.constant dense<0.000000e+00> : vector<32x32xf32>
    %425 = tpu.matmul %418, %411, %cst_133 {dimension_numbers = #tpu.dot_dimension_numbers<[1], [0], [0], [1], [0, 0, 1, 1], [], []>} : vector<32x32xbf16>, vector<32x32xbf16>, vector<32x32xf32> -> vector<32x32xf32>
    %426 = vector.broadcast %412 : vector<1x32xf32> to vector<32x32xf32>
    %427 = arith.addf %425, %426 : vector<32x32xf32>
    %428 = arith.truncf %424 : vector<32x32xf32> to vector<32x32xbf16>
    %429 = arith.truncf %427 : vector<32x32xf32> to vector<32x32xbf16>
    %cst_134 = arith.constant 0.000000e+00 : f32
    %430 = vector.broadcast %cst_134 : f32 to vector<32x32xf32>
    %cst_135 = arith.constant 0.000000e+00 : f32
    %431 = vector.shape_cast %5 : vector<1x32xi1> to vector<1x32xi1>
    %432 = vector.broadcast %431 : vector<1x32xi1> to vector<32x32xi1>
    %433 = vector.broadcast %cst_135 : f32 to vector<32x32xf32>
    %434 = arith.select %432, %421, %433 : vector<32x32xi1>, vector<32x32xf32>
    %435 = arith.truncf %434 : vector<32x32xf32> to vector<32x32xbf16>
    "tpu.trace_start"() <{level = 10 : i32, message = "qd,kd->qk"}> : () -> ()
    %cst_136 = arith.constant dense<0.000000e+00> : vector<32x32xf32>
    %436 = tpu.matmul %435, %428, %cst_136 {dimension_numbers = #tpu.dot_dimension_numbers<[1], [1], [0], [0], [0, 0, 1, 0], [], []>} : vector<32x32xbf16>, vector<32x32xbf16>, vector<32x32xf32> -> vector<32x32xf32>
    "tpu.trace_stop"() : () -> ()
    %437 = vector.broadcast %416 : vector<1x32xf32> to vector<32x32xf32>
    %438 = arith.mulf %436, %437 : vector<32x32xf32>
    %cst_137 = arith.constant dense<0xFF800000> : vector<32xf32>
    %439 = vector.multi_reduction <maximumf>, %438, %cst_137 [1] : vector<32x32xf32> to vector<32xf32>
    %440 = vector.shape_cast %439 : vector<32xf32> to vector<32x1xf32>
    %441 = vector.broadcast %440 : vector<32x1xf32> to vector<32x32xf32>
    %442 = arith.subf %438, %441 : vector<32x32xf32>
    %443 = math.exp %442 : vector<32x32xf32>
    %cst_138 = arith.constant dense<0.000000e+00> : vector<32xf32>
    %444 = vector.multi_reduction <add>, %443, %cst_138 [1] : vector<32x32xf32> to vector<32xf32>
    %445 = vector.shape_cast %444 : vector<32xf32> to vector<32x1xf32>
    %446 = tpu.reciprocal %445 {approx = true} : vector<32x1xf32> -> vector<32x1xf32>
    %447 = vector.broadcast %446 : vector<32x1xf32> to vector<32x32xf32>
    %448 = arith.mulf %443, %447 : vector<32x32xf32>
    %449 = arith.truncf %448 : vector<32x32xf32> to vector<32x32xbf16>
    %cst_139 = arith.constant dense<0.000000e+00> : vector<32x32xf32>
    %450 = tpu.matmul %449, %429, %cst_139 {dimension_numbers = #tpu.dot_dimension_numbers<[1], [0], [0], [1], [0, 0, 1, 1], [], []>} : vector<32x32xbf16>, vector<32x32xbf16>, vector<32x32xf32> -> vector<32x32xf32>
    %cst_140 = arith.constant 0.000000e+00 : f32
    %451 = vector.shape_cast %5 : vector<1x32xi1> to vector<1x32xi1>
    %452 = vector.broadcast %451 : vector<1x32xi1> to vector<32x32xi1>
    %453 = vector.broadcast %cst_140 : f32 to vector<32x32xf32>
    %454 = arith.select %452, %450, %453 : vector<32x32xi1>, vector<32x32xf32>
    %455 = arith.addf %430, %454 : vector<32x32xf32>
    %cst_141 = arith.constant 0.000000e+00 : f32
    %456 = vector.shape_cast %10 : vector<1x32xi1> to vector<1x32xi1>
    %457 = vector.broadcast %456 : vector<1x32xi1> to vector<32x32xi1>
    %458 = vector.broadcast %cst_141 : f32 to vector<32x32xf32>
    %459 = arith.select %457, %421, %458 : vector<32x32xi1>, vector<32x32xf32>
    %460 = arith.truncf %459 : vector<32x32xf32> to vector<32x32xbf16>
    "tpu.trace_start"() <{level = 10 : i32, message = "qd,kd->qk"}> : () -> ()
    %cst_142 = arith.constant dense<0.000000e+00> : vector<32x32xf32>
    %461 = tpu.matmul %460, %428, %cst_142 {dimension_numbers = #tpu.dot_dimension_numbers<[1], [1], [0], [0], [0, 0, 1, 0], [], []>} : vector<32x32xbf16>, vector<32x32xbf16>, vector<32x32xf32> -> vector<32x32xf32>
    "tpu.trace_stop"() : () -> ()
    %462 = vector.broadcast %416 : vector<1x32xf32> to vector<32x32xf32>
    %463 = arith.mulf %461, %462 : vector<32x32xf32>
    %cst_143 = arith.constant dense<0xFF800000> : vector<32xf32>
    %464 = vector.multi_reduction <maximumf>, %463, %cst_143 [1] : vector<32x32xf32> to vector<32xf32>
    %465 = vector.shape_cast %464 : vector<32xf32> to vector<32x1xf32>
    %466 = vector.broadcast %465 : vector<32x1xf32> to vector<32x32xf32>
    %467 = arith.subf %463, %466 : vector<32x32xf32>
    %468 = math.exp %467 : vector<32x32xf32>
    %cst_144 = arith.constant dense<0.000000e+00> : vector<32xf32>
    %469 = vector.multi_reduction <add>, %468, %cst_144 [1] : vector<32x32xf32> to vector<32xf32>
    %470 = vector.shape_cast %469 : vector<32xf32> to vector<32x1xf32>
    %471 = tpu.reciprocal %470 {approx = true} : vector<32x1xf32> -> vector<32x1xf32>
    %472 = vector.broadcast %471 : vector<32x1xf32> to vector<32x32xf32>
    %473 = arith.mulf %468, %472 : vector<32x32xf32>
    %474 = arith.truncf %473 : vector<32x32xf32> to vector<32x32xbf16>
    %cst_145 = arith.constant dense<0.000000e+00> : vector<32x32xf32>
    %475 = tpu.matmul %474, %429, %cst_145 {dimension_numbers = #tpu.dot_dimension_numbers<[1], [0], [0], [1], [0, 0, 1, 1], [], []>} : vector<32x32xbf16>, vector<32x32xbf16>, vector<32x32xf32> -> vector<32x32xf32>
    %cst_146 = arith.constant 0.000000e+00 : f32
    %476 = vector.shape_cast %10 : vector<1x32xi1> to vector<1x32xi1>
    %477 = vector.broadcast %476 : vector<1x32xi1> to vector<32x32xi1>
    %478 = vector.broadcast %cst_146 : f32 to vector<32x32xf32>
    %479 = arith.select %477, %475, %478 : vector<32x32xi1>, vector<32x32xf32>
    %480 = arith.addf %455, %479 : vector<32x32xf32>
    %cst_147 = arith.constant 0.000000e+00 : f32
    %481 = vector.shape_cast %15 : vector<1x32xi1> to vector<1x32xi1>
    %482 = vector.broadcast %481 : vector<1x32xi1> to vector<32x32xi1>
    %483 = vector.broadcast %cst_147 : f32 to vector<32x32xf32>
    %484 = arith.select %482, %421, %483 : vector<32x32xi1>, vector<32x32xf32>
    %485 = arith.truncf %484 : vector<32x32xf32> to vector<32x32xbf16>
    "tpu.trace_start"() <{level = 10 : i32, message = "qd,kd->qk"}> : () -> ()
    %cst_148 = arith.constant dense<0.000000e+00> : vector<32x32xf32>
    %486 = tpu.matmul %485, %428, %cst_148 {dimension_numbers = #tpu.dot_dimension_numbers<[1], [1], [0], [0], [0, 0, 1, 0], [], []>} : vector<32x32xbf16>, vector<32x32xbf16>, vector<32x32xf32> -> vector<32x32xf32>
    "tpu.trace_stop"() : () -> ()
    %487 = vector.broadcast %416 : vector<1x32xf32> to vector<32x32xf32>
    %488 = arith.mulf %486, %487 : vector<32x32xf32>
    %cst_149 = arith.constant dense<0xFF800000> : vector<32xf32>
    %489 = vector.multi_reduction <maximumf>, %488, %cst_149 [1] : vector<32x32xf32> to vector<32xf32>
    %490 = vector.shape_cast %489 : vector<32xf32> to vector<32x1xf32>
    %491 = vector.broadcast %490 : vector<32x1xf32> to vector<32x32xf32>
    %492 = arith.subf %488, %491 : vector<32x32xf32>
    %493 = math.exp %492 : vector<32x32xf32>
    %cst_150 = arith.constant dense<0.000000e+00> : vector<32xf32>
    %494 = vector.multi_reduction <add>, %493, %cst_150 [1] : vector<32x32xf32> to vector<32xf32>
    %495 = vector.shape_cast %494 : vector<32xf32> to vector<32x1xf32>
    %496 = tpu.reciprocal %495 {approx = true} : vector<32x1xf32> -> vector<32x1xf32>
    %497 = vector.broadcast %496 : vector<32x1xf32> to vector<32x32xf32>
    %498 = arith.mulf %493, %497 : vector<32x32xf32>
    %499 = arith.truncf %498 : vector<32x32xf32> to vector<32x32xbf16>
    %cst_151 = arith.constant dense<0.000000e+00> : vector<32x32xf32>
    %500 = tpu.matmul %499, %429, %cst_151 {dimension_numbers = #tpu.dot_dimension_numbers<[1], [0], [0], [1], [0, 0, 1, 1], [], []>} : vector<32x32xbf16>, vector<32x32xbf16>, vector<32x32xf32> -> vector<32x32xf32>
    %cst_152 = arith.constant 0.000000e+00 : f32
    %501 = vector.shape_cast %15 : vector<1x32xi1> to vector<1x32xi1>
    %502 = vector.broadcast %501 : vector<1x32xi1> to vector<32x32xi1>
    %503 = vector.broadcast %cst_152 : f32 to vector<32x32xf32>
    %504 = arith.select %502, %500, %503 : vector<32x32xi1>, vector<32x32xf32>
    %505 = arith.addf %480, %504 : vector<32x32xf32>
    %cst_153 = arith.constant 0.000000e+00 : f32
    %506 = vector.shape_cast %20 : vector<1x32xi1> to vector<1x32xi1>
    %507 = vector.broadcast %506 : vector<1x32xi1> to vector<32x32xi1>
    %508 = vector.broadcast %cst_153 : f32 to vector<32x32xf32>
    %509 = arith.select %507, %421, %508 : vector<32x32xi1>, vector<32x32xf32>
    %510 = arith.truncf %509 : vector<32x32xf32> to vector<32x32xbf16>
    "tpu.trace_start"() <{level = 10 : i32, message = "qd,kd->qk"}> : () -> ()
    %cst_154 = arith.constant dense<0.000000e+00> : vector<32x32xf32>
    %511 = tpu.matmul %510, %428, %cst_154 {dimension_numbers = #tpu.dot_dimension_numbers<[1], [1], [0], [0], [0, 0, 1, 0], [], []>} : vector<32x32xbf16>, vector<32x32xbf16>, vector<32x32xf32> -> vector<32x32xf32>
    "tpu.trace_stop"() : () -> ()
    %512 = vector.broadcast %416 : vector<1x32xf32> to vector<32x32xf32>
    %513 = arith.mulf %511, %512 : vector<32x32xf32>
    %cst_155 = arith.constant dense<0xFF800000> : vector<32xf32>
    %514 = vector.multi_reduction <maximumf>, %513, %cst_155 [1] : vector<32x32xf32> to vector<32xf32>
    %515 = vector.shape_cast %514 : vector<32xf32> to vector<32x1xf32>
    %516 = vector.broadcast %515 : vector<32x1xf32> to vector<32x32xf32>
    %517 = arith.subf %513, %516 : vector<32x32xf32>
    %518 = math.exp %517 : vector<32x32xf32>
    %cst_156 = arith.constant dense<0.000000e+00> : vector<32xf32>
    %519 = vector.multi_reduction <add>, %518, %cst_156 [1] : vector<32x32xf32> to vector<32xf32>
    %520 = vector.shape_cast %519 : vector<32xf32> to vector<32x1xf32>
    %521 = tpu.reciprocal %520 {approx = true} : vector<32x1xf32> -> vector<32x1xf32>
    %522 = vector.broadcast %521 : vector<32x1xf32> to vector<32x32xf32>
    %523 = arith.mulf %518, %522 : vector<32x32xf32>
    %524 = arith.truncf %523 : vector<32x32xf32> to vector<32x32xbf16>
    %cst_157 = arith.constant dense<0.000000e+00> : vector<32x32xf32>
    %525 = tpu.matmul %524, %429, %cst_157 {dimension_numbers = #tpu.dot_dimension_numbers<[1], [0], [0], [1], [0, 0, 1, 1], [], []>} : vector<32x32xbf16>, vector<32x32xbf16>, vector<32x32xf32> -> vector<32x32xf32>
    %cst_158 = arith.constant 0.000000e+00 : f32
    %526 = vector.shape_cast %20 : vector<1x32xi1> to vector<1x32xi1>
    %527 = vector.broadcast %526 : vector<1x32xi1> to vector<32x32xi1>
    %528 = vector.broadcast %cst_158 : f32 to vector<32x32xf32>
    %529 = arith.select %527, %525, %528 : vector<32x32xi1>, vector<32x32xf32>
    %530 = arith.addf %505, %529 : vector<32x32xf32>
    %531 = arith.truncf %530 : vector<32x32xf32> to vector<32x32xbf16>
    %cst_159 = arith.constant dense<0.000000e+00> : vector<32x32xf32>
    %532 = tpu.matmul %531, %414, %cst_159 {dimension_numbers = #tpu.dot_dimension_numbers<[1], [0], [0], [1], [0, 0, 1, 1], [], []>} : vector<32x32xbf16>, vector<32x32xbf16>, vector<32x32xf32> -> vector<32x32xf32>
    %533 = vector.broadcast %415 : vector<1x32xf32> to vector<32x32xf32>
    %534 = arith.addf %532, %533 : vector<32x32xf32>
    %535 = arith.addf %401, %534 : vector<32x32xf32>
    %536 = vector.extract_strided_slice %403 {offsets = [11, 0], sizes = [1, 32], strides = [1, 1]} : vector<17x32xf32> to vector<1x32xf32>
    %537 = vector.extract_strided_slice %403 {offsets = [14, 0], sizes = [1, 32], strides = [1, 1]} : vector<17x32xf32> to vector<1x32xf32>
    %cst_160 = arith.constant dense<0.000000e+00> : vector<32xf32>
    %538 = vector.multi_reduction <add>, %535, %cst_160 [1] : vector<32x32xf32> to vector<32xf32>
    %539 = vector.shape_cast %538 : vector<32xf32> to vector<32x1xf32>
    %cst_161 = arith.constant 3.200000e+01 : f32
    %540 = vector.broadcast %cst_161 : f32 to vector<32x1xf32>
    %541 = arith.divf %539, %540 : vector<32x1xf32>
    %542 = vector.broadcast %541 : vector<32x1xf32> to vector<32x32xf32>
    %543 = arith.subf %535, %542 : vector<32x32xf32>
    %544 = arith.mulf %543, %543 : vector<32x32xf32>
    %cst_162 = arith.constant dense<0.000000e+00> : vector<32xf32>
    %545 = vector.multi_reduction <add>, %544, %cst_162 [1] : vector<32x32xf32> to vector<32xf32>
    %546 = vector.shape_cast %545 : vector<32xf32> to vector<32x1xf32>
    %cst_163 = arith.constant 3.200000e+01 : f32
    %547 = vector.broadcast %cst_163 : f32 to vector<32x1xf32>
    %548 = arith.divf %546, %547 : vector<32x1xf32>
    %549 = vector.broadcast %541 : vector<32x1xf32> to vector<32x32xf32>
    %550 = arith.subf %535, %549 : vector<32x32xf32>
    %cst_164 = arith.constant 9.99999974E-6 : f32
    %551 = vector.broadcast %cst_164 : f32 to vector<32x1xf32>
    %552 = arith.addf %548, %551 : vector<32x1xf32>
    %553 = math.rsqrt %552 : vector<32x1xf32>
    %554 = vector.broadcast %553 : vector<32x1xf32> to vector<32x32xf32>
    %555 = arith.mulf %550, %554 : vector<32x32xf32>
    %556 = vector.broadcast %536 : vector<1x32xf32> to vector<32x32xf32>
    %557 = arith.mulf %555, %556 : vector<32x32xf32>
    %558 = vector.broadcast %537 : vector<1x32xf32> to vector<32x32xf32>
    %559 = arith.addf %557, %558 : vector<32x32xf32>
    %c12 = arith.constant 12 : index
    %c0_165 = arith.constant 0 : index
    %c0_166 = arith.constant 0 : index
    %560 = vector.load %arg5[%c12, %c0_165, %c0_166] : memref<16x32x32xbf16, #tpu.memory_space<vmem>>, vector<1x32x32xbf16>
    %561 = vector.shape_cast %560 : vector<1x32x32xbf16> to vector<32x32xbf16>
    %562 = vector.extract_strided_slice %403 {offsets = [5, 0], sizes = [1, 32], strides = [1, 1]} : vector<17x32xf32> to vector<1x32xf32>
    %c13 = arith.constant 13 : index
    %c0_167 = arith.constant 0 : index
    %c0_168 = arith.constant 0 : index
    %563 = vector.load %arg5[%c13, %c0_167, %c0_168] : memref<16x32x32xbf16, #tpu.memory_space<vmem>>, vector<1x32x32xbf16>
    %564 = vector.shape_cast %563 : vector<1x32x32xbf16> to vector<32x32xbf16>
    %565 = vector.extract_strided_slice %403 {offsets = [6, 0], sizes = [1, 32], strides = [1, 1]} : vector<17x32xf32> to vector<1x32xf32>
    %c14 = arith.constant 14 : index
    %c0_169 = arith.constant 0 : index
    %c0_170 = arith.constant 0 : index
    %566 = vector.load %arg5[%c14, %c0_169, %c0_170] : memref<16x32x32xbf16, #tpu.memory_space<vmem>>, vector<1x32x32xbf16>
    %567 = vector.shape_cast %566 : vector<1x32x32xbf16> to vector<32x32xbf16>
    %568 = vector.extract_strided_slice %403 {offsets = [7, 0], sizes = [1, 32], strides = [1, 1]} : vector<17x32xf32> to vector<1x32xf32>
    %c15 = arith.constant 15 : index
    %c0_171 = arith.constant 0 : index
    %c0_172 = arith.constant 0 : index
    %569 = vector.load %arg5[%c15, %c0_171, %c0_172] : memref<16x32x32xbf16, #tpu.memory_space<vmem>>, vector<1x32x32xbf16>
    %570 = vector.shape_cast %569 : vector<1x32x32xbf16> to vector<32x32xbf16>
    %571 = vector.extract_strided_slice %403 {offsets = [8, 0], sizes = [1, 32], strides = [1, 1]} : vector<17x32xf32> to vector<1x32xf32>
    %572 = vector.extract_strided_slice %403 {offsets = [9, 0], sizes = [1, 32], strides = [1, 1]} : vector<17x32xf32> to vector<1x32xf32>
    %573 = arith.truncf %559 : vector<32x32xf32> to vector<32x32xbf16>
    %574 = arith.truncf %34 : vector<32x32xf32> to vector<32x32xbf16>
    %cst_173 = arith.constant dense<0.000000e+00> : vector<32x32xf32>
    %575 = tpu.matmul %573, %561, %cst_173 {dimension_numbers = #tpu.dot_dimension_numbers<[1], [0], [0], [1], [0, 0, 1, 1], [], []>} : vector<32x32xbf16>, vector<32x32xbf16>, vector<32x32xf32> -> vector<32x32xf32>
    %576 = vector.broadcast %562 : vector<1x32xf32> to vector<32x32xf32>
    %577 = arith.addf %575, %576 : vector<32x32xf32>
    %cst_174 = arith.constant dense<0.000000e+00> : vector<32x32xf32>
    %578 = tpu.matmul %574, %564, %cst_174 {dimension_numbers = #tpu.dot_dimension_numbers<[1], [0], [0], [1], [0, 0, 1, 1], [], []>} : vector<32x32xbf16>, vector<32x32xbf16>, vector<32x32xf32> -> vector<32x32xf32>
    %579 = vector.broadcast %565 : vector<1x32xf32> to vector<32x32xf32>
    %580 = arith.addf %578, %579 : vector<32x32xf32>
    %cst_175 = arith.constant dense<0.000000e+00> : vector<32x32xf32>
    %581 = tpu.matmul %574, %567, %cst_175 {dimension_numbers = #tpu.dot_dimension_numbers<[1], [0], [0], [1], [0, 0, 1, 1], [], []>} : vector<32x32xbf16>, vector<32x32xbf16>, vector<32x32xf32> -> vector<32x32xf32>
    %582 = vector.broadcast %568 : vector<1x32xf32> to vector<32x32xf32>
    %583 = arith.addf %581, %582 : vector<32x32xf32>
    %584 = arith.truncf %580 : vector<32x32xf32> to vector<32x32xbf16>
    %585 = arith.truncf %583 : vector<32x32xf32> to vector<32x32xbf16>
    %cst_176 = arith.constant 0.000000e+00 : f32
    %586 = vector.broadcast %cst_176 : f32 to vector<32x32xf32>
    %cst_177 = arith.constant 0.000000e+00 : f32
    %587 = vector.shape_cast %5 : vector<1x32xi1> to vector<1x32xi1>
    %588 = vector.broadcast %587 : vector<1x32xi1> to vector<32x32xi1>
    %589 = vector.broadcast %cst_177 : f32 to vector<32x32xf32>
    %590 = arith.select %588, %577, %589 : vector<32x32xi1>, vector<32x32xf32>
    %591 = arith.truncf %590 : vector<32x32xf32> to vector<32x32xbf16>
    "tpu.trace_start"() <{level = 10 : i32, message = "qd,kd->qk"}> : () -> ()
    %cst_178 = arith.constant dense<0.000000e+00> : vector<32x32xf32>
    %592 = tpu.matmul %591, %584, %cst_178 {dimension_numbers = #tpu.dot_dimension_numbers<[1], [1], [0], [0], [0, 0, 1, 0], [], []>} : vector<32x32xbf16>, vector<32x32xbf16>, vector<32x32xf32> -> vector<32x32xf32>
    "tpu.trace_stop"() : () -> ()
    %593 = vector.broadcast %572 : vector<1x32xf32> to vector<32x32xf32>
    %594 = arith.mulf %592, %593 : vector<32x32xf32>
    %cst_179 = arith.constant dense<0xFF800000> : vector<32xf32>
    %595 = vector.multi_reduction <maximumf>, %594, %cst_179 [1] : vector<32x32xf32> to vector<32xf32>
    %596 = vector.shape_cast %595 : vector<32xf32> to vector<32x1xf32>
    %597 = vector.broadcast %596 : vector<32x1xf32> to vector<32x32xf32>
    %598 = arith.subf %594, %597 : vector<32x32xf32>
    %599 = math.exp %598 : vector<32x32xf32>
    %cst_180 = arith.constant dense<0.000000e+00> : vector<32xf32>
    %600 = vector.multi_reduction <add>, %599, %cst_180 [1] : vector<32x32xf32> to vector<32xf32>
    %601 = vector.shape_cast %600 : vector<32xf32> to vector<32x1xf32>
    %602 = tpu.reciprocal %601 {approx = true} : vector<32x1xf32> -> vector<32x1xf32>
    %603 = vector.broadcast %602 : vector<32x1xf32> to vector<32x32xf32>
    %604 = arith.mulf %599, %603 : vector<32x32xf32>
    %605 = arith.truncf %604 : vector<32x32xf32> to vector<32x32xbf16>
    %cst_181 = arith.constant dense<0.000000e+00> : vector<32x32xf32>
    %606 = tpu.matmul %605, %585, %cst_181 {dimension_numbers = #tpu.dot_dimension_numbers<[1], [0], [0], [1], [0, 0, 1, 1], [], []>} : vector<32x32xbf16>, vector<32x32xbf16>, vector<32x32xf32> -> vector<32x32xf32>
    %cst_182 = arith.constant 0.000000e+00 : f32
    %607 = vector.shape_cast %5 : vector<1x32xi1> to vector<1x32xi1>
    %608 = vector.broadcast %607 : vector<1x32xi1> to vector<32x32xi1>
    %609 = vector.broadcast %cst_182 : f32 to vector<32x32xf32>
    %610 = arith.select %608, %606, %609 : vector<32x32xi1>, vector<32x32xf32>
    %611 = arith.addf %586, %610 : vector<32x32xf32>
    %cst_183 = arith.constant 0.000000e+00 : f32
    %612 = vector.shape_cast %10 : vector<1x32xi1> to vector<1x32xi1>
    %613 = vector.broadcast %612 : vector<1x32xi1> to vector<32x32xi1>
    %614 = vector.broadcast %cst_183 : f32 to vector<32x32xf32>
    %615 = arith.select %613, %577, %614 : vector<32x32xi1>, vector<32x32xf32>
    %616 = arith.truncf %615 : vector<32x32xf32> to vector<32x32xbf16>
    "tpu.trace_start"() <{level = 10 : i32, message = "qd,kd->qk"}> : () -> ()
    %cst_184 = arith.constant dense<0.000000e+00> : vector<32x32xf32>
    %617 = tpu.matmul %616, %584, %cst_184 {dimension_numbers = #tpu.dot_dimension_numbers<[1], [1], [0], [0], [0, 0, 1, 0], [], []>} : vector<32x32xbf16>, vector<32x32xbf16>, vector<32x32xf32> -> vector<32x32xf32>
    "tpu.trace_stop"() : () -> ()
    %618 = vector.broadcast %572 : vector<1x32xf32> to vector<32x32xf32>
    %619 = arith.mulf %617, %618 : vector<32x32xf32>
    %cst_185 = arith.constant dense<0xFF800000> : vector<32xf32>
    %620 = vector.multi_reduction <maximumf>, %619, %cst_185 [1] : vector<32x32xf32> to vector<32xf32>
    %621 = vector.shape_cast %620 : vector<32xf32> to vector<32x1xf32>
    %622 = vector.broadcast %621 : vector<32x1xf32> to vector<32x32xf32>
    %623 = arith.subf %619, %622 : vector<32x32xf32>
    %624 = math.exp %623 : vector<32x32xf32>
    %cst_186 = arith.constant dense<0.000000e+00> : vector<32xf32>
    %625 = vector.multi_reduction <add>, %624, %cst_186 [1] : vector<32x32xf32> to vector<32xf32>
    %626 = vector.shape_cast %625 : vector<32xf32> to vector<32x1xf32>
    %627 = tpu.reciprocal %626 {approx = true} : vector<32x1xf32> -> vector<32x1xf32>
    %628 = vector.broadcast %627 : vector<32x1xf32> to vector<32x32xf32>
    %629 = arith.mulf %624, %628 : vector<32x32xf32>
    %630 = arith.truncf %629 : vector<32x32xf32> to vector<32x32xbf16>
    %cst_187 = arith.constant dense<0.000000e+00> : vector<32x32xf32>
    %631 = tpu.matmul %630, %585, %cst_187 {dimension_numbers = #tpu.dot_dimension_numbers<[1], [0], [0], [1], [0, 0, 1, 1], [], []>} : vector<32x32xbf16>, vector<32x32xbf16>, vector<32x32xf32> -> vector<32x32xf32>
    %cst_188 = arith.constant 0.000000e+00 : f32
    %632 = vector.shape_cast %10 : vector<1x32xi1> to vector<1x32xi1>
    %633 = vector.broadcast %632 : vector<1x32xi1> to vector<32x32xi1>
    %634 = vector.broadcast %cst_188 : f32 to vector<32x32xf32>
    %635 = arith.select %633, %631, %634 : vector<32x32xi1>, vector<32x32xf32>
    %636 = arith.addf %611, %635 : vector<32x32xf32>
    %cst_189 = arith.constant 0.000000e+00 : f32
    %637 = vector.shape_cast %15 : vector<1x32xi1> to vector<1x32xi1>
    %638 = vector.broadcast %637 : vector<1x32xi1> to vector<32x32xi1>
    %639 = vector.broadcast %cst_189 : f32 to vector<32x32xf32>
    %640 = arith.select %638, %577, %639 : vector<32x32xi1>, vector<32x32xf32>
    %641 = arith.truncf %640 : vector<32x32xf32> to vector<32x32xbf16>
    "tpu.trace_start"() <{level = 10 : i32, message = "qd,kd->qk"}> : () -> ()
    %cst_190 = arith.constant dense<0.000000e+00> : vector<32x32xf32>
    %642 = tpu.matmul %641, %584, %cst_190 {dimension_numbers = #tpu.dot_dimension_numbers<[1], [1], [0], [0], [0, 0, 1, 0], [], []>} : vector<32x32xbf16>, vector<32x32xbf16>, vector<32x32xf32> -> vector<32x32xf32>
    "tpu.trace_stop"() : () -> ()
    %643 = vector.broadcast %572 : vector<1x32xf32> to vector<32x32xf32>
    %644 = arith.mulf %642, %643 : vector<32x32xf32>
    %cst_191 = arith.constant dense<0xFF800000> : vector<32xf32>
    %645 = vector.multi_reduction <maximumf>, %644, %cst_191 [1] : vector<32x32xf32> to vector<32xf32>
    %646 = vector.shape_cast %645 : vector<32xf32> to vector<32x1xf32>
    %647 = vector.broadcast %646 : vector<32x1xf32> to vector<32x32xf32>
    %648 = arith.subf %644, %647 : vector<32x32xf32>
    %649 = math.exp %648 : vector<32x32xf32>
    %cst_192 = arith.constant dense<0.000000e+00> : vector<32xf32>
    %650 = vector.multi_reduction <add>, %649, %cst_192 [1] : vector<32x32xf32> to vector<32xf32>
    %651 = vector.shape_cast %650 : vector<32xf32> to vector<32x1xf32>
    %652 = tpu.reciprocal %651 {approx = true} : vector<32x1xf32> -> vector<32x1xf32>
    %653 = vector.broadcast %652 : vector<32x1xf32> to vector<32x32xf32>
    %654 = arith.mulf %649, %653 : vector<32x32xf32>
    %655 = arith.truncf %654 : vector<32x32xf32> to vector<32x32xbf16>
    %cst_193 = arith.constant dense<0.000000e+00> : vector<32x32xf32>
    %656 = tpu.matmul %655, %585, %cst_193 {dimension_numbers = #tpu.dot_dimension_numbers<[1], [0], [0], [1], [0, 0, 1, 1], [], []>} : vector<32x32xbf16>, vector<32x32xbf16>, vector<32x32xf32> -> vector<32x32xf32>
    %cst_194 = arith.constant 0.000000e+00 : f32
    %657 = vector.shape_cast %15 : vector<1x32xi1> to vector<1x32xi1>
    %658 = vector.broadcast %657 : vector<1x32xi1> to vector<32x32xi1>
    %659 = vector.broadcast %cst_194 : f32 to vector<32x32xf32>
    %660 = arith.select %658, %656, %659 : vector<32x32xi1>, vector<32x32xf32>
    %661 = arith.addf %636, %660 : vector<32x32xf32>
    %cst_195 = arith.constant 0.000000e+00 : f32
    %662 = vector.shape_cast %20 : vector<1x32xi1> to vector<1x32xi1>
    %663 = vector.broadcast %662 : vector<1x32xi1> to vector<32x32xi1>
    %664 = vector.broadcast %cst_195 : f32 to vector<32x32xf32>
    %665 = arith.select %663, %577, %664 : vector<32x32xi1>, vector<32x32xf32>
    %666 = arith.truncf %665 : vector<32x32xf32> to vector<32x32xbf16>
    "tpu.trace_start"() <{level = 10 : i32, message = "qd,kd->qk"}> : () -> ()
    %cst_196 = arith.constant dense<0.000000e+00> : vector<32x32xf32>
    %667 = tpu.matmul %666, %584, %cst_196 {dimension_numbers = #tpu.dot_dimension_numbers<[1], [1], [0], [0], [0, 0, 1, 0], [], []>} : vector<32x32xbf16>, vector<32x32xbf16>, vector<32x32xf32> -> vector<32x32xf32>
    "tpu.trace_stop"() : () -> ()
    %668 = vector.broadcast %572 : vector<1x32xf32> to vector<32x32xf32>
    %669 = arith.mulf %667, %668 : vector<32x32xf32>
    %cst_197 = arith.constant dense<0xFF800000> : vector<32xf32>
    %670 = vector.multi_reduction <maximumf>, %669, %cst_197 [1] : vector<32x32xf32> to vector<32xf32>
    %671 = vector.shape_cast %670 : vector<32xf32> to vector<32x1xf32>
    %672 = vector.broadcast %671 : vector<32x1xf32> to vector<32x32xf32>
    %673 = arith.subf %669, %672 : vector<32x32xf32>
    %674 = math.exp %673 : vector<32x32xf32>
    %cst_198 = arith.constant dense<0.000000e+00> : vector<32xf32>
    %675 = vector.multi_reduction <add>, %674, %cst_198 [1] : vector<32x32xf32> to vector<32xf32>
    %676 = vector.shape_cast %675 : vector<32xf32> to vector<32x1xf32>
    %677 = tpu.reciprocal %676 {approx = true} : vector<32x1xf32> -> vector<32x1xf32>
    %678 = vector.broadcast %677 : vector<32x1xf32> to vector<32x32xf32>
    %679 = arith.mulf %674, %678 : vector<32x32xf32>
    %680 = arith.truncf %679 : vector<32x32xf32> to vector<32x32xbf16>
    %cst_199 = arith.constant dense<0.000000e+00> : vector<32x32xf32>
    %681 = tpu.matmul %680, %585, %cst_199 {dimension_numbers = #tpu.dot_dimension_numbers<[1], [0], [0], [1], [0, 0, 1, 1], [], []>} : vector<32x32xbf16>, vector<32x32xbf16>, vector<32x32xf32> -> vector<32x32xf32>
    %cst_200 = arith.constant 0.000000e+00 : f32
    %682 = vector.shape_cast %20 : vector<1x32xi1> to vector<1x32xi1>
    %683 = vector.broadcast %682 : vector<1x32xi1> to vector<32x32xi1>
    %684 = vector.broadcast %cst_200 : f32 to vector<32x32xf32>
    %685 = arith.select %683, %681, %684 : vector<32x32xi1>, vector<32x32xf32>
    %686 = arith.addf %661, %685 : vector<32x32xf32>
    %687 = arith.truncf %686 : vector<32x32xf32> to vector<32x32xbf16>
    %cst_201 = arith.constant dense<0.000000e+00> : vector<32x32xf32>
    %688 = tpu.matmul %687, %570, %cst_201 {dimension_numbers = #tpu.dot_dimension_numbers<[1], [0], [0], [1], [0, 0, 1, 1], [], []>} : vector<32x32xbf16>, vector<32x32xbf16>, vector<32x32xf32> -> vector<32x32xf32>
    %689 = vector.broadcast %571 : vector<1x32xf32> to vector<32x32xf32>
    %690 = arith.addf %688, %689 : vector<32x32xf32>
    %691 = arith.addf %559, %690 : vector<32x32xf32>
    %692 = vector.extract_strided_slice %403 {offsets = [12, 0], sizes = [1, 32], strides = [1, 1]} : vector<17x32xf32> to vector<1x32xf32>
    %693 = vector.extract_strided_slice %403 {offsets = [15, 0], sizes = [1, 32], strides = [1, 1]} : vector<17x32xf32> to vector<1x32xf32>
    %cst_202 = arith.constant dense<0.000000e+00> : vector<32xf32>
    %694 = vector.multi_reduction <add>, %691, %cst_202 [1] : vector<32x32xf32> to vector<32xf32>
    %695 = vector.shape_cast %694 : vector<32xf32> to vector<32x1xf32>
    %cst_203 = arith.constant 3.200000e+01 : f32
    %696 = vector.broadcast %cst_203 : f32 to vector<32x1xf32>
    %697 = arith.divf %695, %696 : vector<32x1xf32>
    %698 = vector.broadcast %697 : vector<32x1xf32> to vector<32x32xf32>
    %699 = arith.subf %691, %698 : vector<32x32xf32>
    %700 = arith.mulf %699, %699 : vector<32x32xf32>
    %cst_204 = arith.constant dense<0.000000e+00> : vector<32xf32>
    %701 = vector.multi_reduction <add>, %700, %cst_204 [1] : vector<32x32xf32> to vector<32xf32>
    %702 = vector.shape_cast %701 : vector<32xf32> to vector<32x1xf32>
    %cst_205 = arith.constant 3.200000e+01 : f32
    %703 = vector.broadcast %cst_205 : f32 to vector<32x1xf32>
    %704 = arith.divf %702, %703 : vector<32x1xf32>
    %705 = vector.broadcast %697 : vector<32x1xf32> to vector<32x32xf32>
    %706 = arith.subf %691, %705 : vector<32x32xf32>
    %cst_206 = arith.constant 9.99999974E-6 : f32
    %707 = vector.broadcast %cst_206 : f32 to vector<32x1xf32>
    %708 = arith.addf %704, %707 : vector<32x1xf32>
    %709 = math.rsqrt %708 : vector<32x1xf32>
    %710 = vector.broadcast %709 : vector<32x1xf32> to vector<32x32xf32>
    %711 = arith.mulf %706, %710 : vector<32x32xf32>
    %712 = vector.broadcast %692 : vector<1x32xf32> to vector<32x32xf32>
    %713 = arith.mulf %711, %712 : vector<32x32xf32>
    %714 = vector.broadcast %693 : vector<1x32xf32> to vector<32x32xf32>
    %715 = arith.addf %713, %714 : vector<32x32xf32>
    %716 = arith.truncf %715 : vector<32x32xf32> to vector<32x32xbf16>
    %c1_207 = arith.constant 1 : index
    %c0_208 = arith.constant 0 : index
    %c0_209 = arith.constant 0 : index
    %717 = vector.load %arg7[%c1_207, %c0_208, %c0_209] : memref<2x32x64xbf16, #tpu.memory_space<vmem>>, vector<1x32x64xbf16>
    %718 = vector.shape_cast %717 : vector<1x32x64xbf16> to vector<32x64xbf16>
    %cst_210 = arith.constant dense<0.000000e+00> : vector<32x64xf32>
    %719 = tpu.matmul %716, %718, %cst_210 {dimension_numbers = #tpu.dot_dimension_numbers<[1], [0], [0], [1], [0, 0, 1, 1], [], []>} : vector<32x32xbf16>, vector<32x64xbf16>, vector<32x64xf32> -> vector<32x64xf32>
    %c1_211 = arith.constant 1 : index
    %c0_212 = arith.constant 0 : index
    %c0_213 = arith.constant 0 : index
    %720 = vector.load %arg8[%c1_211, %c0_212, %c0_213] : memref<2x1x64xf32, #tpu.memory_space<vmem>>, vector<1x1x64xf32>
    %721 = vector.shape_cast %720 : vector<1x1x64xf32> to vector<1x64xf32>
    %722 = vector.broadcast %721 : vector<1x64xf32> to vector<32x64xf32>
    %723 = arith.addf %719, %722 : vector<32x64xf32>
    %724 = arith.mulf %723, %723 : vector<32x64xf32>
    %725 = arith.mulf %723, %724 : vector<32x64xf32>
    %cst_214 = arith.constant 4.471500e-02 : f32
    %726 = vector.broadcast %cst_214 : f32 to vector<32x64xf32>
    %727 = arith.mulf %726, %725 : vector<32x64xf32>
    %728 = arith.addf %723, %727 : vector<32x64xf32>
    %cst_215 = arith.constant 0.797884583 : f32
    %729 = vector.broadcast %cst_215 : f32 to vector<32x64xf32>
    %730 = arith.mulf %729, %728 : vector<32x64xf32>
    %731 = math.tanh %730 : vector<32x64xf32>
    %cst_216 = arith.constant 1.000000e+00 : f32
    %732 = vector.broadcast %cst_216 : f32 to vector<32x64xf32>
    %733 = arith.addf %732, %731 : vector<32x64xf32>
    %cst_217 = arith.constant 5.000000e-01 : f32
    %734 = vector.broadcast %cst_217 : f32 to vector<32x64xf32>
    %735 = arith.mulf %734, %733 : vector<32x64xf32>
    %736 = arith.mulf %723, %735 : vector<32x64xf32>
    %737 = arith.truncf %736 : vector<32x64xf32> to vector<32x64xbf16>
    %c1_218 = arith.constant 1 : index
    %c0_219 = arith.constant 0 : index
    %c0_220 = arith.constant 0 : index
    %738 = vector.load %arg9[%c1_218, %c0_219, %c0_220] : memref<2x64x32xbf16, #tpu.memory_space<vmem>>, vector<1x64x32xbf16>
    %739 = vector.shape_cast %738 : vector<1x64x32xbf16> to vector<64x32xbf16>
    %cst_221 = arith.constant dense<0.000000e+00> : vector<32x32xf32>
    %740 = tpu.matmul %737, %739, %cst_221 {dimension_numbers = #tpu.dot_dimension_numbers<[1], [0], [0], [1], [0, 0, 1, 1], [], []>} : vector<32x64xbf16>, vector<64x32xbf16>, vector<32x32xf32> -> vector<32x32xf32>
    %741 = vector.extract_strided_slice %403 {offsets = [10, 0], sizes = [1, 32], strides = [1, 1]} : vector<17x32xf32> to vector<1x32xf32>
    %742 = vector.broadcast %741 : vector<1x32xf32> to vector<32x32xf32>
    %743 = arith.addf %740, %742 : vector<32x32xf32>
    %744 = arith.addf %715, %743 : vector<32x32xf32>
    %745 = vector.extract_strided_slice %403 {offsets = [13, 0], sizes = [1, 32], strides = [1, 1]} : vector<17x32xf32> to vector<1x32xf32>
    %746 = vector.extract_strided_slice %403 {offsets = [16, 0], sizes = [1, 32], strides = [1, 1]} : vector<17x32xf32> to vector<1x32xf32>
    %cst_222 = arith.constant dense<0.000000e+00> : vector<32xf32>
    %747 = vector.multi_reduction <add>, %744, %cst_222 [1] : vector<32x32xf32> to vector<32xf32>
    %748 = vector.shape_cast %747 : vector<32xf32> to vector<32x1xf32>
    %cst_223 = arith.constant 3.200000e+01 : f32
    %749 = vector.broadcast %cst_223 : f32 to vector<32x1xf32>
    %750 = arith.divf %748, %749 : vector<32x1xf32>
    %751 = vector.broadcast %750 : vector<32x1xf32> to vector<32x32xf32>
    %752 = arith.subf %744, %751 : vector<32x32xf32>
    %753 = arith.mulf %752, %752 : vector<32x32xf32>
    %cst_224 = arith.constant dense<0.000000e+00> : vector<32xf32>
    %754 = vector.multi_reduction <add>, %753, %cst_224 [1] : vector<32x32xf32> to vector<32xf32>
    %755 = vector.shape_cast %754 : vector<32xf32> to vector<32x1xf32>
    %cst_225 = arith.constant 3.200000e+01 : f32
    %756 = vector.broadcast %cst_225 : f32 to vector<32x1xf32>
    %757 = arith.divf %755, %756 : vector<32x1xf32>
    %758 = vector.broadcast %750 : vector<32x1xf32> to vector<32x32xf32>
    %759 = arith.subf %744, %758 : vector<32x32xf32>
    %cst_226 = arith.constant 9.99999974E-6 : f32
    %760 = vector.broadcast %cst_226 : f32 to vector<32x1xf32>
    %761 = arith.addf %757, %760 : vector<32x1xf32>
    %762 = math.rsqrt %761 : vector<32x1xf32>
    %763 = vector.broadcast %762 : vector<32x1xf32> to vector<32x32xf32>
    %764 = arith.mulf %759, %763 : vector<32x32xf32>
    %765 = vector.broadcast %745 : vector<1x32xf32> to vector<32x32xf32>
    %766 = arith.mulf %764, %765 : vector<32x32xf32>
    %767 = vector.broadcast %746 : vector<1x32xf32> to vector<32x32xf32>
    %768 = arith.addf %766, %767 : vector<32x32xf32>
    %cst_227 = arith.constant dense<0.000000e+00> : vector<32xf32>
    %769 = vector.multi_reduction <add>, %768, %cst_227 [0] : vector<32x32xf32> to vector<32xf32>
    %770 = vector.shape_cast %769 : vector<32xf32> to vector<1x32xf32>
    %cst_228 = arith.constant 3.200000e+01 : f32
    %771 = vector.broadcast %cst_228 : f32 to vector<1x32xf32>
    %772 = arith.divf %770, %771 : vector<1x32xf32>
    %773 = arith.truncf %772 : vector<1x32xf32> to vector<1x32xbf16>
    %c0_229 = arith.constant 0 : index
    %c0_230 = arith.constant 0 : index
    %774 = vector.load %arg10[%c0_229, %c0_230] : memref<32x768xbf16, #tpu.memory_space<vmem>>, vector<32x768xbf16>
    %cst_231 = arith.constant dense<0.000000e+00> : vector<1x768xf32>
    %775 = tpu.matmul %773, %774, %cst_231 {dimension_numbers = #tpu.dot_dimension_numbers<[1], [0], [0], [1], [0, 0, 1, 1], [], []>} : vector<1x32xbf16>, vector<32x768xbf16>, vector<1x768xf32> -> vector<1x768xf32>
    %c0_232 = arith.constant 0 : index
    %c0_233 = arith.constant 0 : index
    %776 = vector.load %arg11[%c0_232, %c0_233] : memref<1x768xf32, #tpu.memory_space<vmem>>, vector<1x768xf32>
    %777 = arith.addf %775, %776 : vector<1x768xf32>
    %778 = arith.mulf %777, %777 : vector<1x768xf32>
    %779 = arith.mulf %777, %778 : vector<1x768xf32>
    %cst_234 = arith.constant 4.471500e-02 : f32
    %780 = vector.broadcast %cst_234 : f32 to vector<1x768xf32>
    %781 = arith.mulf %780, %779 : vector<1x768xf32>
    %782 = arith.addf %777, %781 : vector<1x768xf32>
    %cst_235 = arith.constant 0.797884583 : f32
    %783 = vector.broadcast %cst_235 : f32 to vector<1x768xf32>
    %784 = arith.mulf %783, %782 : vector<1x768xf32>
    %785 = math.tanh %784 : vector<1x768xf32>
    %cst_236 = arith.constant 1.000000e+00 : f32
    %786 = vector.broadcast %cst_236 : f32 to vector<1x768xf32>
    %787 = arith.addf %786, %785 : vector<1x768xf32>
    %cst_237 = arith.constant 5.000000e-01 : f32
    %788 = vector.broadcast %cst_237 : f32 to vector<1x768xf32>
    %789 = arith.mulf %788, %787 : vector<1x768xf32>
    %790 = arith.mulf %777, %789 : vector<1x768xf32>
    %791 = arith.truncf %790 : vector<1x768xf32> to vector<1x768xbf16>
    %c0_238 = arith.constant 0 : index
    %c0_239 = arith.constant 0 : index
    %792 = vector.load %arg12[%c0_238, %c0_239] : memref<768x128xbf16, #tpu.memory_space<vmem>>, vector<768x128xbf16>
    %cst_240 = arith.constant dense<0.000000e+00> : vector<1x128xf32>
    %793 = tpu.matmul %791, %792, %cst_240 {dimension_numbers = #tpu.dot_dimension_numbers<[1], [0], [0], [1], [0, 0, 1, 1], [], []>} : vector<1x768xbf16>, vector<768x128xbf16>, vector<1x128xf32> -> vector<1x128xf32>
    %c0_241 = arith.constant 0 : index
    %c0_242 = arith.constant 0 : index
    %794 = vector.load %arg13[%c0_241, %c0_242] : memref<1x128xf32, #tpu.memory_space<vmem>>, vector<1x128xf32>
    %795 = arith.addf %793, %794 : vector<1x128xf32>
    %796 = tpu.iota {dimensions = array<i32: 1>} : vector<1x128xi32>
    %797 = math.exp %795 : vector<1x128xf32>
    %cst_243 = arith.constant 0.000000e+00 : f32
    %798 = vector.broadcast %cst_243 : f32 to vector<1x128xf32>
    %799 = arith.maximumf %795, %798 : vector<1x128xf32>
    %800 = arith.negf %795 : vector<1x128xf32>
    %801 = math.exp %800 : vector<1x128xf32>
    %cst_244 = arith.constant 1.000000e+00 : f32
    %802 = vector.broadcast %cst_244 : f32 to vector<1x128xf32>
    %803 = arith.addf %802, %801 : vector<1x128xf32>
    %804 = arith.divf %802, %803 : vector<1x128xf32>
    %805 = arith.negf %804 : vector<1x128xf32>
    %806 = math.exp %805 : vector<1x128xf32>
    %cst_245 = arith.constant 1.000000e+00 : f32
    %807 = vector.broadcast %cst_245 : f32 to vector<1x128xf32>
    %808 = arith.addf %807, %806 : vector<1x128xf32>
    %809 = arith.divf %807, %808 : vector<1x128xf32>
    %c0_i32_246 = arith.constant 0 : i32
    %810 = vector.broadcast %c0_i32_246 : i32 to vector<1x128xi32>
    %811 = arith.cmpi eq, %796, %810 : vector<1x128xi32>
    %c3_i32 = arith.constant 3 : i32
    %812 = vector.broadcast %c3_i32 : i32 to vector<1x128xi32>
    %813 = arith.cmpi eq, %796, %812 : vector<1x128xi32>
    %814 = arith.ori %811, %813 : vector<1x128xi1>
    %c1_i32 = arith.constant 1 : i32
    %815 = vector.broadcast %c1_i32 : i32 to vector<1x128xi32>
    %816 = arith.cmpi eq, %796, %815 : vector<1x128xi32>
    %cst_247 = arith.constant 1.000000e+00 : f32
    %817 = vector.broadcast %cst_247 : f32 to vector<1x128xf32>
    %818 = arith.addf %799, %817 : vector<1x128xf32>
    %c2_i32 = arith.constant 2 : i32
    %819 = vector.broadcast %c2_i32 : i32 to vector<1x128xi32>
    %820 = arith.cmpi eq, %796, %819 : vector<1x128xi32>
    %c4_i32 = arith.constant 4 : i32
    %821 = vector.broadcast %c4_i32 : i32 to vector<1x128xi32>
    %822 = arith.cmpi eq, %796, %821 : vector<1x128xi32>
    %c5_i32 = arith.constant 5 : i32
    %823 = vector.broadcast %c5_i32 : i32 to vector<1x128xi32>
    %824 = arith.cmpi eq, %796, %823 : vector<1x128xi32>
    %825 = arith.select %824, %809, %799 : vector<1x128xi1>, vector<1x128xf32>
    %826 = arith.select %822, %795, %825 : vector<1x128xi1>, vector<1x128xf32>
    %827 = arith.select %820, %804, %826 : vector<1x128xi1>, vector<1x128xf32>
    %828 = arith.select %816, %818, %827 : vector<1x128xi1>, vector<1x128xf32>
    %829 = arith.select %814, %797, %828 : vector<1x128xi1>, vector<1x128xf32>
    %830 = vector.shape_cast %829 : vector<1x128xf32> to vector<1x128xf32>
    %831 = vector.broadcast %830 : vector<1x128xf32> to vector<8x128xf32>
    %c0_248 = arith.constant 0 : index
    %c0_249 = arith.constant 0 : index
    %c0_250 = arith.constant 0 : index
    %832 = vector.load %arg14[%c0_248, %c0_249, %c0_250] : memref<1x8x128xf32, #tpu.memory_space<vmem>>, vector<1x8x128xf32>
    %833 = vector.shape_cast %832 : vector<1x8x128xf32> to vector<8x128xf32>
    %834 = vector.shape_cast %831 : vector<8x128xf32> to vector<1x8x128xf32>
    tpu.vector_store %arg14[%c0_248, %c0_249, %c0_250], %834 {strides = array<i32>} : memref<1x8x128xf32, #tpu.memory_space<vmem>>, vector<1x8x128xf32>,
    return
  }
  func.func @transform_0(%arg0: i32) -> (i32, i32, i32) {
    %c0_i32 = arith.constant 0 : i32
    %c0_i32_0 = arith.constant 0 : i32
    %c0_i32_1 = arith.constant 0 : i32
    return %arg0, %c0_i32, %c0_i32_0 : i32, i32, i32
  }
  func.func @transform_1(%arg0: i32) -> (i32, i32, i32) {
    %c0_i32 = arith.constant 0 : i32
    %c0_i32_0 = arith.constant 0 : i32
    %c0_i32_1 = arith.constant 0 : i32
    return %arg0, %c0_i32, %c0_i32_0 : i32, i32, i32
  }
  func.func @transform_2(%arg0: i32) -> (i32, i32) {
    %c0_i32 = arith.constant 0 : i32
    %c0_i32_0 = arith.constant 0 : i32
    %c0_i32_1 = arith.constant 0 : i32
    return %c0_i32, %c0_i32_0 : i32, i32
  }
  func.func @transform_3(%arg0: i32) -> (i32, i32) {
    %c0_i32 = arith.constant 0 : i32
    %c0_i32_0 = arith.constant 0 : i32
    %c0_i32_1 = arith.constant 0 : i32
    return %c0_i32, %c0_i32_0 : i32, i32
  }
  func.func @transform_4(%arg0: i32) -> (i32, i32, i32) {
    %c0_i32 = arith.constant 0 : i32
    %c0_i32_0 = arith.constant 0 : i32
    %c0_i32_1 = arith.constant 0 : i32
    %c0_i32_2 = arith.constant 0 : i32
    return %c0_i32, %c0_i32_0, %c0_i32_1 : i32, i32, i32
  }
  func.func @transform_5(%arg0: i32) -> (i32, i32, i32) {
    %c0_i32 = arith.constant 0 : i32
    %c0_i32_0 = arith.constant 0 : i32
    %c0_i32_1 = arith.constant 0 : i32
    %c0_i32_2 = arith.constant 0 : i32
    return %c0_i32, %c0_i32_0, %c0_i32_1 : i32, i32, i32
  }
  func.func @transform_6(%arg0: i32) -> (i32, i32, i32) {
    %c0_i32 = arith.constant 0 : i32
    %c0_i32_0 = arith.constant 0 : i32
    %c0_i32_1 = arith.constant 0 : i32
    %c0_i32_2 = arith.constant 0 : i32
    return %c0_i32, %c0_i32_0, %c0_i32_1 : i32, i32, i32
  }
  func.func @transform_7(%arg0: i32) -> (i32, i32, i32) {
    %c0_i32 = arith.constant 0 : i32
    %c0_i32_0 = arith.constant 0 : i32
    %c0_i32_1 = arith.constant 0 : i32
    %c0_i32_2 = arith.constant 0 : i32
    return %c0_i32, %c0_i32_0, %c0_i32_1 : i32, i32, i32
  }
  func.func @transform_8(%arg0: i32) -> (i32, i32, i32) {
    %c0_i32 = arith.constant 0 : i32
    %c0_i32_0 = arith.constant 0 : i32
    %c0_i32_1 = arith.constant 0 : i32
    %c0_i32_2 = arith.constant 0 : i32
    return %c0_i32, %c0_i32_0, %c0_i32_1 : i32, i32, i32
  }
  func.func @transform_9(%arg0: i32) -> (i32, i32) {
    %c0_i32 = arith.constant 0 : i32
    %c0_i32_0 = arith.constant 0 : i32
    %c0_i32_1 = arith.constant 0 : i32
    return %c0_i32, %c0_i32_0 : i32, i32
  }
  func.func @transform_10(%arg0: i32) -> (i32, i32) {
    %c0_i32 = arith.constant 0 : i32
    %c0_i32_0 = arith.constant 0 : i32
    %c0_i32_1 = arith.constant 0 : i32
    return %c0_i32, %c0_i32_0 : i32, i32
  }
  func.func @transform_11(%arg0: i32) -> (i32, i32) {
    %c0_i32 = arith.constant 0 : i32
    %c0_i32_0 = arith.constant 0 : i32
    %c0_i32_1 = arith.constant 0 : i32
    return %c0_i32, %c0_i32_0 : i32, i32
  }
  func.func @transform_12(%arg0: i32) -> (i32, i32) {
    %c0_i32 = arith.constant 0 : i32
    %c0_i32_0 = arith.constant 0 : i32
    %c0_i32_1 = arith.constant 0 : i32
    return %c0_i32, %c0_i32_0 : i32, i32
  }
  func.func @transform_13(%arg0: i32) -> (i32, i32, i32) {
    %c0_i32 = arith.constant 0 : i32
    %c0_i32_0 = arith.constant 0 : i32
    %c0_i32_1 = arith.constant 0 : i32
    return %arg0, %c0_i32, %c0_i32_0 : i32, i32, i32
  }
}

</mosaic_0001>

<bundles_post_ra>
// kernel: polymer_decoder_forward.1
= control target key start
LH: loop header
LB: loop body
LE: loop exit
PB: predicated region body
PF: predicated region fallthrough
CT: control target
= control target key end

     0   :  { %s10343_s0 = inlined_call_operand.vmem [shape: s32[2,32,1], index: 0, kind: input, shape index: {}]   ;;  %s10344_s1 = inlined_call_operand.hbm [shape: f32[2,32,32], index: 1, kind: input, shape index: {}]   ;;  %s10345_s2 = inlined_call_operand.vmem [shape: bf16[50,32], index: 2, kind: input, shape index: {}]   ;;  %s10346_s3 = inlined_call_operand.vmem [shape: f32[32,32], index: 3, kind: input, shape index: {}]   ;;  %s10347_s4 = inlined_call_operand.vmem [shape: bf16[16,32,32], index: 4, kind: input, shape index: {}]   ;;  %s10348_s5 = inlined_call_operand.vmem [shape: f32[2,17,32], index: 5, kind: input, shape index: {}]   ;;  %s10349_s6 = inlined_call_operand.hbm [shape: bf16[2,32,64], index: 6, kind: input, shape index: {}]   ;;  %s10350_s7 = inlined_call_operand.hbm [shape: f32[2,1,64], index: 7, kind: input, shape index: {}]   ;;  %s10351_s8 = inlined_call_operand.vmem [shape: bf16[2,64,32], index: 8, kind: input, shape index: {}]   ;;  %s10352_s9 = inlined_call_operand.hbm [shape: bf16[32,768], index: 9, kind: input, shape index: {}]   ;;  %s10353_s10 = inlined_call_operand.hbm [shape: f32[1,768], index: 10, kind: input, shape index: {}]   ;;  %s10354_s11 = inlined_call_operand.hbm [shape: bf16[768,128], index: 11, kind: input, shape index: {}]   ;;  %s10355_s12 = inlined_call_operand.hbm [shape: f32[1,128], index: 12, kind: input, shape index: {}]   ;;  %s10356_s13 = inlined_call_operand.vmem [shape: f32[2,8,128], index: 13, kind: output, shape index: {}]  }
   0x1   :  { %10364 = sst [smem:[#allocation17_spill]] %s10346_s3 }
   0x2   :  { %10365 = sst [smem:[#allocation18_spill]] %s10347_s4 }
   0x3   :  { %10366 = sst [smem:[#allocation19_spill]] %s10348_s5 }
   0x4   :  { %10367 = sst [smem:[#allocation20_spill]] %s10351_s8 }
   0x5   :  { %10368 = sst [smem:[#allocation21_spill]] %s10356_s13 }
   0x6   :  { %18 = vsyncpa [#allocation3], 0 }
   0x7   :  { %20 = vsyncpa [#allocation3 + $0x1], 0 }
   0x8   :  { %21 = vsyncpa [#allocation5], 0 }
   0x9   :  { %22 = vsyncpa [#allocation8], 0 }
   0xa   :  { %23 = vsyncpa [#allocation11], 0  ;;  %s8565_s25 = smov 0   ;;  %s8567_s26 = smov 0  }
   0xb   :  { %s8569_s27 = smov 0   ;;  %s8571_s28 = smov 0  }
   0xc LB: > { %s8478_s29 = smov [#allocation4]   ;;  %s8586_s14 = sadd.s32 4294967295, %s8476_s28   ;;  %s8476_s28 = sphi %s8571_s28, %s10398_s28   ;;  %s8472_s27 = sphi %s8569_s27, %s10397_s27   ;;  %s8468_s26 = sphi %s8567_s26, %s10396_s26   ;;  %s8464_s25 = sphi %s8565_s25, %s10395_s25  }
   0xd   : > { %s367_s30 = sshll.u32 %s8478_s29, 4  ;;  %p6583_p0 = scmp.ge.s32.totalorder %s8476_s28, 1  ;;  %s8591_s30 = int_to_ptr.vmem [resolvable:$true] %s367_s30 }
   0xe   : > { %p10362_p1 = scmp.eq.s32.totalorder %s8586_s14, 0  ;;  %p343_p2 = scmp.lt.s32.totalorder %s8476_s28, 3 }
   0xf   : > { %s8479_s16 = smov [#allocation7]   ;;  %s8480_s19 = smov [#allocation10]  }
  0x10   : > { %p8593_p3 = pnand %p6583_p0, %p343_p2  ;;  %s396_s17 = sshll.u32 %s8479_s16, 4  ;;  %s8605_s17 = int_to_ptr.vmem [resolvable:$true] %s396_s17 }
  0x11   : > { %s8607_s20 = sshll.u32 %s8480_s19, 4  ;;  %s8232_s23 = scalar_lea.hbm %s10349_s6, 512  ;;  %s421_s20 = int_to_ptr.vmem [resolvable:$true] %s8607_s20 }
  0x12   : > { %s10369_s15 = scalar_select %p8593_p3, 1, 0 }
  0x13   : > { %p7686_p4 = pneg %p8593_p3  ;;  %p8233_p6 = scmp.ne.s32.totalorder %s10349_s6, %s8232_s23 }
  0x14   : > { %p8239_p10 = scmp.lt.u32.totalorder %s8232_s23, %s10349_s6 }
  0x15   : > { %p8601_p5 = pnand %p7686_p4, %p10362_p1 }
  0x17   : > { %p8617_p7 = pneg %p8601_p5 }
  0x19   : > { %p8235_p8 = pnand %p8617_p7, %p8233_p6 }
  0x1b   : > { %p8236_p9 = pneg %p8235_p8 }
  0x1d   : > { %p8241_p11 = pnand %p8239_p10, %p8236_p9 }
  0x1f   : > { %8244 = shalt.err (!%p8241_p11)
}
  0x20   : > { %s8245_s21 = scalar_lea.vmem %s8591_s30, 512  ;;  %p8253_p2 = scmp.lt.s32.totalorder %s8591_s30, %s8591_s30 }
  0x21   : > { %p8246_p12 = scmp.ne.s32.totalorder %s8591_s30, %s8245_s21  ;;  %p8254_p4 = scmp.lt.s32.totalorder %s8245_s21, %s8245_s21 }
  0x23   : > { %p8248_p13 = pnand %p8246_p12, %p8617_p7  ;;  %p8255_p6 = por %p8254_p4, %p8253_p2 }
  0x25   : > { %p8249_p0 = pneg %p8248_p13 }
  0x27   : > { %p8256_p8 = pnand %p8255_p6, %p8249_p0 }
  0x29   : > { %8259 = shalt.err (!%p8256_p8)
}
  0x2a   : > { %s10361_s22 = smov 64   ;;  %s8482_s13 = smov 4  }
  0x2b   : > { %7689 = dma.hbm_to_vmem [thread:$0]  (!%p8601_p5), %s10349_s6, 512, %s8591_s30, [#allocation5], %s10361_s22, %s10361_s22, %s8482_s13  }
  0x2c   : > { %s8260_s21 = scalar_lea.hbm %s10352_s9, 1536 }
  0x2d   : > { %p8261_p9 = scmp.ne.s32.totalorder %s10352_s9, %s8260_s21  ;;  %p8267_p12 = scmp.lt.u32.totalorder %s8260_s21, %s10352_s9 }
  0x2f   : > { %p8263_p10 = pnand %p8261_p9, %p8617_p7 }
  0x31   : > { %p8264_p11 = pneg %p8263_p10 }
  0x33   : > { %p8269_p13 = pnand %p8267_p12, %p8264_p11 }
  0x35   : > { %8272 = shalt.err (!%p8269_p13)
}
  0x36   : > { %s8273_s30 = scalar_lea.vmem %s8605_s17, 1536  ;;  %p8281_p6 = scmp.lt.s32.totalorder %s8605_s17, %s8605_s17 }
  0x37   : > { %p8274_p0 = scmp.ne.s32.totalorder %s8605_s17, %s8273_s30  ;;  %p8282_p8 = scmp.lt.s32.totalorder %s8273_s30, %s8273_s30 }
  0x39   : > { %p8276_p2 = pnand %p8274_p0, %p8617_p7  ;;  %p8283_p9 = por %p8282_p8, %p8281_p6 }
  0x3b   : > { %p8277_p4 = pneg %p8276_p2 }
  0x3d   : > { %p8284_p10 = pnand %p8283_p9, %p8277_p4 }
  0x3f   : > { %8287 = shalt.err (!%p8284_p10)
}
  0x40   : > { %s8483_s5 = smov 384   ;;  %s8484_s3 = smov 24  }
  0x41   : > { %7695 = dma.hbm_to_vmem [thread:$0]  (!%p8601_p5), %s10352_s9, 1536, %s8605_s17, [#allocation8], %s8483_s5, %s8483_s5, %s8484_s3  }
  0x42   : > { %s8288_s29 = scalar_lea.hbm %s10354_s11, 6144 }
  0x43   : > { %p8289_p11 = scmp.ne.s32.totalorder %s10354_s11, %s8288_s29  ;;  %p8295_p0 = scmp.lt.u32.totalorder %s8288_s29, %s10354_s11 }
  0x45   : > { %p8291_p12 = pnand %p8289_p11, %p8617_p7 }
  0x47   : > { %p8292_p13 = pneg %p8291_p12 }
  0x49   : > { %p8297_p2 = pnand %p8295_p0, %p8292_p13 }
  0x4b   : > { %8300 = shalt.err (!%p8297_p2)
}
  0x4c   : > { %s8301_s4 = scalar_lea.vmem %s421_s20, 6144  ;;  %p8309_p9 = scmp.lt.s32.totalorder %s421_s20, %s421_s20 }
  0x4d   : > { %p8302_p4 = scmp.ne.s32.totalorder %s421_s20, %s8301_s4  ;;  %p8310_p10 = scmp.lt.s32.totalorder %s8301_s4, %s8301_s4 }
  0x4f   : > { %p8304_p6 = pnand %p8302_p4, %p8617_p7  ;;  %p8311_p1 = por %p8310_p10, %p8309_p9 }
  0x51   : > { %p8305_p8 = pneg %p8304_p6 }
  0x53   : > { %p8312_p3 = pnand %p8311_p1, %p8305_p8 }
  0x55   : > { %8315 = shalt.err (!%p8312_p3)
}
  0x56   : > { %s10372_s17 = smov 64   ;;  %s8485_s3 = smov [#allocation6]  }
  0x57   : > { %7701 = dma.hbm_to_vmem [thread:$0]  (!%p8601_p5), %s10354_s11, 6144, %s421_s20, [#allocation11], %s10372_s17, %s10372_s17, %s8482_s13  }
  0x58   : > { %s380_s8 = sshll.u32 %s8485_s3, 4  ;;  %s8316_s29 = scalar_lea.hbm %s10350_s7, 32  ;;  %s381_s8 = int_to_ptr.vmem [resolvable:$true] %s380_s8 }
  0x59   : > { %p8317_p1 = scmp.ne.s32.totalorder %s10350_s7, %s8316_s29  ;;  %p8323_p12 = scmp.lt.u32.totalorder %s8316_s29, %s10350_s7 }
  0x5b   : > { %p8319_p3 = pnand %p8317_p1, %p8617_p7 }
  0x5d   : > { %p8320_p11 = pneg %p8319_p3 }
  0x5f   : > { %p8325_p13 = pnand %p8323_p12, %p8320_p11 }
  0x61   : > { %8328 = shalt.err (!%p8325_p13)
}
  0x62   : > { %s8329_s20 = scalar_lea.vmem %s381_s8, 32  ;;  %p8337_p6 = scmp.lt.s32.totalorder %s381_s8, %s381_s8 }
  0x63   : > { %p8330_p0 = scmp.ne.s32.totalorder %s381_s8, %s8329_s20  ;;  %p8338_p8 = scmp.lt.s32.totalorder %s8329_s20, %s8329_s20 }
  0x65   : > { %p8332_p2 = pnand %p8330_p0, %p8617_p7  ;;  %p8339_p9 = por %p8338_p8, %p8337_p6 }
  0x67   : > { %p8333_p4 = pneg %p8332_p2 }
  0x69   : > { %p8340_p10 = pnand %p8339_p9, %p8333_p4 }
  0x6b   : > { %8343 = shalt.err (!%p8340_p10)
}
  0x6c   : > { %s8486_s13 = smov 16   ;;  %s8487_s17 = smov 1  }
  0x6d   : > { %7692 = dma.hbm_to_vmem [thread:$0]  (!%p8601_p5), %s10350_s7, 32, %s381_s8, [#allocation5], %s8486_s13, %s8486_s13, %s8487_s17  }
  0x6e   : > { %s8488_s3 = smov [#allocation9]   ;;  %s8489_s24 = smov [#allocation12]  }
  0x6f   : > { %s410_s23 = sshll.u32 %s8488_s3, 4  ;;  %s434_s29 = sshll.u32 %s8489_s24, 4  ;;  %s411_s23 = int_to_ptr.vmem [resolvable:$true] %s410_s23  ;;  %s8704_s29 = int_to_ptr.vmem [resolvable:$true] %s434_s29 }
  0x70   : > { %s8344_s30 = scalar_lea.hbm %s10353_s10, 96 }
  0x71   : > { %p8345_p1 = scmp.ne.s32.totalorder %s10353_s10, %s8344_s30  ;;  %p8351_p12 = scmp.lt.u32.totalorder %s8344_s30, %s10353_s10 }
  0x73   : > { %p8347_p3 = pnand %p8345_p1, %p8617_p7 }
  0x75   : > { %p8348_p11 = pneg %p8347_p3 }
  0x77   : > { %p8353_p13 = pnand %p8351_p12, %p8348_p11 }
  0x79   : > { %8356 = shalt.err (!%p8353_p13)
}
  0x7a   : > { %s8357_s13 = scalar_lea.vmem %s411_s23, 96  ;;  %p8365_p6 = scmp.lt.s32.totalorder %s411_s23, %s411_s23 }
  0x7b   : > { %p8358_p0 = scmp.ne.s32.totalorder %s411_s23, %s8357_s13  ;;  %p8366_p8 = scmp.lt.s32.totalorder %s8357_s13, %s8357_s13 }
  0x7d   : > { %p8360_p2 = pnand %p8358_p0, %p8617_p7  ;;  %p8367_p9 = por %p8366_p8, %p8365_p6 }
  0x7f   : > { %p8361_p4 = pneg %p8360_p2 }
  0x81   : > { %p8368_p10 = pnand %p8367_p9, %p8361_p4 }
  0x83   : > { %8371 = shalt.err (!%p8368_p10)
}
  0x84   : > { %7698 = dma.hbm_to_vmem [thread:$0]  (!%p8601_p5), %s10353_s10, 96, %s411_s23, [#allocation8]  }
  0x85   : > { %s8372_s19 = scalar_lea.hbm %s10355_s12, 16 }
  0x86   : > { %p8373_p1 = scmp.ne.s32.totalorder %s10355_s12, %s8372_s19  ;;  %p8379_p12 = scmp.lt.u32.totalorder %s8372_s19, %s10355_s12 }
  0x88   : > { %p8375_p3 = pnand %p8373_p1, %p8617_p7 }
  0x8a   : > { %p8376_p11 = pneg %p8375_p3 }
  0x8c   : > { %p8381_p13 = pnand %p8379_p12, %p8376_p11 }
  0x8e   : > { %8384 = shalt.err (!%p8381_p13)
}
  0x8f   : > { %s8385_s23 = scalar_lea.vmem %s8704_s29, 16  ;;  %s8392_s22 = scalar_lea.vmem %s8704_s29, 32 }
  0x90   : > { %p8386_p0 = scmp.ne.s32.totalorder %s8704_s29, %s8385_s23  ;;  %p8393_p6 = scmp.lt.s32.totalorder %s8704_s29, %s8704_s29 }
  0x91   : > { %p8394_p8 = scmp.lt.s32.totalorder %s8392_s22, %s8385_s23 }
  0x92   : > { %p8388_p2 = pnand %p8386_p0, %p8617_p7 }
  0x93   : > { %p8395_p9 = por %p8394_p8, %p8393_p6 }
  0x94   : > { %p8389_p4 = pneg %p8388_p2 }
  0x96   : > { %p8396_p10 = pnand %p8395_p9, %p8389_p4 }
  0x98   : > { %8399 = shalt.err (!%p8396_p10)
}
  0x99   : > { %7704 = dma.hbm_to_vmem [thread:$0]  (!%p8601_p5), %s10355_s12, 16, %s8704_s29, [#allocation11]  }
  0x9a   : > { %s8749_s16 = sadd.s32 1, %s8476_s28   ;;  %s62_s18 = sadd.s32 1, %s8472_s27 }
  0x9b   : > { %s59_s17 = ssub.s32 %s8476_s28, %s8749_s16  ;;  %p69_p7 = scmp.ne.s32.totalorder %s8472_s27, %s8468_s26 }
  0x9c   : > { %p60_p1 = scmp.eq.s32.totalorder %s59_s17, 0  ;;  %p70_p3 = scmp.eq.s32.totalorder %s8476_s28, 0 }
  0x9d   : > { %p75_p11 = scmp.ne.s32.totalorder %s8468_s26, %s8464_s25  ;;  %p7715_p12 = scmp.lt.s32.totalorder %s8476_s28, 2 }
  0x9e   : > { %s8761_s5 = scalar_select %p60_p1, %s8472_s27, %s62_s18  }
  0x9f   : > { %p71_p13 = por %p70_p3, %p69_p7  ;;  %p10373_p0 = scmp.eq.s32.totalorder %s8586_s14, 0 }
  0xa0   : > { %s453_s24 = sand.u32 1, %s8472_s27   ;;  %s6905_s29 = sshll.u32 %s8476_s28, 9 }
  0xa1   : > { %p8765_p2 = por %p10373_p0, %p75_p11  ;;  %s6591_s19 = sshll.u32 %s453_s24, 5 }
  0xa2   : > { %s8774_s4 = scalar_lea.hbm %s10344_s1, %s6905_s29  ;;  %s457_s25 = scalar_lea.vmem [#allocation2], %s6591_s19 }
  0xa3   : > { %s464_s20 = sshll.u32 %s457_s25, 4  ;;  %p8776_p5 = pnand %p7715_p12, %p71_p13  ;;  %s8780_s20 = int_to_ptr.vmem [resolvable:$true] %s464_s20 }
  0xa4   : > { %s8782_s28 = scalar_lea.sflag [#allocation3], %s453_s24  ;;  %s8400_s22 = scalar_lea.hbm %s8774_s4, 512 }
  0xa5   : > { %p8401_p4 = scmp.ne.s32.totalorder %s8774_s4, %s8400_s22  ;;  %p8402_p6 = pneg %p8776_p5 }
  0xa6   : > { %s8405_s18 = scalar_lea.hbm %s10344_s1, 1024  ;;  %p8406_p10 = scmp.lt.u32.totalorder %s8774_s4, %s10344_s1 }
  0xa7   : > { %p8403_p8 = pnand %p8402_p6, %p8401_p4  ;;  %p8407_p7 = scmp.lt.u32.totalorder %s8405_s18, %s8400_s22 }
  0xa8   : > { %p8409_p3 = scmp.lt.u32.totalorder %s8400_s22, %s8774_s4 }
  0xa9   : > { %p8404_p9 = pneg %p8403_p8  ;;  %p8408_p1 = por %p8407_p7, %p8406_p10 }
  0xab   : > { %p8410_p11 = por %p8409_p3, %p8408_p1 }
  0xad   : > { %p8411_p12 = pnand %p8410_p11, %p8404_p9 }
  0xaf   : > { %8414 = shalt.err (!%p8411_p12)
}
  0xb0   : > { %s8415_s24 = scalar_lea.vmem %s8780_s20, 512  ;;  %s8490_s19 = smov [#allocation2]  }
  0xb1   : > { %p8416_p13 = scmp.ne.s32.totalorder %s8780_s20, %s8415_s24  ;;  %s8420_s21 = sshll.u32 %s8490_s19, 4  ;;  %s8421_s21 = int_to_ptr.vmem [resolvable:$false] %s8420_s21 }
  0xb2   : > { %s8422_s30 = scalar_lea.vmem %s8421_s21, 1024  ;;  %p8423_p8 = scmp.lt.s32.totalorder %s8780_s20, %s8421_s21 }
  0xb3   : > { %p8418_p0 = pnand %p8416_p13, %p8402_p6  ;;  %p8424_p10 = scmp.lt.s32.totalorder %s8422_s30, %s8415_s24 }
  0xb5   : > { %p8419_p4 = pneg %p8418_p0  ;;  %p8425_p7 = por %p8424_p10, %p8423_p8 }
  0xb7   : > { %p8426_p1 = pnand %p8425_p7, %p8419_p4 }
  0xb9   : > { %8429 = shalt.err (!%p8426_p1)
}
  0xba   : > { %s8491_s25 = smov 128   ;;  %s8492_s22 = smov 8  }
  0xbb   : > { %7708 = dma.hbm_to_vmem [thread:$0]  (!%p8776_p5), %s8774_s4, 512, %s8780_s20, %s8782_s28, %s8491_s25, %s8491_s25, %s8492_s22  }
  0xbc   : > { %p10376_p6 = scmp.ne.s32.totalorder %s10369_s15, 0 }
  0xbd   : > { %s478_s8 = sand.u32 (!%p10376_p6), 1, %s8468_s26  }
  0xbe   : > { %476 = sbr.rel (%p10376_p6) target bundleno = 15459 (0x3c63), region = 72  ;;  %s6595_s13 = sshll.u32 (!%p10376_p6), %s478_s8, 5 }
  0xbf   : > { %s479_s18 = scalar_lea.sflag (!%p10376_p6), [#allocation3], %s478_s8  ;;  %s8813_s17 = scalar_lea.vmem (!%p10376_p6), [#allocation2], %s6595_s13 }
  0xc5   : > { %8447 = dma.done.wait (%p8765_p2), %s479_s18, 512  }
  0xc6   : > { %8449 = vsyncadd (%p8765_p2), %s479_s18, 4294966784  ;;  %p10377_p9 = scmp.eq.s32.totalorder %s8586_s14, 0 }
  0xc8   : > { %8451 = dma.done.wait (%p10377_p9), [#allocation5], 544   ;;  %p10378_p5 = pmov %p10377_p9 }
  0xca   : > { %8453 = vsyncadd (%p10378_p5), [#allocation5], 4294966752  ;;  %p10379_p3 = pmov %p10378_p5 }
  0xcc   : > { %8455 = dma.done.wait (%p10379_p3), [#allocation8], 1632   ;;  %p10380_p11 = pmov %p10379_p3 }
  0xcd   : > { %p10381_p12 = pmov %p10379_p3 }
  0xce   : > { %8457 = vsyncadd (%p10380_p11), [#allocation8], 4294965664 }
  0xcf   : > { %8459 = dma.done.wait (%p10381_p12), [#allocation11], 6160   ;;  %p10382_p13 = pmov %p10379_p3 }
  0xd0   : > { %p553_p2 = scmp.lt.s32.totalorder %s8586_s14, 1  ;;  %v8493_v0 = vmov 0   ;;  %v7772_v5 = vld [vmem:[%s10345_s2] sm:$0xff]   ;;  %v7773_v6 = vld [vmem:[%s10345_s2 + $0x8] sm:$0xff]   ;;  %v7774_v8 = vld [vmem:[%s10345_s2 + $0x10] sm:$0xff]   ;;  %vm646_vm0 = vcmask 1040384   ;;  %v563_v10 = vlaneseq }
  0xd1   : > { %8461 = vsyncadd (%p10382_p13), [#allocation11], 4294961136  ;;  %7771 = vset.pattern.permute.xlu1 %v8493_v0  ;;  %7770 = vset.pattern.permute.xlu0 %v8493_v0  ;;  %v7775_v7 = vld [vmem:[%s10345_s2 + $0x18] ss:$0 sps:$4 sm:$0x11]   ;;  %vm639_vm5 = vcmask 408576  }
  0xd2   : > { %s10400_s14 = smov (!%p553_p2, %s8586_s14), 1  ;;  %7191 = vmatprep.subr.bf16.mxu0 %v7772_v5  ;;  %v648_v9 = vsel %vm646_vm0, %v7775_v7, 0  ;;  %v8853_v11 = vand.u32 127, %v563_v10  ;;  %v8494_v16 = vmov 0.0   ;;  %s10383_s13 = sld [smem:[#allocation18_spill]]  ;;  %vm743_vm6 = vcmask 261120  }
  0xd3   : > { %s6906_s15 = sshll.u32 %s10400_s14, 5  ;;  %7192 = vmatpush3.bf16.msra.mxu0 %v7772_v5  ;;  %s10384_s21 = sld [smem:[#allocation17_spill]]  ;;  %v8907_v43 = vshrl.u32 %v563_v10, 7 }
  0xd4   : > { %s557_s20 = scalar_lea.vmem %s10343_s0, %s6906_s15  ;;  %7193 = vmatprep.subr.bf16.mxu0 %v7773_v6  ;;  %s10385_s28 = sld [smem:[#allocation19_spill]]  ;;  %vm568_vm7 = vcmp.ge.s32.totalorder %v8853_v11, 8  ;;  %vm569_vm8 = vcmp.lt.s32.totalorder %v8853_v11, 16  ;;  %vm571_vm9 = vcmp.ge.s32.totalorder %v8853_v11, 16  ;;  %vm572_vm10 = vcmp.lt.s32.totalorder %v8853_v11, 24 }
  0xd5   : > { %v579_v1 = vld [vmem:[%s557_s20 + $0x10] sm:$0xff]  ;;  %v577_v2 = vld [vmem:[%s557_s20] sm:$0xff]  ;;  %v580_v3 = vld [vmem:[%s557_s20 + $0x18] sm:$0xff]  ;;  %v8910_v44 = vsub.s32 0, %v8907_v43  ;;  %v8918_v46 = vsub.s32 1, %v8907_v43  ;;  %v8927_v48 = vsub.s32 2, %v8907_v43 }
  0xd6   : > { %588 = vperm.xlu1 %7771, %v579_v1   ;;  %582 = vperm.xlu0 %7770, %v577_v2   ;;  %v578_v4 = vld [vmem:[%s557_s20 + $0x8] sm:$0xff]  ;;  %vm574_vm11 = vcmp.ge.s32.totalorder %v8853_v11, 24  ;;  %vm575_vm12 = vcmp.lt.s32.totalorder %v8853_v11, 32  ;;  %vm566_vm13 = vcmp.lt.s32.totalorder %v8853_v11, 8  ;;  %vm8934_vm14 = vmand %vm568_vm7, %vm569_vm8  ;;  %s10393_s24 = sld [smem:[#allocation20_spill]]  ;;  %vm6433_vm7 = vcmp.eq.s32.totalorder %v8853_v11, 1 }
  0xd7   : > { %7194 = vmatpush3.bf16.msra.mxu0 %v7773_v6  ;;  %vm8938_vm15 = vmand %vm571_vm9, %vm572_vm10  ;;  %s6604_s15 = sshll.u32 %s10400_s14, 3  ;;  %s10394_s20 = sld [smem:[#allocation21_spill]] }
  0xd8   : > { %7195 = vmatprep.subr.bf16.mxu0 %v7774_v8  ;;  %v7776_v23 = vld [vmem:[%s10383_s13] sm:$0xff]   ;;  %v7777_v24 = vld [vmem:[%s10383_s13 + $0x10] sm:$0xff]   ;;  %v7778_v25 = vld [vmem:[%s10383_s13 + $0x8] sm:$0xff]  }
  0xd9   : > { %7211 = vmatprep.subr.bf16.mxu1 %v7777_v24  ;;  %v7779_v26 = vld [vmem:[%s10383_s13 + $0x18] sm:$0xff]   ;;  %v7780_v27 = vld [vmem:[%s10383_s13 + $0x20] sm:$0xff]   ;;  %v615_v32 = vld [vmem:[%s10384_s21 + $0x8] sm:$0xff] }
  0xda   : > { %591 = vperm.xlu1 %7771, %v580_v3   ;;  %585 = vperm.xlu0 %7770, %v578_v4   ;;  %v617_v29 = vld [vmem:[%s10384_s21 + $0x18] sm:$0xff]  ;;  %v614_v31 = vld [vmem:[%s10384_s21] sm:$0xff]  ;;  %v616_v33 = vld [vmem:[%s10384_s21 + $0x10] sm:$0xff]  ;;  %s10386_s29 = smov %s10385_s28 }
  0xdb   : > { %7196 = vmatpush3.bf16.msra.mxu0 %v7774_v8  ;;  %7212 = vmatpush3.bf16.msra.mxu1 %v7777_v24  ;;  %v7781_v42 = vld [vmem:[%s10383_s13 + $0x28] sm:$0xff]   ;;  %v8915_v45 = vld [vmem:[%s10385_s28] sm:$0xff] }
  0xdc   : > { %7627 = vmatprep.subr.msk.bf16.mxu0 %vm646_vm0, %v7775_v7  ;;  %7213 = vmatprep.subr.bf16.mxu1 %v7779_v26  ;;  %v730_v47 = vrot.slane %v8915_v45, %v8910_v44  ;;  %v802_v49 = vrot.slane %v8915_v45, %v8918_v46  ;;  %vm8942_vm0 = vmand %vm574_vm11, %vm575_vm12  ;;  %v867_v61 = vrot.slane %v8915_v45, %v8927_v48 }
  0xdd   : > { %s561_s23 = scalar_lea.vmem %s10394_s20, %s6604_s15 }
  0xdf   : > { %7198 = vmatpush3.bf16.msra.mxu0 %v648_v9  ;;  %7214 = vmatpush3.bf16.msra.mxu1 %v7779_v26 }
  0xe0   : > { %7203 = vmatprep.subr.bf16.mxu0 %v7776_v23 }
 0x155   : > { %v589_v12 = vpop.permute.xlu1 %588  ;;  %v583_v13 = vpop.permute.xlu0 %582 }
 0x156   : > { %vm595_vm1 = vcmp.eq.s32.totalorder %v589_v12, %v8853_v11  ;;  %vm593_vm2 = vcmp.eq.s32.totalorder %v583_v13, %v8853_v11 }
 0x157   : > { %v6607_v17 = vsel %vm595_vm1, 1.0, %v8494_v16  ;;  %v6605_v19 = vsel %vm593_vm2, 1.0, %v8494_v16  ;;  %vm3033_vm1 = vcmask 523264   ;;  %vm6437_vm2 = vcmp.eq.s32.totalorder %v8853_v11, 5 }
 0x159   : > { %v592_v14 = vpop.permute.xlu1 %591  ;;  %v586_v15 = vpop.permute.xlu0 %585 }
 0x15a   : > { %vm596_vm3 = vcmp.eq.s32.totalorder %v592_v14, %v8853_v11  ;;  %vm594_vm4 = vcmp.eq.s32.totalorder %v586_v15, %v8853_v11 }
 0x15b   : > { %v6608_v18 = vsel %vm596_vm3, 1.0, %v8494_v16  ;;  %v6606_v20 = vsel %vm594_vm4, 1.0, %v8494_v16  ;;  %vm6430_vm3 = vcmp.eq.s32.totalorder %v8853_v11, 0  ;;  %vm6431_vm4 = vcmp.eq.s32.totalorder %v8853_v11, 3 }
 0x15c   : > { %v606_v21 = vpack.c.bf16 %v6608_v18, %v6607_v17  ;;  %v605_v22 = vpack.c.bf16 %v6606_v20, %v6605_v19  ;;  %vm6432_vm8 = vmor %vm6430_vm3, %vm6431_vm4 }
 0x15e   : > { %7199 = vmatprep.mubr.msk.bf16.mxu0 %vm639_vm5, %v605_v22 }
 0x15f   : > { %7200 = vmatmul.mubr.msk.bf16.vlgmr.msra.gmra.mrb[0].mxu0 %vm639_vm5, %v606_v21  ;;  %vm6436_vm5 = vcmp.eq.s32.totalorder %v8853_v11, 4 }
 0x160   : > { %7204 = vmatpush3.bf16.msra.mxu0 %v7776_v23 }
 0x161   : > { %7205 = vmatprep.subr.bf16.mxu0 %v7778_v25 }
 0x164   : > { %7206 = vmatpush3.bf16.msra.mxu0 %v7778_v25 }
 0x165   : > { %7219 = vmatprep.subr.bf16.mxu0 %v7780_v27 }
 0x232   : > { %v7201_v28 = vpop.f32.mrb[0].mxu0 }
 0x233   : > { %v684_v30 = vpop.f32.mrb[1].mxu0  ;;  %v8892_v39 = vadd.f32 %v7201_v28, %v616_v33 }
 0x234   : > { %v7202_v34 = vpop.f32.mrb[2].mxu0  ;;  %v8888_v37 = vadd.f32 %v684_v30, %v614_v31 }
 0x235   : > { %v8886_v35 = vadd.f32 %v7202_v34, %v617_v29  ;;  %v687_v36 = vpop.f32.mrb[3].mxu0 }
 0x236   : > { %v8890_v38 = vadd.f32 %v687_v36, %v615_v32 }
 0x237   : > { %v726_v41 = vpack.c.bf16 %v8886_v35, %v8892_v39 }
 0x238   : > { %v725_v40 = vpack.c.bf16 %v8890_v38, %v8888_v37 }
 0x23a   : > { %7207 = vmatprep.mubr.msk.bf16.mxu0 %vm743_vm6, %v725_v40  ;;  %7215 = vmatprep.mubr.msk.bf16.mxu1 %vm743_vm6, %v725_v40 }
 0x23b   : > { %7208 = vmatmul.mubr.msk.bf16.vlgmr.msra.gmra.mrb[4].mxu0 %vm743_vm6, %v726_v41  ;;  %7216 = vmatmul.mubr.msk.bf16.vlgmr.msra.gmra.mrb[0].mxu1 %vm743_vm6, %v726_v41 }
 0x23c   : > { %7220 = vmatpush3.bf16.msra.mxu0 %v7780_v27  ;;  %7223 = vmatprep.mubr.msk.bf16.mxu0 %vm743_vm6, %v725_v40 }
 0x23d   : > { %7221 = vmatprep.subr.bf16.mxu0 %v7781_v42 }
 0x240   : > { %7222 = vmatpush3.bf16.msra.mxu0 %v7781_v42 }
 0x243   : > { %7224 = vmatmul.mubr.msk.bf16.vlgmr.msra.gmra.mrb[8].mxu0 %vm743_vm6, %v726_v41 }
 0x30e   : > { %v7209_v51 = vpop.f32.mrb[4].mxu0  ;;  %v7217_v52 = vpop.f32.mrb[0].mxu1 }
 0x30f   : > { %v793_v54 = vadd.f32 %v7209_v51, %v730_v47  ;;  %v784_v55 = vpop.f32.mrb[5].mxu0  ;;  %v849_v56 = vpop.f32.mrb[1].mxu1  ;;  %v858_v1 = vadd.f32 %v7217_v52, %v802_v49 }
 0x310   : > { %v785_v58 = vadd.f32 %v784_v55, %v730_v47  ;;  %v7210_v59 = vpop.f32.mrb[6].mxu0  ;;  %v7218_v60 = vpop.f32.mrb[2].mxu1  ;;  %v850_v2 = vadd.f32 %v849_v56, %v802_v49 }
 0x311   : > { %v937_v62 = vsel %vm566_vm13, %v793_v54, 0.0  ;;  %v1123_v63 = vsel %vm8934_vm14, %v793_v54, 0.0  ;;  %v787_v3 = vpop.f32.mrb[7].mxu0  ;;  %v852_v4 = vpop.f32.mrb[3].mxu1  ;;  %v796_v5 = vadd.f32 %v7210_v59, %v730_v47  ;;  %v861_v6 = vadd.f32 %v7218_v60, %v802_v49 }
 0x312   : > { %v788_v7 = vadd.f32 %v787_v3, %v730_v47  ;;  %v853_v8 = vadd.f32 %v852_v4, %v802_v49  ;;  %v1299_v9 = vsel %vm8938_vm15, %v793_v54, 0.0  ;;  %v1475_v10 = vsel %vm8942_vm0, %v793_v54, 0.0 }
 0x313   : > { %v935_v12 = vsel %vm566_vm13, %v785_v58, 0.0  ;;  %v1121_v13 = vsel %vm8934_vm14, %v785_v58, 0.0  ;;  %v938_v14 = vsel %vm566_vm13, %v796_v5, 0.0  ;;  %v1124_v15 = vsel %vm8934_vm14, %v796_v5, 0.0 }
 0x314   : > { %v1300_v16 = vsel %vm8938_vm15, %v796_v5, 0.0  ;;  %v1476_v17 = vsel %vm8942_vm0, %v796_v5, 0.0  ;;  %v940_v18 = vpack.c.bf16 %v938_v14, %v937_v62  ;;  %v8968_v19 = vpack.c.bf16 %v1124_v15, %v1123_v63 }
 0x315   : > { %v8970_v20 = vpack.c.bf16 %v1300_v16, %v1299_v9  ;;  %v8972_v21 = vpack.c.bf16 %v1476_v17, %v1475_v10  ;;  %v8974_v22 = vpack.c.bf16 %v861_v6, %v858_v1  ;;  %v8976_v23 = vpack.c.bf16 %v853_v8, %v850_v2 }
 0x316   : > { %v7225_v24 = vpop.f32.mrb[8].mxu0  ;;  %v936_v25 = vsel %vm566_vm13, %v788_v7, 0.0  ;;  %v1122_v26 = vsel %vm8934_vm14, %v788_v7, 0.0  ;;  %v1297_v30 = vsel %vm8938_vm15, %v785_v58, 0.0  ;;  %v1298_v31 = vsel %vm8938_vm15, %v788_v7, 0.0 }
 0x317   : > { %v914_v27 = vpop.f32.mrb[9].mxu0  ;;  %v939_v28 = vpack.c.bf16 %v936_v25, %v935_v12  ;;  %v8982_v29 = vpack.c.bf16 %v1122_v26, %v1121_v13  ;;  %7628 = vmatprep.subr.msk.bf16.mxu1 %vm743_vm6, %v8976_v23  ;;  %v8992_v32 = vsel %vm743_vm6, %v8976_v23, 0  ;;  %v8994_v34 = vpack.c.bf16 %v1298_v31, %v1297_v30 }
 0x318   : > { %v7226_v33 = vpop.f32.mrb[10].mxu0  ;;  %v923_v36 = vadd.f32 %v7225_v24, %v867_v61  ;;  %7228 = vmatpush3.bf16.xpose.msra.mxu1 %v8992_v32  ;;  %v1473_v42 = vsel %vm8942_vm0, %v785_v58, 0.0  ;;  %v1474_v47 = vsel %vm8942_vm0, %v788_v7, 0.0  ;;  %v915_v49 = vadd.f32 %v914_v27, %v867_v61 }
 0x319   : > { %7231 = vmatprep.mubr.msk.bf16.mxu1 %vm743_vm6, %v939_v28  ;;  %v926_v40 = vadd.f32 %v7226_v33, %v867_v61  ;;  %v917_v41 = vpop.f32.mrb[11].mxu0  ;;  %7629 = vmatprep.subr.msk.bf16.mxu1 %vm743_vm6, %v8974_v22  ;;  %v9004_v52 = vpack.c.bf16 %v1474_v47, %v1473_v42  ;;  %v9014_v56 = vsel %vm743_vm6, %v8974_v22, 0  ;;  %v9029_v58 = vsub.s32 4, %v8907_v43 }
 0x31a   : > { %v918_v51 = vadd.f32 %v917_v41, %v867_v61 }
 0x31b   : > { %v9006_v54 = vpack.c.bf16 %v926_v40, %v923_v36  ;;  %v9033_v59 = vrot.slane %v8915_v45, %v9029_v58 }
 0x31c   : > { %v9008_v55 = vpack.c.bf16 %v918_v51, %v915_v49 }
 0x31e   : > { %7235 = vmatprep.subr.bf16.mxu0 %v9008_v55 }
 0x31f   : > { %7236 = vmatpush3.bf16.msra.mxu0 %v9008_v55 }
 0x320   : > { %7237 = vmatprep.subr.bf16.mxu0 %v9006_v54  ;;  %7230 = vmatpush3.bf16.xpose.msra.mxu1 %v9014_v56 }
 0x321   : > { %7251 = vmatprep.subr.bf16.mxu1 %v9008_v55 }
 0x323   : > { %7238 = vmatpush3.bf16.msra.mxu0 %v9006_v54 }
 0x324   : > { %7630 = vmatprep.subr.msk.bf16.mxu0 %vm743_vm6, %v8976_v23 }
 0x327   : > { %7232 = vmatmul.mubr.msk.bf16.vlgmr.msra.gmra.mrb[4].mxu1 %vm743_vm6, %v940_v18 }
 0x328   : > { %7252 = vmatpush3.bf16.msra.mxu1 %v9008_v55 }
 0x329   : > { %7253 = vmatprep.subr.bf16.mxu1 %v9006_v54 }
 0x32c   : > { %7254 = vmatpush3.bf16.msra.mxu1 %v9006_v54 }
 0x32d   : > { %7632 = vmatprep.subr.msk.bf16.mxu1 %vm743_vm6, %v8976_v23 }
 0x3fa   : > { %v7233_v60 = vpop.f32.mrb[4].mxu1 }
 0x3fb   : > { %v987_v61 = vpop.f32.mrb[5].mxu1  ;;  %v1008_v2 = vmul.f32 %v7233_v60, %v9033_v59 }
 0x3fc   : > { %v1006_v62 = vmul.f32 %v9033_v59, %v987_v61  ;;  %v7234_v63 = vpop.f32.mrb[6].mxu1 }
 0x3fd   : > { %v990_v1 = vpop.f32.mrb[7].mxu1  ;;  %v1009_v6 = vmul.f32 %v7234_v63, %v9033_v59  ;;  %v1016_v7 = vsel %vm743_vm6, %v1008_v2, -inf }
 0x3fe   : > { %v1007_v3 = vmul.f32 %v9033_v59, %v990_v1  ;;  %v1010_v4 = vsel %vm743_vm6, %v1006_v62, -inf }
 0x3ff   : > { %1011 = vmax.xlane.f32.xlu0 %v1010_v4  ;;  %v1019_v8 = vsel %vm743_vm6, %v1009_v6, -inf }
 0x400   : > { %v1013_v5 = vsel %vm743_vm6, %v1007_v3, -inf }
 0x401   : > { %1014 = vmax.xlane.f32.xlu1 %v1013_v5 }
 0x403   : > { %1017 = vmax.xlane.f32.xlu0 %v1016_v7 }
 0x407   : > { %1020 = vmax.xlane.f32.xlu0 %v1019_v8 }
 0x48c   : > { %v1012_v9 = vpop.xlane.xlu0 %1011 }
 0x48d   : > { %v1022_v10 = vsub.f32 %v1006_v62, %v1012_v9 }
 0x48e   : > { %v1015_v12 = vpop.xlane.xlu1 %1014 }
 0x48f   : > { %v1026_v13 = vmul.f32 1.442695, %v1022_v10  ;;  %v1023_v14 = vsub.f32 %v1007_v3, %v1015_v12 }
 0x490   : > { %v1018_v15 = vpop.xlane.xlu0 %1017 }
 0x491   : > { %7886 = vpow2.f32 %v1026_v13  ;;  %v1028_v16 = vmul.f32 1.442695, %v1023_v14  ;;  %v1024_v17 = vsub.f32 %v1008_v2, %v1018_v15 }
 0x493   : > { %7888 = vpow2.f32 %v1028_v16  ;;  %v1030_v18 = vmul.f32 1.442695, %v1024_v17 }
 0x494   : > { %v1021_v24 = vpop.xlane.xlu0 %1020 }
 0x495   : > { %7890 = vpow2.f32 %v1030_v18  ;;  %v1025_v25 = vsub.f32 %v1009_v6, %v1021_v24 }
 0x497   : > { %v1032_v26 = vmul.f32 1.442695, %v1025_v25 }
 0x499   : > { %7892 = vpow2.f32 %v1032_v26 }
 0x49b   : > { %v7887_v27 = vpop.eup %7886 }
 0x49c   : > { %v1034_v28 = vsel %vm743_vm6, %v7887_v27, 0.0 }
 0x49d   : > { %v7889_v30 = vpop.eup %7888  ;;  %1035 = vadd.xlane.f32.xlu1 %v1034_v28 }
 0x49e   : > { %v1037_v31 = vsel %vm743_vm6, %v7889_v30, 0.0 }
 0x49f   : > { %v7891_v33 = vpop.eup %7890  ;;  %1038 = vadd.xlane.f32.xlu0 %v1037_v31 }
 0x4a0   : > { %v1040_v36 = vsel %vm743_vm6, %v7891_v33, 0.0 }
 0x4a1   : > { %1041 = vadd.xlane.f32.xlu1 %v1040_v36 }
 0x4a3   : > { %v7893_v40 = vpop.eup %7892 }
 0x4a4   : > { %v1043_v41 = vsel %vm743_vm6, %v7893_v40, 0.0 }
 0x4a5   : > { %1044 = vadd.xlane.f32.xlu0 %v1043_v41 }
 0x52a   : > { %v1036_v42 = vpop.xlane.xlu1 %1035 }
 0x52b   : > { %7894 = vrcp.f32 %v1036_v42 }
 0x52c   : > { %v1039_v47 = vpop.xlane.xlu0 %1038 }
 0x52d   : > { %7896 = vrcp.f32 %v1039_v47 }
 0x52e   : > { %v1042_v49 = vpop.xlane.xlu1 %1041 }
 0x52f   : > { %7898 = vrcp.f32 %v1042_v49 }
 0x532   : > { %v1045_v51 = vpop.xlane.xlu0 %1044 }
 0x533   : > { %7900 = vrcp.f32 %v1045_v51 }
 0x535   : > { %v7895_v60 = vpop.eup %7894 }
 0x536   : > { %v1050_v62 = vmul.f32 %v7895_v60, %v7887_v27 }
 0x537   : > { %v7897_v61 = vpop.eup %7896 }
 0x538   : > { %v1051_v63 = vmul.f32 %v7897_v61, %v7889_v30 }
 0x539   : > { %v7899_v2 = vpop.eup %7898 }
 0x53a   : > { %v1054_v1 = vpack.c.bf16 %v1051_v63, %v1050_v62  ;;  %v1052_v4 = vmul.f32 %v7899_v2, %v7891_v33 }
 0x53c   : > { %7239 = vmatprep.mubr.msk.bf16.mxu0 %vm743_vm6, %v1054_v1 }
 0x53d   : > { %v7901_v3 = vpop.eup %7900 }
 0x53e   : > { %v1053_v5 = vmul.f32 %v7901_v3, %v7893_v40 }
 0x540   : > { %v1055_v6 = vpack.c.bf16 %v1053_v5, %v1052_v4 }
 0x542   : > { %7240 = vmatmul.mubr.msk.bf16.vlgmr.msra.gmra.mrb[12].mxu0 %vm743_vm6, %v1055_v6 }
 0x543   : > { %7244 = vmatpush3.bf16.xpose.msra.mxu0 %v8992_v32  ;;  %7247 = vmatprep.mubr.msk.bf16.mxu0 %vm743_vm6, %v8982_v29 }
 0x544   : > { %7631 = vmatprep.subr.msk.bf16.mxu0 %vm743_vm6, %v8974_v22 }
 0x54b   : > { %7246 = vmatpush3.bf16.xpose.msra.mxu0 %v9014_v56 }
 0x54c   : > { %7267 = vmatprep.subr.bf16.mxu0 %v9008_v55 }
 0x552   : > { %7248 = vmatmul.mubr.msk.bf16.vlgmr.msra.gmra.mrb[16].mxu0 %vm743_vm6, %v8968_v19 }
 0x553   : > { %7268 = vmatpush3.bf16.msra.mxu0 %v9008_v55 }
 0x554   : > { %7269 = vmatprep.subr.bf16.mxu0 %v9006_v54 }
 0x557   : > { %7270 = vmatpush3.bf16.msra.mxu0 %v9006_v54 }
 0x558   : > { %7634 = vmatprep.subr.msk.bf16.mxu0 %vm743_vm6, %v8976_v23 }
 0x615   : > { %v9063_v29 = vpop.f32.mrb[12].mxu0 }
 0x616   : > { %v9065_v7 = vpop.f32.mrb[13].mxu0 }
 0x617   : > { %v9067_v8 = vpop.f32.mrb[14].mxu0 }
 0x618   : > { %v9069_v9 = vpop.f32.mrb[15].mxu0 }
 0x625   : > { %v7249_v10 = vpop.f32.mrb[16].mxu0 }
 0x626   : > { %v1167_v12 = vpop.f32.mrb[17].mxu0  ;;  %v1184_v15 = vmul.f32 %v7249_v10, %v9033_v59 }
 0x627   : > { %v1182_v19 = vmul.f32 %v1167_v12, %v9033_v59  ;;  %v7250_v13 = vpop.f32.mrb[18].mxu0 }
 0x628   : > { %v1170_v14 = vpop.f32.mrb[19].mxu0  ;;  %v1185_v17 = vmul.f32 %v7250_v13, %v9033_v59  ;;  %v1192_v24 = vsel %vm743_vm6, %v1184_v15, -inf }
 0x629   : > { %v1183_v16 = vmul.f32 %v1170_v14, %v9033_v59  ;;  %v1186_v23 = vsel %vm743_vm6, %v1182_v19, -inf }
 0x62a   : > { %1187 = vmax.xlane.f32.xlu1 %v1186_v23  ;;  %v1195_v25 = vsel %vm743_vm6, %v1185_v17, -inf }
 0x62b   : > { %v1189_v18 = vsel %vm743_vm6, %v1183_v16, -inf }
 0x62c   : > { %1190 = vmax.xlane.f32.xlu0 %v1189_v18 }
 0x62e   : > { %1193 = vmax.xlane.f32.xlu1 %v1192_v24 }
 0x630   : > { %1196 = vmax.xlane.f32.xlu0 %v1195_v25 }
 0x6b7   : > { %v1188_v26 = vpop.xlane.xlu1 %1187 }
 0x6b8   : > { %v1198_v27 = vsub.f32 %v1182_v19, %v1188_v26 }
 0x6b9   : > { %v1191_v28 = vpop.xlane.xlu0 %1190 }
 0x6ba   : > { %v1202_v30 = vmul.f32 1.442695, %v1198_v27  ;;  %v1199_v31 = vsub.f32 %v1183_v16, %v1191_v28  ;;  %v1111_v28 = vsel %vm566_vm13, %v9065_v7, 0.0  ;;  %v1112_v7 = vsel %vm566_vm13, %v9069_v9, 0.0 }
 0x6bb   : > { %v1194_v33 = vpop.xlane.xlu1 %1193 }
 0x6bc   : > { %7902 = vpow2.f32 %v1202_v30  ;;  %v1204_v36 = vmul.f32 1.442695, %v1199_v31  ;;  %v1200_v40 = vsub.f32 %v1184_v15, %v1194_v33 }
 0x6bd   : > { %v1197_v41 = vpop.xlane.xlu0 %1196 }
 0x6be   : > { %7904 = vpow2.f32 %v1204_v36  ;;  %v1206_v42 = vmul.f32 1.442695, %v1200_v40  ;;  %v1201_v47 = vsub.f32 %v1185_v17, %v1197_v41 }
 0x6c0   : > { %7906 = vpow2.f32 %v1206_v42  ;;  %v1208_v49 = vmul.f32 1.442695, %v1201_v47 }
 0x6c2   : > { %7908 = vpow2.f32 %v1208_v49 }
 0x6c6   : > { %v7903_v51 = vpop.eup %7902 }
 0x6c7   : > { %v1210_v60 = vsel %vm743_vm6, %v7903_v51, 0.0 }
 0x6c8   : > { %v7905_v61 = vpop.eup %7904  ;;  %1211 = vadd.xlane.f32.xlu1 %v1210_v60 }
 0x6c9   : > { %v1213_v62 = vsel %vm743_vm6, %v7905_v61, 0.0 }
 0x6ca   : > { %v7907_v63 = vpop.eup %7906  ;;  %1214 = vadd.xlane.f32.xlu0 %v1213_v62 }
 0x6cb   : > { %v1216_v1 = vsel %vm743_vm6, %v7907_v63, 0.0 }
 0x6cc   : > { %v7909_v2 = vpop.eup %7908  ;;  %1217 = vadd.xlane.f32.xlu1 %v1216_v1 }
 0x6cd   : > { %v1219_v3 = vsel %vm743_vm6, %v7909_v2, 0.0 }
 0x6ce   : > { %1220 = vadd.xlane.f32.xlu0 %v1219_v3 }
 0x755   : > { %v1212_v4 = vpop.xlane.xlu1 %1211 }
 0x756   : > { %7910 = vrcp.f32 %v1212_v4 }
 0x757   : > { %v1215_v5 = vpop.xlane.xlu0 %1214 }
 0x758   : > { %7912 = vrcp.f32 %v1215_v5 }
 0x759   : > { %v1218_v6 = vpop.xlane.xlu1 %1217 }
 0x75a   : > { %7914 = vrcp.f32 %v1218_v6 }
 0x75b   : > { %v1221_v10 = vpop.xlane.xlu0 %1220 }
 0x75c   : > { %7916 = vrcp.f32 %v1221_v10 }
 0x760   : > { %v7911_v12 = vpop.eup %7910 }
 0x761   : > { %v1226_v13 = vmul.f32 %v7911_v12, %v7903_v51 }
 0x762   : > { %v7913_v19 = vpop.eup %7912 }
 0x763   : > { %v1227_v14 = vmul.f32 %v7913_v19, %v7905_v61 }
 0x764   : > { %v7915_v15 = vpop.eup %7914 }
 0x765   : > { %v1230_v16 = vpack.c.bf16 %v1227_v14, %v1226_v13  ;;  %v1228_v17 = vmul.f32 %v7915_v15, %v7907_v63 }
 0x766   : > { %v7917_v23 = vpop.eup %7916 }
 0x767   : > { %v1229_v18 = vmul.f32 %v7917_v23, %v7909_v2  ;;  %7255 = vmatprep.mubr.msk.bf16.mxu1 %vm743_vm6, %v1230_v16 }
 0x769   : > { %v1231_v24 = vpack.c.bf16 %v1229_v18, %v1228_v17 }
 0x76b   : > { %7256 = vmatmul.mubr.msk.bf16.vlgmr.msra.gmra.mrb[8].mxu1 %vm743_vm6, %v1231_v24 }
 0x76c   : > { %7260 = vmatpush3.bf16.xpose.msra.mxu1 %v8992_v32  ;;  %7263 = vmatprep.mubr.msk.bf16.mxu1 %vm743_vm6, %v8994_v34  ;;  %v1113_v34 = vsel %vm566_vm13, %v9063_v29, 0.0 }
 0x76d   : > { %7633 = vmatprep.subr.msk.bf16.mxu1 %vm743_vm6, %v8974_v22 }
 0x774   : > { %7262 = vmatpush3.bf16.xpose.msra.mxu1 %v9014_v56 }
 0x775   : > { %7283 = vmatprep.subr.bf16.mxu1 %v9008_v55 }
 0x77b   : > { %7264 = vmatmul.mubr.msk.bf16.vlgmr.msra.gmra.mrb[12].mxu1 %vm743_vm6, %v8970_v20 }
 0x77c   : > { %7284 = vmatpush3.bf16.msra.mxu1 %v9008_v55 }
 0x77d   : > { %7285 = vmatprep.subr.bf16.mxu1 %v9006_v54 }
 0x780   : > { %7286 = vmatpush3.bf16.msra.mxu1 %v9006_v54  ;;  %v1114_v54 = vsel %vm566_vm13, %v9067_v8, 0.0 }
 0x83e   : > { %v7257_v25 = vpop.f32.mrb[8].mxu1 }
 0x83f   : > { %v1289_v26 = vsel %vm8934_vm14, %v7257_v25, 0.0  ;;  %v1272_v27 = vpop.f32.mrb[9].mxu1 }
 0x840   : > { %v9105_v20 = vadd.f32 %v1289_v26, %v1113_v34  ;;  %v1287_v55 = vsel %vm8934_vm14, %v1272_v27, 0.0  ;;  %v7258_v30 = vpop.f32.mrb[10].mxu1 }
 0x841   : > { %v9112_v31 = vadd.f32 %v1287_v55, %v1111_v28  ;;  %v1290_v29 = vsel %vm8934_vm14, %v7258_v30, 0.0  ;;  %v1275_v33 = vpop.f32.mrb[11].mxu1 }
 0x842   : > { %v9119_v36 = vadd.f32 %v1290_v29, %v1114_v54  ;;  %v1288_v40 = vsel %vm8934_vm14, %v1275_v33, 0.0 }
 0x843   : > { %v9123_v41 = vadd.f32 %v1288_v40, %v1112_v7 }
 0x84e   : > { %v7265_v42 = vpop.f32.mrb[12].mxu1 }
 0x84f   : > { %v1343_v47 = vpop.f32.mrb[13].mxu1  ;;  %v1360_v60 = vmul.f32 %v7265_v42, %v9033_v59 }
 0x850   : > { %v1358_v8 = vmul.f32 %v1343_v47, %v9033_v59  ;;  %v7266_v49 = vpop.f32.mrb[14].mxu1 }
 0x851   : > { %v1346_v51 = vpop.f32.mrb[15].mxu1  ;;  %v1361_v9 = vmul.f32 %v7266_v49, %v9033_v59  ;;  %v1368_v1 = vsel %vm743_vm6, %v1360_v60, -inf }
 0x852   : > { %v1359_v61 = vmul.f32 %v1346_v51, %v9033_v59  ;;  %v1362_v62 = vsel %vm743_vm6, %v1358_v8, -inf }
 0x853   : > { %1363 = vmax.xlane.f32.xlu1 %v1362_v62  ;;  %v1371_v2 = vsel %vm743_vm6, %v1361_v9, -inf }
 0x854   : > { %v1365_v63 = vsel %vm743_vm6, %v1359_v61, -inf }
 0x855   : > { %1366 = vmax.xlane.f32.xlu0 %v1365_v63 }
 0x857   : > { %1369 = vmax.xlane.f32.xlu1 %v1368_v1 }
 0x859   : > { %1372 = vmax.xlane.f32.xlu0 %v1371_v2 }
 0x8e0   : > { %v1364_v3 = vpop.xlane.xlu1 %1363 }
 0x8e1   : > { %v1374_v4 = vsub.f32 %v1358_v8, %v1364_v3 }
 0x8e2   : > { %v1367_v5 = vpop.xlane.xlu0 %1366 }
 0x8e3   : > { %v1378_v6 = vmul.f32 1.442695, %v1374_v4  ;;  %v1375_v10 = vsub.f32 %v1359_v61, %v1367_v5 }
 0x8e4   : > { %v1370_v12 = vpop.xlane.xlu1 %1369 }
 0x8e5   : > { %7918 = vpow2.f32 %v1378_v6  ;;  %v1380_v19 = vmul.f32 1.442695, %v1375_v10  ;;  %v1376_v13 = vsub.f32 %v1360_v60, %v1370_v12 }
 0x8e6   : > { %v1373_v14 = vpop.xlane.xlu0 %1372 }
 0x8e7   : > { %7920 = vpow2.f32 %v1380_v19  ;;  %v1382_v15 = vmul.f32 1.442695, %v1376_v13  ;;  %v1377_v16 = vsub.f32 %v1361_v9, %v1373_v14 }
 0x8e9   : > { %7922 = vpow2.f32 %v1382_v15  ;;  %v1384_v23 = vmul.f32 1.442695, %v1377_v16 }
 0x8eb   : > { %7924 = vpow2.f32 %v1384_v23 }
 0x8ef   : > { %v7919_v17 = vpop.eup %7918 }
 0x8f0   : > { %v1386_v18 = vsel %vm743_vm6, %v7919_v17, 0.0 }
 0x8f1   : > { %v7921_v24 = vpop.eup %7920  ;;  %1387 = vadd.xlane.f32.xlu1 %v1386_v18 }
 0x8f2   : > { %v1389_v25 = vsel %vm743_vm6, %v7921_v24, 0.0 }
 0x8f3   : > { %v7923_v34 = vpop.eup %7922  ;;  %1390 = vadd.xlane.f32.xlu0 %v1389_v25 }
 0x8f4   : > { %v1392_v26 = vsel %vm743_vm6, %v7923_v34, 0.0 }
 0x8f5   : > { %v7925_v27 = vpop.eup %7924  ;;  %1393 = vadd.xlane.f32.xlu1 %v1392_v26 }
 0x8f6   : > { %v1395_v28 = vsel %vm743_vm6, %v7925_v27, 0.0 }
 0x8f7   : > { %1396 = vadd.xlane.f32.xlu0 %v1395_v28 }
 0x97e   : > { %v1388_v55 = vpop.xlane.xlu1 %1387 }
 0x97f   : > { %7926 = vrcp.f32 %v1388_v55 }
 0x980   : > { %v1391_v30 = vpop.xlane.xlu0 %1390 }
 0x981   : > { %7928 = vrcp.f32 %v1391_v30 }
 0x982   : > { %v1394_v54 = vpop.xlane.xlu1 %1393 }
 0x983   : > { %7930 = vrcp.f32 %v1394_v54 }
 0x984   : > { %v1397_v29 = vpop.xlane.xlu0 %1396 }
 0x985   : > { %7932 = vrcp.f32 %v1397_v29 }
 0x989   : > { %v7927_v33 = vpop.eup %7926 }
 0x98a   : > { %v1402_v40 = vmul.f32 %v7927_v33, %v7919_v17 }
 0x98b   : > { %v7929_v7 = vpop.eup %7928 }
 0x98c   : > { %v1403_v42 = vmul.f32 %v7929_v7, %v7921_v24 }
 0x98d   : > { %v7931_v47 = vpop.eup %7930 }
 0x98e   : > { %v1406_v8 = vpack.c.bf16 %v1403_v42, %v1402_v40  ;;  %v1404_v51 = vmul.f32 %v7931_v47, %v7923_v34 }
 0x98f   : > { %v7933_v49 = vpop.eup %7932 }
 0x990   : > { %v1405_v60 = vmul.f32 %v7933_v49, %v7925_v27  ;;  %7271 = vmatprep.mubr.msk.bf16.mxu0 %vm743_vm6, %v1406_v8 }
 0x992   : > { %v1407_v61 = vpack.c.bf16 %v1405_v60, %v1404_v51 }
 0x994   : > { %7272 = vmatmul.mubr.msk.bf16.vlgmr.msra.gmra.mrb[20].mxu0 %vm743_vm6, %v1407_v61 }
 0x995   : > { %7276 = vmatpush3.bf16.xpose.msra.mxu0 %v8992_v32  ;;  %7279 = vmatprep.mubr.msk.bf16.mxu0 %vm743_vm6, %v9004_v52 }
 0x996   : > { %7635 = vmatprep.subr.msk.bf16.mxu0 %vm743_vm6, %v8974_v22 }
 0x99d   : > { %7278 = vmatpush3.bf16.xpose.msra.mxu0 %v9014_v56 }
 0x9a4   : > { %7280 = vmatmul.mubr.msk.bf16.vlgmr.msra.gmra.mrb[24].mxu0 %vm743_vm6, %v8972_v21 }
 0xa67   : > { %v7273_v62 = vpop.f32.mrb[20].mxu0 }
 0xa68   : > { %v1465_v9 = vsel %vm8938_vm15, %v7273_v62, 0.0  ;;  %v1448_v63 = vpop.f32.mrb[21].mxu0 }
 0xa69   : > { %v9150_v1 = vadd.f32 %v1465_v9, %v9105_v20  ;;  %v1463_v32 = vsel %vm8938_vm15, %v1448_v63, 0.0  ;;  %v7274_v52 = vpop.f32.mrb[22].mxu0 }
 0xa6a   : > { %v9155_v2 = vadd.f32 %v1463_v32, %v9112_v31  ;;  %v1466_v22 = vsel %vm8938_vm15, %v7274_v52, 0.0  ;;  %v1451_v56 = vpop.f32.mrb[23].mxu0 }
 0xa6b   : > { %v9160_v21 = vadd.f32 %v1466_v22, %v9119_v36  ;;  %v1464_v3 = vsel %vm8938_vm15, %v1451_v56, 0.0 }
 0xa6c   : > { %v9165_v20 = vadd.f32 %v1464_v3, %v9123_v41 }
 0xa77   : > { %v7281_v4 = vpop.f32.mrb[24].mxu0 }
 0xa78   : > { %v1519_v5 = vpop.f32.mrb[25].mxu0  ;;  %v1536_v12 = vmul.f32 %v7281_v4, %v9033_v59 }
 0xa79   : > { %v1534_v6 = vmul.f32 %v1519_v5, %v9033_v59  ;;  %v7282_v10 = vpop.f32.mrb[26].mxu0  ;;  %v7782_v5 = vld [vmem:[%s10383_s13 + $0x30] sm:$0xff]  }
 0xa7a   : > { %v1522_v31 = vpop.f32.mrb[27].mxu0  ;;  %v1537_v36 = vmul.f32 %v7282_v10, %v9033_v59  ;;  %v1544_v41 = vsel %vm743_vm6, %v1536_v12, -inf  ;;  %7291 = vmatprep.subr.bf16.mxu1 %v7782_v5 }
 0xa7b   : > { %v1535_v19 = vmul.f32 %v1522_v31, %v9033_v59  ;;  %v1538_v13 = vsel %vm743_vm6, %v1534_v6, -inf }
 0xa7c   : > { %1539 = vmax.xlane.f32.xlu1 %v1538_v13  ;;  %v1547_v15 = vsel %vm743_vm6, %v1537_v36, -inf }
 0xa7d   : > { %v1541_v14 = vsel %vm743_vm6, %v1535_v19, -inf }
 0xa7e   : > { %1542 = vmax.xlane.f32.xlu0 %v1541_v14 }
 0xa80   : > { %1545 = vmax.xlane.f32.xlu1 %v1544_v41 }
 0xa82   : > { %1548 = vmax.xlane.f32.xlu0 %v1547_v15 }
 0xb09   : > { %v1540_v16 = vpop.xlane.xlu1 %1539 }
 0xb0a   : > { %v1550_v23 = vsub.f32 %v1534_v6, %v1540_v16  ;;  %v7783_v6 = vld [vmem:[%s10383_s13 + $0x38] sm:$0xff]  }
 0xb0b   : > { %v1543_v17 = vpop.xlane.xlu0 %1542 }
 0xb0c   : > { %v1554_v18 = vmul.f32 1.442695, %v1550_v23  ;;  %v1551_v24 = vsub.f32 %v1535_v19, %v1543_v17 }
 0xb0d   : > { %v1546_v25 = vpop.xlane.xlu1 %1545 }
 0xb0e   : > { %7934 = vpow2.f32 %v1554_v18  ;;  %v1556_v34 = vmul.f32 1.442695, %v1551_v24  ;;  %v1552_v26 = vsub.f32 %v1536_v12, %v1546_v25 }
 0xb0f   : > { %v1549_v27 = vpop.xlane.xlu0 %1548 }
 0xb10   : > { %7936 = vpow2.f32 %v1556_v34  ;;  %v1558_v59 = vmul.f32 1.442695, %v1552_v26  ;;  %v1553_v28 = vsub.f32 %v1537_v36, %v1549_v27 }
 0xb12   : > { %7938 = vpow2.f32 %v1558_v59  ;;  %v1560_v55 = vmul.f32 1.442695, %v1553_v28 }
 0xb14   : > { %7940 = vpow2.f32 %v1560_v55 }
 0xb18   : > { %v7935_v30 = vpop.eup %7934 }
 0xb19   : > { %v1562_v54 = vsel %vm743_vm6, %v7935_v30, 0.0 }
 0xb1a   : > { %v7937_v29 = vpop.eup %7936  ;;  %1563 = vadd.xlane.f32.xlu1 %v1562_v54 }
 0xb1b   : > { %v1565_v33 = vsel %vm743_vm6, %v7937_v29, 0.0 }
 0xb1c   : > { %v7939_v7 = vpop.eup %7938  ;;  %1566 = vadd.xlane.f32.xlu0 %v1565_v33 }
 0xb1d   : > { %v1568_v40 = vsel %vm743_vm6, %v7939_v7, 0.0 }
 0xb1e   : > { %v7941_v42 = vpop.eup %7940  ;;  %1569 = vadd.xlane.f32.xlu1 %v1568_v40 }
 0xb1f   : > { %v1571_v47 = vsel %vm743_vm6, %v7941_v42, 0.0 }
 0xb20   : > { %1572 = vadd.xlane.f32.xlu0 %v1571_v47 }
 0xba7   : > { %v1564_v8 = vpop.xlane.xlu1 %1563 }
 0xba8   : > { %7942 = vrcp.f32 %v1564_v8 }
 0xba9   : > { %v1567_v49 = vpop.xlane.xlu0 %1566 }
 0xbaa   : > { %7944 = vrcp.f32 %v1567_v49 }
 0xbab   : > { %v1570_v51 = vpop.xlane.xlu1 %1569 }
 0xbac   : > { %7946 = vrcp.f32 %v1570_v51 }
 0xbad   : > { %v1573_v60 = vpop.xlane.xlu0 %1572 }
 0xbae   : > { %7948 = vrcp.f32 %v1573_v60 }
 0xbb2   : > { %v7943_v61 = vpop.eup %7942 }
 0xbb3   : > { %v1578_v9 = vmul.f32 %v7943_v61, %v7935_v30 }
 0xbb4   : > { %v7945_v62 = vpop.eup %7944 }
 0xbb5   : > { %v1579_v63 = vmul.f32 %v7945_v62, %v7937_v29 }
 0xbb6   : > { %v7947_v32 = vpop.eup %7946 }
 0xbb7   : > { %v1582_v52 = vpack.c.bf16 %v1579_v63, %v1578_v9  ;;  %v1580_v56 = vmul.f32 %v7947_v32, %v7939_v7 }
 0xbb8   : > { %v7949_v22 = vpop.eup %7948 }
 0xbb9   : > { %v1581_v3 = vmul.f32 %v7949_v22, %v7941_v42  ;;  %7287 = vmatprep.mubr.msk.bf16.mxu1 %vm743_vm6, %v1582_v52 }
 0xbbb   : > { %v1583_v4 = vpack.c.bf16 %v1581_v3, %v1580_v56 }
 0xbbd   : > { %7288 = vmatmul.mubr.msk.bf16.vlgmr.msra.gmra.mrb[16].mxu1 %vm743_vm6, %v1583_v4 }
 0xbbe   : > { %7292 = vmatpush3.bf16.msra.mxu1 %v7782_v5 }
 0xbbf   : > { %7293 = vmatprep.subr.bf16.mxu1 %v7783_v6 }
 0xbc2   : > { %7294 = vmatpush3.bf16.msra.mxu1 %v7783_v6  ;;  %v7785_v6 = vld [vmem:[%s10383_s13 + $0x58] sm:$0xff]  }
 0xc90   : > { %v7289_v10 = vpop.f32.mrb[16].mxu1 }
 0xc91   : > { %v1641_v31 = vsel %vm8942_vm0, %v7289_v10, 0.0  ;;  %v1624_v12 = vpop.f32.mrb[17].mxu1  ;;  %v699_v10 = vld [vmem:[%s8813_s17] sm:$0xff] }
 0xc92   : > { %v1645_v19 = vadd.f32 %v1641_v31, %v9150_v1  ;;  %v1639_v13 = vsel %vm8942_vm0, %v1624_v12, 0.0  ;;  %v7290_v36 = vpop.f32.mrb[18].mxu1  ;;  %v9202_v1 = vsub.s32 3, %v8907_v43  ;;  %v700_v31 = vld [vmem:[%s8813_s17 + $0x8] sm:$0xff] }
 0xc93   : > { %v1643_v14 = vadd.f32 %v1639_v13, %v9155_v2  ;;  %v1642_v41 = vsel %vm8942_vm0, %v7290_v36, 0.0  ;;  %v1627_v15 = vpop.f32.mrb[19].mxu1  ;;  %v9226_v12 = vpack.c.bf16 %v700_v31, %v699_v10  ;;  %v702_v13 = vld [vmem:[%s8813_s17 + $0x18] sm:$0xff] }
 0xc94   : > { %v1646_v16 = vadd.f32 %v1642_v41, %v9160_v21  ;;  %v1640_v23 = vsel %vm8942_vm0, %v1627_v15, 0.0  ;;  %v1652_v2 = vrot.slane %v8915_v45, %v9202_v1  ;;  %v7787_v41 = vld [vmem:[%s10383_s13 + $0x48] sm:$0xff]   ;;  %v7788_v15 = vld [vmem:[%s10383_s13 + $0x60] sm:$0xff]  }
 0xc95   : > { %v1644_v17 = vadd.f32 %v1640_v23, %v9165_v20 }
 0xc96   : > { %v1648_v18 = vpack.c.bf16 %v1646_v16, %v1645_v19  ;;  %v701_v19 = vld [vmem:[%s8813_s17 + $0x10] sm:$0xff] }
 0xc97   : > { %v1647_v24 = vpack.c.bf16 %v1644_v17, %v1643_v14  ;;  %v9230_v36 = vpack.c.bf16 %v702_v13, %v701_v19  ;;  %v7786_v14 = vld [vmem:[%s10383_s13 + $0x40] sm:$0xff]  }
 0xc98   : > { %7299 = vmatprep.subr.bf16.mxu0 %v7786_v14 }
 0xc99   : > { %7295 = vmatprep.mubr.msk.bf16.mxu1 %vm743_vm6, %v1647_v24  ;;  %7300 = vmatpush3.bf16.msra.mxu0 %v7786_v14 }
 0xc9a   : > { %7296 = vmatmul.mubr.msk.bf16.vlgmr.msra.gmra.mrb[20].mxu1 %vm743_vm6, %v1648_v18  ;;  %7301 = vmatprep.subr.bf16.mxu0 %v7787_v41 }
 0xc9b   : > { %7311 = vmatprep.mubr.msk.bf16.mxu1 %vm743_vm6, %v9226_v12 }
 0xc9d   : > { %7302 = vmatpush3.bf16.msra.mxu0 %v7787_v41  ;;  %v9301_v41 = vsub.s32 5, %v8907_v43 }
 0xc9e   : > { %7315 = vmatprep.subr.bf16.mxu0 %v7788_v15 }
 0xd6d   : > { %v7297_v25 = vpop.f32.mrb[20].mxu1 }
 0xd6e   : > { %v1705_v34 = vpop.f32.mrb[21].mxu1  ;;  %v1714_v21 = vadd.f32 %v7297_v25, %v1652_v2 }
 0xd6f   : > { %v1706_v26 = vadd.f32 %v1705_v34, %v1652_v2  ;;  %v7298_v27 = vpop.f32.mrb[22].mxu1 }
 0xd70   : > { %v1708_v59 = vpop.f32.mrb[23].mxu1  ;;  %v1717_v28 = vadd.f32 %v7298_v27, %v1652_v2  ;;  %v1722_v29 = vadd.f32 %v1714_v21, %v8892_v39 }
 0xd71   : > { %v1709_v20 = vadd.f32 %v1708_v59, %v1652_v2  ;;  %v1720_v55 = vadd.f32 %v1706_v26, %v8888_v37  ;;  %v7784_v37 = vld [vmem:[%s10383_s13 + $0x50] sm:$0xff]  }
 0xd72   : > { %v1723_v45 = vadd.f32 %v1717_v28, %v8886_v35  ;;  %v1730_v7 = vsel %vm743_vm6, %v1722_v29, 0.0  ;;  %7307 = vmatprep.subr.bf16.mxu1 %v7784_v37  ;;  %v9248_v28 = vld [vmem:[%s10386_s29 + $0x8] sm:$0xff] }
 0xd73   : > { %v1724_v30 = vsel %vm743_vm6, %v1720_v55, 0.0  ;;  %v1721_v54 = vadd.f32 %v1709_v20, %v8890_v38  ;;  %7308 = vmatpush3.bf16.msra.mxu1 %v7784_v37  ;;  %v1780_v20 = vrot.slane %v9248_v28, %v9202_v1 }
 0xd74   : > { %1725 = vadd.xlane.f32.xlu1 %v1724_v30  ;;  %v1733_v40 = vsel %vm743_vm6, %v1723_v45, 0.0  ;;  %7309 = vmatprep.subr.bf16.mxu1 %v7785_v6 }
 0xd75   : > { %v1727_v33 = vsel %vm743_vm6, %v1721_v54, 0.0 }
 0xd76   : > { %1728 = vadd.xlane.f32.xlu0 %v1727_v33 }
 0xd77   : > { %7310 = vmatpush3.bf16.msra.mxu1 %v7785_v6 }
 0xd78   : > { %1731 = vadd.xlane.f32.xlu1 %v1730_v7 }
 0xd7a   : > { %1734 = vadd.xlane.f32.xlu0 %v1733_v40  ;;  %7312 = vmatmul.mubr.msk.bf16.vlgmr.msra.gmra.mrb[24].mxu1 %vm743_vm6, %v9230_v36 }
 0xe01   : > { %v1726_v38 = vpop.xlane.xlu1 %1725 }
 0xe02   : > { %v1737_v39 = vmul.f32 0.03125, %v1726_v38 }
 0xe03   : > { %v1729_v42 = vpop.xlane.xlu0 %1728 }
 0xe04   : > { %v1741_v47 = vsub.f32 %v1720_v55, %v1737_v39  ;;  %v1738_v8 = vmul.f32 0.03125, %v1729_v42  ;;  %v9253_v55 = vsub.s32 6, %v8907_v43 }
 0xe05   : > { %v1732_v49 = vpop.xlane.xlu1 %1731 }
 0xe06   : > { %v1742_v35 = vsub.f32 %v1721_v54, %v1738_v8  ;;  %v1739_v51 = vmul.f32 0.03125, %v1732_v49  ;;  %v1745_v60 = vmul.f32 %v1741_v47, %v1741_v47  ;;  %v1788_v7 = vrot.slane %v9248_v28, %v9253_v55 }
 0xe07   : > { %v1735_v61 = vpop.xlane.xlu0 %1734 }
 0xe08   : > { %v1743_v62 = vsub.f32 %v1722_v29, %v1739_v51  ;;  %v1740_v9 = vmul.f32 0.03125, %v1735_v61  ;;  %v1749_v63 = vsel %vm743_vm6, %v1745_v60, 0.0  ;;  %v1746_v32 = vmul.f32 %v1742_v35, %v1742_v35 }
 0xe09   : > { %1750 = vadd.xlane.f32.xlu1 %v1749_v63  ;;  %v8228_v63 = vld [vmem:[%s10386_s29] sm:$0xff] }
 0xe0a   : > { %v1744_v52 = vsub.f32 %v1723_v45, %v1740_v9  ;;  %v1752_v22 = vsel %vm743_vm6, %v1746_v32, 0.0  ;;  %v1747_v56 = vmul.f32 %v1743_v62, %v1743_v62  ;;  %v7789_v9 = vld [vmem:[%s10383_s13 + $0x68] sm:$0xff]   ;;  %v1891_v32 = vrot.slane %v8228_v63, %v9253_v55 }
 0xe0b   : > { %1753 = vadd.xlane.f32.xlu0 %v1752_v22 }
 0xe0c   : > { %v1755_v3 = vsel %vm743_vm6, %v1747_v56, 0.0  ;;  %v1748_v4 = vmul.f32 %v1744_v52, %v1744_v52 }
 0xe0d   : > { %1756 = vadd.xlane.f32.xlu1 %v1755_v3 }
 0xe0e   : > { %v1758_v5 = vsel %vm743_vm6, %v1748_v4, 0.0 }
 0xe0f   : > { %1759 = vadd.xlane.f32.xlu0 %v1758_v5 }
 0xe96   : > { %v1751_v16 = vpop.xlane.xlu1 %1750 }
 0xe97   : > { %v1761_v23 = vmul.f32 0.03125, %v1751_v16  ;;  %v9305_v16 = vsub.s32 7, %v8907_v43 }
 0xe98   : > { %v1754_v17 = vpop.xlane.xlu0 %1753 }
 0xe99   : > { %v1765_v18 = vadd.f32 1e-05, %v1761_v23  ;;  %v1762_v24 = vmul.f32 0.03125, %v1754_v17 }
 0xe9a   : > { %v1757_v2 = vpop.xlane.xlu1 %1756 }
 0xe9b   : > { %7950 = vrsqrt.f32 %v1765_v18  ;;  %v1766_v25 = vadd.f32 1e-05, %v1762_v24  ;;  %v1763_v34 = vmul.f32 0.03125, %v1757_v2 }
 0xe9c   : > { %v1760_v21 = vpop.xlane.xlu0 %1759 }
 0xe9d   : > { %7952 = vrsqrt.f32 %v1766_v25  ;;  %v1767_v26 = vadd.f32 1e-05, %v1763_v34  ;;  %v1764_v27 = vmul.f32 0.03125, %v1760_v21 }
 0xe9f   : > { %7954 = vrsqrt.f32 %v1767_v26  ;;  %v1768_v59 = vadd.f32 1e-05, %v1764_v27  ;;  %v1962_v26 = vrot.slane %v8228_v63, %v9305_v16 }
 0xea1   : > { %7956 = vrsqrt.f32 %v1768_v59 }
 0xea5   : > { %v7951_v30 = vpop.eup %7950 }
 0xea6   : > { %v1773_v54 = vmul.f32 %v7951_v30, %v1741_v47 }
 0xea7   : > { %v7953_v29 = vpop.eup %7952 }
 0xea8   : > { %v1774_v33 = vmul.f32 %v7953_v29, %v1742_v35  ;;  %v1781_v45 = vmul.f32 %v1780_v20, %v1773_v54 }
 0xea9   : > { %v7955_v40 = vpop.eup %7954 }
 0xeaa   : > { %v1775_v37 = vmul.f32 %v7955_v40, %v1743_v62  ;;  %v1782_v38 = vmul.f32 %v1780_v20, %v1774_v33  ;;  %v9257_v49 = vadd.f32 %v1788_v7, %v1781_v45 }
 0xeab   : > { %v7957_v39 = vpop.eup %7956 }
 0xeac   : > { %v1783_v42 = vmul.f32 %v1780_v20, %v1775_v37  ;;  %v1776_v8 = vmul.f32 %v7957_v39, %v1744_v52  ;;  %v9259_v51 = vadd.f32 %v1788_v7, %v1782_v38  ;;  %v7313_v52 = vpop.f32.mrb[24].mxu1 }
 0xead   : > { %v1953_v22 = vadd.f32 %v7313_v52, %v1891_v32  ;;  %v1944_v56 = vpop.f32.mrb[25].mxu1 }
 0xeae   : > { %v1784_v60 = vmul.f32 %v1780_v20, %v1776_v8  ;;  %v1813_v47 = vpack.c.bf16 %v9259_v51, %v9257_v49  ;;  %v9264_v35 = vadd.f32 %v1788_v7, %v1783_v42  ;;  %v1945_v3 = vadd.f32 %v1944_v56, %v1891_v32  ;;  %v7314_v4 = vpop.f32.mrb[26].mxu1 }
 0xeaf   : > { %v1956_v5 = vadd.f32 %v7314_v4, %v1891_v32  ;;  %v1947_v6 = vpop.f32.mrb[27].mxu1 }
 0xeb0   : > { %7303 = vmatprep.mubr.msk.bf16.mxu0 %vm743_vm6, %v1813_v47  ;;  %v9266_v61 = vadd.f32 %v1788_v7, %v1784_v60  ;;  %v1948_v10 = vadd.f32 %v1947_v6, %v1891_v32 }
 0xeb1   : > { %v9282_v31 = vpack.c.bf16 %v1956_v5, %v1953_v22 }
 0xeb2   : > { %v1814_v62 = vpack.c.bf16 %v9266_v61, %v9264_v35  ;;  %v9284_v19 = vpack.c.bf16 %v1948_v10, %v1945_v3 }
 0xeb3   : > { %v9297_v14 = vsel %vm743_vm6, %v9282_v31, 0 }
 0xeb4   : > { %7304 = vmatmul.mubr.msk.bf16.vlgmr.msra.gmra.mrb[28].mxu0 %vm743_vm6, %v1814_v62  ;;  %7636 = vmatprep.subr.msk.bf16.mxu1 %vm743_vm6, %v9284_v19  ;;  %v9290_v13 = vsel %vm743_vm6, %v9284_v19, 0 }
 0xeb5   : > { %7316 = vmatpush3.bf16.msra.mxu0 %v7788_v15  ;;  %7319 = vmatprep.mubr.msk.bf16.mxu0 %vm743_vm6, %v9226_v12  ;;  %v1820_v15 = vrot.slane %v8228_v63, %v9301_v41 }
 0xeb6   : > { %7317 = vmatprep.subr.bf16.mxu0 %v7789_v9  ;;  %7324 = vmatpush3.bf16.xpose.msra.mxu1 %v9290_v13 }
 0xeb7   : > { %7637 = vmatprep.subr.msk.bf16.mxu1 %vm743_vm6, %v9282_v31 }
 0xeb9   : > { %7318 = vmatpush3.bf16.msra.mxu0 %v7789_v9 }
 0xebc   : > { %7320 = vmatmul.mubr.msk.bf16.vlgmr.msra.gmra.mrb[32].mxu0 %vm743_vm6, %v9230_v36 }
 0xebe   : > { %7326 = vmatpush3.bf16.xpose.msra.mxu1 %v9297_v14 }
 0xf87   : > { %v7305_v23 = vpop.f32.mrb[28].mxu0 }
 0xf88   : > { %v1882_v17 = vadd.f32 %v7305_v23, %v1820_v15  ;;  %v1873_v18 = vpop.f32.mrb[29].mxu0 }
 0xf89   : > { %v1874_v24 = vadd.f32 %v1873_v18, %v1820_v15  ;;  %v7306_v2 = vpop.f32.mrb[30].mxu0 }
 0xf8a   : > { %v2030_v25 = vsel %vm566_vm13, %v1882_v17, 0.0  ;;  %v2214_v34 = vsel %vm8934_vm14, %v1882_v17, 0.0  ;;  %v1876_v21 = vpop.f32.mrb[31].mxu0  ;;  %v2388_v27 = vsel %vm8938_vm15, %v1882_v17, 0.0  ;;  %v2562_v43 = vsel %vm8942_vm0, %v1882_v17, 0.0 }
 0xf8b   : > { %v1885_v59 = vadd.f32 %v7306_v2, %v1820_v15  ;;  %v1877_v20 = vadd.f32 %v1876_v21, %v1820_v15  ;;  %v2028_v30 = vsel %vm566_vm13, %v1874_v24, 0.0  ;;  %v2212_v54 = vsel %vm8934_vm14, %v1874_v24, 0.0 }
 0xf8c   : > { %v2386_v29 = vsel %vm8938_vm15, %v1874_v24, 0.0  ;;  %v2560_v33 = vsel %vm8942_vm0, %v1874_v24, 0.0  ;;  %v9372_v24 = vrot.slane %v9248_v28, %v8918_v46 }
 0xf8d   : > { %v2031_v45 = vsel %vm566_vm13, %v1885_v59, 0.0  ;;  %v2215_v7 = vsel %vm8934_vm14, %v1885_v59, 0.0  ;;  %v2389_v40 = vsel %vm8938_vm15, %v1885_v59, 0.0  ;;  %v2563_v37 = vsel %vm8942_vm0, %v1885_v59, 0.0 }
 0xf8e   : > { %v2033_v38 = vpack.c.bf16 %v2031_v45, %v2030_v25  ;;  %v9332_v39 = vpack.c.bf16 %v2215_v7, %v2214_v34  ;;  %v9334_v42 = vpack.c.bf16 %v2389_v40, %v2388_v27  ;;  %v9336_v8 = vpack.c.bf16 %v2563_v37, %v2562_v43 }
 0xf8f   : > { %v7321_v60 = vpop.f32.mrb[32].mxu0  ;;  %v2029_v47 = vsel %vm566_vm13, %v1877_v20, 0.0  ;;  %v2213_v62 = vsel %vm8934_vm14, %v1877_v20, 0.0  ;;  %v2387_v9 = vsel %vm8938_vm15, %v1877_v20, 0.0  ;;  %v2561_v63 = vsel %vm8942_vm0, %v1877_v20, 0.0 }
 0xf90   : > { %v2018_v32 = vadd.f32 %v7321_v60, %v1962_v26  ;;  %v2009_v52 = vpop.f32.mrb[33].mxu0  ;;  %v2032_v22 = vpack.c.bf16 %v2029_v47, %v2028_v30  ;;  %v9346_v56 = vpack.c.bf16 %v2213_v62, %v2212_v54  ;;  %v9348_v3 = vpack.c.bf16 %v2387_v9, %v2386_v29 }
 0xf91   : > { %v2010_v4 = vadd.f32 %v2009_v52, %v1962_v26  ;;  %v7322_v5 = vpop.f32.mrb[34].mxu0  ;;  %v9350_v6 = vpack.c.bf16 %v2561_v63, %v2560_v33 }
 0xf92   : > { %7327 = vmatprep.mubr.msk.bf16.mxu1 %vm743_vm6, %v2032_v22  ;;  %v2021_v10 = vadd.f32 %v7322_v5, %v1962_v26  ;;  %v2012_v15 = vpop.f32.mrb[35].mxu0 }
 0xf93   : > { %7328 = vmatmul.mubr.msk.bf16.vlgmr.msra.gmra.mrb[28].mxu1 %vm743_vm6, %v2033_v38  ;;  %v2013_v23 = vadd.f32 %v2012_v15, %v1962_v26 }
 0xf94   : > { %v9354_v17 = vpack.c.bf16 %v2021_v10, %v2018_v32 }
 0xf95   : > { %v9356_v18 = vpack.c.bf16 %v2013_v23, %v2010_v4 }
 0xf97   : > { %7331 = vmatprep.subr.bf16.mxu0 %v9356_v18  ;;  %7347 = vmatprep.subr.bf16.mxu1 %v9356_v18 }
 0xf98   : > { %7332 = vmatpush3.bf16.msra.mxu0 %v9356_v18  ;;  %7348 = vmatpush3.bf16.msra.mxu1 %v9356_v18 }
 0xf99   : > { %7333 = vmatprep.subr.bf16.mxu0 %v9354_v17  ;;  %7349 = vmatprep.subr.bf16.mxu1 %v9354_v17 }
 0xf9c   : > { %7334 = vmatpush3.bf16.msra.mxu0 %v9354_v17  ;;  %7350 = vmatpush3.bf16.msra.mxu1 %v9354_v17 }
 0xf9d   : > { %7638 = vmatprep.subr.msk.bf16.mxu0 %vm743_vm6, %v9284_v19  ;;  %7640 = vmatprep.subr.msk.bf16.mxu1 %vm743_vm6, %v9284_v19 }
0x1066   : > { %v7329_v2 = vpop.f32.mrb[28].mxu1 }
0x1067   : > { %v2080_v25 = vpop.f32.mrb[29].mxu1  ;;  %v2101_v27 = vmul.f32 %v7329_v2, %v9372_v24 }
0x1068   : > { %v2099_v34 = vmul.f32 %v9372_v24, %v2080_v25  ;;  %v7330_v21 = vpop.f32.mrb[30].mxu1 }
0x1069   : > { %v2083_v26 = vpop.f32.mrb[31].mxu1  ;;  %v2102_v20 = vmul.f32 %v7330_v21, %v9372_v24  ;;  %v2109_v54 = vsel %vm743_vm6, %v2101_v27, -inf }
0x106a   : > { %v2100_v43 = vmul.f32 %v9372_v24, %v2083_v26  ;;  %v2103_v59 = vsel %vm743_vm6, %v2099_v34, -inf }
0x106b   : > { %2104 = vmax.xlane.f32.xlu1 %v2103_v59  ;;  %v2112_v29 = vsel %vm743_vm6, %v2102_v20, -inf }
0x106c   : > { %v2106_v30 = vsel %vm743_vm6, %v2100_v43, -inf }
0x106d   : > { %2107 = vmax.xlane.f32.xlu0 %v2106_v30 }
0x106f   : > { %2110 = vmax.xlane.f32.xlu1 %v2109_v54 }
0x1071   : > { %2113 = vmax.xlane.f32.xlu0 %v2112_v29 }
0x10f8   : > { %v2105_v33 = vpop.xlane.xlu1 %2104 }
0x10f9   : > { %v2115_v45 = vsub.f32 %v2099_v34, %v2105_v33 }
0x10fa   : > { %v2108_v7 = vpop.xlane.xlu0 %2107 }
0x10fb   : > { %v2119_v40 = vmul.f32 1.442695, %v2115_v45  ;;  %v2116_v37 = vsub.f32 %v2100_v43, %v2108_v7 }
0x10fc   : > { %v2111_v38 = vpop.xlane.xlu1 %2110 }
0x10fd   : > { %7958 = vpow2.f32 %v2119_v40  ;;  %v2121_v60 = vmul.f32 1.442695, %v2116_v37  ;;  %v2117_v47 = vsub.f32 %v2101_v27, %v2111_v38 }
0x10fe   : > { %v2114_v62 = vpop.xlane.xlu0 %2113 }
0x10ff   : > { %7960 = vpow2.f32 %v2121_v60  ;;  %v2123_v9 = vmul.f32 1.442695, %v2117_v47  ;;  %v2118_v63 = vsub.f32 %v2102_v20, %v2114_v62 }
0x1101   : > { %7962 = vpow2.f32 %v2123_v9  ;;  %v2125_v32 = vmul.f32 1.442695, %v2118_v63 }
0x1103   : > { %7964 = vpow2.f32 %v2125_v32 }
0x1107   : > { %v7959_v52 = vpop.eup %7958 }
0x1108   : > { %v2127_v22 = vsel %vm743_vm6, %v7959_v52, 0.0 }
0x1109   : > { %v7961_v4 = vpop.eup %7960  ;;  %2128 = vadd.xlane.f32.xlu1 %v2127_v22 }
0x110a   : > { %v2130_v5 = vsel %vm743_vm6, %v7961_v4, 0.0 }
0x110b   : > { %v7963_v10 = vpop.eup %7962  ;;  %2131 = vadd.xlane.f32.xlu0 %v2130_v5 }
0x110c   : > { %v2133_v15 = vsel %vm743_vm6, %v7963_v10, 0.0 }
0x110d   : > { %v7965_v23 = vpop.eup %7964  ;;  %2134 = vadd.xlane.f32.xlu1 %v2133_v15 }
0x110e   : > { %v2136_v2 = vsel %vm743_vm6, %v7965_v23, 0.0 }
0x110f   : > { %2137 = vadd.xlane.f32.xlu0 %v2136_v2 }
0x1196   : > { %v2129_v25 = vpop.xlane.xlu1 %2128 }
0x1197   : > { %7966 = vrcp.f32 %v2129_v25 }
0x1198   : > { %v2132_v34 = vpop.xlane.xlu0 %2131 }
0x1199   : > { %7968 = vrcp.f32 %v2132_v34 }
0x119a   : > { %v2135_v21 = vpop.xlane.xlu1 %2134 }
0x119b   : > { %7970 = vrcp.f32 %v2135_v21 }
0x119c   : > { %v2138_v26 = vpop.xlane.xlu0 %2137 }
0x119d   : > { %7972 = vrcp.f32 %v2138_v26 }
0x11a1   : > { %v7967_v27 = vpop.eup %7966 }
0x11a2   : > { %v2143_v59 = vmul.f32 %v7967_v27, %v7959_v52 }
0x11a3   : > { %v7969_v43 = vpop.eup %7968 }
0x11a4   : > { %v2144_v20 = vmul.f32 %v7969_v43, %v7961_v4 }
0x11a5   : > { %v7971_v30 = vpop.eup %7970 }
0x11a6   : > { %v2147_v54 = vpack.c.bf16 %v2144_v20, %v2143_v59  ;;  %v2145_v33 = vmul.f32 %v7971_v30, %v7963_v10 }
0x11a7   : > { %v7973_v29 = vpop.eup %7972 }
0x11a8   : > { %v2146_v45 = vmul.f32 %v7973_v29, %v7965_v23  ;;  %7335 = vmatprep.mubr.msk.bf16.mxu0 %vm743_vm6, %v2147_v54 }
0x11aa   : > { %v2148_v7 = vpack.c.bf16 %v2146_v45, %v2145_v33 }
0x11ac   : > { %7336 = vmatmul.mubr.msk.bf16.vlgmr.msra.gmra.mrb[36].mxu0 %vm743_vm6, %v2148_v7 }
0x11ad   : > { %7340 = vmatpush3.bf16.xpose.msra.mxu0 %v9290_v13  ;;  %7343 = vmatprep.mubr.msk.bf16.mxu0 %vm743_vm6, %v9346_v56 }
0x11ae   : > { %7639 = vmatprep.subr.msk.bf16.mxu0 %vm743_vm6, %v9282_v31 }
0x11b5   : > { %7342 = vmatpush3.bf16.xpose.msra.mxu0 %v9297_v14 }
0x11b6   : > { %7363 = vmatprep.subr.bf16.mxu0 %v9356_v18 }
0x11bc   : > { %7344 = vmatmul.mubr.msk.bf16.vlgmr.msra.gmra.mrb[40].mxu0 %vm743_vm6, %v9332_v39 }
0x11bd   : > { %7364 = vmatpush3.bf16.msra.mxu0 %v9356_v18 }
0x11be   : > { %7365 = vmatprep.subr.bf16.mxu0 %v9354_v17 }
0x11c1   : > { %7366 = vmatpush3.bf16.msra.mxu0 %v9354_v17 }
0x11c2   : > { %7642 = vmatprep.subr.msk.bf16.mxu0 %vm743_vm6, %v9284_v19 }
0x127f   : > { %v9402_v56 = vpop.f32.mrb[36].mxu0 }
0x1280   : > { %v9404_v40 = vpop.f32.mrb[37].mxu0 }
0x1281   : > { %v9406_v37 = vpop.f32.mrb[38].mxu0 }
0x1282   : > { %v9408_v38 = vpop.f32.mrb[39].mxu0 }
0x128f   : > { %v7345_v60 = vpop.f32.mrb[40].mxu0 }
0x1290   : > { %v2258_v47 = vpop.f32.mrb[41].mxu0  ;;  %v2275_v63 = vmul.f32 %v7345_v60, %v9372_v24 }
0x1291   : > { %v2273_v39 = vmul.f32 %v2258_v47, %v9372_v24  ;;  %v7346_v62 = vpop.f32.mrb[42].mxu0 }
0x1292   : > { %v2261_v9 = vpop.f32.mrb[43].mxu0  ;;  %v2276_v52 = vmul.f32 %v7346_v62, %v9372_v24  ;;  %v2283_v4 = vsel %vm743_vm6, %v2275_v63, -inf }
0x1293   : > { %v2274_v32 = vmul.f32 %v2261_v9, %v9372_v24  ;;  %v2277_v19 = vsel %vm743_vm6, %v2273_v39, -inf }
0x1294   : > { %2278 = vmax.xlane.f32.xlu1 %v2277_v19  ;;  %v2286_v5 = vsel %vm743_vm6, %v2276_v52, -inf }
0x1295   : > { %v2280_v22 = vsel %vm743_vm6, %v2274_v32, -inf }
0x1296   : > { %2281 = vmax.xlane.f32.xlu0 %v2280_v22 }
0x1298   : > { %2284 = vmax.xlane.f32.xlu1 %v2283_v4 }
0x129a   : > { %2287 = vmax.xlane.f32.xlu0 %v2286_v5 }
0x1321   : > { %v2279_v10 = vpop.xlane.xlu1 %2278 }
0x1322   : > { %v2289_v15 = vsub.f32 %v2273_v39, %v2279_v10 }
0x1323   : > { %v2282_v23 = vpop.xlane.xlu0 %2281 }
0x1324   : > { %v2293_v2 = vmul.f32 1.442695, %v2289_v15  ;;  %v2290_v25 = vsub.f32 %v2274_v32, %v2282_v23 }
0x1325   : > { %v2285_v34 = vpop.xlane.xlu1 %2284 }
0x1326   : > { %7974 = vpow2.f32 %v2293_v2  ;;  %v2295_v21 = vmul.f32 1.442695, %v2290_v25  ;;  %v2291_v26 = vsub.f32 %v2275_v63, %v2285_v34 }
0x1327   : > { %v2288_v27 = vpop.xlane.xlu0 %2287 }
0x1328   : > { %7976 = vpow2.f32 %v2295_v21  ;;  %v2297_v43 = vmul.f32 1.442695, %v2291_v26  ;;  %v2292_v59 = vsub.f32 %v2276_v52, %v2288_v27  ;;  %v2204_v26 = vsel %vm566_vm13, %v9404_v40, 0.0 }
0x1329   : > { %v2205_v40 = vsel %vm566_vm13, %v9408_v38, 0.0 }
0x132a   : > { %7978 = vpow2.f32 %v2297_v43  ;;  %v2299_v20 = vmul.f32 1.442695, %v2292_v59 }
0x132c   : > { %7980 = vpow2.f32 %v2299_v20 }
0x1330   : > { %v7975_v30 = vpop.eup %7974 }
0x1331   : > { %v2301_v54 = vsel %vm743_vm6, %v7975_v30, 0.0 }
0x1332   : > { %v7977_v29 = vpop.eup %7976  ;;  %2302 = vadd.xlane.f32.xlu1 %v2301_v54 }
0x1333   : > { %v2304_v33 = vsel %vm743_vm6, %v7977_v29, 0.0 }
0x1334   : > { %v7979_v45 = vpop.eup %7978  ;;  %2305 = vadd.xlane.f32.xlu0 %v2304_v33 }
0x1335   : > { %v2307_v7 = vsel %vm743_vm6, %v7979_v45, 0.0 }
0x1336   : > { %v7981_v60 = vpop.eup %7980  ;;  %2308 = vadd.xlane.f32.xlu1 %v2307_v7 }
0x1337   : > { %v2310_v47 = vsel %vm743_vm6, %v7981_v60, 0.0 }
0x1338   : > { %2311 = vadd.xlane.f32.xlu0 %v2310_v47 }
0x13bf   : > { %v2303_v39 = vpop.xlane.xlu1 %2302 }
0x13c0   : > { %7982 = vrcp.f32 %v2303_v39 }
0x13c1   : > { %v2306_v62 = vpop.xlane.xlu0 %2305 }
0x13c2   : > { %7984 = vrcp.f32 %v2306_v62 }
0x13c3   : > { %v2309_v9 = vpop.xlane.xlu1 %2308 }
0x13c4   : > { %7986 = vrcp.f32 %v2309_v9 }
0x13c5   : > { %v2312_v63 = vpop.xlane.xlu0 %2311 }
0x13c6   : > { %7988 = vrcp.f32 %v2312_v63 }
0x13ca   : > { %v7983_v32 = vpop.eup %7982 }
0x13cb   : > { %v2317_v52 = vmul.f32 %v7983_v32, %v7975_v30 }
0x13cc   : > { %v7985_v19 = vpop.eup %7984 }
0x13cd   : > { %v2318_v22 = vmul.f32 %v7985_v19, %v7977_v29 }
0x13ce   : > { %v7987_v4 = vpop.eup %7986 }
0x13cf   : > { %v2321_v5 = vpack.c.bf16 %v2318_v22, %v2317_v52  ;;  %v2319_v15 = vmul.f32 %v7987_v4, %v7979_v45 }
0x13d0   : > { %v7989_v10 = vpop.eup %7988 }
0x13d1   : > { %v2320_v23 = vmul.f32 %v7989_v10, %v7981_v60  ;;  %7351 = vmatprep.mubr.msk.bf16.mxu1 %vm743_vm6, %v2321_v5 }
0x13d3   : > { %v2322_v2 = vpack.c.bf16 %v2320_v23, %v2319_v15 }
0x13d5   : > { %7352 = vmatmul.mubr.msk.bf16.vlgmr.msra.gmra.mrb[32].mxu1 %vm743_vm6, %v2322_v2 }
0x13d6   : > { %7356 = vmatpush3.bf16.xpose.msra.mxu1 %v9290_v13  ;;  %7359 = vmatprep.mubr.msk.bf16.mxu1 %vm743_vm6, %v9348_v3  ;;  %v2206_v3 = vsel %vm566_vm13, %v9402_v56, 0.0 }
0x13d7   : > { %7641 = vmatprep.subr.msk.bf16.mxu1 %vm743_vm6, %v9282_v31 }
0x13de   : > { %7358 = vmatpush3.bf16.xpose.msra.mxu1 %v9297_v14 }
0x13df   : > { %7379 = vmatprep.subr.bf16.mxu1 %v9356_v18 }
0x13e5   : > { %7360 = vmatmul.mubr.msk.bf16.vlgmr.msra.gmra.mrb[36].mxu1 %vm743_vm6, %v9334_v42 }
0x13e6   : > { %7380 = vmatpush3.bf16.msra.mxu1 %v9356_v18 }
0x13e7   : > { %7381 = vmatprep.subr.bf16.mxu1 %v9354_v17 }
0x13ea   : > { %7382 = vmatpush3.bf16.msra.mxu1 %v9354_v17  ;;  %v2207_v17 = vsel %vm566_vm13, %v9406_v37, 0.0 }
0x14a8   : > { %v7353_v25 = vpop.f32.mrb[32].mxu1 }
0x14a9   : > { %v2380_v34 = vsel %vm8934_vm14, %v7353_v25, 0.0  ;;  %v2363_v21 = vpop.f32.mrb[33].mxu1 }
0x14aa   : > { %v9444_v42 = vadd.f32 %v2380_v34, %v2206_v3  ;;  %v2378_v18 = vsel %vm8934_vm14, %v2363_v21, 0.0  ;;  %v7354_v27 = vpop.f32.mrb[34].mxu1 }
0x14ab   : > { %v9451_v43 = vadd.f32 %v2378_v18, %v2204_v26  ;;  %v2381_v56 = vsel %vm8934_vm14, %v7354_v27, 0.0  ;;  %v2366_v59 = vpop.f32.mrb[35].mxu1 }
0x14ac   : > { %v9458_v20 = vadd.f32 %v2381_v56, %v2207_v17  ;;  %v2379_v30 = vsel %vm8934_vm14, %v2366_v59, 0.0 }
0x14ad   : > { %v9462_v54 = vadd.f32 %v2379_v30, %v2205_v40 }
0x14b8   : > { %v7361_v29 = vpop.f32.mrb[36].mxu1 }
0x14b9   : > { %v2432_v33 = vpop.f32.mrb[37].mxu1  ;;  %v2449_v60 = vmul.f32 %v7361_v29, %v9372_v24 }
0x14ba   : > { %v2447_v37 = vmul.f32 %v2432_v33, %v9372_v24  ;;  %v7362_v45 = vpop.f32.mrb[38].mxu1 }
0x14bb   : > { %v2435_v7 = vpop.f32.mrb[39].mxu1  ;;  %v2450_v38 = vmul.f32 %v7362_v45, %v9372_v24  ;;  %v2457_v9 = vsel %vm743_vm6, %v2449_v60, -inf }
0x14bc   : > { %v2448_v47 = vmul.f32 %v2435_v7, %v9372_v24  ;;  %v2451_v39 = vsel %vm743_vm6, %v2447_v37, -inf }
0x14bd   : > { %2452 = vmax.xlane.f32.xlu1 %v2451_v39  ;;  %v2460_v63 = vsel %vm743_vm6, %v2450_v38, -inf }
0x14be   : > { %v2454_v62 = vsel %vm743_vm6, %v2448_v47, -inf }
0x14bf   : > { %2455 = vmax.xlane.f32.xlu0 %v2454_v62 }
0x14c1   : > { %2458 = vmax.xlane.f32.xlu1 %v2457_v9 }
0x14c3   : > { %2461 = vmax.xlane.f32.xlu0 %v2460_v63 }
0x154a   : > { %v2453_v32 = vpop.xlane.xlu1 %2452 }
0x154b   : > { %v2463_v19 = vsub.f32 %v2447_v37, %v2453_v32 }
0x154c   : > { %v2456_v52 = vpop.xlane.xlu0 %2455 }
0x154d   : > { %v2467_v22 = vmul.f32 1.442695, %v2463_v19  ;;  %v2464_v4 = vsub.f32 %v2448_v47, %v2456_v52 }
0x154e   : > { %v2459_v5 = vpop.xlane.xlu1 %2458 }
0x154f   : > { %7990 = vpow2.f32 %v2467_v22  ;;  %v2469_v10 = vmul.f32 1.442695, %v2464_v4  ;;  %v2465_v15 = vsub.f32 %v2449_v60, %v2459_v5 }
0x1550   : > { %v2462_v23 = vpop.xlane.xlu0 %2461 }
0x1551   : > { %7992 = vpow2.f32 %v2469_v10  ;;  %v2471_v2 = vmul.f32 1.442695, %v2465_v15  ;;  %v2466_v25 = vsub.f32 %v2450_v38, %v2462_v23 }
0x1553   : > { %7994 = vpow2.f32 %v2471_v2  ;;  %v2473_v3 = vmul.f32 1.442695, %v2466_v25 }
0x1555   : > { %7996 = vpow2.f32 %v2473_v3 }
0x1559   : > { %v7991_v34 = vpop.eup %7990 }
0x155a   : > { %v2475_v21 = vsel %vm743_vm6, %v7991_v34, 0.0 }
0x155b   : > { %v7993_v26 = vpop.eup %7992  ;;  %2476 = vadd.xlane.f32.xlu1 %v2475_v21 }
0x155c   : > { %v2478_v18 = vsel %vm743_vm6, %v7993_v26, 0.0 }
0x155d   : > { %v7995_v27 = vpop.eup %7994  ;;  %2479 = vadd.xlane.f32.xlu0 %v2478_v18 }
0x155e   : > { %v2481_v17 = vsel %vm743_vm6, %v7995_v27, 0.0 }
0x155f   : > { %v7997_v56 = vpop.eup %7996  ;;  %2482 = vadd.xlane.f32.xlu1 %v2481_v17 }
0x1560   : > { %v2484_v59 = vsel %vm743_vm6, %v7997_v56, 0.0 }
0x1561   : > { %2485 = vadd.xlane.f32.xlu0 %v2484_v59 }
0x15e8   : > { %v2477_v40 = vpop.xlane.xlu1 %2476 }
0x15e9   : > { %7998 = vrcp.f32 %v2477_v40 }
0x15ea   : > { %v2480_v30 = vpop.xlane.xlu0 %2479 }
0x15eb   : > { %8000 = vrcp.f32 %v2480_v30 }
0x15ec   : > { %v2483_v29 = vpop.xlane.xlu1 %2482 }
0x15ed   : > { %8002 = vrcp.f32 %v2483_v29 }
0x15ee   : > { %v2486_v33 = vpop.xlane.xlu0 %2485 }
0x15ef   : > { %8004 = vrcp.f32 %v2486_v33 }
0x15f3   : > { %v7999_v37 = vpop.eup %7998 }
0x15f4   : > { %v2491_v7 = vmul.f32 %v7999_v37, %v7991_v34 }
0x15f5   : > { %v8001_v45 = vpop.eup %8000 }
0x15f6   : > { %v2492_v60 = vmul.f32 %v8001_v45, %v7993_v26 }
0x15f7   : > { %v8003_v47 = vpop.eup %8002 }
0x15f8   : > { %v2495_v39 = vpack.c.bf16 %v2492_v60, %v2491_v7  ;;  %v2493_v62 = vmul.f32 %v8003_v47, %v7995_v27 }
0x15f9   : > { %v8005_v38 = vpop.eup %8004 }
0x15fa   : > { %v2494_v9 = vmul.f32 %v8005_v38, %v7997_v56  ;;  %7367 = vmatprep.mubr.msk.bf16.mxu0 %vm743_vm6, %v2495_v39 }
0x15fc   : > { %v2496_v63 = vpack.c.bf16 %v2494_v9, %v2493_v62 }
0x15fe   : > { %7368 = vmatmul.mubr.msk.bf16.vlgmr.msra.gmra.mrb[44].mxu0 %vm743_vm6, %v2496_v63 }
0x15ff   : > { %7372 = vmatpush3.bf16.xpose.msra.mxu0 %v9290_v13  ;;  %7375 = vmatprep.mubr.msk.bf16.mxu0 %vm743_vm6, %v9350_v6 }
0x1600   : > { %7643 = vmatprep.subr.msk.bf16.mxu0 %vm743_vm6, %v9282_v31 }
0x1607   : > { %7374 = vmatpush3.bf16.xpose.msra.mxu0 %v9297_v14 }
0x160e   : > { %7376 = vmatmul.mubr.msk.bf16.vlgmr.msra.gmra.mrb[48].mxu0 %vm743_vm6, %v9336_v8 }
0x16d1   : > { %v7369_v32 = vpop.f32.mrb[44].mxu0 }
0x16d2   : > { %v2554_v19 = vsel %vm8938_vm15, %v7369_v32, 0.0  ;;  %v2537_v52 = vpop.f32.mrb[45].mxu0 }
0x16d3   : > { %v9489_v22 = vadd.f32 %v2554_v19, %v9444_v42  ;;  %v2552_v13 = vsel %vm8938_vm15, %v2537_v52, 0.0  ;;  %v7370_v6 = vpop.f32.mrb[46].mxu0 }
0x16d4   : > { %v9494_v4 = vadd.f32 %v2552_v13, %v9451_v43  ;;  %v2555_v31 = vsel %vm8938_vm15, %v7370_v6, 0.0  ;;  %v2540_v14 = vpop.f32.mrb[47].mxu0 }
0x16d5   : > { %v9499_v8 = vadd.f32 %v2555_v31, %v9458_v20  ;;  %v2553_v5 = vsel %vm8938_vm15, %v2540_v14, 0.0 }
0x16d6   : > { %v9504_v42 = vadd.f32 %v2553_v5, %v9462_v54 }
0x16e1   : > { %v7377_v10 = vpop.f32.mrb[48].mxu0 }
0x16e2   : > { %v2606_v15 = vpop.f32.mrb[49].mxu0  ;;  %v2623_v25 = vmul.f32 %v7377_v10, %v9372_v24 }
0x16e3   : > { %v2621_v23 = vmul.f32 %v2606_v15, %v9372_v24  ;;  %v7378_v2 = vpop.f32.mrb[50].mxu0 }
0x16e4   : > { %v2609_v43 = vpop.f32.mrb[51].mxu0  ;;  %v2624_v20 = vmul.f32 %v7378_v2, %v9372_v24  ;;  %v2631_v54 = vsel %vm743_vm6, %v2623_v25, -inf }
0x16e5   : > { %v2622_v3 = vmul.f32 %v2609_v43, %v9372_v24  ;;  %v2625_v34 = vsel %vm743_vm6, %v2621_v23, -inf }
0x16e6   : > { %2626 = vmax.xlane.f32.xlu1 %v2625_v34  ;;  %v2634_v26 = vsel %vm743_vm6, %v2624_v20, -inf  ;;  %v7791_v34 = vld [vmem:[%s10383_s13 + $0x78] sm:$0xff]  }
0x16e7   : > { %v2628_v21 = vsel %vm743_vm6, %v2622_v3, -inf }
0x16e8   : > { %2629 = vmax.xlane.f32.xlu0 %v2628_v21 }
0x16ea   : > { %2632 = vmax.xlane.f32.xlu1 %v2631_v54 }
0x16ec   : > { %2635 = vmax.xlane.f32.xlu0 %v2634_v26 }
0x1773   : > { %v2627_v18 = vpop.xlane.xlu1 %2626 }
0x1774   : > { %v2637_v27 = vsub.f32 %v2621_v23, %v2627_v18 }
0x1775   : > { %v2630_v17 = vpop.xlane.xlu0 %2629 }
0x1776   : > { %v2641_v56 = vmul.f32 1.442695, %v2637_v27  ;;  %v2638_v59 = vsub.f32 %v2622_v3, %v2630_v17  ;;  %v7790_v3 = vld [vmem:[%s10383_s13 + $0x70] sm:$0xff]  }
0x1777   : > { %v2633_v40 = vpop.xlane.xlu1 %2632  ;;  %7387 = vmatprep.subr.bf16.mxu1 %v7790_v3 }
0x1778   : > { %8006 = vpow2.f32 %v2641_v56  ;;  %v2643_v30 = vmul.f32 1.442695, %v2638_v59  ;;  %v2639_v29 = vsub.f32 %v2623_v25, %v2633_v40 }
0x1779   : > { %v2636_v33 = vpop.xlane.xlu0 %2635 }
0x177a   : > { %8008 = vpow2.f32 %v2643_v30  ;;  %v2645_v24 = vmul.f32 1.442695, %v2639_v29  ;;  %v2640_v37 = vsub.f32 %v2624_v20, %v2636_v33 }
0x177c   : > { %8010 = vpow2.f32 %v2645_v24  ;;  %v2647_v45 = vmul.f32 1.442695, %v2640_v37 }
0x177e   : > { %8012 = vpow2.f32 %v2647_v45 }
0x1782   : > { %v8007_v7 = vpop.eup %8006 }
0x1783   : > { %v2649_v60 = vsel %vm743_vm6, %v8007_v7, 0.0 }
0x1784   : > { %v8009_v47 = vpop.eup %8008  ;;  %2650 = vadd.xlane.f32.xlu1 %v2649_v60 }
0x1785   : > { %v2652_v39 = vsel %vm743_vm6, %v8009_v47, 0.0 }
0x1786   : > { %v8011_v38 = vpop.eup %8010  ;;  %2653 = vadd.xlane.f32.xlu0 %v2652_v39 }
0x1787   : > { %v2655_v62 = vsel %vm743_vm6, %v8011_v38, 0.0 }
0x1788   : > { %v8013_v9 = vpop.eup %8012  ;;  %2656 = vadd.xlane.f32.xlu1 %v2655_v62 }
0x1789   : > { %v2658_v63 = vsel %vm743_vm6, %v8013_v9, 0.0 }
0x178a   : > { %2659 = vadd.xlane.f32.xlu0 %v2658_v63 }
0x1811   : > { %v2651_v32 = vpop.xlane.xlu1 %2650 }
0x1812   : > { %8014 = vrcp.f32 %v2651_v32 }
0x1813   : > { %v2654_v19 = vpop.xlane.xlu0 %2653 }
0x1814   : > { %8016 = vrcp.f32 %v2654_v19 }
0x1815   : > { %v2657_v52 = vpop.xlane.xlu1 %2656 }
0x1816   : > { %8018 = vrcp.f32 %v2657_v52 }
0x1817   : > { %v2660_v13 = vpop.xlane.xlu0 %2659 }
0x1818   : > { %8020 = vrcp.f32 %v2660_v13 }
0x181c   : > { %v8015_v6 = vpop.eup %8014 }
0x181d   : > { %v2665_v14 = vmul.f32 %v8015_v6, %v8007_v7 }
0x181e   : > { %v8017_v31 = vpop.eup %8016 }
0x181f   : > { %v2666_v5 = vmul.f32 %v8017_v31, %v8009_v47 }
0x1820   : > { %v8019_v10 = vpop.eup %8018 }
0x1821   : > { %v2669_v15 = vpack.c.bf16 %v2666_v5, %v2665_v14  ;;  %v2667_v2 = vmul.f32 %v8019_v10, %v8011_v38 }
0x1822   : > { %v8021_v23 = vpop.eup %8020 }
0x1823   : > { %v2668_v43 = vmul.f32 %v8021_v23, %v8013_v9  ;;  %7383 = vmatprep.mubr.msk.bf16.mxu1 %vm743_vm6, %v2669_v15 }
0x1825   : > { %v2670_v25 = vpack.c.bf16 %v2668_v43, %v2667_v2 }
0x1827   : > { %7384 = vmatmul.mubr.msk.bf16.vlgmr.msra.gmra.mrb[40].mxu1 %vm743_vm6, %v2670_v25 }
0x1828   : > { %7388 = vmatpush3.bf16.msra.mxu1 %v7790_v3 }
0x1829   : > { %7389 = vmatprep.subr.bf16.mxu1 %v7791_v34 }
0x182c   : > { %7390 = vmatpush3.bf16.msra.mxu1 %v7791_v34 }
0x18fa   : > { %v7385_v20 = vpop.f32.mrb[40].mxu1 }
0x18fb   : > { %v2728_v21 = vsel %vm8942_vm0, %v7385_v20, 0.0  ;;  %v2711_v54 = vpop.f32.mrb[41].mxu1 }
0x18fc   : > { %v2732_v26 = vadd.f32 %v2728_v21, %v9489_v22  ;;  %v2726_v18 = vsel %vm8942_vm0, %v2711_v54, 0.0  ;;  %v7386_v27 = vpop.f32.mrb[42].mxu1  ;;  %v2739_v22 = vrot.slane %v9248_v28, %v8910_v44 }
0x18fd   : > { %v2730_v17 = vadd.f32 %v2726_v18, %v9494_v4  ;;  %v2729_v56 = vsel %vm8942_vm0, %v7386_v27, 0.0  ;;  %v2714_v59 = vpop.f32.mrb[43].mxu1  ;;  %v7793_v18 = vld [vmem:[#allocation4 + $0x8] sm:$0xff]  }
0x18fe   : > { %v2733_v40 = vadd.f32 %v2729_v56, %v9499_v8  ;;  %v2727_v30 = vsel %vm8942_vm0, %v2714_v59, 0.0 }
0x18ff   : > { %v2731_v29 = vadd.f32 %v2727_v30, %v9504_v42 }
0x1900   : > { %v2735_v33 = vpack.c.bf16 %v2733_v40, %v2732_v26  ;;  %v7792_v26 = vld [vmem:[#allocation4] sm:$0xff]  }
0x1901   : > { %v2734_v24 = vpack.c.bf16 %v2731_v29, %v2730_v17  ;;  %7395 = vmatprep.subr.bf16.mxu0 %v7792_v26 }
0x1902   : > { %7396 = vmatpush3.bf16.msra.mxu0 %v7792_v26 }
0x1903   : > { %7391 = vmatprep.mubr.msk.bf16.mxu1 %vm743_vm6, %v2734_v24  ;;  %7397 = vmatprep.subr.bf16.mxu0 %v7793_v18 }
0x1904   : > { %7392 = vmatmul.mubr.msk.bf16.vlgmr.msra.gmra.mrb[44].mxu1 %vm743_vm6, %v2735_v33 }
0x1906   : > { %7398 = vmatpush3.bf16.msra.mxu0 %v7793_v18 }
0x19d7   : > { %v7393_v4 = vpop.f32.mrb[44].mxu1 }
0x19d8   : > { %v2792_v37 = vpop.f32.mrb[45].mxu1  ;;  %v2801_v45 = vadd.f32 %v7393_v4, %v2739_v22 }
0x19d9   : > { %v2793_v7 = vadd.f32 %v2792_v37, %v2739_v22  ;;  %v7394_v60 = vpop.f32.mrb[46].mxu1 }
0x19da   : > { %v2795_v8 = vpop.f32.mrb[47].mxu1  ;;  %v2804_v47 = vadd.f32 %v7394_v60, %v2739_v22  ;;  %v2809_v9 = vadd.f32 %v2801_v45, %v9264_v35  ;;  %v2866_v45 = vrot.slane %v9248_v28, %v9029_v58 }
0x19db   : > { %v2796_v39 = vadd.f32 %v2795_v8, %v2739_v22  ;;  %v2807_v38 = vadd.f32 %v2793_v7, %v9257_v49 }
0x19dc   : > { %v2810_v32 = vadd.f32 %v2804_v47, %v9266_v61  ;;  %v2817_v19 = vsel %vm743_vm6, %v2809_v9, 0.0 }
0x19dd   : > { %v2811_v42 = vsel %vm743_vm6, %v2807_v38, 0.0  ;;  %v2808_v62 = vadd.f32 %v2796_v39, %v9259_v51 }
0x19de   : > { %2812 = vadd.xlane.f32.xlu1 %v2811_v42  ;;  %v2820_v52 = vsel %vm743_vm6, %v2810_v32, 0.0 }
0x19df   : > { %v2814_v63 = vsel %vm743_vm6, %v2808_v62, 0.0 }
0x19e0   : > { %2815 = vadd.xlane.f32.xlu0 %v2814_v63 }
0x19e2   : > { %2818 = vadd.xlane.f32.xlu1 %v2817_v19 }
0x19e4   : > { %2821 = vadd.xlane.f32.xlu0 %v2820_v52 }
0x1a6b   : > { %v2813_v13 = vpop.xlane.xlu1 %2812 }
0x1a6c   : > { %v2823_v49 = vmul.f32 0.03125, %v2813_v13 }
0x1a6d   : > { %v2816_v6 = vpop.xlane.xlu0 %2815 }
0x1a6e   : > { %v2827_v31 = vsub.f32 %v2807_v38, %v2823_v49  ;;  %v2824_v14 = vmul.f32 0.03125, %v2816_v6  ;;  %v9559_v38 = vld [vmem:[%s10386_s29 + $0x8] sm:$0xff] }
0x1a6f   : > { %v2819_v51 = vpop.xlane.xlu1 %2818  ;;  %v2874_v42 = vrot.slane %v9559_v38, %v9305_v16 }
0x1a70   : > { %v2828_v5 = vsub.f32 %v2808_v62, %v2824_v14  ;;  %v2825_v35 = vmul.f32 0.03125, %v2819_v51  ;;  %v2831_v10 = vmul.f32 %v2827_v31, %v2827_v31 }
0x1a71   : > { %v2822_v15 = vpop.xlane.xlu0 %2821 }
0x1a72   : > { %v2829_v23 = vsub.f32 %v2809_v9, %v2825_v35  ;;  %v2826_v2 = vmul.f32 0.03125, %v2822_v15  ;;  %v2835_v61 = vsel %vm743_vm6, %v2831_v10, 0.0  ;;  %v2832_v43 = vmul.f32 %v2828_v5, %v2828_v5  ;;  %v7795_v35 = vld [vmem:[%s10393_s24 + $0x8] sm:$0xff]   ;;  %v7796_v10 = vld [vmem:[%s10393_s24 + $0x10] sm:$0xff]   ;;  %v7797_v15 = vld [vmem:[%s10393_s24 + $0x18] sm:$0xff]  }
0x1a73   : > { %2836 = vadd.xlane.f32.xlu1 %v2835_v61 }
0x1a74   : > { %v2830_v25 = vsub.f32 %v2810_v32, %v2826_v2  ;;  %v2838_v3 = vsel %vm743_vm6, %v2832_v43, 0.0  ;;  %v2833_v34 = vmul.f32 %v2829_v23, %v2829_v23 }
0x1a75   : > { %2839 = vadd.xlane.f32.xlu0 %v2838_v3 }
0x1a76   : > { %v2841_v20 = vsel %vm743_vm6, %v2833_v34, 0.0  ;;  %v2834_v21 = vmul.f32 %v2830_v25, %v2830_v25 }
0x1a77   : > { %2842 = vadd.xlane.f32.xlu1 %v2841_v20 }
0x1a78   : > { %v2844_v54 = vsel %vm743_vm6, %v2834_v21, 0.0 }
0x1a79   : > { %2845 = vadd.xlane.f32.xlu0 %v2844_v54 }
0x1b00   : > { %v2837_v27 = vpop.xlane.xlu1 %2836 }
0x1b01   : > { %v2847_v17 = vmul.f32 0.03125, %v2837_v27 }
0x1b02   : > { %v2840_v56 = vpop.xlane.xlu0 %2839 }
0x1b03   : > { %v2851_v59 = vadd.f32 1e-05, %v2847_v17  ;;  %v2848_v40 = vmul.f32 0.03125, %v2840_v56 }
0x1b04   : > { %v2843_v30 = vpop.xlane.xlu1 %2842 }
0x1b05   : > { %8022 = vrsqrt.f32 %v2851_v59  ;;  %v2852_v29 = vadd.f32 1e-05, %v2848_v40  ;;  %v2849_v33 = vmul.f32 0.03125, %v2843_v30 }
0x1b06   : > { %v2846_v24 = vpop.xlane.xlu0 %2845 }
0x1b07   : > { %8024 = vrsqrt.f32 %v2852_v29  ;;  %v2853_v22 = vadd.f32 1e-05, %v2849_v33  ;;  %v2850_v4 = vmul.f32 0.03125, %v2846_v24 }
0x1b09   : > { %8026 = vrsqrt.f32 %v2853_v22  ;;  %v2854_v37 = vadd.f32 1e-05, %v2850_v4 }
0x1b0b   : > { %8028 = vrsqrt.f32 %v2854_v37 }
0x1b0f   : > { %v8023_v7 = vpop.eup %8022 }
0x1b10   : > { %v2859_v60 = vmul.f32 %v8023_v7, %v2827_v31 }
0x1b11   : > { %v8025_v8 = vpop.eup %8024 }
0x1b12   : > { %v2860_v47 = vmul.f32 %v8025_v8, %v2828_v5  ;;  %v2867_v39 = vmul.f32 %v2866_v45, %v2859_v60  ;;  %v7794_v5 = vld [vmem:[%s10393_s24] sm:$0xff]  }
0x1b13   : > { %v8027_v62 = vpop.eup %8026  ;;  %7403 = vmatprep.subr.bf16.mxu1 %v7794_v5 }
0x1b14   : > { %v2861_v9 = vmul.f32 %v8027_v62, %v2829_v23  ;;  %v2868_v63 = vmul.f32 %v2866_v45, %v2860_v47  ;;  %v9563_v28 = vadd.f32 %v2874_v42, %v2867_v39  ;;  %7404 = vmatpush3.bf16.msra.mxu1 %v7794_v5  ;;  %v6707_v23 = vld [vmem:[#allocation6] ss:$0 sm:$0xff] }
0x1b15   : > { %v8029_v32 = vpop.eup %8028  ;;  %7405 = vmatprep.subr.bf16.mxu1 %v7795_v35 }
0x1b16   : > { %v2869_v19 = vmul.f32 %v2866_v45, %v2861_v9  ;;  %v2862_v52 = vmul.f32 %v8029_v32, %v2830_v25  ;;  %v9565_v13 = vadd.f32 %v2874_v42, %v2868_v63 }
0x1b18   : > { %v2870_v49 = vmul.f32 %v2866_v45, %v2862_v52  ;;  %v2879_v6 = vpack.c.bf16 %v9565_v13, %v9563_v28  ;;  %v9570_v31 = vadd.f32 %v2874_v42, %v2869_v19  ;;  %7406 = vmatpush3.bf16.msra.mxu1 %v7795_v35 }
0x1b19   : > { %7407 = vmatprep.subr.bf16.mxu1 %v7796_v10 }
0x1b1a   : > { %7399 = vmatprep.mubr.msk.bf16.mxu0 %vm743_vm6, %v2879_v6  ;;  %v9572_v14 = vadd.f32 %v2874_v42, %v2870_v49 }
0x1b1c   : > { %v2880_v51 = vpack.c.bf16 %v9572_v14, %v9570_v31  ;;  %7408 = vmatpush3.bf16.msra.mxu1 %v7796_v10 }
0x1b1d   : > { %7409 = vmatprep.subr.bf16.mxu1 %v7797_v15 }
0x1b1e   : > { %7400 = vmatmul.mubr.msk.bf16.vlgmr.msra.gmra.mrb[52].mxu0 %vm743_vm6, %v2880_v51 }
0x1b20   : > { %7410 = vmatpush3.bf16.msra.mxu1 %v7797_v15 }
0x1bf1   : > { %v7401_v2 = vpop.f32.mrb[52].mxu0 }
0x1bf2   : > { %v2953_v61 = vadd.f32 %v7401_v2, %v6707_v23  ;;  %v2944_v43 = vpop.f32.mrb[53].mxu0 }
0x1bf3   : > { %v2945_v25 = vadd.f32 %v6707_v23, %v2944_v43  ;;  %v7402_v3 = vpop.f32.mrb[54].mxu0 }
0x1bf4   : > { %v2961_v34 = vmul.f32 %v2953_v61, %v2953_v61  ;;  %v2956_v20 = vadd.f32 %v7402_v3, %v6707_v23  ;;  %v2947_v21 = vpop.f32.mrb[55].mxu0  ;;  %v3008_v3 = vrot.slane %v9559_v38, %v8927_v48 }
0x1bf5   : > { %v2959_v54 = vmul.f32 %v2945_v25, %v2945_v25  ;;  %v2948_v26 = vadd.f32 %v6707_v23, %v2947_v21 }
0x1bf6   : > { %v2965_v18 = vmul.f32 %v2961_v34, %v2953_v61  ;;  %v2962_v27 = vmul.f32 %v2956_v20, %v2956_v20 }
0x1bf7   : > { %v2963_v17 = vmul.f32 %v2959_v54, %v2945_v25  ;;  %v2960_v56 = vmul.f32 %v2948_v26, %v2948_v26 }
0x1bf8   : > { %v2969_v59 = vmul.f32 0.044715, %v2965_v18  ;;  %v2966_v40 = vmul.f32 %v2962_v27, %v2956_v20 }
0x1bf9   : > { %v2967_v30 = vmul.f32 0.044715, %v2963_v17  ;;  %v2964_v29 = vmul.f32 %v2960_v56, %v2948_v26 }
0x1bfa   : > { %v2973_v33 = vadd.f32 %v2969_v59, %v2953_v61  ;;  %v2970_v24 = vmul.f32 0.044715, %v2966_v40 }
0x1bfb   : > { %v2971_v22 = vadd.f32 %v2967_v30, %v2945_v25  ;;  %v2968_v4 = vmul.f32 0.044715, %v2964_v29 }
0x1bfc   : > { %v2977_v37 = vmul.f32 0.7978846, %v2973_v33  ;;  %v2974_v45 = vadd.f32 %v2970_v24, %v2956_v20 }
0x1bfd   : > { %v2975_v7 = vmul.f32 0.7978846, %v2971_v22  ;;  %v2972_v60 = vadd.f32 %v2968_v4, %v2948_v26 }
0x1bfe   : > { %8030 = vtanh.f32 %v2977_v37  ;;  %v2978_v8 = vmul.f32 0.7978846, %v2974_v45 }
0x1bff   : > { %8032 = vtanh.f32 %v2975_v7  ;;  %v2976_v47 = vmul.f32 0.7978846, %v2972_v60 }
0x1c00   : > { %8034 = vtanh.f32 %v2978_v8 }
0x1c01   : > { %8036 = vtanh.f32 %v2976_v47 }
0x1c08   : > { %v8031_v39 = vpop.eup %8030 }
0x1c09   : > { %v8033_v42 = vpop.eup %8032  ;;  %v2985_v62 = vadd.f32 1.0, %v8031_v39 }
0x1c0a   : > { %v8035_v9 = vpop.eup %8034  ;;  %v2983_v63 = vadd.f32 1.0, %v8033_v42 }
0x1c0b   : > { %v8037_v32 = vpop.eup %8036  ;;  %v2989_v19 = vmul.f32 0.5, %v2985_v62  ;;  %v2986_v52 = vadd.f32 1.0, %v8035_v9 }
0x1c0c   : > { %v2987_v49 = vmul.f32 0.5, %v2983_v63  ;;  %v2984_v6 = vadd.f32 1.0, %v8037_v32 }
0x1c0d   : > { %v2990_v51 = vmul.f32 0.5, %v2986_v52  ;;  %v2993_v35 = vmul.f32 %v2989_v19, %v2953_v61  ;;  %v7798_v52 = vld [vmem:[%s10383_s13 + $0x80] sm:$0xff]  }
0x1c0e   : > { %v2988_v5 = vmul.f32 0.5, %v2984_v6  ;;  %v2991_v15 = vmul.f32 %v2987_v49, %v2945_v25  ;;  %v7799_v49 = vld [vmem:[%s10383_s13 + $0xa0] sm:$0xff]   ;;  %7415 = vmatprep.subr.bf16.mxu0 %v7798_v52  ;;  %v7800_v6 = vld [vmem:[%s10383_s13 + $0x88] sm:$0xff]  }
0x1c0f   : > { %v2994_v10 = vmul.f32 %v2990_v51, %v2956_v20  ;;  %7431 = vmatprep.subr.bf16.mxu1 %v7799_v49  ;;  %7416 = vmatpush3.bf16.msra.mxu0 %v7798_v52  ;;  %v7801_v51 = vld [vmem:[%s10383_s13 + $0xa8] sm:$0xff]  }
0x1c10   : > { %v2992_v23 = vmul.f32 %v2988_v5, %v2948_v26  ;;  %7417 = vmatprep.subr.bf16.mxu0 %v7800_v6  ;;  %v7802_v5 = vld [vmem:[%s10383_s13 + $0x90] sm:$0xff]  }
0x1c11   : > { %v2996_v2 = vpack.c.bf16 %v2994_v10, %v2993_v35 }
0x1c12   : > { %v2995_v43 = vpack.c.bf16 %v2992_v23, %v2991_v15 }
0x1c13   : > { %7418 = vmatpush3.bf16.msra.mxu0 %v7800_v6 }
0x1c14   : > { %7411 = vmatprep.mubr.msk.bf16.mxu1 %vm3033_vm1, %v2995_v43  ;;  %7423 = vmatprep.subr.bf16.mxu0 %v7802_v5 }
0x1c15   : > { %7412 = vmatmul.mubr.msk.bf16.vlgmr.msra.gmra.mrb[48].mxu1 %vm3033_vm1, %v2996_v2 }
0x1c16   : > { %7432 = vmatpush3.bf16.msra.mxu1 %v7799_v49 }
0x1c17   : > { %7433 = vmatprep.subr.bf16.mxu1 %v7801_v51 }
0x1c1a   : > { %7434 = vmatpush3.bf16.msra.mxu1 %v7801_v51 }
0x1ce8   : > { %v7413_v34 = vpop.f32.mrb[48].mxu1 }
0x1ce9   : > { %v3074_v21 = vpop.f32.mrb[49].mxu1  ;;  %v3083_v54 = vadd.f32 %v7413_v34, %v3008_v3 }
0x1cea   : > { %v3075_v18 = vadd.f32 %v3074_v21, %v3008_v3  ;;  %v7414_v27 = vpop.f32.mrb[50].mxu1 }
0x1ceb   : > { %v3077_v17 = vpop.f32.mrb[51].mxu1  ;;  %v3086_v61 = vadd.f32 %v7414_v27, %v3008_v3  ;;  %v3091_v59 = vadd.f32 %v3083_v54, %v9570_v31 }
0x1cec   : > { %v3078_v20 = vadd.f32 %v3077_v17, %v3008_v3  ;;  %v3089_v25 = vadd.f32 %v3075_v18, %v9563_v28  ;;  %v3148_v17 = vrot.slane %v9559_v38, %v9301_v41 }
0x1ced   : > { %v3092_v30 = vadd.f32 %v3086_v61, %v9572_v14  ;;  %v3099_v29 = vsel %vm743_vm6, %v3091_v59, 0.0 }
0x1cee   : > { %v3093_v26 = vsel %vm743_vm6, %v3089_v25, 0.0  ;;  %v3090_v56 = vadd.f32 %v3078_v20, %v9565_v13 }
0x1cef   : > { %3094 = vadd.xlane.f32.xlu1 %v3093_v26  ;;  %v3102_v33 = vsel %vm743_vm6, %v3092_v30, 0.0 }
0x1cf0   : > { %v3096_v40 = vsel %vm743_vm6, %v3090_v56, 0.0 }
0x1cf1   : > { %3097 = vadd.xlane.f32.xlu0 %v3096_v40  ;;  %v6718_v40 = vld [vmem:[%s10386_s29 + $0x10] ss:$0 sm:$0xff] }
0x1cf3   : > { %3100 = vadd.xlane.f32.xlu1 %v3099_v29 }
0x1cf5   : > { %3103 = vadd.xlane.f32.xlu0 %v3102_v33 }
0x1d7c   : > { %v3095_v24 = vpop.xlane.xlu1 %3094 }
0x1d7d   : > { %v3105_v28 = vmul.f32 0.03125, %v3095_v24 }
0x1d7e   : > { %v3098_v22 = vpop.xlane.xlu0 %3097 }
0x1d7f   : > { %v3109_v4 = vsub.f32 %v3089_v25, %v3105_v28  ;;  %v3106_v37 = vmul.f32 0.03125, %v3098_v22 }
0x1d80   : > { %v3101_v13 = vpop.xlane.xlu1 %3100 }
0x1d81   : > { %v3110_v45 = vsub.f32 %v3090_v56, %v3106_v37  ;;  %v3107_v31 = vmul.f32 0.03125, %v3101_v13  ;;  %v3113_v7 = vmul.f32 %v3109_v4, %v3109_v4 }
0x1d82   : > { %v3104_v60 = vpop.xlane.xlu0 %3103 }
0x1d83   : > { %v3111_v8 = vsub.f32 %v3091_v59, %v3107_v31  ;;  %v3108_v47 = vmul.f32 0.03125, %v3104_v60  ;;  %v3117_v14 = vsel %vm743_vm6, %v3113_v7, 0.0  ;;  %v3114_v39 = vmul.f32 %v3110_v45, %v3110_v45  ;;  %v7803_v7 = vld [vmem:[%s10383_s13 + $0x98] sm:$0xff]  }
0x1d84   : > { %3118 = vadd.xlane.f32.xlu1 %v3117_v14  ;;  %v9649_v60 = vld [vmem:[%s10386_s29 + $0x18] sm:$0xff] }
0x1d85   : > { %v3112_v42 = vsub.f32 %v3092_v30, %v3108_v47  ;;  %v3120_v62 = vsel %vm743_vm6, %v3114_v39, 0.0  ;;  %v3115_v9 = vmul.f32 %v3111_v8, %v3111_v8  ;;  %v3326_v47 = vrot.slane %v9649_v60, %v8927_v48 }
0x1d86   : > { %3121 = vadd.xlane.f32.xlu0 %v3120_v62  ;;  %v3261_v52 = vrot.slane %v9649_v60, %v8918_v46 }
0x1d87   : > { %v3123_v63 = vsel %vm743_vm6, %v3115_v9, 0.0  ;;  %v3116_v32 = vmul.f32 %v3112_v42, %v3112_v42 }
0x1d88   : > { %3124 = vadd.xlane.f32.xlu1 %v3123_v63 }
0x1d89   : > { %v3126_v19 = vsel %vm743_vm6, %v3116_v32, 0.0 }
0x1d8a   : > { %3127 = vadd.xlane.f32.xlu0 %v3126_v19 }
0x1e11   : > { %v3119_v35 = vpop.xlane.xlu1 %3118 }
0x1e12   : > { %v3129_v10 = vmul.f32 0.03125, %v3119_v35 }
0x1e13   : > { %v3122_v15 = vpop.xlane.xlu0 %3121 }
0x1e14   : > { %v3133_v23 = vadd.f32 1e-05, %v3129_v10  ;;  %v3130_v2 = vmul.f32 0.03125, %v3122_v15 }
0x1e15   : > { %v3125_v43 = vpop.xlane.xlu1 %3124 }
0x1e16   : > { %8038 = vrsqrt.f32 %v3133_v23  ;;  %v3134_v3 = vadd.f32 1e-05, %v3130_v2  ;;  %v3131_v34 = vmul.f32 0.03125, %v3125_v43 }
0x1e17   : > { %v3128_v21 = vpop.xlane.xlu0 %3127 }
0x1e18   : > { %8040 = vrsqrt.f32 %v3134_v3  ;;  %v3135_v54 = vadd.f32 1e-05, %v3131_v34  ;;  %v3132_v18 = vmul.f32 0.03125, %v3128_v21 }
0x1e1a   : > { %8042 = vrsqrt.f32 %v3135_v54  ;;  %v3136_v27 = vadd.f32 1e-05, %v3132_v18 }
0x1e1c   : > { %8044 = vrsqrt.f32 %v3136_v27 }
0x1e20   : > { %v8039_v61 = vpop.eup %8038 }
0x1e21   : > { %v3141_v20 = vmul.f32 %v8039_v61, %v3109_v4 }
0x1e22   : > { %v8041_v25 = vpop.eup %8040 }
0x1e23   : > { %v3142_v26 = vmul.f32 %v8041_v25, %v3110_v45  ;;  %v3149_v56 = vmul.f32 %v3148_v17, %v3141_v20 }
0x1e24   : > { %v8043_v59 = vpop.eup %8042 }
0x1e25   : > { %v3143_v30 = vmul.f32 %v8043_v59, %v3111_v8  ;;  %v3150_v29 = vmul.f32 %v3148_v17, %v3142_v26  ;;  %v9625_v22 = vadd.f32 %v6718_v40, %v3149_v56  ;;  %v3190_v8 = vrot.slane %v9649_v60, %v8910_v44 }
0x1e26   : > { %v8045_v33 = vpop.eup %8044 }
0x1e27   : > { %v3151_v24 = vmul.f32 %v3148_v17, %v3143_v30  ;;  %v3144_v28 = vmul.f32 %v8045_v33, %v3112_v42  ;;  %v9627_v37 = vadd.f32 %v6718_v40, %v3150_v29 }
0x1e29   : > { %v3152_v38 = vmul.f32 %v3148_v17, %v3144_v28  ;;  %v3185_v4 = vpack.c.bf16 %v9627_v37, %v9625_v22  ;;  %v9633_v13 = vadd.f32 %v6718_v40, %v3151_v24 }
0x1e2b   : > { %7419 = vmatprep.mubr.msk.bf16.mxu0 %vm743_vm6, %v3185_v4  ;;  %7435 = vmatprep.mubr.msk.bf16.mxu1 %vm743_vm6, %v3185_v4  ;;  %v9635_v45 = vadd.f32 %v6718_v40, %v3152_v38 }
0x1e2d   : > { %v3186_v31 = vpack.c.bf16 %v9635_v45, %v9633_v13 }
0x1e2f   : > { %7420 = vmatmul.mubr.msk.bf16.vlgmr.msra.gmra.mrb[56].mxu0 %vm743_vm6, %v3186_v31  ;;  %7436 = vmatmul.mubr.msk.bf16.vlgmr.msra.gmra.mrb[52].mxu1 %vm743_vm6, %v3186_v31 }
0x1e30   : > { %7424 = vmatpush3.bf16.msra.mxu0 %v7802_v5  ;;  %7427 = vmatprep.mubr.msk.bf16.mxu0 %vm743_vm6, %v3185_v4 }
0x1e31   : > { %7425 = vmatprep.subr.bf16.mxu0 %v7803_v7 }
0x1e34   : > { %7426 = vmatpush3.bf16.msra.mxu0 %v7803_v7 }
0x1e37   : > { %7428 = vmatmul.mubr.msk.bf16.vlgmr.msra.gmra.mrb[60].mxu0 %vm743_vm6, %v3186_v31 }
0x1f02   : > { %v7421_v14 = vpop.f32.mrb[56].mxu0  ;;  %v7437_v39 = vpop.f32.mrb[52].mxu1 }
0x1f03   : > { %v3252_v42 = vadd.f32 %v7421_v14, %v3190_v8  ;;  %v3243_v62 = vpop.f32.mrb[57].mxu0  ;;  %v3373_v9 = vpop.f32.mrb[53].mxu1  ;;  %v3382_v51 = vadd.f32 %v7437_v39, %v3326_v47 }
0x1f04   : > { %v3244_v63 = vadd.f32 %v3243_v62, %v3190_v8  ;;  %v7422_v32 = vpop.f32.mrb[58].mxu0  ;;  %v7438_v19 = vpop.f32.mrb[54].mxu1  ;;  %v3374_v5 = vadd.f32 %v3373_v9, %v3326_v47 }
0x1f05   : > { %v3394_v49 = vsel %vm566_vm13, %v3252_v42, 0.0  ;;  %v3578_v6 = vsel %vm8934_vm14, %v3252_v42, 0.0  ;;  %v3246_v35 = vpop.f32.mrb[59].mxu0  ;;  %v3376_v10 = vpop.f32.mrb[55].mxu1  ;;  %v3255_v15 = vadd.f32 %v7422_v32, %v3190_v8  ;;  %v3385_v23 = vadd.f32 %v7438_v19, %v3326_v47 }
0x1f06   : > { %v3247_v2 = vadd.f32 %v3246_v35, %v3190_v8  ;;  %v3377_v43 = vadd.f32 %v3376_v10, %v3326_v47  ;;  %v3752_v3 = vsel %vm8938_vm15, %v3252_v42, 0.0  ;;  %v3926_v34 = vsel %vm8942_vm0, %v3252_v42, 0.0 }
0x1f07   : > { %v3392_v21 = vsel %vm566_vm13, %v3244_v63, 0.0  ;;  %v3576_v54 = vsel %vm8934_vm14, %v3244_v63, 0.0  ;;  %v3395_v18 = vsel %vm566_vm13, %v3255_v15, 0.0  ;;  %v3579_v27 = vsel %vm8934_vm14, %v3255_v15, 0.0 }
0x1f08   : > { %v3753_v17 = vsel %vm8938_vm15, %v3255_v15, 0.0  ;;  %v3927_v61 = vsel %vm8942_vm0, %v3255_v15, 0.0  ;;  %v3397_v20 = vpack.c.bf16 %v3395_v18, %v3394_v49  ;;  %v9677_v25 = vpack.c.bf16 %v3579_v27, %v3578_v6 }
0x1f09   : > { %v9679_v26 = vpack.c.bf16 %v3753_v17, %v3752_v3  ;;  %v9681_v56 = vpack.c.bf16 %v3927_v61, %v3926_v34  ;;  %v9683_v59 = vpack.c.bf16 %v3385_v23, %v3382_v51  ;;  %v9685_v40 = vpack.c.bf16 %v3377_v43, %v3374_v5 }
0x1f0a   : > { %v7429_v30 = vpop.f32.mrb[60].mxu0  ;;  %v3393_v29 = vsel %vm566_vm13, %v3247_v2, 0.0  ;;  %v3577_v33 = vsel %vm8934_vm14, %v3247_v2, 0.0  ;;  %v3750_v4 = vsel %vm8938_vm15, %v3244_v63, 0.0  ;;  %v3751_v31 = vsel %vm8938_vm15, %v3247_v2, 0.0 }
0x1f0b   : > { %v3308_v24 = vpop.f32.mrb[61].mxu0  ;;  %v3396_v28 = vpack.c.bf16 %v3393_v29, %v3392_v21  ;;  %v9691_v38 = vpack.c.bf16 %v3577_v33, %v3576_v54  ;;  %7447 = vmatprep.subr.bf16.mxu1 %v9685_v40  ;;  %v9698_v8 = vpack.c.bf16 %v3751_v31, %v3750_v4  ;;  %v3924_v47 = vsel %vm8942_vm0, %v3244_v63, 0.0 }
0x1f0c   : > { %v7430_v7 = vpop.f32.mrb[62].mxu0  ;;  %v3925_v14 = vsel %vm8942_vm0, %v3247_v2, 0.0  ;;  %v3317_v39 = vadd.f32 %v7429_v30, %v3261_v52  ;;  %7448 = vmatpush3.bf16.msra.mxu1 %v9685_v40  ;;  %v3309_v32 = vadd.f32 %v3308_v24, %v3261_v52  ;;  %v9739_v51 = vrot.slane %v9649_v60, %v9029_v58 }
0x1f0d   : > { %7443 = vmatprep.mubr.msk.bf16.mxu0 %vm743_vm6, %v3396_v28  ;;  %v3320_v42 = vadd.f32 %v7430_v7, %v3261_v52  ;;  %v3311_v62 = vpop.f32.mrb[63].mxu0  ;;  %v9706_v9 = vpack.c.bf16 %v3925_v14, %v3924_v47  ;;  %7449 = vmatprep.subr.bf16.mxu1 %v9683_v59 }
0x1f0e   : > { %v3312_v19 = vadd.f32 %v3311_v62, %v3261_v52 }
0x1f0f   : > { %v9709_v49 = vpack.c.bf16 %v3320_v42, %v3317_v39 }
0x1f10   : > { %v9711_v6 = vpack.c.bf16 %v3312_v19, %v3309_v32  ;;  %7450 = vmatpush3.bf16.msra.mxu1 %v9683_v59 }
0x1f11   : > { %v9727_v52 = vsel %vm743_vm6, %v9709_v49, 0 }
0x1f12   : > { %7644 = vmatprep.subr.msk.bf16.mxu0 %vm743_vm6, %v9711_v6  ;;  %7646 = vmatprep.subr.msk.bf16.mxu1 %vm743_vm6, %v9711_v6  ;;  %v9720_v63 = vsel %vm743_vm6, %v9711_v6, 0 }
0x1f13   : > { %7440 = vmatpush3.bf16.xpose.msra.mxu0 %v9720_v63 }
0x1f14   : > { %7645 = vmatprep.subr.msk.bf16.mxu0 %vm743_vm6, %v9709_v49 }
0x1f1b   : > { %7442 = vmatpush3.bf16.xpose.msra.mxu0 %v9727_v52 }
0x1f1c   : > { %7463 = vmatprep.subr.bf16.mxu0 %v9685_v40 }
0x1f22   : > { %7444 = vmatmul.mubr.msk.bf16.vlgmr.msra.gmra.mrb[64].mxu0 %vm743_vm6, %v3397_v20 }
0x1f23   : > { %7464 = vmatpush3.bf16.msra.mxu0 %v9685_v40 }
0x1f24   : > { %7465 = vmatprep.subr.bf16.mxu0 %v9683_v59 }
0x1f27   : > { %7466 = vmatpush3.bf16.msra.mxu0 %v9683_v59 }
0x1f28   : > { %7648 = vmatprep.subr.msk.bf16.mxu0 %vm743_vm6, %v9711_v6 }
0x1ff5   : > { %v7445_v5 = vpop.f32.mrb[64].mxu0 }
0x1ff6   : > { %v3444_v35 = vpop.f32.mrb[65].mxu0  ;;  %v3465_v2 = vmul.f32 %v7445_v5, %v9739_v51 }
0x1ff7   : > { %v3463_v10 = vmul.f32 %v9739_v51, %v3444_v35  ;;  %v7446_v15 = vpop.f32.mrb[66].mxu0 }
0x1ff8   : > { %v3447_v23 = vpop.f32.mrb[67].mxu0  ;;  %v3466_v34 = vmul.f32 %v7446_v15, %v9739_v51  ;;  %v3473_v54 = vsel %vm743_vm6, %v3465_v2, -inf }
0x1ff9   : > { %v3464_v43 = vmul.f32 %v9739_v51, %v3447_v23  ;;  %v3467_v3 = vsel %vm743_vm6, %v3463_v10, -inf }
0x1ffa   : > { %3468 = vmax.xlane.f32.xlu1 %v3467_v3  ;;  %v3476_v18 = vsel %vm743_vm6, %v3466_v34, -inf }
0x1ffb   : > { %v3470_v21 = vsel %vm743_vm6, %v3464_v43, -inf }
0x1ffc   : > { %3471 = vmax.xlane.f32.xlu0 %v3470_v21 }
0x1ffe   : > { %3474 = vmax.xlane.f32.xlu1 %v3473_v54 }
0x2000   : > { %3477 = vmax.xlane.f32.xlu0 %v3476_v18 }
0x2087   : > { %v3469_v27 = vpop.xlane.xlu1 %3468 }
0x2088   : > { %v3479_v17 = vsub.f32 %v3463_v10, %v3469_v27 }
0x2089   : > { %v3472_v61 = vpop.xlane.xlu0 %3471 }
0x208a   : > { %v3483_v20 = vmul.f32 1.442695, %v3479_v17  ;;  %v3480_v30 = vsub.f32 %v3464_v43, %v3472_v61 }
0x208b   : > { %v3475_v29 = vpop.xlane.xlu1 %3474 }
0x208c   : > { %8046 = vpow2.f32 %v3483_v20  ;;  %v3485_v33 = vmul.f32 1.442695, %v3480_v30  ;;  %v3481_v24 = vsub.f32 %v3465_v2, %v3475_v29 }
0x208d   : > { %v3478_v28 = vpop.xlane.xlu0 %3477 }
0x208e   : > { %8048 = vpow2.f32 %v3485_v33  ;;  %v3487_v4 = vmul.f32 1.442695, %v3481_v24  ;;  %v3482_v31 = vsub.f32 %v3466_v34, %v3478_v28 }
0x2090   : > { %8050 = vpow2.f32 %v3487_v4  ;;  %v3489_v7 = vmul.f32 1.442695, %v3482_v31 }
0x2092   : > { %8052 = vpow2.f32 %v3489_v7 }
0x2096   : > { %v8047_v47 = vpop.eup %8046 }
0x2097   : > { %v3491_v14 = vsel %vm743_vm6, %v8047_v47, 0.0 }
0x2098   : > { %v8049_v39 = vpop.eup %8048  ;;  %3492 = vadd.xlane.f32.xlu1 %v3491_v14 }
0x2099   : > { %v3494_v42 = vsel %vm743_vm6, %v8049_v39, 0.0 }
0x209a   : > { %v8051_v62 = vpop.eup %8050  ;;  %3495 = vadd.xlane.f32.xlu0 %v3494_v42 }
0x209b   : > { %v3497_v32 = vsel %vm743_vm6, %v8051_v62, 0.0 }
0x209c   : > { %v8053_v19 = vpop.eup %8052  ;;  %3498 = vadd.xlane.f32.xlu1 %v3497_v32 }
0x209d   : > { %v3500_v5 = vsel %vm743_vm6, %v8053_v19, 0.0 }
0x209e   : > { %3501 = vadd.xlane.f32.xlu0 %v3500_v5 }
0x2125   : > { %v3493_v35 = vpop.xlane.xlu1 %3492 }
0x2126   : > { %8054 = vrcp.f32 %v3493_v35 }
0x2127   : > { %v3496_v10 = vpop.xlane.xlu0 %3495 }
0x2128   : > { %8056 = vrcp.f32 %v3496_v10 }
0x2129   : > { %v3499_v15 = vpop.xlane.xlu1 %3498 }
0x212a   : > { %8058 = vrcp.f32 %v3499_v15 }
0x212b   : > { %v3502_v23 = vpop.xlane.xlu0 %3501 }
0x212c   : > { %8060 = vrcp.f32 %v3502_v23 }
0x2130   : > { %v8055_v2 = vpop.eup %8054 }
0x2131   : > { %v3507_v3 = vmul.f32 %v8055_v2, %v8047_v47 }
0x2132   : > { %v8057_v43 = vpop.eup %8056 }
0x2133   : > { %v3508_v34 = vmul.f32 %v8057_v43, %v8049_v39 }
0x2134   : > { %v8059_v21 = vpop.eup %8058 }
0x2135   : > { %v3511_v54 = vpack.c.bf16 %v3508_v34, %v3507_v3  ;;  %v3509_v27 = vmul.f32 %v8059_v21, %v8051_v62 }
0x2136   : > { %v8061_v18 = vpop.eup %8060 }
0x2137   : > { %v3510_v17 = vmul.f32 %v8061_v18, %v8053_v19  ;;  %7451 = vmatprep.mubr.msk.bf16.mxu1 %vm743_vm6, %v3511_v54 }
0x2139   : > { %v3512_v61 = vpack.c.bf16 %v3510_v17, %v3509_v27 }
0x213b   : > { %7452 = vmatmul.mubr.msk.bf16.vlgmr.msra.gmra.mrb[56].mxu1 %vm743_vm6, %v3512_v61 }
0x213c   : > { %7456 = vmatpush3.bf16.xpose.msra.mxu1 %v9720_v63  ;;  %7459 = vmatprep.mubr.msk.bf16.mxu1 %vm743_vm6, %v9691_v38 }
0x213d   : > { %7647 = vmatprep.subr.msk.bf16.mxu1 %vm743_vm6, %v9709_v49 }
0x2144   : > { %7458 = vmatpush3.bf16.xpose.msra.mxu1 %v9727_v52 }
0x2145   : > { %7479 = vmatprep.subr.bf16.mxu1 %v9685_v40 }
0x214b   : > { %7460 = vmatmul.mubr.msk.bf16.vlgmr.msra.gmra.mrb[60].mxu1 %vm743_vm6, %v9677_v25 }
0x214c   : > { %7480 = vmatpush3.bf16.msra.mxu1 %v9685_v40 }
0x214d   : > { %7481 = vmatprep.subr.bf16.mxu1 %v9683_v59 }
0x2150   : > { %7482 = vmatpush3.bf16.msra.mxu1 %v9683_v59 }
0x2151   : > { %7650 = vmatprep.subr.msk.bf16.mxu1 %vm743_vm6, %v9711_v6 }
0x220e   : > { %v9769_v38 = vpop.f32.mrb[56].mxu1 }
0x220f   : > { %v9771_v20 = vpop.f32.mrb[57].mxu1 }
0x2210   : > { %v9773_v30 = vpop.f32.mrb[58].mxu1 }
0x2211   : > { %v9775_v29 = vpop.f32.mrb[59].mxu1 }
0x221e   : > { %v7461_v33 = vpop.f32.mrb[60].mxu1 }
0x221f   : > { %v3622_v24 = vpop.f32.mrb[61].mxu1  ;;  %v3639_v31 = vmul.f32 %v7461_v33, %v9739_v51 }
0x2220   : > { %v3637_v25 = vmul.f32 %v3622_v24, %v9739_v51  ;;  %v7462_v28 = vpop.f32.mrb[62].mxu1 }
0x2221   : > { %v3625_v4 = vpop.f32.mrb[63].mxu1  ;;  %v3640_v47 = vmul.f32 %v7462_v28, %v9739_v51  ;;  %v3647_v39 = vsel %vm743_vm6, %v3639_v31, -inf }
0x2222   : > { %v3638_v7 = vmul.f32 %v3625_v4, %v9739_v51  ;;  %v3641_v6 = vsel %vm743_vm6, %v3637_v25, -inf }
0x2223   : > { %3642 = vmax.xlane.f32.xlu1 %v3641_v6  ;;  %v3650_v42 = vsel %vm743_vm6, %v3640_v47, -inf }
0x2224   : > { %v3644_v14 = vsel %vm743_vm6, %v3638_v7, -inf }
0x2225   : > { %3645 = vmax.xlane.f32.xlu0 %v3644_v14 }
0x2227   : > { %3648 = vmax.xlane.f32.xlu1 %v3647_v39 }
0x2229   : > { %3651 = vmax.xlane.f32.xlu0 %v3650_v42 }
0x22b0   : > { %v3643_v62 = vpop.xlane.xlu1 %3642 }
0x22b1   : > { %v3653_v32 = vsub.f32 %v3637_v25, %v3643_v62 }
0x22b2   : > { %v3646_v19 = vpop.xlane.xlu0 %3645 }
0x22b3   : > { %v3657_v5 = vmul.f32 1.442695, %v3653_v32  ;;  %v3654_v35 = vsub.f32 %v3638_v7, %v3646_v19 }
0x22b4   : > { %v3649_v10 = vpop.xlane.xlu1 %3648 }
0x22b5   : > { %8062 = vpow2.f32 %v3657_v5  ;;  %v3659_v15 = vmul.f32 1.442695, %v3654_v35  ;;  %v3655_v23 = vsub.f32 %v3639_v31, %v3649_v10 }
0x22b6   : > { %v3652_v2 = vpop.xlane.xlu0 %3651 }
0x22b7   : > { %8064 = vpow2.f32 %v3659_v15  ;;  %v3661_v43 = vmul.f32 1.442695, %v3655_v23  ;;  %v3656_v3 = vsub.f32 %v3640_v47, %v3652_v2  ;;  %v3568_v23 = vsel %vm566_vm13, %v9771_v20, 0.0 }
0x22b8   : > { %v3569_v20 = vsel %vm566_vm13, %v9775_v29, 0.0 }
0x22b9   : > { %8066 = vpow2.f32 %v3661_v43  ;;  %v3663_v34 = vmul.f32 1.442695, %v3656_v3 }
0x22bb   : > { %8068 = vpow2.f32 %v3663_v34 }
0x22bf   : > { %v8063_v21 = vpop.eup %8062 }
0x22c0   : > { %v3665_v54 = vsel %vm743_vm6, %v8063_v21, 0.0 }
0x22c1   : > { %v8065_v18 = vpop.eup %8064  ;;  %3666 = vadd.xlane.f32.xlu1 %v3665_v54 }
0x22c2   : > { %v3668_v27 = vsel %vm743_vm6, %v8065_v18, 0.0 }
0x22c3   : > { %v8067_v17 = vpop.eup %8066  ;;  %3669 = vadd.xlane.f32.xlu0 %v3668_v27 }
0x22c4   : > { %v3671_v61 = vsel %vm743_vm6, %v8067_v17, 0.0 }
0x22c5   : > { %v8069_v33 = vpop.eup %8068  ;;  %3672 = vadd.xlane.f32.xlu1 %v3671_v61 }
0x22c6   : > { %v3674_v24 = vsel %vm743_vm6, %v8069_v33, 0.0 }
0x22c7   : > { %3675 = vadd.xlane.f32.xlu0 %v3674_v24 }
0x234e   : > { %v3667_v25 = vpop.xlane.xlu1 %3666 }
0x234f   : > { %8070 = vrcp.f32 %v3667_v25 }
0x2350   : > { %v3670_v28 = vpop.xlane.xlu0 %3669 }
0x2351   : > { %8072 = vrcp.f32 %v3670_v28 }
0x2352   : > { %v3673_v4 = vpop.xlane.xlu1 %3672 }
0x2353   : > { %8074 = vrcp.f32 %v3673_v4 }
0x2354   : > { %v3676_v31 = vpop.xlane.xlu0 %3675 }
0x2355   : > { %8076 = vrcp.f32 %v3676_v31 }
0x2359   : > { %v8071_v7 = vpop.eup %8070 }
0x235a   : > { %v3681_v47 = vmul.f32 %v8071_v7, %v8063_v21 }
0x235b   : > { %v8073_v6 = vpop.eup %8072 }
0x235c   : > { %v3682_v14 = vmul.f32 %v8073_v6, %v8065_v18 }
0x235d   : > { %v8075_v39 = vpop.eup %8074 }
0x235e   : > { %v3685_v42 = vpack.c.bf16 %v3682_v14, %v3681_v47  ;;  %v3683_v32 = vmul.f32 %v8075_v39, %v8067_v17 }
0x235f   : > { %v8077_v62 = vpop.eup %8076 }
0x2360   : > { %v3684_v19 = vmul.f32 %v8077_v62, %v8069_v33  ;;  %7467 = vmatprep.mubr.msk.bf16.mxu0 %vm743_vm6, %v3685_v42 }
0x2362   : > { %v3686_v5 = vpack.c.bf16 %v3684_v19, %v3683_v32 }
0x2364   : > { %7468 = vmatmul.mubr.msk.bf16.vlgmr.msra.gmra.mrb[68].mxu0 %vm743_vm6, %v3686_v5 }
0x2365   : > { %7472 = vmatpush3.bf16.xpose.msra.mxu0 %v9720_v63  ;;  %7475 = vmatprep.mubr.msk.bf16.mxu0 %vm743_vm6, %v9698_v8  ;;  %v3570_v8 = vsel %vm566_vm13, %v9769_v38, 0.0 }
0x2366   : > { %7649 = vmatprep.subr.msk.bf16.mxu0 %vm743_vm6, %v9709_v49 }
0x236d   : > { %7474 = vmatpush3.bf16.xpose.msra.mxu0 %v9727_v52 }
0x236e   : > { %7495 = vmatprep.subr.bf16.mxu0 %v9685_v40 }
0x2374   : > { %7476 = vmatmul.mubr.msk.bf16.vlgmr.msra.gmra.mrb[72].mxu0 %vm743_vm6, %v9679_v26 }
0x2375   : > { %7496 = vmatpush3.bf16.msra.mxu0 %v9685_v40 }
0x2376   : > { %7497 = vmatprep.subr.bf16.mxu0 %v9683_v59 }
0x2379   : > { %7498 = vmatpush3.bf16.msra.mxu0 %v9683_v59  ;;  %v3571_v59 = vsel %vm566_vm13, %v9773_v30, 0.0 }
0x2437   : > { %v7469_v35 = vpop.f32.mrb[68].mxu0 }
0x2438   : > { %v3744_v10 = vsel %vm8934_vm14, %v7469_v35, 0.0  ;;  %v3727_v15 = vpop.f32.mrb[69].mxu0 }
0x2439   : > { %v9811_v26 = vadd.f32 %v3744_v10, %v3570_v8  ;;  %v3742_v40 = vsel %vm8934_vm14, %v3727_v15, 0.0  ;;  %v7470_v2 = vpop.f32.mrb[70].mxu0 }
0x243a   : > { %v9818_v43 = vadd.f32 %v3742_v40, %v3568_v23  ;;  %v3745_v38 = vsel %vm8934_vm14, %v7470_v2, 0.0  ;;  %v3730_v3 = vpop.f32.mrb[71].mxu0 }
0x243b   : > { %v9825_v34 = vadd.f32 %v3745_v38, %v3571_v59  ;;  %v3743_v21 = vsel %vm8934_vm14, %v3730_v3, 0.0 }
0x243c   : > { %v9829_v54 = vadd.f32 %v3743_v21, %v3569_v20 }
0x2447   : > { %v7477_v18 = vpop.f32.mrb[72].mxu0 }
0x2448   : > { %v3796_v27 = vpop.f32.mrb[73].mxu0  ;;  %v3813_v33 = vmul.f32 %v7477_v18, %v9739_v51 }
0x2449   : > { %v3811_v30 = vmul.f32 %v3796_v27, %v9739_v51  ;;  %v7478_v17 = vpop.f32.mrb[74].mxu0 }
0x244a   : > { %v3799_v61 = vpop.f32.mrb[75].mxu0  ;;  %v3814_v29 = vmul.f32 %v7478_v17, %v9739_v51  ;;  %v3821_v4 = vsel %vm743_vm6, %v3813_v33, -inf }
0x244b   : > { %v3812_v24 = vmul.f32 %v3799_v61, %v9739_v51  ;;  %v3815_v25 = vsel %vm743_vm6, %v3811_v30, -inf }
0x244c   : > { %3816 = vmax.xlane.f32.xlu1 %v3815_v25  ;;  %v3824_v31 = vsel %vm743_vm6, %v3814_v29, -inf }
0x244d   : > { %v3818_v28 = vsel %vm743_vm6, %v3812_v24, -inf }
0x244e   : > { %3819 = vmax.xlane.f32.xlu0 %v3818_v28 }
0x2450   : > { %3822 = vmax.xlane.f32.xlu1 %v3821_v4 }
0x2452   : > { %3825 = vmax.xlane.f32.xlu0 %v3824_v31 }
0x24d9   : > { %v3817_v7 = vpop.xlane.xlu1 %3816 }
0x24da   : > { %v3827_v6 = vsub.f32 %v3811_v30, %v3817_v7 }
0x24db   : > { %v3820_v47 = vpop.xlane.xlu0 %3819 }
0x24dc   : > { %v3831_v14 = vmul.f32 1.442695, %v3827_v6  ;;  %v3828_v39 = vsub.f32 %v3812_v24, %v3820_v47 }
0x24dd   : > { %v3823_v42 = vpop.xlane.xlu1 %3822 }
0x24de   : > { %8078 = vpow2.f32 %v3831_v14  ;;  %v3833_v62 = vmul.f32 1.442695, %v3828_v39  ;;  %v3829_v32 = vsub.f32 %v3813_v33, %v3823_v42 }
0x24df   : > { %v3826_v19 = vpop.xlane.xlu0 %3825 }
0x24e0   : > { %8080 = vpow2.f32 %v3833_v62  ;;  %v3835_v5 = vmul.f32 1.442695, %v3829_v32  ;;  %v3830_v35 = vsub.f32 %v3814_v29, %v3826_v19 }
0x24e2   : > { %8082 = vpow2.f32 %v3835_v5  ;;  %v3837_v8 = vmul.f32 1.442695, %v3830_v35 }
0x24e4   : > { %8084 = vpow2.f32 %v3837_v8 }
0x24e8   : > { %v8079_v10 = vpop.eup %8078 }
0x24e9   : > { %v3839_v15 = vsel %vm743_vm6, %v8079_v10, 0.0 }
0x24ea   : > { %v8081_v23 = vpop.eup %8080  ;;  %3840 = vadd.xlane.f32.xlu1 %v3839_v15 }
0x24eb   : > { %v3842_v40 = vsel %vm743_vm6, %v8081_v23, 0.0 }
0x24ec   : > { %v8083_v2 = vpop.eup %8082  ;;  %3843 = vadd.xlane.f32.xlu0 %v3842_v40 }
0x24ed   : > { %v3845_v59 = vsel %vm743_vm6, %v8083_v2, 0.0 }
0x24ee   : > { %v8085_v38 = vpop.eup %8084  ;;  %3846 = vadd.xlane.f32.xlu1 %v3845_v59 }
0x24ef   : > { %v3848_v3 = vsel %vm743_vm6, %v8085_v38, 0.0 }
0x24f0   : > { %3849 = vadd.xlane.f32.xlu0 %v3848_v3 }
0x2577   : > { %v3841_v20 = vpop.xlane.xlu1 %3840 }
0x2578   : > { %8086 = vrcp.f32 %v3841_v20 }
0x2579   : > { %v3844_v21 = vpop.xlane.xlu0 %3843 }
0x257a   : > { %8088 = vrcp.f32 %v3844_v21 }
0x257b   : > { %v3847_v18 = vpop.xlane.xlu1 %3846 }
0x257c   : > { %8090 = vrcp.f32 %v3847_v18 }
0x257d   : > { %v3850_v27 = vpop.xlane.xlu0 %3849 }
0x257e   : > { %8092 = vrcp.f32 %v3850_v27 }
0x2582   : > { %v8087_v30 = vpop.eup %8086 }
0x2583   : > { %v3855_v61 = vmul.f32 %v8087_v30, %v8079_v10 }
0x2584   : > { %v8089_v17 = vpop.eup %8088 }
0x2585   : > { %v3856_v33 = vmul.f32 %v8089_v17, %v8081_v23 }
0x2586   : > { %v8091_v24 = vpop.eup %8090 }
0x2587   : > { %v3859_v25 = vpack.c.bf16 %v3856_v33, %v3855_v61  ;;  %v3857_v28 = vmul.f32 %v8091_v24, %v8083_v2 }
0x2588   : > { %v8093_v29 = vpop.eup %8092 }
0x2589   : > { %v3858_v4 = vmul.f32 %v8093_v29, %v8085_v38  ;;  %7483 = vmatprep.mubr.msk.bf16.mxu1 %vm743_vm6, %v3859_v25 }
0x258b   : > { %v3860_v31 = vpack.c.bf16 %v3858_v4, %v3857_v28 }
0x258d   : > { %7484 = vmatmul.mubr.msk.bf16.vlgmr.msra.gmra.mrb[64].mxu1 %vm743_vm6, %v3860_v31 }
0x258e   : > { %7488 = vmatpush3.bf16.xpose.msra.mxu1 %v9720_v63  ;;  %7491 = vmatprep.mubr.msk.bf16.mxu1 %vm743_vm6, %v9706_v9 }
0x258f   : > { %7651 = vmatprep.subr.msk.bf16.mxu1 %vm743_vm6, %v9709_v49 }
0x2596   : > { %7490 = vmatpush3.bf16.xpose.msra.mxu1 %v9727_v52 }
0x259d   : > { %7492 = vmatmul.mubr.msk.bf16.vlgmr.msra.gmra.mrb[68].mxu1 %vm743_vm6, %v9681_v56 }
0x2660   : > { %v7485_v7 = vpop.f32.mrb[64].mxu1 }
0x2661   : > { %v3918_v6 = vsel %vm8938_vm15, %v7485_v7, 0.0  ;;  %v3901_v47 = vpop.f32.mrb[65].mxu1 }
0x2662   : > { %v9856_v14 = vadd.f32 %v3918_v6, %v9811_v26  ;;  %v3916_v63 = vsel %vm8938_vm15, %v3901_v47, 0.0  ;;  %v7486_v9 = vpop.f32.mrb[66].mxu1 }
0x2663   : > { %v9861_v39 = vadd.f32 %v3916_v63, %v9818_v43  ;;  %v3919_v49 = vsel %vm8938_vm15, %v7486_v9, 0.0  ;;  %v3904_v52 = vpop.f32.mrb[67].mxu1 }
0x2664   : > { %v9866_v56 = vadd.f32 %v3919_v49, %v9825_v34  ;;  %v3917_v42 = vsel %vm8938_vm15, %v3904_v52, 0.0 }
0x2665   : > { %v9871_v26 = vadd.f32 %v3917_v42, %v9829_v54 }
0x2670   : > { %v7493_v62 = vpop.f32.mrb[68].mxu1 }
0x2671   : > { %v3970_v32 = vpop.f32.mrb[69].mxu1  ;;  %v3987_v35 = vmul.f32 %v7493_v62, %v9739_v51 }
0x2672   : > { %v3985_v19 = vmul.f32 %v3970_v32, %v9739_v51  ;;  %v7494_v5 = vpop.f32.mrb[70].mxu1 }
0x2673   : > { %v3973_v43 = vpop.f32.mrb[71].mxu1  ;;  %v3988_v34 = vmul.f32 %v7494_v5, %v9739_v51  ;;  %v3995_v54 = vsel %vm743_vm6, %v3987_v35, -inf }
0x2674   : > { %v3986_v8 = vmul.f32 %v3973_v43, %v9739_v51  ;;  %v3989_v10 = vsel %vm743_vm6, %v3985_v19, -inf }
0x2675   : > { %3990 = vmax.xlane.f32.xlu1 %v3989_v10  ;;  %v3998_v23 = vsel %vm743_vm6, %v3988_v34, -inf  ;;  %v7805_v10 = vld [vmem:[%s10383_s13 + $0xb8] sm:$0xff]  }
0x2676   : > { %v3992_v15 = vsel %vm743_vm6, %v3986_v8, -inf }
0x2677   : > { %3993 = vmax.xlane.f32.xlu0 %v3992_v15 }
0x2679   : > { %3996 = vmax.xlane.f32.xlu1 %v3995_v54 }
0x267b   : > { %3999 = vmax.xlane.f32.xlu0 %v3998_v23 }
0x2702   : > { %v3991_v40 = vpop.xlane.xlu1 %3990 }
0x2703   : > { %v4001_v2 = vsub.f32 %v3985_v19, %v3991_v40 }
0x2704   : > { %v3994_v59 = vpop.xlane.xlu0 %3993 }
0x2705   : > { %v4005_v38 = vmul.f32 1.442695, %v4001_v2  ;;  %v4002_v3 = vsub.f32 %v3986_v8, %v3994_v59  ;;  %v7804_v8 = vld [vmem:[%s10383_s13 + $0xb0] sm:$0xff]  }
0x2706   : > { %v3997_v20 = vpop.xlane.xlu1 %3996  ;;  %7503 = vmatprep.subr.bf16.mxu0 %v7804_v8 }
0x2707   : > { %8094 = vpow2.f32 %v4005_v38  ;;  %v4007_v21 = vmul.f32 1.442695, %v4002_v3  ;;  %v4003_v18 = vsub.f32 %v3987_v35, %v3997_v20 }
0x2708   : > { %v4000_v27 = vpop.xlane.xlu0 %3999 }
0x2709   : > { %8096 = vpow2.f32 %v4007_v21  ;;  %v4009_v51 = vmul.f32 1.442695, %v4003_v18  ;;  %v4004_v30 = vsub.f32 %v3988_v34, %v4000_v27 }
0x270b   : > { %8098 = vpow2.f32 %v4009_v51  ;;  %v4011_v17 = vmul.f32 1.442695, %v4004_v30 }
0x270d   : > { %8100 = vpow2.f32 %v4011_v17 }
0x2711   : > { %v8095_v61 = vpop.eup %8094 }
0x2712   : > { %v4013_v33 = vsel %vm743_vm6, %v8095_v61, 0.0 }
0x2713   : > { %v8097_v24 = vpop.eup %8096  ;;  %4014 = vadd.xlane.f32.xlu1 %v4013_v33 }
0x2714   : > { %v4016_v25 = vsel %vm743_vm6, %v8097_v24, 0.0 }
0x2715   : > { %v8099_v29 = vpop.eup %8098  ;;  %4017 = vadd.xlane.f32.xlu0 %v4016_v25 }
0x2716   : > { %v4019_v28 = vsel %vm743_vm6, %v8099_v29, 0.0 }
0x2717   : > { %v8101_v4 = vpop.eup %8100  ;;  %4020 = vadd.xlane.f32.xlu1 %v4019_v28 }
0x2718   : > { %v4022_v31 = vsel %vm743_vm6, %v8101_v4, 0.0 }
0x2719   : > { %4023 = vadd.xlane.f32.xlu0 %v4022_v31 }
0x27a0   : > { %v4015_v7 = vpop.xlane.xlu1 %4014 }
0x27a1   : > { %8102 = vrcp.f32 %v4015_v7 }
0x27a2   : > { %v4018_v6 = vpop.xlane.xlu0 %4017 }
0x27a3   : > { %8104 = vrcp.f32 %v4018_v6 }
0x27a4   : > { %v4021_v47 = vpop.xlane.xlu1 %4020 }
0x27a5   : > { %8106 = vrcp.f32 %v4021_v47 }
0x27a6   : > { %v4024_v63 = vpop.xlane.xlu0 %4023 }
0x27a7   : > { %8108 = vrcp.f32 %v4024_v63 }
0x27ab   : > { %v8103_v9 = vpop.eup %8102 }
0x27ac   : > { %v4029_v52 = vmul.f32 %v8103_v9, %v8095_v61 }
0x27ad   : > { %v8105_v49 = vpop.eup %8104 }
0x27ae   : > { %v4030_v42 = vmul.f32 %v8105_v49, %v8097_v24 }
0x27af   : > { %v8107_v62 = vpop.eup %8106 }
0x27b0   : > { %v4033_v32 = vpack.c.bf16 %v4030_v42, %v4029_v52  ;;  %v4031_v5 = vmul.f32 %v8107_v62, %v8099_v29 }
0x27b1   : > { %v8109_v19 = vpop.eup %8108 }
0x27b2   : > { %v4032_v43 = vmul.f32 %v8109_v19, %v8101_v4  ;;  %7499 = vmatprep.mubr.msk.bf16.mxu0 %vm743_vm6, %v4033_v32 }
0x27b4   : > { %v4034_v35 = vpack.c.bf16 %v4032_v43, %v4031_v5 }
0x27b6   : > { %7500 = vmatmul.mubr.msk.bf16.vlgmr.msra.gmra.mrb[76].mxu0 %vm743_vm6, %v4034_v35 }
0x27b7   : > { %7504 = vmatpush3.bf16.msra.mxu0 %v7804_v8 }
0x27b8   : > { %7505 = vmatprep.subr.bf16.mxu0 %v7805_v10 }
0x27bb   : > { %7506 = vmatpush3.bf16.msra.mxu0 %v7805_v10 }
0x2889   : > { %v7501_v34 = vpop.f32.mrb[76].mxu0 }
0x288a   : > { %v4092_v15 = vsel %vm8942_vm0, %v7501_v34, 0.0  ;;  %v4075_v54 = vpop.f32.mrb[77].mxu0 }
0x288b   : > { %v4096_v23 = vadd.f32 %v4092_v15, %v9856_v14  ;;  %v4090_v40 = vsel %vm8942_vm0, %v4075_v54, 0.0  ;;  %v7502_v2 = vpop.f32.mrb[78].mxu0  ;;  %v4103_v14 = vrot.slane %v9649_v60, %v9202_v1 }
0x288c   : > { %v4094_v59 = vadd.f32 %v4090_v40, %v9861_v39  ;;  %v4093_v38 = vsel %vm8942_vm0, %v7502_v2, 0.0  ;;  %v4078_v3 = vpop.f32.mrb[79].mxu0  ;;  %v7808_v40 = vld [vmem:[%s10383_s13 + $0xc0] sm:$0xff]   ;;  %v7809_v2 = vld [vmem:[%s10383_s13 + $0xc8] sm:$0xff]  }
0x288d   : > { %v4097_v20 = vadd.f32 %v4093_v38, %v9866_v56  ;;  %v4091_v21 = vsel %vm8942_vm0, %v4078_v3, 0.0  ;;  %7511 = vmatprep.subr.bf16.mxu1 %v7808_v40 }
0x288e   : > { %v4095_v18 = vadd.f32 %v4091_v21, %v9871_v26  ;;  %7512 = vmatpush3.bf16.msra.mxu1 %v7808_v40 }
0x288f   : > { %v4099_v27 = vpack.c.bf16 %v4097_v20, %v4096_v23  ;;  %v7807_v23 = vld [vmem:[%s10383_s13 + $0xd8] sm:$0xff]   ;;  %7513 = vmatprep.subr.bf16.mxu1 %v7809_v2 }
0x2890   : > { %v4098_v51 = vpack.c.bf16 %v4095_v18, %v4094_v59  ;;  %v7810_v59 = vld [vmem:[%s10383_s13 + $0xe0] sm:$0xff]  }
0x2892   : > { %7507 = vmatprep.mubr.msk.bf16.mxu0 %vm743_vm6, %v4098_v51  ;;  %7514 = vmatpush3.bf16.msra.mxu1 %v7809_v2 }
0x2893   : > { %7508 = vmatmul.mubr.msk.bf16.vlgmr.msra.gmra.mrb[80].mxu0 %vm743_vm6, %v4099_v27  ;;  %7527 = vmatprep.subr.bf16.mxu1 %v7810_v59 }
0x2894   : > { %7523 = vmatprep.mubr.msk.bf16.mxu0 %vm743_vm6, %v9226_v12 }
0x2966   : > { %v7509_v39 = vpop.f32.mrb[80].mxu0 }
0x2967   : > { %v4156_v30 = vpop.f32.mrb[81].mxu0  ;;  %v4165_v56 = vadd.f32 %v7509_v39, %v4103_v14 }
0x2968   : > { %v4157_v17 = vadd.f32 %v4156_v30, %v4103_v14  ;;  %v7510_v61 = vpop.f32.mrb[82].mxu0 }
0x2969   : > { %v4159_v33 = vpop.f32.mrb[83].mxu0  ;;  %v4168_v24 = vadd.f32 %v7510_v61, %v4103_v14  ;;  %v4173_v29 = vadd.f32 %v4165_v56, %v9633_v13  ;;  %v9943_v61 = vld [vmem:[%s10386_s29 + $0x20] sm:$0xff] }
0x296a   : > { %v4171_v26 = vadd.f32 %v4157_v17, %v9625_v22  ;;  %v4160_v25 = vadd.f32 %v4159_v33, %v4103_v14  ;;  %v7806_v22 = vld [vmem:[%s10383_s13 + $0xd0] sm:$0xff]   ;;  %v4230_v33 = vrot.slane %v9943_v61, %v9202_v1 }
0x296b   : > { %v4174_v31 = vadd.f32 %v4168_v24, %v9635_v45  ;;  %v4181_v7 = vsel %vm743_vm6, %v4173_v29, 0.0  ;;  %7519 = vmatprep.subr.bf16.mxu0 %v7806_v22 }
0x296c   : > { %v4172_v28 = vadd.f32 %v4160_v25, %v9627_v37  ;;  %v4175_v4 = vsel %vm743_vm6, %v4171_v26, 0.0  ;;  %7520 = vmatpush3.bf16.msra.mxu0 %v7806_v22 }
0x296d   : > { %4176 = vadd.xlane.f32.xlu1 %v4175_v4  ;;  %v4184_v6 = vsel %vm743_vm6, %v4174_v31, 0.0  ;;  %7521 = vmatprep.subr.bf16.mxu0 %v7807_v23  ;;  %v4238_v4 = vrot.slane %v9943_v61, %v9253_v55 }
0x296e   : > { %v4178_v60 = vsel %vm743_vm6, %v4172_v28, 0.0 }
0x296f   : > { %4179 = vadd.xlane.f32.xlu0 %v4178_v60 }
0x2970   : > { %7522 = vmatpush3.bf16.msra.mxu0 %v7807_v23 }
0x2971   : > { %4182 = vadd.xlane.f32.xlu1 %v4181_v7 }
0x2973   : > { %4185 = vadd.xlane.f32.xlu0 %v4184_v6  ;;  %7524 = vmatmul.mubr.msk.bf16.vlgmr.msra.gmra.mrb[84].mxu0 %vm743_vm6, %v9230_v36 }
0x29fa   : > { %v4177_v37 = vpop.xlane.xlu1 %4176 }
0x29fb   : > { %v4187_v13 = vmul.f32 0.03125, %v4177_v37 }
0x29fc   : > { %v4180_v47 = vpop.xlane.xlu0 %4179 }
0x29fd   : > { %v4191_v63 = vsub.f32 %v4171_v26, %v4187_v13  ;;  %v4188_v45 = vmul.f32 0.03125, %v4180_v47 }
0x29fe   : > { %v4183_v9 = vpop.xlane.xlu1 %4182 }
0x29ff   : > { %v4192_v49 = vsub.f32 %v4172_v28, %v4188_v45  ;;  %v4189_v52 = vmul.f32 0.03125, %v4183_v9  ;;  %v4195_v42 = vmul.f32 %v4191_v63, %v4191_v63 }
0x2a00   : > { %v4186_v62 = vpop.xlane.xlu0 %4185 }
0x2a01   : > { %v4193_v32 = vsub.f32 %v4173_v29, %v4189_v52  ;;  %v4190_v19 = vmul.f32 0.03125, %v4186_v62  ;;  %v4199_v5 = vsel %vm743_vm6, %v4195_v42, 0.0  ;;  %v4196_v43 = vmul.f32 %v4192_v49, %v4192_v49  ;;  %v7811_v42 = vld [vmem:[%s10383_s13 + $0xe8] sm:$0xff]   ;;  %v8230_v62 = vld [vmem:[%s10386_s29 + $0x18] sm:$0xff] }
0x2a02   : > { %4200 = vadd.xlane.f32.xlu1 %v4199_v5  ;;  %v4268_v23 = vrot.slane %v8230_v62, %v9301_v41 }
0x2a03   : > { %v4194_v35 = vsub.f32 %v4174_v31, %v4190_v19  ;;  %v4202_v8 = vsel %vm743_vm6, %v4196_v43, 0.0  ;;  %v4197_v10 = vmul.f32 %v4193_v32, %v4193_v32 }
0x2a04   : > { %4203 = vadd.xlane.f32.xlu0 %v4202_v8 }
0x2a05   : > { %v4205_v34 = vsel %vm743_vm6, %v4197_v10, 0.0  ;;  %v4198_v15 = vmul.f32 %v4194_v35, %v4194_v35 }
0x2a06   : > { %4206 = vadd.xlane.f32.xlu1 %v4205_v34 }
0x2a07   : > { %v4208_v54 = vsel %vm743_vm6, %v4198_v15, 0.0 }
0x2a08   : > { %4209 = vadd.xlane.f32.xlu0 %v4208_v54 }
0x2a46   : > { %v7525_v19 = vpop.f32.mrb[84].mxu0 }
0x2a47   : > { %v4386_v43 = vpop.f32.mrb[85].mxu0 }
0x2a48   : > { %v7526_v8 = vpop.f32.mrb[86].mxu0 }
0x2a49   : > { %v4389_v34 = vpop.f32.mrb[87].mxu0 }
0x2a8f   : > { %v4201_v38 = vpop.xlane.xlu1 %4200 }
0x2a90   : > { %v4211_v3 = vmul.f32 0.03125, %v4201_v38 }
0x2a91   : > { %v4204_v20 = vpop.xlane.xlu0 %4203 }
0x2a92   : > { %v4215_v21 = vadd.f32 1e-05, %v4211_v3  ;;  %v4212_v18 = vmul.f32 0.03125, %v4204_v20 }
0x2a93   : > { %v4207_v27 = vpop.xlane.xlu1 %4206 }
0x2a94   : > { %8110 = vrsqrt.f32 %v4215_v21  ;;  %v4216_v51 = vadd.f32 1e-05, %v4212_v18  ;;  %v4213_v14 = vmul.f32 0.03125, %v4207_v27  ;;  %v4404_v27 = vrot.slane %v8230_v62, %v9305_v16 }
0x2a95   : > { %v4210_v39 = vpop.xlane.xlu0 %4209 }
0x2a96   : > { %8112 = vrsqrt.f32 %v4216_v51  ;;  %v4217_v30 = vadd.f32 1e-05, %v4213_v14  ;;  %v4214_v56 = vmul.f32 0.03125, %v4210_v39 }
0x2a98   : > { %8114 = vrsqrt.f32 %v4217_v30  ;;  %v4218_v17 = vadd.f32 1e-05, %v4214_v56 }
0x2a9a   : > { %8116 = vrsqrt.f32 %v4218_v17 }
0x2a9e   : > { %v8111_v26 = vpop.eup %8110 }
0x2a9f   : > { %v4223_v24 = vmul.f32 %v8111_v26, %v4191_v63 }
0x2aa0   : > { %v8113_v25 = vpop.eup %8112 }
0x2aa1   : > { %v4224_v29 = vmul.f32 %v8113_v25, %v4192_v49  ;;  %v4231_v28 = vmul.f32 %v4230_v33, %v4223_v24 }
0x2aa2   : > { %v8115_v31 = vpop.eup %8114 }
0x2aa3   : > { %v4225_v60 = vmul.f32 %v8115_v31, %v4193_v32  ;;  %v4232_v7 = vmul.f32 %v4230_v33, %v4224_v29  ;;  %v9949_v13 = vadd.f32 %v4238_v4, %v4231_v28  ;;  %v4339_v32 = vrot.slane %v8230_v62, %v9253_v55 }
0x2aa4   : > { %v8117_v6 = vpop.eup %8116 }
0x2aa5   : > { %v4233_v22 = vmul.f32 %v4230_v33, %v4225_v60  ;;  %v4226_v37 = vmul.f32 %v8117_v6, %v4194_v35  ;;  %v9951_v47 = vadd.f32 %v4238_v4, %v4232_v7  ;;  %v4395_v5 = vadd.f32 %v7525_v19, %v4339_v32 }
0x2aa6   : > { %v4387_v35 = vadd.f32 %v4386_v43, %v4339_v32  ;;  %v4398_v10 = vadd.f32 %v7526_v8, %v4339_v32  ;;  %v4390_v15 = vadd.f32 %v4389_v34, %v4339_v32 }
0x2aa7   : > { %v4234_v45 = vmul.f32 %v4230_v33, %v4226_v37  ;;  %v4263_v63 = vpack.c.bf16 %v9951_v47, %v9949_v13  ;;  %v9956_v9 = vadd.f32 %v4238_v4, %v4233_v22 }
0x2aa8   : > { %v9976_v54 = vpack.c.bf16 %v4390_v15, %v4387_v35 }
0x2aa9   : > { %7515 = vmatprep.mubr.msk.bf16.mxu1 %vm743_vm6, %v4263_v63  ;;  %v9958_v49 = vadd.f32 %v4238_v4, %v4234_v45 }
0x2aaa   : > { %7652 = vmatprep.subr.msk.bf16.mxu0 %vm743_vm6, %v9976_v54 }
0x2aab   : > { %v4264_v52 = vpack.c.bf16 %v9958_v49, %v9956_v9 }
0x2aad   : > { %7516 = vmatmul.mubr.msk.bf16.vlgmr.msra.gmra.mrb[72].mxu1 %vm743_vm6, %v4264_v52 }
0x2aae   : > { %7528 = vmatpush3.bf16.msra.mxu1 %v7810_v59  ;;  %7531 = vmatprep.mubr.msk.bf16.mxu1 %vm743_vm6, %v9226_v12  ;;  %v9974_v12 = vpack.c.bf16 %v4398_v10, %v4395_v5 }
0x2aaf   : > { %7529 = vmatprep.subr.bf16.mxu1 %v7811_v42 }
0x2ab0   : > { %v9989_v55 = vsel %vm743_vm6, %v9974_v12, 0 }
0x2ab2   : > { %7530 = vmatpush3.bf16.msra.mxu1 %v7811_v42 }
0x2ab5   : > { %7532 = vmatmul.mubr.msk.bf16.vlgmr.msra.gmra.mrb[76].mxu1 %vm743_vm6, %v9230_v36  ;;  %v9982_v36 = vsel %vm743_vm6, %v9976_v54, 0 }
0x2ab6   : > { %7536 = vmatpush3.bf16.xpose.msra.mxu0 %v9982_v36 }
0x2ab7   : > { %7653 = vmatprep.subr.msk.bf16.mxu0 %vm743_vm6, %v9974_v12 }
0x2abe   : > { %7538 = vmatpush3.bf16.xpose.msra.mxu0 %v9989_v55 }
0x2b80   : > { %v7517_v40 = vpop.f32.mrb[72].mxu1 }
0x2b81   : > { %v4330_v2 = vadd.f32 %v7517_v40, %v4268_v23  ;;  %v4321_v59 = vpop.f32.mrb[73].mxu1  ;;  %v10058_v40 = vrot.slane %v9943_v61, %v8918_v46 }
0x2b82   : > { %v4322_v38 = vadd.f32 %v4321_v59, %v4268_v23  ;;  %v7518_v3 = vpop.f32.mrb[74].mxu1 }
0x2b83   : > { %v4472_v20 = vsel %vm566_vm13, %v4330_v2, 0.0  ;;  %v4656_v21 = vsel %vm8934_vm14, %v4330_v2, 0.0  ;;  %v4324_v18 = vpop.f32.mrb[75].mxu1  ;;  %v4830_v51 = vsel %vm8938_vm15, %v4330_v2, 0.0  ;;  %v5004_v14 = vsel %vm8942_vm0, %v4330_v2, 0.0 }
0x2b84   : > { %v4333_v39 = vadd.f32 %v7518_v3, %v4268_v23  ;;  %v4325_v30 = vadd.f32 %v4324_v18, %v4268_v23  ;;  %v4470_v56 = vsel %vm566_vm13, %v4322_v38, 0.0  ;;  %v4654_v17 = vsel %vm8934_vm14, %v4322_v38, 0.0 }
0x2b85   : > { %v4828_v33 = vsel %vm8938_vm15, %v4322_v38, 0.0  ;;  %v5002_v26 = vsel %vm8942_vm0, %v4322_v38, 0.0 }
0x2b86   : > { %v4473_v24 = vsel %vm566_vm13, %v4333_v39, 0.0  ;;  %v4657_v25 = vsel %vm8934_vm14, %v4333_v39, 0.0  ;;  %v4831_v29 = vsel %vm8938_vm15, %v4333_v39, 0.0  ;;  %v5005_v28 = vsel %vm8942_vm0, %v4333_v39, 0.0 }
0x2b87   : > { %v4475_v4 = vpack.c.bf16 %v4473_v24, %v4472_v20  ;;  %v10018_v31 = vpack.c.bf16 %v4657_v25, %v4656_v21  ;;  %v10020_v60 = vpack.c.bf16 %v4831_v29, %v4830_v51  ;;  %v10022_v7 = vpack.c.bf16 %v5005_v28, %v5004_v14 }
0x2b88   : > { %v7533_v6 = vpop.f32.mrb[76].mxu1  ;;  %v4471_v22 = vsel %vm566_vm13, %v4325_v30, 0.0  ;;  %v4655_v37 = vsel %vm8934_vm14, %v4325_v30, 0.0  ;;  %v4829_v45 = vsel %vm8938_vm15, %v4325_v30, 0.0  ;;  %v5003_v63 = vsel %vm8942_vm0, %v4325_v30, 0.0 }
0x2b89   : > { %v4460_v52 = vadd.f32 %v7533_v6, %v4404_v27  ;;  %v4451_v42 = vpop.f32.mrb[77].mxu1  ;;  %v4474_v62 = vpack.c.bf16 %v4471_v22, %v4470_v56  ;;  %v10032_v32 = vpack.c.bf16 %v4655_v37, %v4654_v17  ;;  %v10034_v19 = vpack.c.bf16 %v4829_v45, %v4828_v33 }
0x2b8a   : > { %v4452_v5 = vadd.f32 %v4451_v42, %v4404_v27  ;;  %v7534_v43 = vpop.f32.mrb[78].mxu1  ;;  %v10036_v35 = vpack.c.bf16 %v5003_v63, %v5002_v26 }
0x2b8b   : > { %7539 = vmatprep.mubr.msk.bf16.mxu0 %vm743_vm6, %v4474_v62  ;;  %v4463_v8 = vadd.f32 %v7534_v43, %v4404_v27  ;;  %v4454_v10 = vpop.f32.mrb[79].mxu1 }
0x2b8c   : > { %7540 = vmatmul.mubr.msk.bf16.vlgmr.msra.gmra.mrb[88].mxu0 %vm743_vm6, %v4475_v4  ;;  %v4455_v34 = vadd.f32 %v4454_v10, %v4404_v27 }
0x2b8d   : > { %v10040_v15 = vpack.c.bf16 %v4463_v8, %v4460_v52 }
0x2b8e   : > { %v10042_v23 = vpack.c.bf16 %v4455_v34, %v4452_v5 }
0x2b90   : > { %7543 = vmatprep.subr.bf16.mxu1 %v10042_v23  ;;  %7559 = vmatprep.subr.bf16.mxu0 %v10042_v23 }
0x2b91   : > { %7544 = vmatpush3.bf16.msra.mxu1 %v10042_v23  ;;  %7560 = vmatpush3.bf16.msra.mxu0 %v10042_v23 }
0x2b92   : > { %7545 = vmatprep.subr.bf16.mxu1 %v10040_v15  ;;  %7561 = vmatprep.subr.bf16.mxu0 %v10040_v15 }
0x2b95   : > { %7546 = vmatpush3.bf16.msra.mxu1 %v10040_v15  ;;  %7562 = vmatpush3.bf16.msra.mxu0 %v10040_v15 }
0x2b96   : > { %7654 = vmatprep.subr.msk.bf16.mxu1 %vm743_vm6, %v9976_v54  ;;  %7656 = vmatprep.subr.msk.bf16.mxu0 %vm743_vm6, %v9976_v54 }
0x2c5f   : > { %v7541_v2 = vpop.f32.mrb[88].mxu0 }
0x2c60   : > { %v4522_v59 = vpop.f32.mrb[89].mxu0  ;;  %v4543_v21 = vmul.f32 %v7541_v2, %v10058_v40 }
0x2c61   : > { %v4541_v38 = vmul.f32 %v10058_v40, %v4522_v59  ;;  %v7542_v3 = vpop.f32.mrb[90].mxu0 }
0x2c62   : > { %v4525_v20 = vpop.f32.mrb[91].mxu0  ;;  %v4544_v51 = vmul.f32 %v7542_v3, %v10058_v40  ;;  %v4551_v39 = vsel %vm743_vm6, %v4543_v21, -inf }
0x2c63   : > { %v4542_v18 = vmul.f32 %v10058_v40, %v4525_v20  ;;  %v4545_v27 = vsel %vm743_vm6, %v4541_v38, -inf }
0x2c64   : > { %4546 = vmax.xlane.f32.xlu1 %v4545_v27  ;;  %v4554_v30 = vsel %vm743_vm6, %v4544_v51, -inf }
0x2c65   : > { %v4548_v14 = vsel %vm743_vm6, %v4542_v18, -inf }
0x2c66   : > { %4549 = vmax.xlane.f32.xlu0 %v4548_v14 }
0x2c68   : > { %4552 = vmax.xlane.f32.xlu1 %v4551_v39 }
0x2c6a   : > { %4555 = vmax.xlane.f32.xlu0 %v4554_v30 }
0x2cf1   : > { %v4547_v56 = vpop.xlane.xlu1 %4546 }
0x2cf2   : > { %v4557_v17 = vsub.f32 %v4541_v38, %v4547_v56 }
0x2cf3   : > { %v4550_v33 = vpop.xlane.xlu0 %4549 }
0x2cf4   : > { %v4561_v26 = vmul.f32 1.442695, %v4557_v17  ;;  %v4558_v24 = vsub.f32 %v4542_v18, %v4550_v33 }
0x2cf5   : > { %v4553_v25 = vpop.xlane.xlu1 %4552 }
0x2cf6   : > { %8118 = vpow2.f32 %v4561_v26  ;;  %v4563_v29 = vmul.f32 1.442695, %v4558_v24  ;;  %v4559_v28 = vsub.f32 %v4543_v21, %v4553_v25 }
0x2cf7   : > { %v4556_v4 = vpop.xlane.xlu0 %4555 }
0x2cf8   : > { %8120 = vpow2.f32 %v4563_v29  ;;  %v4565_v6 = vmul.f32 1.442695, %v4559_v28  ;;  %v4560_v22 = vsub.f32 %v4544_v51, %v4556_v4 }
0x2cfa   : > { %8122 = vpow2.f32 %v4565_v6  ;;  %v4567_v37 = vmul.f32 1.442695, %v4560_v22 }
0x2cfc   : > { %8124 = vpow2.f32 %v4567_v37 }
0x2d00   : > { %v8119_v45 = vpop.eup %8118 }
0x2d01   : > { %v4569_v63 = vsel %vm743_vm6, %v8119_v45, 0.0 }
0x2d02   : > { %v8121_v52 = vpop.eup %8120  ;;  %4570 = vadd.xlane.f32.xlu1 %v4569_v63 }
0x2d03   : > { %v4572_v42 = vsel %vm743_vm6, %v8121_v52, 0.0 }
0x2d04   : > { %v8123_v62 = vpop.eup %8122  ;;  %4573 = vadd.xlane.f32.xlu0 %v4572_v42 }
0x2d05   : > { %v4575_v5 = vsel %vm743_vm6, %v8123_v62, 0.0 }
0x2d06   : > { %v8125_v43 = vpop.eup %8124  ;;  %4576 = vadd.xlane.f32.xlu1 %v4575_v5 }
0x2d07   : > { %v4578_v8 = vsel %vm743_vm6, %v8125_v43, 0.0 }
0x2d08   : > { %4579 = vadd.xlane.f32.xlu0 %v4578_v8 }
0x2d8f   : > { %v4571_v10 = vpop.xlane.xlu1 %4570 }
0x2d90   : > { %8126 = vrcp.f32 %v4571_v10 }
0x2d91   : > { %v4574_v34 = vpop.xlane.xlu0 %4573 }
0x2d92   : > { %8128 = vrcp.f32 %v4574_v34 }
0x2d93   : > { %v4577_v2 = vpop.xlane.xlu1 %4576 }
0x2d94   : > { %8130 = vrcp.f32 %v4577_v2 }
0x2d95   : > { %v4580_v59 = vpop.xlane.xlu0 %4579 }
0x2d96   : > { %8132 = vrcp.f32 %v4580_v59 }
0x2d9a   : > { %v8127_v38 = vpop.eup %8126 }
0x2d9b   : > { %v4585_v20 = vmul.f32 %v8127_v38, %v8119_v45 }
0x2d9c   : > { %v8129_v3 = vpop.eup %8128 }
0x2d9d   : > { %v4586_v21 = vmul.f32 %v8129_v3, %v8121_v52 }
0x2d9e   : > { %v8131_v18 = vpop.eup %8130 }
0x2d9f   : > { %v4589_v27 = vpack.c.bf16 %v4586_v21, %v4585_v20  ;;  %v4587_v14 = vmul.f32 %v8131_v18, %v8123_v62 }
0x2da0   : > { %v8133_v51 = vpop.eup %8132 }
0x2da1   : > { %v4588_v39 = vmul.f32 %v8133_v51, %v8125_v43  ;;  %7547 = vmatprep.mubr.msk.bf16.mxu1 %vm743_vm6, %v4589_v27 }
0x2da3   : > { %v4590_v30 = vpack.c.bf16 %v4588_v39, %v4587_v14 }
0x2da5   : > { %7548 = vmatmul.mubr.msk.bf16.vlgmr.msra.gmra.mrb[80].mxu1 %vm743_vm6, %v4590_v30 }
0x2da6   : > { %7552 = vmatpush3.bf16.xpose.msra.mxu1 %v9982_v36  ;;  %7555 = vmatprep.mubr.msk.bf16.mxu1 %vm743_vm6, %v10032_v32 }
0x2da7   : > { %7655 = vmatprep.subr.msk.bf16.mxu1 %vm743_vm6, %v9974_v12 }
0x2dae   : > { %7554 = vmatpush3.bf16.xpose.msra.mxu1 %v9989_v55 }
0x2daf   : > { %7575 = vmatprep.subr.bf16.mxu1 %v10042_v23 }
0x2db5   : > { %7556 = vmatmul.mubr.msk.bf16.vlgmr.msra.gmra.mrb[84].mxu1 %vm743_vm6, %v10018_v31 }
0x2db6   : > { %7576 = vmatpush3.bf16.msra.mxu1 %v10042_v23 }
0x2db7   : > { %7577 = vmatprep.subr.bf16.mxu1 %v10040_v15 }
0x2dba   : > { %7578 = vmatpush3.bf16.msra.mxu1 %v10040_v15 }
0x2dbb   : > { %7658 = vmatprep.subr.msk.bf16.mxu1 %vm743_vm6, %v9976_v54 }
0x2e78   : > { %v10088_v32 = vpop.f32.mrb[80].mxu1 }
0x2e79   : > { %v10090_v56 = vpop.f32.mrb[81].mxu1 }
0x2e7a   : > { %v10092_v17 = vpop.f32.mrb[82].mxu1 }
0x2e7b   : > { %v10094_v33 = vpop.f32.mrb[83].mxu1 }
0x2e88   : > { %v7557_v26 = vpop.f32.mrb[84].mxu1 }
0x2e89   : > { %v4700_v24 = vpop.f32.mrb[85].mxu1  ;;  %v4717_v28 = vmul.f32 %v7557_v26, %v10058_v40 }
0x2e8a   : > { %v4715_v31 = vmul.f32 %v4700_v24, %v10058_v40  ;;  %v7558_v25 = vpop.f32.mrb[86].mxu1 }
0x2e8b   : > { %v4703_v29 = vpop.f32.mrb[87].mxu1  ;;  %v4718_v6 = vmul.f32 %v7558_v25, %v10058_v40  ;;  %v4725_v37 = vsel %vm743_vm6, %v4717_v28, -inf }
0x2e8c   : > { %v4716_v4 = vmul.f32 %v4703_v29, %v10058_v40  ;;  %v4719_v54 = vsel %vm743_vm6, %v4715_v31, -inf }
0x2e8d   : > { %4720 = vmax.xlane.f32.xlu1 %v4719_v54  ;;  %v4728_v45 = vsel %vm743_vm6, %v4718_v6, -inf }
0x2e8e   : > { %v4722_v22 = vsel %vm743_vm6, %v4716_v4, -inf }
0x2e8f   : > { %4723 = vmax.xlane.f32.xlu0 %v4722_v22 }
0x2e91   : > { %4726 = vmax.xlane.f32.xlu1 %v4725_v37 }
0x2e93   : > { %4729 = vmax.xlane.f32.xlu0 %v4728_v45 }
0x2f1a   : > { %v4721_v63 = vpop.xlane.xlu1 %4720 }
0x2f1b   : > { %v4731_v52 = vsub.f32 %v4715_v31, %v4721_v63 }
0x2f1c   : > { %v4724_v42 = vpop.xlane.xlu0 %4723 }
0x2f1d   : > { %v4735_v62 = vmul.f32 1.442695, %v4731_v52  ;;  %v4732_v5 = vsub.f32 %v4716_v4, %v4724_v42 }
0x2f1e   : > { %v4727_v43 = vpop.xlane.xlu1 %4726 }
0x2f1f   : > { %8134 = vpow2.f32 %v4735_v62  ;;  %v4737_v8 = vmul.f32 1.442695, %v4732_v5  ;;  %v4733_v10 = vsub.f32 %v4717_v28, %v4727_v43  ;;  %v4646_v5 = vsel %vm566_vm13, %v10090_v56, 0.0 }
0x2f20   : > { %v4730_v34 = vpop.xlane.xlu0 %4729  ;;  %v4647_v56 = vsel %vm566_vm13, %v10094_v33, 0.0 }
0x2f21   : > { %8136 = vpow2.f32 %v4737_v8  ;;  %v4739_v2 = vmul.f32 1.442695, %v4733_v10  ;;  %v4734_v59 = vsub.f32 %v4718_v6, %v4730_v34 }
0x2f23   : > { %8138 = vpow2.f32 %v4739_v2  ;;  %v4741_v38 = vmul.f32 1.442695, %v4734_v59 }
0x2f25   : > { %8140 = vpow2.f32 %v4741_v38 }
0x2f29   : > { %v8135_v3 = vpop.eup %8134 }
0x2f2a   : > { %v4743_v20 = vsel %vm743_vm6, %v8135_v3, 0.0 }
0x2f2b   : > { %v8137_v21 = vpop.eup %8136  ;;  %4744 = vadd.xlane.f32.xlu1 %v4743_v20 }
0x2f2c   : > { %v4746_v18 = vsel %vm743_vm6, %v8137_v21, 0.0 }
0x2f2d   : > { %v8139_v27 = vpop.eup %8138  ;;  %4747 = vadd.xlane.f32.xlu0 %v4746_v18 }
0x2f2e   : > { %v4749_v51 = vsel %vm743_vm6, %v8139_v27, 0.0 }
0x2f2f   : > { %v8141_v14 = vpop.eup %8140  ;;  %4750 = vadd.xlane.f32.xlu1 %v4749_v51 }
0x2f30   : > { %v4752_v39 = vsel %vm743_vm6, %v8141_v14, 0.0 }
0x2f31   : > { %4753 = vadd.xlane.f32.xlu0 %v4752_v39 }
0x2fb8   : > { %v4745_v30 = vpop.xlane.xlu1 %4744 }
0x2fb9   : > { %8142 = vrcp.f32 %v4745_v30 }
0x2fba   : > { %v4748_v26 = vpop.xlane.xlu0 %4747 }
0x2fbb   : > { %8144 = vrcp.f32 %v4748_v26 }
0x2fbc   : > { %v4751_v24 = vpop.xlane.xlu1 %4750 }
0x2fbd   : > { %8146 = vrcp.f32 %v4751_v24 }
0x2fbe   : > { %v4754_v31 = vpop.xlane.xlu0 %4753 }
0x2fbf   : > { %8148 = vrcp.f32 %v4754_v31 }
0x2fc3   : > { %v8143_v25 = vpop.eup %8142 }
0x2fc4   : > { %v4759_v28 = vmul.f32 %v8143_v25, %v8135_v3 }
0x2fc5   : > { %v8145_v29 = vpop.eup %8144 }
0x2fc6   : > { %v4760_v4 = vmul.f32 %v8145_v29, %v8137_v21 }
0x2fc7   : > { %v8147_v54 = vpop.eup %8146 }
0x2fc8   : > { %v4763_v6 = vpack.c.bf16 %v4760_v4, %v4759_v28  ;;  %v4761_v37 = vmul.f32 %v8147_v54, %v8139_v27 }
0x2fc9   : > { %v8149_v22 = vpop.eup %8148 }
0x2fca   : > { %v4762_v45 = vmul.f32 %v8149_v22, %v8141_v14  ;;  %7563 = vmatprep.mubr.msk.bf16.mxu0 %vm743_vm6, %v4763_v6 }
0x2fcc   : > { %v4764_v63 = vpack.c.bf16 %v4762_v45, %v4761_v37 }
0x2fce   : > { %7564 = vmatmul.mubr.msk.bf16.vlgmr.msra.gmra.mrb[92].mxu0 %vm743_vm6, %v4764_v63 }
0x2fcf   : > { %7568 = vmatpush3.bf16.xpose.msra.mxu0 %v9982_v36  ;;  %7571 = vmatprep.mubr.msk.bf16.mxu0 %vm743_vm6, %v10034_v19  ;;  %v4648_v19 = vsel %vm566_vm13, %v10088_v32, 0.0 }
0x2fd0   : > { %7657 = vmatprep.subr.msk.bf16.mxu0 %vm743_vm6, %v9974_v12 }
0x2fd7   : > { %7570 = vmatpush3.bf16.xpose.msra.mxu0 %v9989_v55 }
0x2fd8   : > { %7591 = vmatprep.subr.bf16.mxu0 %v10042_v23 }
0x2fde   : > { %7572 = vmatmul.mubr.msk.bf16.vlgmr.msra.gmra.mrb[96].mxu0 %vm743_vm6, %v10020_v60 }
0x2fdf   : > { %7592 = vmatpush3.bf16.msra.mxu0 %v10042_v23 }
0x2fe0   : > { %7593 = vmatprep.subr.bf16.mxu0 %v10040_v15 }
0x2fe3   : > { %7594 = vmatpush3.bf16.msra.mxu0 %v10040_v15  ;;  %v4649_v15 = vsel %vm566_vm13, %v10092_v17, 0.0 }
0x30a1   : > { %v7565_v52 = vpop.f32.mrb[92].mxu0 }
0x30a2   : > { %v4822_v42 = vsel %vm8934_vm14, %v7565_v52, 0.0  ;;  %v4805_v62 = vpop.f32.mrb[93].mxu0 }
0x30a3   : > { %v10130_v60 = vadd.f32 %v4822_v42, %v4648_v19  ;;  %v4820_v23 = vsel %vm8934_vm14, %v4805_v62, 0.0  ;;  %v7566_v43 = vpop.f32.mrb[94].mxu0 }
0x30a4   : > { %v10137_v8 = vadd.f32 %v4820_v23, %v4646_v5  ;;  %v4823_v32 = vsel %vm8934_vm14, %v7566_v43, 0.0  ;;  %v4808_v10 = vpop.f32.mrb[95].mxu0 }
0x30a5   : > { %v10144_v34 = vadd.f32 %v4823_v32, %v4649_v15  ;;  %v4821_v2 = vsel %vm8934_vm14, %v4808_v10, 0.0 }
0x30a6   : > { %v10148_v59 = vadd.f32 %v4821_v2, %v4647_v56 }
0x30b1   : > { %v7573_v38 = vpop.f32.mrb[96].mxu0 }
0x30b2   : > { %v4874_v3 = vpop.f32.mrb[97].mxu0  ;;  %v4891_v18 = vmul.f32 %v7573_v38, %v10058_v40 }
0x30b3   : > { %v4889_v17 = vmul.f32 %v4874_v3, %v10058_v40  ;;  %v7574_v20 = vpop.f32.mrb[98].mxu0 }
0x30b4   : > { %v4877_v21 = vpop.f32.mrb[99].mxu0  ;;  %v4892_v33 = vmul.f32 %v7574_v20, %v10058_v40  ;;  %v4899_v14 = vsel %vm743_vm6, %v4891_v18, -inf }
0x30b5   : > { %v4890_v27 = vmul.f32 %v4877_v21, %v10058_v40  ;;  %v4893_v51 = vsel %vm743_vm6, %v4889_v17, -inf }
0x30b6   : > { %4894 = vmax.xlane.f32.xlu1 %v4893_v51  ;;  %v4902_v39 = vsel %vm743_vm6, %v4892_v33, -inf }
0x30b7   : > { %v4896_v50 = vsel %vm743_vm6, %v4890_v27, -inf }
0x30b8   : > { %4897 = vmax.xlane.f32.xlu0 %v4896_v50 }
0x30ba   : > { %4900 = vmax.xlane.f32.xlu1 %v4899_v14 }
0x30bc   : > { %4903 = vmax.xlane.f32.xlu0 %v4902_v39 }
0x3143   : > { %v4895_v30 = vpop.xlane.xlu1 %4894 }
0x3144   : > { %v4905_v26 = vsub.f32 %v4889_v17, %v4895_v30 }
0x3145   : > { %v4898_v24 = vpop.xlane.xlu0 %4897 }
0x3146   : > { %v4909_v31 = vmul.f32 1.442695, %v4905_v26  ;;  %v4906_v25 = vsub.f32 %v4890_v27, %v4898_v24 }
0x3147   : > { %v4901_v29 = vpop.xlane.xlu1 %4900 }
0x3148   : > { %8150 = vpow2.f32 %v4909_v31  ;;  %v4911_v28 = vmul.f32 1.442695, %v4906_v25  ;;  %v4907_v4 = vsub.f32 %v4891_v18, %v4901_v29 }
0x3149   : > { %v4904_v54 = vpop.xlane.xlu0 %4903 }
0x314a   : > { %8152 = vpow2.f32 %v4911_v28  ;;  %v4913_v6 = vmul.f32 1.442695, %v4907_v4  ;;  %v4908_v22 = vsub.f32 %v4892_v33, %v4904_v54 }
0x314c   : > { %8154 = vpow2.f32 %v4913_v6  ;;  %v4915_v37 = vmul.f32 1.442695, %v4908_v22 }
0x314e   : > { %8156 = vpow2.f32 %v4915_v37 }
0x3152   : > { %v8151_v45 = vpop.eup %8150 }
0x3153   : > { %v4917_v63 = vsel %vm743_vm6, %v8151_v45, 0.0 }
0x3154   : > { %v8153_v52 = vpop.eup %8152  ;;  %4918 = vadd.xlane.f32.xlu1 %v4917_v63 }
0x3155   : > { %v4920_v19 = vsel %vm743_vm6, %v8153_v52, 0.0 }
0x3156   : > { %v8155_v42 = vpop.eup %8154  ;;  %4921 = vadd.xlane.f32.xlu0 %v4920_v19 }
0x3157   : > { %v4923_v62 = vsel %vm743_vm6, %v8155_v42, 0.0 }
0x3158   : > { %v8157_v5 = vpop.eup %8156  ;;  %4924 = vadd.xlane.f32.xlu1 %v4923_v62 }
0x3159   : > { %v4926_v23 = vsel %vm743_vm6, %v8157_v5, 0.0 }
0x315a   : > { %4927 = vadd.xlane.f32.xlu0 %v4926_v23 }
0x31e1   : > { %v4919_v43 = vpop.xlane.xlu1 %4918 }
0x31e2   : > { %8158 = vrcp.f32 %v4919_v43 }
0x31e3   : > { %v4922_v15 = vpop.xlane.xlu0 %4921 }
0x31e4   : > { %8160 = vrcp.f32 %v4922_v15 }
0x31e5   : > { %v4925_v32 = vpop.xlane.xlu1 %4924 }
0x31e6   : > { %8162 = vrcp.f32 %v4925_v32 }
0x31e7   : > { %v4928_v10 = vpop.xlane.xlu0 %4927 }
0x31e8   : > { %8164 = vrcp.f32 %v4928_v10 }
0x31ec   : > { %v8159_v56 = vpop.eup %8158 }
0x31ed   : > { %v4933_v38 = vmul.f32 %v8159_v56, %v8151_v45 }
0x31ee   : > { %v8161_v2 = vpop.eup %8160 }
0x31ef   : > { %v4934_v3 = vmul.f32 %v8161_v2, %v8153_v52 }
0x31f0   : > { %v8163_v17 = vpop.eup %8162 }
0x31f1   : > { %v4937_v20 = vpack.c.bf16 %v4934_v3, %v4933_v38  ;;  %v4935_v18 = vmul.f32 %v8163_v17, %v8155_v42 }
0x31f2   : > { %v8165_v21 = vpop.eup %8164 }
0x31f3   : > { %v4936_v27 = vmul.f32 %v8165_v21, %v8157_v5  ;;  %7579 = vmatprep.mubr.msk.bf16.mxu1 %vm743_vm6, %v4937_v20 }
0x31f5   : > { %v4938_v51 = vpack.c.bf16 %v4936_v27, %v4935_v18 }
0x31f7   : > { %7580 = vmatmul.mubr.msk.bf16.vlgmr.msra.gmra.mrb[88].mxu1 %vm743_vm6, %v4938_v51 }
0x31f8   : > { %7584 = vmatpush3.bf16.xpose.msra.mxu1 %v9982_v36  ;;  %7587 = vmatprep.mubr.msk.bf16.mxu1 %vm743_vm6, %v10036_v35 }
0x31f9   : > { %7659 = vmatprep.subr.msk.bf16.mxu1 %vm743_vm6, %v9974_v12 }
0x3200   : > { %7586 = vmatpush3.bf16.xpose.msra.mxu1 %v9989_v55 }
0x3207   : > { %7588 = vmatmul.mubr.msk.bf16.vlgmr.msra.gmra.mrb[92].mxu1 %vm743_vm6, %v10022_v7 }
0x32ca   : > { %v7581_v33 = vpop.f32.mrb[88].mxu1 }
0x32cb   : > { %v4996_v50 = vsel %vm8938_vm15, %v7581_v33, 0.0  ;;  %v4979_v14 = vpop.f32.mrb[89].mxu1 }
0x32cc   : > { %v10175_v39 = vadd.f32 %v4996_v50, %v10130_v60  ;;  %v4994_v36 = vsel %vm8938_vm15, %v4979_v14, 0.0  ;;  %v7582_v35 = vpop.f32.mrb[90].mxu1 }
0x32cd   : > { %v10180_v30 = vadd.f32 %v4994_v36, %v10137_v8  ;;  %v4997_v12 = vsel %vm8938_vm15, %v7582_v35, 0.0  ;;  %v4982_v55 = vpop.f32.mrb[91].mxu1 }
0x32ce   : > { %v10185_v7 = vadd.f32 %v4997_v12, %v10144_v34  ;;  %v4995_v26 = vsel %vm8938_vm15, %v4982_v55, 0.0 }
0x32cf   : > { %v10190_v60 = vadd.f32 %v4995_v26, %v10148_v59 }
0x32da   : > { %v7589_v24 = vpop.f32.mrb[92].mxu1 }
0x32db   : > { %v5048_v31 = vpop.f32.mrb[93].mxu1  ;;  %v5065_v28 = vmul.f32 %v7589_v24, %v10058_v40 }
0x32dc   : > { %v5063_v25 = vmul.f32 %v5048_v31, %v10058_v40  ;;  %v7590_v29 = vpop.f32.mrb[94].mxu1  ;;  %v7812_v31 = vld [vmem:[%s10383_s13 + $0xf0] sm:$0xff]  }
0x32dd   : > { %v5051_v8 = vpop.f32.mrb[95].mxu1  ;;  %v5066_v34 = vmul.f32 %v7590_v29, %v10058_v40  ;;  %v5073_v59 = vsel %vm743_vm6, %v5065_v28, -inf  ;;  %7599 = vmatprep.subr.bf16.mxu0 %v7812_v31 }
0x32de   : > { %v5064_v4 = vmul.f32 %v5051_v8, %v10058_v40  ;;  %v5067_v54 = vsel %vm743_vm6, %v5063_v25, -inf }
0x32df   : > { %5068 = vmax.xlane.f32.xlu1 %v5067_v54  ;;  %v5076_v6 = vsel %vm743_vm6, %v5066_v34, -inf }
0x32e0   : > { %v5070_v53 = vsel %vm743_vm6, %v5064_v4, -inf }
0x32e1   : > { %5071 = vmax.xlane.f32.xlu0 %v5070_v53 }
0x32e3   : > { %5074 = vmax.xlane.f32.xlu1 %v5073_v59 }
0x32e5   : > { %5077 = vmax.xlane.f32.xlu0 %v5076_v6 }
0x336c   : > { %v5069_v22 = vpop.xlane.xlu1 %5068 }
0x336d   : > { %v5079_v37 = vsub.f32 %v5063_v25, %v5069_v22  ;;  %v7813_v25 = vld [vmem:[%s10383_s13 + $0xf8] sm:$0xff]  }
0x336e   : > { %v5072_v45 = vpop.xlane.xlu0 %5071 }
0x336f   : > { %v5083_v63 = vmul.f32 1.442695, %v5079_v37  ;;  %v5080_v52 = vsub.f32 %v5064_v4, %v5072_v45 }
0x3370   : > { %v5075_v19 = vpop.xlane.xlu1 %5074 }
0x3371   : > { %8166 = vpow2.f32 %v5083_v63  ;;  %v5085_v42 = vmul.f32 1.442695, %v5080_v52  ;;  %v5081_v62 = vsub.f32 %v5065_v28, %v5075_v19 }
0x3372   : > { %v5078_v5 = vpop.xlane.xlu0 %5077 }
0x3373   : > { %8168 = vpow2.f32 %v5085_v42  ;;  %v5087_v40 = vmul.f32 1.442695, %v5081_v62  ;;  %v5082_v23 = vsub.f32 %v5066_v34, %v5078_v5 }
0x3375   : > { %8170 = vpow2.f32 %v5087_v40  ;;  %v5089_v43 = vmul.f32 1.442695, %v5082_v23 }
0x3377   : > { %8172 = vpow2.f32 %v5089_v43 }
0x337b   : > { %v8167_v15 = vpop.eup %8166 }
0x337c   : > { %v5091_v32 = vsel %vm743_vm6, %v8167_v15, 0.0 }
0x337d   : > { %v8169_v10 = vpop.eup %8168  ;;  %5092 = vadd.xlane.f32.xlu1 %v5091_v32 }
0x337e   : > { %v5094_v56 = vsel %vm743_vm6, %v8169_v10, 0.0 }
0x337f   : > { %v8171_v2 = vpop.eup %8170  ;;  %5095 = vadd.xlane.f32.xlu0 %v5094_v56 }
0x3380   : > { %v5097_v38 = vsel %vm743_vm6, %v8171_v2, 0.0 }
0x3381   : > { %v8173_v3 = vpop.eup %8172  ;;  %5098 = vadd.xlane.f32.xlu1 %v5097_v38 }
0x3382   : > { %v5100_v17 = vsel %vm743_vm6, %v8173_v3, 0.0 }
0x3383   : > { %5101 = vadd.xlane.f32.xlu0 %v5100_v17 }
0x340a   : > { %v5093_v20 = vpop.xlane.xlu1 %5092 }
0x340b   : > { %8174 = vrcp.f32 %v5093_v20 }
0x340c   : > { %v5096_v21 = vpop.xlane.xlu0 %5095 }
0x340d   : > { %8176 = vrcp.f32 %v5096_v21 }
0x340e   : > { %v5099_v18 = vpop.xlane.xlu1 %5098 }
0x340f   : > { %8178 = vrcp.f32 %v5099_v18 }
0x3410   : > { %v5102_v27 = vpop.xlane.xlu0 %5101 }
0x3411   : > { %8180 = vrcp.f32 %v5102_v27 }
0x3415   : > { %v8175_v51 = vpop.eup %8174 }
0x3416   : > { %v5107_v50 = vmul.f32 %v8175_v51, %v8167_v15 }
0x3417   : > { %v8177_v33 = vpop.eup %8176 }
0x3418   : > { %v5108_v14 = vmul.f32 %v8177_v33, %v8169_v10 }
0x3419   : > { %v8179_v36 = vpop.eup %8178 }
0x341a   : > { %v5111_v35 = vpack.c.bf16 %v5108_v14, %v5107_v50  ;;  %v5109_v55 = vmul.f32 %v8179_v36, %v8171_v2 }
0x341b   : > { %v8181_v12 = vpop.eup %8180 }
0x341c   : > { %v5110_v26 = vmul.f32 %v8181_v12, %v8173_v3  ;;  %7595 = vmatprep.mubr.msk.bf16.mxu0 %vm743_vm6, %v5111_v35 }
0x341e   : > { %v5112_v24 = vpack.c.bf16 %v5110_v26, %v5109_v55 }
0x3420   : > { %7596 = vmatmul.mubr.msk.bf16.vlgmr.msra.gmra.mrb[100].mxu0 %vm743_vm6, %v5112_v24  ;;  %v7814_v24 = vld [vmem:[#allocation4 + $0x10] sm:$0xff]  }
0x3421   : > { %7600 = vmatpush3.bf16.msra.mxu0 %v7812_v31  ;;  %7607 = vmatprep.subr.bf16.mxu1 %v7814_v24  ;;  %v7815_v31 = vld [vmem:[#allocation4 + $0x18] sm:$0xff]  }
0x3422   : > { %7601 = vmatprep.subr.bf16.mxu0 %v7813_v25  ;;  %7608 = vmatpush3.bf16.msra.mxu1 %v7814_v24 }
0x3423   : > { %7609 = vmatprep.subr.bf16.mxu1 %v7815_v31 }
0x3425   : > { %7602 = vmatpush3.bf16.msra.mxu0 %v7813_v25 }
0x3426   : > { %7610 = vmatpush3.bf16.msra.mxu1 %v7815_v31 }
0x34f3   : > { %v7597_v29 = vpop.f32.mrb[100].mxu0 }
0x34f4   : > { %v5170_v8 = vsel %vm8942_vm0, %v7597_v29, 0.0  ;;  %v5153_v28 = vpop.f32.mrb[101].mxu0 }
0x34f5   : > { %v5174_v4 = vadd.f32 %v5170_v8, %v10175_v39  ;;  %v5168_v54 = vsel %vm8942_vm0, %v5153_v28, 0.0  ;;  %v7598_v34 = vpop.f32.mrb[102].mxu0  ;;  %v5181_v39 = vrot.slane %v9943_v61, %v8910_v44 }
0x34f6   : > { %v5172_v53 = vadd.f32 %v5168_v54, %v10180_v30  ;;  %v5171_v59 = vsel %vm8942_vm0, %v7598_v34, 0.0  ;;  %v5156_v6 = vpop.f32.mrb[103].mxu0 }
0x34f7   : > { %v5175_v22 = vadd.f32 %v5171_v59, %v10185_v7  ;;  %v5169_v37 = vsel %vm8942_vm0, %v5156_v6, 0.0 }
0x34f8   : > { %v5173_v45 = vadd.f32 %v5169_v37, %v10190_v60 }
0x34f9   : > { %v5177_v63 = vpack.c.bf16 %v5175_v22, %v5174_v4 }
0x34fa   : > { %v5176_v52 = vpack.c.bf16 %v5173_v45, %v5172_v53  ;;  %v5308_v45 = vrot.slane %v9943_v61, %v9029_v58 }
0x34fc   : > { %7603 = vmatprep.mubr.msk.bf16.mxu0 %vm743_vm6, %v5176_v52 }
0x34fd   : > { %7604 = vmatmul.mubr.msk.bf16.vlgmr.msra.gmra.mrb[104].mxu0 %vm743_vm6, %v5177_v63 }
0x35d0   : > { %v7605_v30 = vpop.f32.mrb[104].mxu0 }
0x35d1   : > { %v5234_v19 = vpop.f32.mrb[105].mxu0  ;;  %v5243_v42 = vadd.f32 %v7605_v30, %v5181_v39 }
0x35d2   : > { %v5235_v62 = vadd.f32 %v5234_v19, %v5181_v39  ;;  %v7606_v5 = vpop.f32.mrb[106].mxu0 }
0x35d3   : > { %v5237_v7 = vpop.f32.mrb[107].mxu0  ;;  %v5246_v40 = vadd.f32 %v7606_v5, %v5181_v39  ;;  %v5251_v60 = vadd.f32 %v5243_v42, %v9956_v9  ;;  %v5316_v42 = vrot.slane %v9943_v61, %v9305_v16  ;;  %v7816_v61 = vld [vmem:[%s10393_s24 + $0x20] sm:$0xff]  }
0x35d4   : > { %v5249_v57 = vadd.f32 %v5235_v62, %v9949_v13  ;;  %v5238_v23 = vadd.f32 %v5237_v7, %v5181_v39  ;;  %7615 = vmatprep.subr.bf16.mxu0 %v7816_v61 }
0x35d5   : > { %v5252_v32 = vadd.f32 %v5246_v40, %v9958_v49  ;;  %v5259_v56 = vsel %vm743_vm6, %v5251_v60, 0.0  ;;  %7616 = vmatpush3.bf16.msra.mxu0 %v7816_v61 }
0x35d6   : > { %v5250_v43 = vadd.f32 %v5238_v23, %v9951_v47  ;;  %v5253_v15 = vsel %vm743_vm6, %v5249_v57, 0.0 }
0x35d7   : > { %5254 = vadd.xlane.f32.xlu1 %v5253_v15  ;;  %v5262_v2 = vsel %vm743_vm6, %v5252_v32, 0.0 }
0x35d8   : > { %v5256_v10 = vsel %vm743_vm6, %v5250_v43, 0.0 }
0x35d9   : > { %5257 = vadd.xlane.f32.xlu0 %v5256_v10 }
0x35db   : > { %5260 = vadd.xlane.f32.xlu1 %v5259_v56 }
0x35dd   : > { %5263 = vadd.xlane.f32.xlu0 %v5262_v2  ;;  %v7817_v2 = vld [vmem:[%s10393_s24 + $0x28] sm:$0xff]  }
0x35de   : > { %7617 = vmatprep.subr.bf16.mxu0 %v7817_v2 }
0x35df   : > { %7618 = vmatpush3.bf16.msra.mxu0 %v7817_v2 }
0x3664   : > { %v5255_v13 = vpop.xlane.xlu1 %5254 }
0x3665   : > { %v5265_v38 = vmul.f32 0.03125, %v5255_v13  ;;  %v7818_v13 = vld [vmem:[%s10393_s24 + $0x30] sm:$0xff]  }
0x3666   : > { %v5258_v3 = vpop.xlane.xlu0 %5257  ;;  %7619 = vmatprep.subr.bf16.mxu0 %v7818_v13 }
0x3667   : > { %v5269_v9 = vsub.f32 %v5249_v57, %v5265_v38  ;;  %v5266_v17 = vmul.f32 0.03125, %v5258_v3  ;;  %7620 = vmatpush3.bf16.msra.mxu0 %v7818_v13  ;;  %v7819_v38 = vld [vmem:[%s10393_s24 + $0x38] sm:$0xff]   ;;  %v6818_v3 = vld [vmem:[#allocation6 + $0x1] ss:$0 sm:$0xff] }
0x3668   : > { %v5261_v47 = vpop.xlane.xlu1 %5260  ;;  %7621 = vmatprep.subr.bf16.mxu0 %v7819_v38 }
0x3669   : > { %v5270_v20 = vsub.f32 %v5250_v43, %v5266_v17  ;;  %v5267_v21 = vmul.f32 0.03125, %v5261_v47  ;;  %v5273_v18 = vmul.f32 %v5269_v9, %v5269_v9 }
0x366a   : > { %v5264_v27 = vpop.xlane.xlu0 %5263 }
0x366b   : > { %v5271_v49 = vsub.f32 %v5251_v60, %v5267_v21  ;;  %v5268_v51 = vmul.f32 0.03125, %v5264_v27  ;;  %v5277_v33 = vsel %vm743_vm6, %v5273_v18, 0.0  ;;  %v5274_v50 = vmul.f32 %v5270_v20, %v5270_v20  ;;  %7622 = vmatpush3.bf16.msra.mxu0 %v7819_v38 }
0x366c   : > { %5278 = vadd.xlane.f32.xlu1 %v5277_v33 }
0x366d   : > { %v5272_v14 = vsub.f32 %v5252_v32, %v5268_v51  ;;  %v5280_v36 = vsel %vm743_vm6, %v5274_v50, 0.0  ;;  %v5275_v35 = vmul.f32 %v5271_v49, %v5271_v49 }
0x366e   : > { %5281 = vadd.xlane.f32.xlu0 %v5280_v36 }
0x366f   : > { %v5283_v12 = vsel %vm743_vm6, %v5275_v35, 0.0  ;;  %v5276_v55 = vmul.f32 %v5272_v14, %v5272_v14 }
0x3670   : > { %5284 = vadd.xlane.f32.xlu1 %v5283_v12 }
0x3671   : > { %v5286_v26 = vsel %vm743_vm6, %v5276_v55, 0.0 }
0x3672   : > { %5287 = vadd.xlane.f32.xlu0 %v5286_v26 }
0x36f9   : > { %v5279_v25 = vpop.xlane.xlu1 %5278 }
0x36fa   : > { %v5289_v29 = vmul.f32 0.03125, %v5279_v25 }
0x36fb   : > { %v5282_v8 = vpop.xlane.xlu0 %5281 }
0x36fc   : > { %v5293_v28 = vadd.f32 1e-05, %v5289_v29  ;;  %v5290_v4 = vmul.f32 0.03125, %v5282_v8 }
0x36fd   : > { %v5285_v54 = vpop.xlane.xlu1 %5284 }
0x36fe   : > { %8182 = vrsqrt.f32 %v5293_v28  ;;  %v5294_v34 = vadd.f32 1e-05, %v5290_v4  ;;  %v5291_v53 = vmul.f32 0.03125, %v5285_v54 }
0x36ff   : > { %v5288_v59 = vpop.xlane.xlu0 %5287 }
0x3700   : > { %8184 = vrsqrt.f32 %v5294_v34  ;;  %v5295_v6 = vadd.f32 1e-05, %v5291_v53  ;;  %v5292_v22 = vmul.f32 0.03125, %v5288_v59 }
0x3702   : > { %8186 = vrsqrt.f32 %v5295_v6  ;;  %v5296_v37 = vadd.f32 1e-05, %v5292_v22 }
0x3704   : > { %8188 = vrsqrt.f32 %v5296_v37 }
0x3708   : > { %v8183_v63 = vpop.eup %8182 }
0x3709   : > { %v5301_v52 = vmul.f32 %v8183_v63, %v5269_v9 }
0x370a   : > { %v8185_v39 = vpop.eup %8184 }
0x370b   : > { %v5302_v30 = vmul.f32 %v8185_v39, %v5270_v20  ;;  %v5309_v19 = vmul.f32 %v5308_v45, %v5301_v52 }
0x370c   : > { %v8187_v62 = vpop.eup %8186 }
0x370d   : > { %v5303_v5 = vmul.f32 %v8187_v62, %v5271_v49  ;;  %v5310_v7 = vmul.f32 %v5308_v45, %v5302_v30  ;;  %v10244_v60 = vadd.f32 %v5316_v42, %v5309_v19 }
0x370e   : > { %v8189_v57 = vpop.eup %8188 }
0x370f   : > { %v5311_v40 = vmul.f32 %v5308_v45, %v5303_v5  ;;  %v5304_v23 = vmul.f32 %v8189_v57, %v5272_v14  ;;  %v10246_v43 = vadd.f32 %v5316_v42, %v5310_v7 }
0x3711   : > { %v5312_v15 = vmul.f32 %v5308_v45, %v5304_v23  ;;  %v5321_v32 = vpack.c.bf16 %v10246_v43, %v10244_v60  ;;  %v10251_v10 = vadd.f32 %v5316_v42, %v5311_v40 }
0x3713   : > { %7611 = vmatprep.mubr.msk.bf16.mxu1 %vm743_vm6, %v5321_v32  ;;  %v10253_v56 = vadd.f32 %v5316_v42, %v5312_v15 }
0x3715   : > { %v5322_v16 = vpack.c.bf16 %v10253_v56, %v10251_v10 }
0x3717   : > { %7612 = vmatmul.mubr.msk.bf16.vlgmr.msra.gmra.mrb[96].mxu1 %vm743_vm6, %v5322_v16  ;;  %v10277_v16 = vld [vmem:[%s10386_s29 + $0x20] sm:$0xff] }
0x3718   : > { %5759 = vmatprep.mubr.bf16.mxu1 %v8493_v0  ;;  %v5453_v61 = vrot.slane %v10277_v16, %v8927_v48 }
0x37ea   : > { %v7613_v9 = vpop.f32.mrb[96].mxu1 }
0x37eb   : > { %v5397_v17 = vadd.f32 %v7613_v9, %v6818_v3  ;;  %v5388_v47 = vpop.f32.mrb[97].mxu1 }
0x37ec   : > { %v5389_v20 = vadd.f32 %v6818_v3, %v5388_v47  ;;  %v7614_v21 = vpop.f32.mrb[98].mxu1 }
0x37ed   : > { %v5405_v18 = vmul.f32 %v5397_v17, %v5397_v17  ;;  %v5400_v27 = vadd.f32 %v7614_v21, %v6818_v3  ;;  %v5391_v49 = vpop.f32.mrb[99].mxu1 }
0x37ee   : > { %v5403_v51 = vmul.f32 %v5389_v20, %v5389_v20  ;;  %v5392_v33 = vadd.f32 %v6818_v3, %v5391_v49 }
0x37ef   : > { %v5409_v50 = vmul.f32 %v5405_v18, %v5397_v17  ;;  %v5406_v14 = vmul.f32 %v5400_v27, %v5400_v27 }
0x37f0   : > { %v5407_v36 = vmul.f32 %v5403_v51, %v5389_v20  ;;  %v5404_v35 = vmul.f32 %v5392_v33, %v5392_v33 }
0x37f1   : > { %v5413_v12 = vmul.f32 0.044715, %v5409_v50  ;;  %v5410_v55 = vmul.f32 %v5406_v14, %v5400_v27 }
0x37f2   : > { %v5411_v26 = vmul.f32 0.044715, %v5407_v36  ;;  %v5408_v24 = vmul.f32 %v5404_v35, %v5392_v33 }
0x37f3   : > { %v5417_v31 = vadd.f32 %v5413_v12, %v5397_v17  ;;  %v5414_v25 = vmul.f32 0.044715, %v5410_v55 }
0x37f4   : > { %v5415_v29 = vadd.f32 %v5411_v26, %v5389_v20  ;;  %v5412_v8 = vmul.f32 0.044715, %v5408_v24 }
0x37f5   : > { %v5421_v28 = vmul.f32 0.7978846, %v5417_v31  ;;  %v5418_v4 = vadd.f32 %v5414_v25, %v5400_v27 }
0x37f6   : > { %v5419_v54 = vmul.f32 0.7978846, %v5415_v29  ;;  %v5416_v34 = vadd.f32 %v5412_v8, %v5392_v33 }
0x37f7   : > { %8190 = vtanh.f32 %v5421_v28  ;;  %v5422_v53 = vmul.f32 0.7978846, %v5418_v4 }
0x37f8   : > { %8192 = vtanh.f32 %v5419_v54  ;;  %v5420_v59 = vmul.f32 0.7978846, %v5416_v34 }
0x37f9   : > { %8194 = vtanh.f32 %v5422_v53 }
0x37fa   : > { %8196 = vtanh.f32 %v5420_v59 }
0x3801   : > { %v8191_v6 = vpop.eup %8190 }
0x3802   : > { %v8193_v22 = vpop.eup %8192  ;;  %v5429_v37 = vadd.f32 1.0, %v8191_v6  ;;  %v7820_v6 = vld [vmem:[#allocation7] ss:$24 sps:$4 sm:$0xff]  }
0x3803   : > { %v8195_v45 = vpop.eup %8194  ;;  %v5427_v63 = vadd.f32 1.0, %v8193_v22  ;;  %v7822_v22 = vld [vmem:[#allocation7 + $0x4] ss:$24 sps:$4 sm:$0xff]  }
0x3804   : > { %v8197_v52 = vpop.eup %8196  ;;  %v5433_v39 = vmul.f32 0.5, %v5429_v37  ;;  %v5430_v30 = vadd.f32 1.0, %v8195_v45  ;;  %v7823_v37 = vld [vmem:[#allocation7 + $0x10] ss:$24 sps:$4 sm:$0xff]   ;;  %v7825_v45 = vld [vmem:[#allocation7 + $0x14] ss:$24 sps:$4 sm:$0xff]   ;;  %5727 = vmatprep.subr.bf16.mxu1 %v7822_v22 }
0x3805   : > { %v5431_v19 = vmul.f32 0.5, %v5427_v63  ;;  %v5428_v42 = vadd.f32 1.0, %v8197_v52  ;;  %v7828_v63 = vld [vmem:[#allocation7 + $0x34] ss:$24 sps:$4 sm:$0xff]   ;;  %v7831_v52 = vld [vmem:[#allocation7 + $0x44] ss:$24 sps:$4 sm:$0xff]   ;;  %5728 = vmatpush1.bf16.msra.mxu1 %v7820_v6  ;;  %5809 = vmatprep.subr.bf16.mxu0 %v7825_v45 }
0x3806   : > { %v5434_v62 = vmul.f32 0.5, %v5430_v30  ;;  %v5437_v7 = vmul.f32 %v5433_v39, %v5397_v17  ;;  %v7826_v39 = vld [vmem:[#allocation7 + $0x30] ss:$24 sps:$4 sm:$0xff]   ;;  %5729 = vmatprep.subr.bf16.mxu1 %v7828_v63  ;;  %v7829_v30 = vld [vmem:[#allocation7 + $0x40] ss:$24 sps:$4 sm:$0xff]  }
0x3807   : > { %v5432_v5 = vmul.f32 0.5, %v5428_v42  ;;  %v5435_v40 = vmul.f32 %v5431_v19, %v5389_v20  ;;  %v7834_v19 = vld [vmem:[#allocation7 + $0xc] ss:$24 sps:$4 sm:$0xff]   ;;  %v7835_v6 = vld [vmem:[#allocation7 + $0x38] ss:$24 sps:$4 sm:$0xff]  }
0x3808   : > { %v5438_v57 = vmul.f32 %v5434_v62, %v5400_v27  ;;  %v7838_v22 = vld [vmem:[#allocation10 + $0x40] sm:$0xff]   ;;  %v7840_v45 = vld [vmem:[#allocation10 + $0x48] sm:$0xff]  }
0x3809   : > { %v5436_v23 = vmul.f32 %v5432_v5, %v5392_v33  ;;  %5730 = vmatpush1.bf16.msra.mxu1 %v7826_v39  ;;  %v7841_v63 = vld [vmem:[#allocation10 + $0x8] sm:$0xff]   ;;  %v7843_v39 = vld [vmem:[#allocation10 + $0x10] sm:$0xff]  }
0x380a   : > { %v5440_v15 = vpack.c.bf16 %v5438_v57, %v5437_v7  ;;  %5768 = vmatprep.subr.bf16.mxu1 %v7834_v19  ;;  %v7845_v19 = vld [vmem:[#allocation10 + $0x80] sm:$0xff]  }
0x380b   : > { %v5439_v32 = vpack.c.bf16 %v5436_v23, %v5435_v40 }
0x380d   : > { %7623 = vmatprep.mubr.msk.bf16.mxu0 %vm3033_vm1, %v5439_v32 }
0x380e   : > { %7624 = vmatmul.mubr.msk.bf16.vlgmr.msra.gmra.mrb[108].mxu0 %vm3033_vm1, %v5440_v15 }
0x380f   : > { %5841 = vmatprep.mubr.bf16.mxu0 %v8493_v0  ;;  %5810 = vmatpush1.bf16.msra.mxu0 %v7823_v37  ;;  %v7839_v37 = vld [vmem:[#allocation10] sm:$0xff]  }
0x3810   : > { %5811 = vmatprep.subr.bf16.mxu0 %v7831_v52  ;;  %v7842_v52 = vld [vmem:[#allocation10 + $0x50] sm:$0xff]  }
0x3813   : > { %5812 = vmatpush1.bf16.msra.mxu0 %v7829_v30  ;;  %v7844_v30 = vld [vmem:[#allocation10 + $0xc0] sm:$0xff]  }
0x3814   : > { %7147 = vmatprep.subr.bf16.mxu0 %v7844_v30 }
0x38e1   : > { %v7625_v2 = vpop.f32.mrb[108].mxu0 }
0x38e2   : > { %v5518_v13 = vpop.f32.mrb[109].mxu0  ;;  %v5527_v38 = vadd.f32 %v7625_v2, %v5453_v61 }
0x38e3   : > { %v5519_v3 = vadd.f32 %v5518_v13, %v5453_v61  ;;  %v7626_v9 = vpop.f32.mrb[110].mxu0 }
0x38e4   : > { %v5521_v17 = vpop.f32.mrb[111].mxu0  ;;  %v5530_v20 = vadd.f32 %v7626_v9, %v5453_v61  ;;  %v5535_v18 = vadd.f32 %v5527_v38, %v10251_v10  ;;  %v5592_v38 = vrot.slane %v10277_v16, %v9301_v41 }
0x38e5   : > { %v5533_v47 = vadd.f32 %v5519_v3, %v10244_v60  ;;  %v5522_v21 = vadd.f32 %v5521_v17, %v5453_v61 }
0x38e6   : > { %v5536_v51 = vadd.f32 %v5530_v20, %v10253_v56  ;;  %v5543_v50 = vsel %vm743_vm6, %v5535_v18, 0.0 }
0x38e7   : > { %v5534_v27 = vadd.f32 %v5522_v21, %v10246_v43  ;;  %v5537_v49 = vsel %vm743_vm6, %v5533_v47, 0.0 }
0x38e8   : > { %5538 = vadd.xlane.f32.xlu1 %v5537_v49  ;;  %v5546_v14 = vsel %vm743_vm6, %v5536_v51, 0.0 }
0x38e9   : > { %v5540_v33 = vsel %vm743_vm6, %v5534_v27, 0.0 }
0x38ea   : > { %5541 = vadd.xlane.f32.xlu0 %v5540_v33 }
0x38ec   : > { %5544 = vadd.xlane.f32.xlu1 %v5543_v50 }
0x38ee   : > { %5547 = vadd.xlane.f32.xlu0 %v5546_v14 }
0x3975   : > { %v5539_v60 = vpop.xlane.xlu1 %5538 }
0x3976   : > { %v5549_v36 = vmul.f32 0.03125, %v5539_v60 }
0x3977   : > { %v5542_v35 = vpop.xlane.xlu0 %5541 }
0x3978   : > { %v5553_v10 = vsub.f32 %v5533_v47, %v5549_v36  ;;  %v5550_v12 = vmul.f32 0.03125, %v5542_v35  ;;  %v6837_v47 = vld [vmem:[%s10386_s29 + $0x28] ss:$0 sm:$0xff] }
0x3979   : > { %v5545_v43 = vpop.xlane.xlu1 %5544 }
0x397a   : > { %v5554_v55 = vsub.f32 %v5534_v27, %v5550_v12  ;;  %v5551_v26 = vmul.f32 0.03125, %v5545_v43  ;;  %v5557_v24 = vmul.f32 %v5553_v10, %v5553_v10 }
0x397b   : > { %v5548_v31 = vpop.xlane.xlu0 %5547 }
0x397c   : > { %v5555_v56 = vsub.f32 %v5535_v18, %v5551_v26  ;;  %v5552_v25 = vmul.f32 0.03125, %v5548_v31  ;;  %v5561_v29 = vsel %vm743_vm6, %v5557_v24, 0.0  ;;  %v5558_v8 = vmul.f32 %v5554_v55, %v5554_v55 }
0x397d   : > { %5562 = vadd.xlane.f32.xlu1 %v5561_v29 }
0x397e   : > { %v5556_v28 = vsub.f32 %v5536_v51, %v5552_v25  ;;  %v5564_v4 = vsel %vm743_vm6, %v5558_v8, 0.0  ;;  %v5559_v54 = vmul.f32 %v5555_v56, %v5555_v56 }
0x397f   : > { %5565 = vadd.xlane.f32.xlu0 %v5564_v4 }
0x3980   : > { %v5567_v34 = vsel %vm743_vm6, %v5559_v54, 0.0  ;;  %v5560_v53 = vmul.f32 %v5556_v28, %v5556_v28 }
0x3981   : > { %5568 = vadd.xlane.f32.xlu1 %v5567_v34  ;;  %v7832_v34 = vld [vmem:[#allocation7 + $0x8] ss:$24 sps:$4 sm:$0xff]  }
0x3982   : > { %v5570_v59 = vsel %vm743_vm6, %v5560_v53, 0.0 }
0x3983   : > { %5571 = vadd.xlane.f32.xlu0 %v5570_v59  ;;  %v7837_v59 = vld [vmem:[#allocation7 + $0x3c] ss:$24 sps:$4 sm:$0xff]  }
0x3a0a   : > { %v5563_v42 = vpop.xlane.xlu1 %5562 }
0x3a0b   : > { %v5573_v62 = vmul.f32 0.03125, %v5563_v42  ;;  %v7847_v42 = vld [vmem:[#allocation10 + $0x18] sm:$0xff]  }
0x3a0c   : > { %v5566_v5 = vpop.xlane.xlu0 %5565 }
0x3a0d   : > { %v5577_v7 = vadd.f32 1e-05, %v5573_v62  ;;  %v5574_v57 = vmul.f32 0.03125, %v5566_v5  ;;  %v7848_v62 = vld [vmem:[#allocation10 + $0xc8] sm:$0xff]  }
0x3a0e   : > { %v5569_v40 = vpop.xlane.xlu1 %5568  ;;  %v7849_v5 = vld [vmem:[#allocation10 + $0x88] sm:$0xff]  }
0x3a0f   : > { %8198 = vrsqrt.f32 %v5577_v7  ;;  %v5578_v23 = vadd.f32 1e-05, %v5574_v57  ;;  %v5575_v15 = vmul.f32 0.03125, %v5569_v40  ;;  %v7850_v7 = vld [vmem:[#allocation10 + $0x60] sm:$0xff]   ;;  %v7852_v40 = vld [vmem:[#allocation10 + $0xd0] sm:$0xff]  }
0x3a10   : > { %v5572_v32 = vpop.xlane.xlu0 %5571  ;;  %v7851_v57 = vld [vmem:[#allocation10 + $0x20] sm:$0xff]  }
0x3a11   : > { %8200 = vrsqrt.f32 %v5578_v23  ;;  %v5579_v61 = vadd.f32 1e-05, %v5575_v15  ;;  %v5576_v2 = vmul.f32 0.03125, %v5572_v32  ;;  %v7853_v23 = vld [vmem:[#allocation10 + $0x90] sm:$0xff]   ;;  %v7854_v15 = vld [vmem:[#allocation10 + $0x68] sm:$0xff]  }
0x3a12   : > { %v7855_v32 = vld [vmem:[#allocation10 + $0x28] sm:$0xff]  }
0x3a13   : > { %8202 = vrsqrt.f32 %v5579_v61  ;;  %v5580_v13 = vadd.f32 1e-05, %v5576_v2  ;;  %v7856_v61 = vld [vmem:[#allocation10 + $0xd8] sm:$0xff]  }
0x3a14   : > { %v7857_v2 = vld [vmem:[#allocation10 + $0x98] sm:$0xff]  }
0x3a15   : > { %8204 = vrsqrt.f32 %v5580_v13  ;;  %v7858_v13 = vld [vmem:[#allocation10 + $0x70] sm:$0xff]  }
0x3a19   : > { %v8199_v3 = vpop.eup %8198 }
0x3a1a   : > { %v5585_v9 = vmul.f32 %v8199_v3, %v5553_v10  ;;  %v7859_v3 = vld [vmem:[#allocation10 + $0x30] sm:$0xff]  }
0x3a1b   : > { %v8201_v17 = vpop.eup %8200 }
0x3a1c   : > { %v5593_v20 = vmul.f32 %v5592_v38, %v5585_v9  ;;  %v5586_v21 = vmul.f32 %v8201_v17, %v5554_v55  ;;  %v7861_v9 = vld [vmem:[#allocation10 + $0xa0] sm:$0xff]   ;;  %v7862_v17 = vld [vmem:[#allocation10 + $0x78] sm:$0xff]  }
0x3a1d   : > { %v8203_v18 = vpop.eup %8202 }
0x3a1e   : > { %v5601_v27 = vadd.f32 %v6837_v47, %v5593_v20  ;;  %v5594_v49 = vmul.f32 %v5592_v38, %v5586_v21  ;;  %v5587_v51 = vmul.f32 %v8203_v18, %v5555_v56  ;;  %v7863_v20 = vld [vmem:[#allocation10 + $0x38] sm:$0xff]   ;;  %v7865_v21 = vld [vmem:[#allocation10 + $0xa8] sm:$0xff]   ;;  %v7866_v18 = vld [vmem:[#allocation10 + $0x140] sm:$0xff]  }
0x3a1f   : > { %v8205_v33 = vpop.eup %8204 }
0x3a20   : > { %v5602_v50 = vadd.f32 %v6837_v47, %v5594_v49  ;;  %v5595_v14 = vmul.f32 %v5592_v38, %v5587_v51  ;;  %v5588_v60 = vmul.f32 %v8205_v33, %v5556_v28  ;;  %v5605_v36 = vsel %vm743_vm6, %v5601_v27, 0.0  ;;  %v7867_v27 = vld [vmem:[#allocation10 + $0xf0] sm:$0xff]   ;;  %v7871_v51 = vld [vmem:[#allocation10 + $0xf8] sm:$0xff]  }
0x3a21   : > { %v7869_v49 = vld [vmem:[#allocation10 + $0xb0] sm:$0xff]   ;;  %v7873_v33 = vld [vmem:[#allocation10 + $0xb8] sm:$0xff]  }
0x3a22   : > { %v5606_v16 = vsel %vm743_vm6, %v5602_v50, 0.0  ;;  %v5603_v35 = vadd.f32 %v6837_v47, %v5595_v14  ;;  %v5596_v10 = vmul.f32 %v5592_v38, %v5588_v60  ;;  %v7860_v38 = vld [vmem:[#allocation10 + $0xe0] sm:$0xff]   ;;  %v5632_v50 = vld [vmem:[#allocation9] sm:$0x3f] }
0x3a23   : > { %v5607_v12 = vadd.f32 %v5606_v16, %v5605_v36  ;;  %v5697_v14 = vrot.slane %v5632_v50, %v8910_v44  ;;  %v5701_v60 = vrot.slane %v5632_v50, %v8918_v46  ;;  %v5717_v36 = vrot.slane %v5632_v50, %v9301_v41 }
0x3a24   : > { %v5608_v43 = vsel %vm743_vm6, %v5603_v35, 0.0  ;;  %v5604_v26 = vadd.f32 %v6837_v47, %v5596_v10  ;;  %v7864_v47 = vld [vmem:[#allocation10 + $0xe8] sm:$0xff]   ;;  %v5709_v41 = vrot.slane %v5632_v50, %v9202_v1 }
0x3a25   : > { %v5609_v24 = vadd.f32 %v5608_v43, %v5607_v12 }
0x3a26   : > { %v5610_v55 = vsel %vm743_vm6, %v5604_v26, 0.0 }
0x3a27   : > { %v5611_v31 = vadd.f32 %v5610_v55, %v5609_v24 }
0x3a29   : > { %v5612_v25 = vrot.slane %v5611_v31, 4 }
0x3a2b   : > { %v5613_v56 = vadd.f32 %v5612_v25, %v5611_v31 }
0x3a2d   : > { %v5614_v29 = vrot.slane %v5613_v56, 2 }
0x3a2f   : > { %v5615_v8 = vadd.f32 %v5614_v29, %v5613_v56 }
0x3a31   : > { %v5616_v4 = vrot.slane %v5615_v8, 1 }
0x3a33   : > { %v5617_v28 = vadd.f32 %v5616_v4, %v5615_v8 }
0x3a35   : > { %v5618_v54 = vmul.f32 0.03125, %v5617_v28 }
0x3a37   : > { %v5619_v53 = vpack.c.bf16 %v5618_v54, %v5618_v54  ;;  %v5705_v54 = vrot.slane %v5632_v50, %v8927_v48  ;;  %v5713_v48 = vrot.slane %v5632_v50, %v9029_v58 }
0x3a39   : > { %6850 = vmatmul.mubr.msk.bf16.vlgmr.msra.gmra.mrb[100].mxu1 %vm743_vm6, %v5619_v53  ;;  %6852 = vmatmul.mubr.msk.bf16.vlgmr.msra.gmra.mrb[112].mxu0 %vm743_vm6, %v5619_v53 }
0x3a3a   : > { %5769 = vmatpush1.bf16.msra.mxu1 %v7832_v34  ;;  %5800 = vmatprep.mubr.bf16.mxu1 %v8493_v0  ;;  %v7846_v0 = vld [vmem:[#allocation10 + $0x58] sm:$0xff]  }
0x3a3b   : > { %5770 = vmatprep.subr.bf16.mxu1 %v7837_v59  ;;  %7148 = vmatpush3.bf16.msra.mxu0 %v7845_v19 }
0x3a3c   : > { %7149 = vmatprep.subr.bf16.mxu0 %v7848_v62 }
0x3a3e   : > { %5771 = vmatpush1.bf16.msra.mxu1 %v7835_v6 }
0x3a3f   : > { %7125 = vmatprep.subr.bf16.mxu1 %v7838_v22  ;;  %7150 = vmatpush3.bf16.msra.mxu0 %v7849_v5 }
0x3a40   : > { %7151 = vmatprep.subr.bf16.mxu0 %v7852_v40 }
0x3a41   : > { %6851 = vmatmul.mubr.msk.bf16.vlgmr.msra.gmra.mrb[104].mxu1 %vm743_vm6, %v5619_v53  ;;  %vm6435_vm6 = vcmp.eq.s32.totalorder %v8853_v11, 2 }
0x3a42   : > { %7126 = vmatpush3.bf16.msra.mxu1 %v7839_v37 }
0x3a43   : > { %7127 = vmatprep.subr.bf16.mxu1 %v7840_v45  ;;  %7152 = vmatpush3.bf16.msra.mxu0 %v7853_v23 }
0x3a44   : > { %7153 = vmatprep.subr.bf16.mxu0 %v7856_v61 }
0x3a46   : > { %7128 = vmatpush3.bf16.msra.mxu1 %v7841_v63 }
0x3a47   : > { %7129 = vmatprep.subr.bf16.mxu1 %v7842_v52  ;;  %7154 = vmatpush3.bf16.msra.mxu0 %v7857_v2 }
0x3a48   : > { %7155 = vmatprep.subr.bf16.mxu0 %v7860_v38 }
0x3a4a   : > { %7130 = vmatpush3.bf16.msra.mxu1 %v7843_v39 }
0x3a4b   : > { %7131 = vmatprep.subr.bf16.mxu1 %v7846_v0  ;;  %7156 = vmatpush3.bf16.msra.mxu0 %v7861_v9 }
0x3a4c   : > { %7157 = vmatprep.subr.bf16.mxu0 %v7864_v47 }
0x3a4e   : > { %7132 = vmatpush3.bf16.msra.mxu1 %v7847_v42 }
0x3a4f   : > { %7133 = vmatprep.subr.bf16.mxu1 %v7850_v7  ;;  %7158 = vmatpush3.bf16.msra.mxu0 %v7865_v21 }
0x3a50   : > { %7159 = vmatprep.subr.bf16.mxu0 %v7867_v27 }
0x3a52   : > { %7134 = vmatpush3.bf16.msra.mxu1 %v7851_v57 }
0x3a53   : > { %7135 = vmatprep.subr.bf16.mxu1 %v7854_v15  ;;  %7160 = vmatpush3.bf16.msra.mxu0 %v7869_v49 }
0x3a54   : > { %7161 = vmatprep.subr.bf16.mxu0 %v7871_v51 }
0x3a56   : > { %7136 = vmatpush3.bf16.msra.mxu1 %v7855_v32 }
0x3a57   : > { %7137 = vmatprep.subr.bf16.mxu1 %v7858_v13  ;;  %7162 = vmatpush3.bf16.msra.mxu0 %v7873_v33 }
0x3a5a   : > { %7138 = vmatpush3.bf16.msra.mxu1 %v7859_v3 }
0x3a5b   : > { %7139 = vmatprep.subr.bf16.mxu1 %v7862_v17 }
0x3a5e   : > { %7140 = vmatpush3.bf16.msra.mxu1 %v7863_v20 }
0x3a5f   : > { %7169 = vmatprep.subr.bf16.mxu1 %v7866_v18 }
0x3b0c   : > { %v5761_v16 = vpop.f32.mrb[100].mxu1  ;;  %v5843_v35 = vpop.f32.mrb[112].mxu0 }
0x3b0d   : > { %v5762_v10 = vadd.f32 %v5761_v16, %v5697_v14  ;;  %v5763_v12 = vpop.f32.mrb[101].mxu1  ;;  %v5845_v43 = vpop.f32.mrb[113].mxu0  ;;  %v10312_v15 = vadd.f32 %v5843_v35, %v5713_v48 }
0x3b0e   : > { %v5764_v26 = vadd.f32 %v5763_v12, %v5701_v60  ;;  %v5846_v24 = vadd.f32 %v5845_v43, %v5717_v36  ;;  %v5765_v55 = vpop.f32.mrb[102].mxu1  ;;  %v5847_v31 = vpop.f32.mrb[114].mxu0  ;;  %v7868_v43 = vld [vmem:[#allocation10 + $0x100] sm:$0xff]  }
0x3b0f   : > { %v5850_v25 = vmul.f32 %v5762_v10, %v5762_v10  ;;  %v5766_v56 = vpop.f32.mrb[103].mxu1  ;;  %v5848_v29 = vpop.f32.mrb[115].mxu0  ;;  %v5854_v38 = vmul.f32 %v10312_v15, %v10312_v15 }
0x3b10   : > { %v5851_v8 = vmul.f32 %v5764_v26, %v5764_v26  ;;  %v5855_v4 = vmul.f32 %v5846_v24, %v5846_v24 }
0x3b11   : > { %v5856_v28 = vmul.f32 %v5850_v25, %v5762_v10  ;;  %v5860_v9 = vmul.f32 %v5854_v38, %v10312_v15  ;;  %v7870_v25 = vld [vmem:[#allocation10 + $0x148] sm:$0xff]  }
0x3b12   : > { %v5857_v46 = vmul.f32 %v5851_v8, %v5764_v26  ;;  %v5861_v34 = vmul.f32 %v5855_v4, %v5846_v24 }
0x3b13   : > { %v5862_v53 = vmul.f32 0.044715, %v5856_v28  ;;  %v5866_v49 = vmul.f32 0.044715, %v5860_v9 }
0x3b14   : > { %v5863_v59 = vmul.f32 0.044715, %v5857_v46  ;;  %v5867_v6 = vmul.f32 0.044715, %v5861_v34  ;;  %v5802_v22 = vpop.f32.mrb[104].mxu1 }
0x3b15   : > { %v5868_v37 = vadd.f32 %v5862_v53, %v5762_v10  ;;  %v5803_v45 = vadd.f32 %v5802_v22, %v5705_v54  ;;  %v5804_v63 = vpop.f32.mrb[105].mxu1  ;;  %v5872_v35 = vadd.f32 %v5866_v49, %v10312_v15  ;;  %v7874_v54 = vld [vmem:[#allocation10 + $0x150] sm:$0xff]   ;;  %v7876_v53 = vld [vmem:[#allocation10 + $0x158] sm:$0xff]   ;;  %v7879_v22 = vld [vmem:[#allocation10 + $0x120] sm:$0xff]  }
0x3b16   : > { %v5869_v52 = vadd.f32 %v5863_v59, %v5764_v26  ;;  %v5873_v39 = vadd.f32 %v5867_v6, %v5846_v24  ;;  %v5805_v30 = vadd.f32 %v5804_v63, %v5709_v41  ;;  %v5806_v19 = vpop.f32.mrb[106].mxu1  ;;  %v7875_v41 = vld [vmem:[#allocation10 + $0x110] sm:$0xff]   ;;  %v7877_v59 = vld [vmem:[#allocation10 + $0x118] sm:$0xff]   ;;  %v7878_v6 = vld [vmem:[#allocation10 + $0x160] sm:$0xff]  }
0x3b17   : > { %v5874_v0 = vmul.f32 0.7978846, %v5868_v37  ;;  %v5852_v42 = vmul.f32 %v5803_v45, %v5803_v45  ;;  %v5807_v62 = vpop.f32.mrb[107].mxu1  ;;  %v5878_v28 = vmul.f32 0.7978846, %v5872_v35  ;;  %v7880_v37 = vld [vmem:[#allocation10 + $0x168] sm:$0xff]  }
0x3b18   : > { %v5875_v5 = vmul.f32 0.7978846, %v5869_v52  ;;  %v5879_v7 = vmul.f32 0.7978846, %v5873_v39  ;;  %v5853_v57 = vmul.f32 %v5805_v30, %v5805_v30  ;;  %v7881_v63 = vld [vmem:[#allocation10 + $0x128] sm:$0xff]   ;;  %v7882_v52 = vld [vmem:[#allocation10 + $0x170] sm:$0xff]  }
0x3b19   : > { %8206 = vtanh.f32 %v5874_v0  ;;  %v5858_v1 = vmul.f32 %v5852_v42, %v5803_v45  ;;  %v7884_v19 = vld [vmem:[#allocation10 + $0x178] sm:$0xff]  }
0x3b1a   : > { %v5859_v40 = vmul.f32 %v5853_v57, %v5805_v30  ;;  %8208 = vtanh.f32 %v5875_v5  ;;  %v7885_v42 = vld [vmem:[#allocation10 + $0x138] sm:$0xff]  }
0x3b1b   : > { %v5864_v23 = vmul.f32 0.044715, %v5858_v1  ;;  %8210 = vtanh.f32 %v5879_v7 }
0x3b1c   : > { %v5865_v32 = vmul.f32 0.044715, %v5859_v40 }
0x3b1d   : > { %v5870_v61 = vadd.f32 %v5864_v23, %v5803_v45  ;;  %v6006_v23 = vld [vmem:[#allocation12] sm:$0x1] }
0x3b1e   : > { %v5871_v2 = vadd.f32 %v5865_v32, %v5805_v30 }
0x3b1f   : > { %v5876_v13 = vmul.f32 0.7978846, %v5870_v61 }
0x3b20   : > { %v5877_v3 = vmul.f32 0.7978846, %v5871_v2 }
0x3b21   : > { %8212 = vtanh.f32 %v5876_v13 }
0x3b22   : > { %8214 = vtanh.f32 %v5877_v3 }
0x3b23   : > { %v8207_v58 = vpop.eup %8206  ;;  %8216 = vtanh.f32 %v5878_v28 }
0x3b24   : > { %v5886_v17 = vadd.f32 1.0, %v8207_v58  ;;  %v8209_v47 = vpop.eup %8208 }
0x3b25   : > { %v8211_v20 = vpop.eup %8210  ;;  %v5887_v21 = vadd.f32 1.0, %v8209_v47 }
0x3b26   : > { %v5892_v18 = vmul.f32 0.5, %v5886_v17  ;;  %v5891_v27 = vadd.f32 1.0, %v8211_v20 }
0x3b27   : > { %v5893_v51 = vmul.f32 0.5, %v5887_v21 }
0x3b28   : > { %v5898_v33 = vmul.f32 %v5892_v18, %v5762_v10  ;;  %v5897_v50 = vmul.f32 0.5, %v5891_v27  ;;  %v7872_v10 = vld [vmem:[#allocation10 + $0x108] sm:$0xff]  }
0x3b29   : > { %v5899_v14 = vmul.f32 %v5893_v51, %v5764_v26 }
0x3b2a   : > { %v5903_v36 = vmul.f32 %v5897_v50, %v5846_v24  ;;  %v5904_v31 = vpack.c.bf16 %v5898_v33, %v5898_v33 }
0x3b2b   : > { %v8213_v60 = vpop.eup %8212  ;;  %v5905_v12 = vpack.c.bf16 %v5899_v14, %v5899_v14 }
0x3b2c   : > { %v8215_v16 = vpop.eup %8214  ;;  %v5888_v55 = vadd.f32 1.0, %v8213_v60  ;;  %v5909_v29 = vpack.c.bf16 %v5903_v36, %v5903_v36 }
0x3b2d   : > { %v5889_v56 = vadd.f32 1.0, %v8215_v16  ;;  %6327 = vmatprep.mubr.bf16.mxu1 %v5905_v12 }
0x3b2e   : > { %v5894_v8 = vmul.f32 0.5, %v5888_v55  ;;  %6328 = vmatmul.mubr.bf16.vlgmr.msra.gmra.mrb[108].mxu1 %v5904_v31 }
0x3b2f   : > { %v5895_v4 = vmul.f32 0.5, %v5889_v56  ;;  %7170 = vmatpush3.bf16.msra.mxu1 %v7868_v43  ;;  %6407 = vmatprep.mubr.bf16.mxu1 %v5909_v29 }
0x3b30   : > { %v5900_v26 = vmul.f32 %v5894_v8, %v5803_v45  ;;  %7171 = vmatprep.subr.bf16.mxu1 %v7870_v25  ;;  %v8217_v45 = vpop.eup %8216 }
0x3b31   : > { %v5901_v24 = vmul.f32 %v5895_v4, %v5805_v30  ;;  %v5890_v39 = vadd.f32 1.0, %v8217_v45  ;;  %v7883_v30 = vld [vmem:[#allocation10 + $0x130] sm:$0xff]  }
0x3b32   : > { %v5906_v34 = vpack.c.bf16 %v5900_v26, %v5900_v26 }
0x3b33   : > { %v5907_v46 = vpack.c.bf16 %v5901_v24, %v5901_v24  ;;  %7172 = vmatpush3.bf16.msra.mxu1 %v7872_v10  ;;  %v5896_v0 = vmul.f32 0.5, %v5890_v39 }
0x3b34   : > { %7173 = vmatprep.subr.bf16.mxu1 %v7874_v54 }
0x3b35   : > { %6367 = vmatprep.mubr.bf16.mxu0 %v5907_v46  ;;  %v5902_v62 = vmul.f32 %v5896_v0, %v10312_v15 }
0x3b36   : > { %6368 = vmatmul.mubr.bf16.vlgmr.msra.gmra.mrb[116].mxu0 %v5906_v34 }
0x3b37   : > { %7174 = vmatpush3.bf16.msra.mxu1 %v7875_v41  ;;  %v5908_v48 = vpack.c.bf16 %v5902_v62, %v5902_v62 }
0x3b38   : > { %7175 = vmatprep.subr.bf16.mxu1 %v7876_v53 }
0x3b3b   : > { %7176 = vmatpush3.bf16.msra.mxu1 %v7877_v59 }
0x3b3c   : > { %7177 = vmatprep.subr.bf16.mxu1 %v7878_v6 }
0x3b3f   : > { %7178 = vmatpush3.bf16.msra.mxu1 %v7879_v22 }
0x3b40   : > { %7179 = vmatprep.subr.bf16.mxu1 %v7880_v37 }
0x3b43   : > { %7180 = vmatpush3.bf16.msra.mxu1 %v7881_v63 }
0x3b44   : > { %7181 = vmatprep.subr.bf16.mxu1 %v7882_v52 }
0x3b47   : > { %7182 = vmatpush3.bf16.msra.mxu1 %v7883_v30 }
0x3b48   : > { %7183 = vmatprep.subr.bf16.mxu1 %v7884_v19 }
0x3b4b   : > { %7184 = vmatpush3.bf16.msra.mxu1 %v7885_v42 }
0x3b4e   : > { %6408 = vmatmul.mubr.bf16.vlgmr.msra.gmra.mrb[112].mxu1 %v5908_v48 }
0x3c01   : > { %v7141_v5 = vpop.f32.mrb[108].mxu1 }
0x3c02   : > { %v7142_v7 = vpop.f32.mrb[109].mxu1 }
0x3c03   : > { %v7143_v57 = vadd.f32 %v7142_v7, %v7141_v5  ;;  %v7144_v1 = vpop.f32.mrb[110].mxu1 }
0x3c04   : > { %v7145_v40 = vpop.f32.mrb[111].mxu1 }
0x3c05   : > { %v6330_v2 = vadd.f32 %v7143_v57, %v6006_v23 }
0x3c09   : > { %v7163_v32 = vpop.f32.mrb[116].mxu0 }
0x3c0a   : > { %v7164_v61 = vpop.f32.mrb[117].mxu0 }
0x3c0b   : > { %v7165_v13 = vadd.f32 %v7164_v61, %v7163_v32  ;;  %v7166_v38 = vpop.f32.mrb[118].mxu0 }
0x3c0c   : > { %v7167_v3 = vpop.f32.mrb[119].mxu0 }
0x3c0d   : > { %v6370_v58 = vadd.f32 %v7165_v13, %v6330_v2 }
0x3c21   : > { %v7185_v9 = vpop.f32.mrb[112].mxu1 }
0x3c22   : > { %v7186_v17 = vpop.f32.mrb[113].mxu1 }
0x3c23   : > { %v7187_v47 = vadd.f32 %v7186_v17, %v7185_v9  ;;  %v7188_v15 = vpop.f32.mrb[114].mxu1 }
0x3c24   : > { %v7189_v20 = vpop.f32.mrb[115].mxu1 }
0x3c25   : > { %v6410_v21 = vadd.f32 %v7187_v47, %v6370_v58 }
0x3c27   : > { %v6901_v18 = vmul.f32 -1.442695, %v6410_v21  ;;  %v6415_v60 = vmul.f32 1.442695, %v6410_v21  ;;  %v6417_v36 = vmax.f32 %v6410_v21, 0.0 }
0x3c29   : > { %8218 = vpow2.f32 %v6901_v18  ;;  %v6434_v12 = vadd.f32 1.0, %v6417_v36 }
0x3c33   : > { %v8219_v27 = vpop.eup %8218 }
0x3c34   : > { %v6421_v49 = vadd.f32 1.0, %v8219_v27 }
0x3c36   : > { %8220 = vrcp.f32 %v6421_v49 }
0x3c40   : > { %v8221_v51 = vpop.eup %8220 }
0x3c41   : > { %v6902_v33 = vmul.f32 -1.442695, %v8221_v51 }
0x3c43   : > { %8222 = vpow2.f32 %v6902_v33 }
0x3c4d   : > { %v8223_v50 = vpop.eup %8222 }
0x3c4e   : > { %v6427_v14 = vadd.f32 1.0, %v8223_v50 }
0x3c50   : > { %8224 = vrcp.f32 %v6427_v14 }
0x3c51   : > { %8226 = vpow2.f32 %v6415_v60 }
0x3c5a   : > { %v8225_v16 = vpop.eup %8224 }
0x3c5b   : > { %v6438_v35 = vsel %vm6437_vm2, %v8225_v16, %v6417_v36  ;;  %v8227_v31 = vpop.eup %8226 }
0x3c5c   : > { %v6439_v43 = vsel %vm6436_vm5, %v6410_v21, %v6438_v35 }
0x3c5d   : > { %v6440_v55 = vsel %vm6435_vm6, %v8221_v51, %v6439_v43 }
0x3c5e   : > { %v6441_v25 = vsel %vm6433_vm7, %v6434_v12, %v6440_v55 }
0x3c5f   : > { %v6442_v56 = vsel %vm6432_vm8, %v8227_v31, %v6441_v25 }
0x3c60   : > { %v6446_v29 = vrot.slane %v6442_v56, %v8910_v44 }
0x3c62   : > { %6447 = vst [vmem:[%s561_s23] sm:$0xff] %v6446_v29 }
0x3c63 PF: > { %p26_p0 = scmp.ge.s32.totalorder %s8749_s16, 4   ;;  %s10395_s25 = smov %s8468_s26 }
0x3c64   : > { %s10396_s26 = smov %s8472_s27  ;;  %s10397_s27 = smov %s8761_s5 }
0x3c65   : > { %s10398_s28 = smov %s8749_s16  ;;  %28 = sbr.rel (!%p26_p0) target bundleno = 12 (0xc), region = 158 }
0x3c6c   :  { %6467 = vsyncpa [#allocation3], 1 }
0x3c6d   :  { %6469 = vsyncpa [#allocation3 + $0x1], 1 }
0x3c6e   :  { %6470 = vsyncpa [#allocation5], 1 }
0x3c6f   :  { %6471 = vsyncpa [#allocation8], 1 }
0x3c70   :  { %6472 = vsyncpa [#allocation11], 1 }

</bundles_post_ra>
